<compile_context>
chip_gen: v7x
topology: tpu7x:2x2x1
jax: 0.10.0
libtpu: 0.0.40
codegen_flags: <defaults>
</compile_context>

<pallas_src>
import math

import jax
import jax.numpy as jnp
from jax import lax
from jax.experimental import pallas as pl
from jax.experimental.pallas import tpu as pltpu

D_MODEL = 32
N_HEADS = 4
D_K = D_MODEL // N_HEADS
D_FF = 64
N_LAYERS = 2
VOCAB = 11
EPS = 1e-6
NEG_INF = -1e9
_PW = 3 * D_MODEL          # packed small-parameter row width (96 = widest bias, bqkv)


# ----------------------------- in-kernel helpers -----------------------------

def _layer_norm(x, a, b):
    # a * (x - mean) / (std + eps) + b  with torch.std (unbiased, n-1) semantics.
    mean = jnp.mean(x, axis=-1, keepdims=True)
    diff = x - mean
    var = jnp.sum(diff * diff, axis=-1, keepdims=True) / (x.shape[-1] - 1)
    return a * diff / (jnp.sqrt(var) + EPS) + b


def _mha(qsrc, qoff, kvsrc, koff, voff, bias, wo, bo, B, Sq, Sk):
    """Multi-head attention over a batch-flattened activation.

    qsrc: (B*Sq, *) with q at lane offset qoff; kvsrc: (B*Sk, *) with k/v at koff/voff.
    bias: (B, Sq, Sk) additive mask (-1e9 masked / 0 kept). wo: (d, d), bo: (1, d).
    Per-head output is folded through the matching ROW block of wo (sublane slice) and
    accumulated, avoiding the lane-axis head concat / lane-offset writes.
    """
    scale = 1.0 / math.sqrt(D_K)
    outs = []
    for b in range(B):                                    # static, B = 2
        qb = qsrc[b * Sq:(b + 1) * Sq, :]                 # sublane slice (cheap)
        kvb = kvsrc[b * Sk:(b + 1) * Sk, :]
        bias_b = bias[b]                                  # (Sq, Sk)
        acc = None
        for h in range(N_HEADS):                          # static, H = 4
            qh = qb[:, qoff + h * D_K: qoff + (h + 1) * D_K]
            kh = kvb[:, koff + h * D_K: koff + (h + 1) * D_K]
            vh = kvb[:, voff + h * D_K: voff + (h + 1) * D_K]
            s = lax.dot_general(qh, kh, (((1,), (1,)), ((), ())),
                                preferred_element_type=jnp.float32) * scale + bias_b
            s = s - jnp.max(s, axis=-1, keepdims=True)
            p = jnp.exp(s)
            p = p / jnp.sum(p, axis=-1, keepdims=True)
            oh = jnp.dot(p, vh, preferred_element_type=jnp.float32)          # (Sq, D_K)
            c = jnp.dot(oh, wo[h * D_K:(h + 1) * D_K, :],                     # row block of wo
                        preferred_element_type=jnp.float32)                   # (Sq, d)
            acc = c if acc is None else acc + c
        outs.append(acc)
    return jnp.concatenate(outs, axis=0) + bo             # sublane concat -> (B*Sq, d)


# ----------------------------- the single fused kernel -----------------------------
#
# Packed small-parameter slab row layouts (width _PW = 96, zero padded):
#   encoder e_p[l]  (8, 96):  0 bqkv | 1 ln1_a | 2 ln1_b | 3 bo | 4 ln2_a | 5 ln2_b | 6 b1 | 7 b2
#   decoder d_p[l] (16, 96):  0 self_bqkv | 1 ln1_a | 2 ln1_b | 3 self_bo |
#                             4 cross_bq | 5 ln2_a | 6 ln2_b | 7 cross_bo | 8 cross_bkv |
#                             9 b1 | 10 b2 | 11 ln3_a | 12 ln3_b | 13-15 pad
#   fln (4, 32):              0 enc_ln_a | 1 enc_ln_b | 2 dec_ln_a | 3 dec_ln_b

def _encdec_kernel(xs_ref, xt_ref, ebias_ref, tbias_ref, cbias_ref,
                   e_wqkv_ref, e_wo_ref, e_w1_ref, e_w2_ref, e_p_ref,
                   d_wqkv_ref, d_wo_ref, d_cwq_ref, d_cwkv_ref, d_cwo_ref,
                   d_w1_ref, d_w2_ref, d_p_ref, fln_ref, o_ref):
    B, Ss, d = xs_ref.shape
    St = xt_ref.shape[1]
    ebias = ebias_ref[...]
    tbias = tbias_ref[...]
    cbias = cbias_ref[...]

    # ---------------- Encoder ----------------
    x = xs_ref[...].reshape(B * Ss, d)                    # batch flattened, position-wise ops
    for l in range(N_LAYERS):                             # static, L = 2
        p = e_p_ref[l]                                    # (8, 96)
        # self-attention sub-layer: x + MHA(LN(x))
        nx = _layer_norm(x, p[1:2, :d], p[2:3, :d])
        qkv = jnp.dot(nx, e_wqkv_ref[l], preferred_element_type=jnp.float32) + p[0:1, :]
        x = x + _mha(qkv, 0, qkv, d, 2 * d, ebias, e_wo_ref[l], p[3:4, :d], B, Ss, Ss)
        # feed-forward sub-layer: x + FFN(LN(x))
        nx = _layer_norm(x, p[4:5, :d], p[5:6, :d])
        h = jnp.maximum(
            jnp.dot(nx, e_w1_ref[l], preferred_element_type=jnp.float32) + p[6:7, :D_FF], 0.0)
        x = x + jnp.dot(h, e_w2_ref[l], preferred_element_type=jnp.float32) + p[7:8, :d]
    memory = _layer_norm(x, fln_ref[0:1, :], fln_ref[1:2, :])     # encoder output, stays in VMEM

    # ---------------- Decoder ----------------
    y = xt_ref[...].reshape(B * St, d)
    for l in range(N_LAYERS):
        p = d_p_ref[l]                                    # (16, 96)
        # masked self-attention
        nx = _layer_norm(y, p[1:2, :d], p[2:3, :d])
        qkv = jnp.dot(nx, d_wqkv_ref[l], preferred_element_type=jnp.float32) + p[0:1, :]
        y = y + _mha(qkv, 0, qkv, d, 2 * d, tbias, d_wo_ref[l], p[3:4, :d], B, St, St)
        # cross-attention over encoder memory
        nx = _layer_norm(y, p[5:6, :d], p[6:7, :d])
        q = jnp.dot(nx, d_cwq_ref[l], preferred_element_type=jnp.float32) + p[4:5, :d]
        kv = jnp.dot(memory, d_cwkv_ref[l], preferred_element_type=jnp.float32) + p[8:9, :2 * d]
        y = y + _mha(q, 0, kv, 0, d, cbias, d_cwo_ref[l], p[7:8, :d], B, St, Ss)
        # feed-forward
        nx = _layer_norm(y, p[11:12, :d], p[12:13, :d])
        h = jnp.maximum(
            jnp.dot(nx, d_w1_ref[l], preferred_element_type=jnp.float32) + p[9:10, :D_FF], 0.0)
        y = y + jnp.dot(h, d_w2_ref[l], preferred_element_type=jnp.float32) + p[10:11, :d]
    y = _layer_norm(y, fln_ref[2:3, :], fln_ref[3:4, :])

    for b in range(B):
        o_ref[b] = y[b * St:(b + 1) * St, :]


# ----------------------------- model glue (runs under jit) -----------------------------

def positional_encoding(S, d):
    pos = jnp.arange(S, dtype=jnp.float32)[:, None]
    div = jnp.exp(jnp.arange(0, d, 2, dtype=jnp.float32) * -(math.log(10000.0) / d))
    pe = jnp.zeros((S, d), jnp.float32)
    pe = pe.at[:, 0::2].set(jnp.sin(pos * div))
    pe = pe.at[:, 1::2].set(jnp.cos(pos * div))
    return pe


def embed(tokens, lut):
    # Embeddings: lut(x) * sqrt(d_model), then PositionalEncoding (dropout = identity).
    x = jnp.take(lut, tokens, axis=0) * math.sqrt(D_MODEL)
    return x + positional_encoding(tokens.shape[1], D_MODEL)[None, :, :]


def _mask_bias(mask, B, Sq, Sk):
    m = jnp.broadcast_to(mask, (B, 1, Sq, Sk)).astype(jnp.float32)
    return jnp.where(m == 0.0, jnp.float32(NEG_INF), jnp.float32(0.0)).reshape(B, Sq, Sk)


def encoder_decoder_forward_impl(pp, src, tgt, src_mask, tgt_mask):
    B, Ss = src.shape
    St = tgt.shape[1]
    d = D_MODEL
    L = N_LAYERS

    xs = embed(src, pp['src_lut'])
    xt = embed(tgt, pp['tgt_lut'])
    ebias = _mask_bias(src_mask, B, Ss, Ss)      # encoder self-attention
    tbias = _mask_bias(tgt_mask, B, St, St)      # decoder masked self-attention
    cbias = _mask_bias(src_mask, B, St, Ss)      # decoder cross-attention

    def bs(shape):
        nd = len(shape)
        return pl.BlockSpec(shape, lambda i: (0,) * nd)

    in_specs = [
        bs((B, Ss, d)), bs((B, St, d)),
        bs((B, Ss, Ss)), bs((B, St, St)), bs((B, St, Ss)),
        bs((L, d, 3 * d)), bs((L, d, d)), bs((L, d, D_FF)), bs((L, D_FF, d)), bs((L, 8, _PW)),
        bs((L, d, 3 * d)), bs((L, d, d)), bs((L, d, d)), bs((L, d, 2 * d)), bs((L, d, d)),
        bs((L, d, D_FF)), bs((L, D_FF, d)), bs((L, 16, _PW)),
        bs((4, d)),
    ]

    return pl.pallas_call(
        _encdec_kernel,
        grid=(1,),
        in_specs=in_specs,
        out_specs=bs((B, St, d)),
        out_shape=jax.ShapeDtypeStruct((B, St, d), jnp.float32),
        compiler_params=pltpu.CompilerParams(dimension_semantics=("arbitrary",)),
    )(xs, xt, ebias, tbias, cbias,
      pp['e_wqkv'], pp['e_wo'], pp['e_w1'], pp['e_w2'], pp['e_p'],
      pp['d_wqkv'], pp['d_wo'], pp['d_cwq'], pp['d_cwkv'], pp['d_cwo'],
      pp['d_w1'], pp['d_w2'], pp['d_p'], pp['fln'])


encoder_decoder_forward = jax.jit(encoder_decoder_forward_impl)


# ----------------------------- params: raw init + one-time packing -----------------------------

def init_raw_params(key):
    kiter = iter(jax.random.split(key, 256))

    def mat(din, dout):
        return jax.random.normal(next(kiter), (din, dout), jnp.float32) * 0.05

    def vec(dd):
        return jnp.zeros((dd,), jnp.float32)

    def mha():
        return {'wq': mat(D_MODEL, D_MODEL), 'bq': vec(D_MODEL),
                'wk': mat(D_MODEL, D_MODEL), 'bk': vec(D_MODEL),
                'wv': mat(D_MODEL, D_MODEL), 'bv': vec(D_MODEL),
                'wo': mat(D_MODEL, D_MODEL), 'bo': vec(D_MODEL)}

    def ffn():
        return {'w1': mat(D_MODEL, D_FF), 'b1': vec(D_FF),
                'w2': mat(D_FF, D_MODEL), 'b2': vec(D_MODEL)}

    def ln():
        return {'a': jnp.ones((D_MODEL,), jnp.float32),
                'b': jnp.zeros((D_MODEL,), jnp.float32)}

    return {
        'src_lut': jax.random.normal(next(kiter), (VOCAB, D_MODEL), jnp.float32),
        'tgt_lut': jax.random.normal(next(kiter), (VOCAB, D_MODEL), jnp.float32),
        'enc_layers': [{'self_attn': mha(), 'ff': ffn(), 'ln1': ln(), 'ln2': ln()}
                       for _ in range(N_LAYERS)],
        'enc_ln': ln(),
        'dec_layers': [{'self_attn': mha(), 'src_attn': mha(), 'ff': ffn(),
                        'ln1': ln(), 'ln2': ln(), 'ln3': ln()}
                       for _ in range(N_LAYERS)],
        'dec_ln': ln(),
        # Generator (final vocab projection) is not invoked by EncoderDecoder.forward.
    }


def _pack_rows(rows, n_rows):
    padded = [jnp.pad(r, (0, _PW - r.shape[0])) for r in rows]
    while len(padded) < n_rows:
        padded.append(jnp.zeros((_PW,), jnp.float32))
    return jnp.stack(padded)


def pack_params(raw):
    """One-time packing: fuse QKV weights, stack per-layer tensors over a layer axis and
    pack all tiny biases/LN params into one slab per stack (done at init, not per forward)."""
    e_wqkv, e_wo, e_w1, e_w2, e_p = [], [], [], [], []
    for lp in raw['enc_layers']:
        a, f = lp['self_attn'], lp['ff']
        e_wqkv.append(jnp.concatenate([a['wq'], a['wk'], a['wv']], axis=1))
        e_wo.append(a['wo'])
        e_w1.append(f['w1'])
        e_w2.append(f['w2'])
        e_p.append(_pack_rows([
            jnp.concatenate([a['bq'], a['bk'], a['bv']]),        # 0 bqkv
            lp['ln1']['a'], lp['ln1']['b'], a['bo'],             # 1,2,3
            lp['ln2']['a'], lp['ln2']['b'],                      # 4,5
            f['b1'], f['b2'],                                    # 6,7
        ], 8))

    d_wqkv, d_wo, d_cwq, d_cwkv, d_cwo, d_w1, d_w2, d_p = [], [], [], [], [], [], [], []
    for lp in raw['dec_layers']:
        sa, ca, f = lp['self_attn'], lp['src_attn'], lp['ff']
        d_wqkv.append(jnp.concatenate([sa['wq'], sa['wk'], sa['wv']], axis=1))
        d_wo.append(sa['wo'])
        d_cwq.append(ca['wq'])
        d_cwkv.append(jnp.concatenate([ca['wk'], ca['wv']], axis=1))
        d_cwo.append(ca['wo'])
        d_w1.append(f['w1'])
        d_w2.append(f['w2'])
        d_p.append(_pack_rows([
            jnp.concatenate([sa['bq'], sa['bk'], sa['bv']]),     # 0 self bqkv
            lp['ln1']['a'], lp['ln1']['b'], sa['bo'],            # 1,2,3
            ca['bq'], lp['ln2']['a'], lp['ln2']['b'], ca['bo'],  # 4,5,6,7
            jnp.concatenate([ca['bk'], ca['bv']]),               # 8 cross bkv
            f['b1'], f['b2'],                                    # 9,10
            lp['ln3']['a'], lp['ln3']['b'],                      # 11,12
        ], 16))

    return {
        'src_lut': raw['src_lut'], 'tgt_lut': raw['tgt_lut'],
        'e_wqkv': jnp.stack(e_wqkv), 'e_wo': jnp.stack(e_wo),
        'e_w1': jnp.stack(e_w1), 'e_w2': jnp.stack(e_w2), 'e_p': jnp.stack(e_p),
        'd_wqkv': jnp.stack(d_wqkv), 'd_wo': jnp.stack(d_wo),
        'd_cwq': jnp.stack(d_cwq), 'd_cwkv': jnp.stack(d_cwkv), 'd_cwo': jnp.stack(d_cwo),
        'd_w1': jnp.stack(d_w1), 'd_w2': jnp.stack(d_w2), 'd_p': jnp.stack(d_p),
        'fln': jnp.stack([raw['enc_ln']['a'], raw['enc_ln']['b'],
                          raw['dec_ln']['a'], raw['dec_ln']['b']]),
    }


# ----------------------------- main -----------------------------

if __name__ == "__main__":
    key = jax.random.PRNGKey(0)
    pkey, skey, tkey = jax.random.split(key, 3)
    params = pack_params(init_raw_params(pkey))

    B, S_SRC, S_TGT = 2, 8, 8
    src = jax.random.randint(skey, (B, S_SRC), 1, VOCAB)
    tgt = jax.random.randint(tkey, (B, S_TGT), 1, VOCAB)
    src = src.at[1, -1].set(0)   # introduce a pad token to exercise the padding mask
    tgt = tgt.at[1, -1].set(0)

    # src_mask: (src != pad) -> [B, 1, 1, S_src]
    src_mask = (src != 0)[:, None, None, :].astype(jnp.float32)
    # tgt_mask: padding mask & subsequent (causal) mask -> [B, 1, S_tgt, S_tgt]
    sub = jnp.tril(jnp.ones((S_TGT, S_TGT), jnp.float32))
    tgt_mask = (tgt != 0)[:, None, None, :].astype(jnp.float32) * sub[None, None, :, :]

    out = encoder_decoder_forward(params, src, tgt, src_mask, tgt_mask)
    out = jax.block_until_ready(out)
    assert out.shape == (B, S_TGT, D_MODEL)
    assert bool(jnp.all(jnp.isfinite(out)))
    print("KERNEL_OK")
</pallas_src>

<mosaic_0001>
module attributes {stable_mosaic.version = 11 : i64} {
  func.func @_encdec_kernel(%arg0: i32, %arg1: memref<2x8x32xf32, #tpu.memory_space<vmem>>, %arg2: memref<2x8x32xf32, #tpu.memory_space<vmem>>, %arg3: memref<2x8x8xf32, #tpu.memory_space<vmem>>, %arg4: memref<2x8x8xf32, #tpu.memory_space<vmem>>, %arg5: memref<2x8x8xf32, #tpu.memory_space<vmem>>, %arg6: memref<2x32x96xf32, #tpu.memory_space<vmem>>, %arg7: memref<2x32x32xf32, #tpu.memory_space<vmem>>, %arg8: memref<2x32x64xf32, #tpu.memory_space<vmem>>, %arg9: memref<2x64x32xf32, #tpu.memory_space<vmem>>, %arg10: memref<2x8x96xf32, #tpu.memory_space<vmem>>, %arg11: memref<2x32x96xf32, #tpu.memory_space<vmem>>, %arg12: memref<2x32x32xf32, #tpu.memory_space<vmem>>, %arg13: memref<2x32x32xf32, #tpu.memory_space<vmem>>, %arg14: memref<2x32x64xf32, #tpu.memory_space<vmem>>, %arg15: memref<2x32x32xf32, #tpu.memory_space<vmem>>, %arg16: memref<2x32x64xf32, #tpu.memory_space<vmem>>, %arg17: memref<2x64x32xf32, #tpu.memory_space<vmem>>, %arg18: memref<2x16x96xf32, #tpu.memory_space<vmem>>, %arg19: memref<4x32xf32, #tpu.memory_space<vmem>>, %arg20: memref<2x8x32xf32, #tpu.memory_space<vmem>>) attributes {dimension_semantics = [#tpu.dimension_semantics<arbitrary>], iteration_bounds = array<i64: 1>, scalar_prefetch = 0 : i64, scratch_operands = 0 : i64, tpu.core_type = #tpu.core_type<tc>, window_params = [{pipeline_mode = #tpu.pipeline_mode<synchronous>, transform_indices = @transform_0, window_bounds = array<i64: 2, 8, 32>}, {pipeline_mode = #tpu.pipeline_mode<synchronous>, transform_indices = @transform_1, window_bounds = array<i64: 2, 8, 32>}, {pipeline_mode = #tpu.pipeline_mode<synchronous>, transform_indices = @transform_2, window_bounds = array<i64: 2, 8, 8>}, {pipeline_mode = #tpu.pipeline_mode<synchronous>, transform_indices = @transform_3, window_bounds = array<i64: 2, 8, 8>}, {pipeline_mode = #tpu.pipeline_mode<synchronous>, transform_indices = @transform_4, window_bounds = array<i64: 2, 8, 8>}, {pipeline_mode = #tpu.pipeline_mode<synchronous>, transform_indices = @transform_5, window_bounds = array<i64: 2, 32, 96>}, {pipeline_mode = #tpu.pipeline_mode<synchronous>, transform_indices = @transform_6, window_bounds = array<i64: 2, 32, 32>}, {pipeline_mode = #tpu.pipeline_mode<synchronous>, transform_indices = @transform_7, window_bounds = array<i64: 2, 32, 64>}, {pipeline_mode = #tpu.pipeline_mode<synchronous>, transform_indices = @transform_8, window_bounds = array<i64: 2, 64, 32>}, {pipeline_mode = #tpu.pipeline_mode<synchronous>, transform_indices = @transform_9, window_bounds = array<i64: 2, 8, 96>}, {pipeline_mode = #tpu.pipeline_mode<synchronous>, transform_indices = @transform_10, window_bounds = array<i64: 2, 32, 96>}, {pipeline_mode = #tpu.pipeline_mode<synchronous>, transform_indices = @transform_11, window_bounds = array<i64: 2, 32, 32>}, {pipeline_mode = #tpu.pipeline_mode<synchronous>, transform_indices = @transform_12, window_bounds = array<i64: 2, 32, 32>}, {pipeline_mode = #tpu.pipeline_mode<synchronous>, transform_indices = @transform_13, window_bounds = array<i64: 2, 32, 64>}, {pipeline_mode = #tpu.pipeline_mode<synchronous>, transform_indices = @transform_14, window_bounds = array<i64: 2, 32, 32>}, {pipeline_mode = #tpu.pipeline_mode<synchronous>, transform_indices = @transform_15, window_bounds = array<i64: 2, 32, 64>}, {pipeline_mode = #tpu.pipeline_mode<synchronous>, transform_indices = @transform_16, window_bounds = array<i64: 2, 64, 32>}, {pipeline_mode = #tpu.pipeline_mode<synchronous>, transform_indices = @transform_17, window_bounds = array<i64: 2, 16, 96>}, {pipeline_mode = #tpu.pipeline_mode<synchronous>, transform_indices = @transform_18, window_bounds = array<i64: 4, 32>}, {pipeline_mode = #tpu.pipeline_mode<synchronous>, transform_indices = @transform_19, window_bounds = array<i64: 2, 8, 32>}]} {
    %c0 = arith.constant 0 : index
    %c0_0 = arith.constant 0 : index
    %c0_1 = arith.constant 0 : index
    %0 = vector.load %arg3[%c0, %c0_0, %c0_1] : memref<2x8x8xf32, #tpu.memory_space<vmem>>, vector<2x8x8xf32>
    %c0_2 = arith.constant 0 : index
    %c0_3 = arith.constant 0 : index
    %c0_4 = arith.constant 0 : index
    %1 = vector.load %arg4[%c0_2, %c0_3, %c0_4] : memref<2x8x8xf32, #tpu.memory_space<vmem>>, vector<2x8x8xf32>
    %c0_5 = arith.constant 0 : index
    %c0_6 = arith.constant 0 : index
    %c0_7 = arith.constant 0 : index
    %2 = vector.load %arg5[%c0_5, %c0_6, %c0_7] : memref<2x8x8xf32, #tpu.memory_space<vmem>>, vector<2x8x8xf32>
    %c0_8 = arith.constant 0 : index
    %c0_9 = arith.constant 0 : index
    %c0_10 = arith.constant 0 : index
    %3 = vector.load %arg1[%c0_8, %c0_9, %c0_10] : memref<2x8x32xf32, #tpu.memory_space<vmem>>, vector<2x8x32xf32>
    %4 = vector.shape_cast %3 : vector<2x8x32xf32> to vector<16x32xf32>
    %c0_11 = arith.constant 0 : index
    %c0_12 = arith.constant 0 : index
    %c0_13 = arith.constant 0 : index
    %5 = vector.load %arg10[%c0_11, %c0_12, %c0_13] : memref<2x8x96xf32, #tpu.memory_space<vmem>>, vector<1x8x96xf32>
    %6 = vector.shape_cast %5 : vector<1x8x96xf32> to vector<8x96xf32>
    %7 = vector.extract_strided_slice %6 {offsets = [1, 0], sizes = [1, 32], strides = [1, 1]} : vector<8x96xf32> to vector<1x32xf32>
    %8 = vector.extract_strided_slice %6 {offsets = [2, 0], sizes = [1, 32], strides = [1, 1]} : vector<8x96xf32> to vector<1x32xf32>
    %cst = arith.constant dense<0.000000e+00> : vector<16xf32>
    %9 = vector.multi_reduction <add>, %4, %cst [1] : vector<16x32xf32> to vector<16xf32>
    %10 = vector.shape_cast %9 : vector<16xf32> to vector<16x1xf32>
    %cst_14 = arith.constant 3.200000e+01 : f32
    %11 = vector.broadcast %cst_14 : f32 to vector<16x1xf32>
    %12 = arith.divf %10, %11 : vector<16x1xf32>
    %13 = vector.broadcast %12 : vector<16x1xf32> to vector<16x32xf32>
    %14 = arith.subf %4, %13 : vector<16x32xf32>
    %15 = arith.mulf %14, %14 : vector<16x32xf32>
    %cst_15 = arith.constant dense<0.000000e+00> : vector<16xf32>
    %16 = vector.multi_reduction <add>, %15, %cst_15 [1] : vector<16x32xf32> to vector<16xf32>
    %17 = vector.shape_cast %16 : vector<16xf32> to vector<16x1xf32>
    %cst_16 = arith.constant 3.100000e+01 : f32
    %18 = vector.broadcast %cst_16 : f32 to vector<16x1xf32>
    %19 = arith.divf %17, %18 : vector<16x1xf32>
    %20 = vector.broadcast %7 : vector<1x32xf32> to vector<16x32xf32>
    %21 = arith.mulf %20, %14 : vector<16x32xf32>
    %22 = math.sqrt %19 : vector<16x1xf32>
    %cst_17 = arith.constant 9.99999997E-7 : f32
    %23 = vector.broadcast %cst_17 : f32 to vector<16x1xf32>
    %24 = arith.addf %22, %23 : vector<16x1xf32>
    %25 = vector.broadcast %24 : vector<16x1xf32> to vector<16x32xf32>
    %26 = arith.divf %21, %25 : vector<16x32xf32>
    %27 = vector.broadcast %8 : vector<1x32xf32> to vector<16x32xf32>
    %28 = arith.addf %26, %27 : vector<16x32xf32>
    %c0_18 = arith.constant 0 : index
    %c0_19 = arith.constant 0 : index
    %c0_20 = arith.constant 0 : index
    %29 = vector.load %arg6[%c0_18, %c0_19, %c0_20] : memref<2x32x96xf32, #tpu.memory_space<vmem>>, vector<1x32x96xf32>
    %30 = vector.shape_cast %29 : vector<1x32x96xf32> to vector<32x96xf32>
    %cst_21 = arith.constant dense<0.000000e+00> : vector<16x96xf32>
    %31 = tpu.matmul %28, %30, %cst_21 {dimension_numbers = #tpu.dot_dimension_numbers<[1], [0], [0], [1], [0, 0, 1, 1], [], []>} : vector<16x32xf32>, vector<32x96xf32>, vector<16x96xf32> -> vector<16x96xf32>
    %32 = vector.extract_strided_slice %6 {offsets = [0, 0], sizes = [1, 96], strides = [1, 1]} : vector<8x96xf32> to vector<1x96xf32>
    %33 = vector.broadcast %32 : vector<1x96xf32> to vector<16x96xf32>
    %34 = arith.addf %31, %33 : vector<16x96xf32>
    %c0_22 = arith.constant 0 : index
    %c0_23 = arith.constant 0 : index
    %c0_24 = arith.constant 0 : index
    %35 = vector.load %arg7[%c0_22, %c0_23, %c0_24] : memref<2x32x32xf32, #tpu.memory_space<vmem>>, vector<1x32x32xf32>
    %36 = vector.shape_cast %35 : vector<1x32x32xf32> to vector<32x32xf32>
    %37 = vector.extract_strided_slice %6 {offsets = [3, 0], sizes = [1, 32], strides = [1, 1]} : vector<8x96xf32> to vector<1x32xf32>
    %38 = vector.extract_strided_slice %34 {offsets = [0, 0], sizes = [8, 96], strides = [1, 1]} : vector<16x96xf32> to vector<8x96xf32>
    %39 = vector.extract_strided_slice %34 {offsets = [0, 0], sizes = [8, 96], strides = [1, 1]} : vector<16x96xf32> to vector<8x96xf32>
    %40 = vector.extract_strided_slice %0 {offsets = [0, 0, 0], sizes = [1, 8, 8], strides = [1, 1, 1]} : vector<2x8x8xf32> to vector<1x8x8xf32>
    %41 = vector.shape_cast %40 : vector<1x8x8xf32> to vector<8x8xf32>
    %42 = vector.extract_strided_slice %38 {offsets = [0, 0], sizes = [8, 8], strides = [1, 1]} : vector<8x96xf32> to vector<8x8xf32>
    %43 = vector.extract_strided_slice %39 {offsets = [0, 32], sizes = [8, 8], strides = [1, 1]} : vector<8x96xf32> to vector<8x8xf32>
    %44 = vector.extract_strided_slice %39 {offsets = [0, 64], sizes = [8, 8], strides = [1, 1]} : vector<8x96xf32> to vector<8x8xf32>
    %cst_25 = arith.constant dense<0.000000e+00> : vector<8x8xf32>
    %45 = tpu.matmul %42, %43, %cst_25 {dimension_numbers = #tpu.dot_dimension_numbers<[1], [1], [0], [0], [0, 0, 1, 0], [], []>} : vector<8x8xf32>, vector<8x8xf32>, vector<8x8xf32> -> vector<8x8xf32>
    %cst_26 = arith.constant 0.353553385 : f32
    %46 = vector.broadcast %cst_26 : f32 to vector<8x8xf32>
    %47 = arith.mulf %45, %46 : vector<8x8xf32>
    %48 = arith.addf %47, %41 : vector<8x8xf32>
    %cst_27 = arith.constant dense<0xFF800000> : vector<8xf32>
    %49 = vector.multi_reduction <maximumf>, %48, %cst_27 [1] : vector<8x8xf32> to vector<8xf32>
    %50 = vector.shape_cast %49 : vector<8xf32> to vector<8x1xf32>
    %51 = vector.broadcast %50 : vector<8x1xf32> to vector<8x8xf32>
    %52 = arith.subf %48, %51 : vector<8x8xf32>
    %53 = math.exp %52 : vector<8x8xf32>
    %cst_28 = arith.constant dense<0.000000e+00> : vector<8xf32>
    %54 = vector.multi_reduction <add>, %53, %cst_28 [1] : vector<8x8xf32> to vector<8xf32>
    %55 = vector.shape_cast %54 : vector<8xf32> to vector<8x1xf32>
    %56 = vector.broadcast %55 : vector<8x1xf32> to vector<8x8xf32>
    %57 = arith.divf %53, %56 : vector<8x8xf32>
    %cst_29 = arith.constant dense<0.000000e+00> : vector<8x8xf32>
    %58 = tpu.matmul %57, %44, %cst_29 {dimension_numbers = #tpu.dot_dimension_numbers<[1], [0], [0], [1], [0, 0, 1, 1], [], []>} : vector<8x8xf32>, vector<8x8xf32>, vector<8x8xf32> -> vector<8x8xf32>
    %59 = vector.extract_strided_slice %36 {offsets = [0, 0], sizes = [8, 32], strides = [1, 1]} : vector<32x32xf32> to vector<8x32xf32>
    %cst_30 = arith.constant dense<0.000000e+00> : vector<8x32xf32>
    %60 = tpu.matmul %58, %59, %cst_30 {dimension_numbers = #tpu.dot_dimension_numbers<[1], [0], [0], [1], [0, 0, 1, 1], [], []>} : vector<8x8xf32>, vector<8x32xf32>, vector<8x32xf32> -> vector<8x32xf32>
    %61 = vector.extract_strided_slice %38 {offsets = [0, 8], sizes = [8, 8], strides = [1, 1]} : vector<8x96xf32> to vector<8x8xf32>
    %62 = vector.extract_strided_slice %39 {offsets = [0, 40], sizes = [8, 8], strides = [1, 1]} : vector<8x96xf32> to vector<8x8xf32>
    %63 = vector.extract_strided_slice %39 {offsets = [0, 72], sizes = [8, 8], strides = [1, 1]} : vector<8x96xf32> to vector<8x8xf32>
    %cst_31 = arith.constant dense<0.000000e+00> : vector<8x8xf32>
    %64 = tpu.matmul %61, %62, %cst_31 {dimension_numbers = #tpu.dot_dimension_numbers<[1], [1], [0], [0], [0, 0, 1, 0], [], []>} : vector<8x8xf32>, vector<8x8xf32>, vector<8x8xf32> -> vector<8x8xf32>
    %cst_32 = arith.constant 0.353553385 : f32
    %65 = vector.broadcast %cst_32 : f32 to vector<8x8xf32>
    %66 = arith.mulf %64, %65 : vector<8x8xf32>
    %67 = arith.addf %66, %41 : vector<8x8xf32>
    %cst_33 = arith.constant dense<0xFF800000> : vector<8xf32>
    %68 = vector.multi_reduction <maximumf>, %67, %cst_33 [1] : vector<8x8xf32> to vector<8xf32>
    %69 = vector.shape_cast %68 : vector<8xf32> to vector<8x1xf32>
    %70 = vector.broadcast %69 : vector<8x1xf32> to vector<8x8xf32>
    %71 = arith.subf %67, %70 : vector<8x8xf32>
    %72 = math.exp %71 : vector<8x8xf32>
    %cst_34 = arith.constant dense<0.000000e+00> : vector<8xf32>
    %73 = vector.multi_reduction <add>, %72, %cst_34 [1] : vector<8x8xf32> to vector<8xf32>
    %74 = vector.shape_cast %73 : vector<8xf32> to vector<8x1xf32>
    %75 = vector.broadcast %74 : vector<8x1xf32> to vector<8x8xf32>
    %76 = arith.divf %72, %75 : vector<8x8xf32>
    %cst_35 = arith.constant dense<0.000000e+00> : vector<8x8xf32>
    %77 = tpu.matmul %76, %63, %cst_35 {dimension_numbers = #tpu.dot_dimension_numbers<[1], [0], [0], [1], [0, 0, 1, 1], [], []>} : vector<8x8xf32>, vector<8x8xf32>, vector<8x8xf32> -> vector<8x8xf32>
    %78 = vector.extract_strided_slice %36 {offsets = [8, 0], sizes = [8, 32], strides = [1, 1]} : vector<32x32xf32> to vector<8x32xf32>
    %cst_36 = arith.constant dense<0.000000e+00> : vector<8x32xf32>
    %79 = tpu.matmul %77, %78, %cst_36 {dimension_numbers = #tpu.dot_dimension_numbers<[1], [0], [0], [1], [0, 0, 1, 1], [], []>} : vector<8x8xf32>, vector<8x32xf32>, vector<8x32xf32> -> vector<8x32xf32>
    %80 = arith.addf %60, %79 : vector<8x32xf32>
    %81 = vector.extract_strided_slice %38 {offsets = [0, 16], sizes = [8, 8], strides = [1, 1]} : vector<8x96xf32> to vector<8x8xf32>
    %82 = vector.extract_strided_slice %39 {offsets = [0, 48], sizes = [8, 8], strides = [1, 1]} : vector<8x96xf32> to vector<8x8xf32>
    %83 = vector.extract_strided_slice %39 {offsets = [0, 80], sizes = [8, 8], strides = [1, 1]} : vector<8x96xf32> to vector<8x8xf32>
    %cst_37 = arith.constant dense<0.000000e+00> : vector<8x8xf32>
    %84 = tpu.matmul %81, %82, %cst_37 {dimension_numbers = #tpu.dot_dimension_numbers<[1], [1], [0], [0], [0, 0, 1, 0], [], []>} : vector<8x8xf32>, vector<8x8xf32>, vector<8x8xf32> -> vector<8x8xf32>
    %cst_38 = arith.constant 0.353553385 : f32
    %85 = vector.broadcast %cst_38 : f32 to vector<8x8xf32>
    %86 = arith.mulf %84, %85 : vector<8x8xf32>
    %87 = arith.addf %86, %41 : vector<8x8xf32>
    %cst_39 = arith.constant dense<0xFF800000> : vector<8xf32>
    %88 = vector.multi_reduction <maximumf>, %87, %cst_39 [1] : vector<8x8xf32> to vector<8xf32>
    %89 = vector.shape_cast %88 : vector<8xf32> to vector<8x1xf32>
    %90 = vector.broadcast %89 : vector<8x1xf32> to vector<8x8xf32>
    %91 = arith.subf %87, %90 : vector<8x8xf32>
    %92 = math.exp %91 : vector<8x8xf32>
    %cst_40 = arith.constant dense<0.000000e+00> : vector<8xf32>
    %93 = vector.multi_reduction <add>, %92, %cst_40 [1] : vector<8x8xf32> to vector<8xf32>
    %94 = vector.shape_cast %93 : vector<8xf32> to vector<8x1xf32>
    %95 = vector.broadcast %94 : vector<8x1xf32> to vector<8x8xf32>
    %96 = arith.divf %92, %95 : vector<8x8xf32>
    %cst_41 = arith.constant dense<0.000000e+00> : vector<8x8xf32>
    %97 = tpu.matmul %96, %83, %cst_41 {dimension_numbers = #tpu.dot_dimension_numbers<[1], [0], [0], [1], [0, 0, 1, 1], [], []>} : vector<8x8xf32>, vector<8x8xf32>, vector<8x8xf32> -> vector<8x8xf32>
    %98 = vector.extract_strided_slice %36 {offsets = [16, 0], sizes = [8, 32], strides = [1, 1]} : vector<32x32xf32> to vector<8x32xf32>
    %cst_42 = arith.constant dense<0.000000e+00> : vector<8x32xf32>
    %99 = tpu.matmul %97, %98, %cst_42 {dimension_numbers = #tpu.dot_dimension_numbers<[1], [0], [0], [1], [0, 0, 1, 1], [], []>} : vector<8x8xf32>, vector<8x32xf32>, vector<8x32xf32> -> vector<8x32xf32>
    %100 = arith.addf %80, %99 : vector<8x32xf32>
    %101 = vector.extract_strided_slice %38 {offsets = [0, 24], sizes = [8, 8], strides = [1, 1]} : vector<8x96xf32> to vector<8x8xf32>
    %102 = vector.extract_strided_slice %39 {offsets = [0, 56], sizes = [8, 8], strides = [1, 1]} : vector<8x96xf32> to vector<8x8xf32>
    %103 = vector.extract_strided_slice %39 {offsets = [0, 88], sizes = [8, 8], strides = [1, 1]} : vector<8x96xf32> to vector<8x8xf32>
    %cst_43 = arith.constant dense<0.000000e+00> : vector<8x8xf32>
    %104 = tpu.matmul %101, %102, %cst_43 {dimension_numbers = #tpu.dot_dimension_numbers<[1], [1], [0], [0], [0, 0, 1, 0], [], []>} : vector<8x8xf32>, vector<8x8xf32>, vector<8x8xf32> -> vector<8x8xf32>
    %cst_44 = arith.constant 0.353553385 : f32
    %105 = vector.broadcast %cst_44 : f32 to vector<8x8xf32>
    %106 = arith.mulf %104, %105 : vector<8x8xf32>
    %107 = arith.addf %106, %41 : vector<8x8xf32>
    %cst_45 = arith.constant dense<0xFF800000> : vector<8xf32>
    %108 = vector.multi_reduction <maximumf>, %107, %cst_45 [1] : vector<8x8xf32> to vector<8xf32>
    %109 = vector.shape_cast %108 : vector<8xf32> to vector<8x1xf32>
    %110 = vector.broadcast %109 : vector<8x1xf32> to vector<8x8xf32>
    %111 = arith.subf %107, %110 : vector<8x8xf32>
    %112 = math.exp %111 : vector<8x8xf32>
    %cst_46 = arith.constant dense<0.000000e+00> : vector<8xf32>
    %113 = vector.multi_reduction <add>, %112, %cst_46 [1] : vector<8x8xf32> to vector<8xf32>
    %114 = vector.shape_cast %113 : vector<8xf32> to vector<8x1xf32>
    %115 = vector.broadcast %114 : vector<8x1xf32> to vector<8x8xf32>
    %116 = arith.divf %112, %115 : vector<8x8xf32>
    %cst_47 = arith.constant dense<0.000000e+00> : vector<8x8xf32>
    %117 = tpu.matmul %116, %103, %cst_47 {dimension_numbers = #tpu.dot_dimension_numbers<[1], [0], [0], [1], [0, 0, 1, 1], [], []>} : vector<8x8xf32>, vector<8x8xf32>, vector<8x8xf32> -> vector<8x8xf32>
    %118 = vector.extract_strided_slice %36 {offsets = [24, 0], sizes = [8, 32], strides = [1, 1]} : vector<32x32xf32> to vector<8x32xf32>
    %cst_48 = arith.constant dense<0.000000e+00> : vector<8x32xf32>
    %119 = tpu.matmul %117, %118, %cst_48 {dimension_numbers = #tpu.dot_dimension_numbers<[1], [0], [0], [1], [0, 0, 1, 1], [], []>} : vector<8x8xf32>, vector<8x32xf32>, vector<8x32xf32> -> vector<8x32xf32>
    %120 = arith.addf %100, %119 : vector<8x32xf32>
    %121 = vector.extract_strided_slice %34 {offsets = [8, 0], sizes = [8, 96], strides = [1, 1]} : vector<16x96xf32> to vector<8x96xf32>
    %122 = vector.extract_strided_slice %34 {offsets = [8, 0], sizes = [8, 96], strides = [1, 1]} : vector<16x96xf32> to vector<8x96xf32>
    %123 = vector.extract_strided_slice %0 {offsets = [1, 0, 0], sizes = [1, 8, 8], strides = [1, 1, 1]} : vector<2x8x8xf32> to vector<1x8x8xf32>
    %124 = vector.shape_cast %123 : vector<1x8x8xf32> to vector<8x8xf32>
    %125 = vector.extract_strided_slice %121 {offsets = [0, 0], sizes = [8, 8], strides = [1, 1]} : vector<8x96xf32> to vector<8x8xf32>
    %126 = vector.extract_strided_slice %122 {offsets = [0, 32], sizes = [8, 8], strides = [1, 1]} : vector<8x96xf32> to vector<8x8xf32>
    %127 = vector.extract_strided_slice %122 {offsets = [0, 64], sizes = [8, 8], strides = [1, 1]} : vector<8x96xf32> to vector<8x8xf32>
    %cst_49 = arith.constant dense<0.000000e+00> : vector<8x8xf32>
    %128 = tpu.matmul %125, %126, %cst_49 {dimension_numbers = #tpu.dot_dimension_numbers<[1], [1], [0], [0], [0, 0, 1, 0], [], []>} : vector<8x8xf32>, vector<8x8xf32>, vector<8x8xf32> -> vector<8x8xf32>
    %cst_50 = arith.constant 0.353553385 : f32
    %129 = vector.broadcast %cst_50 : f32 to vector<8x8xf32>
    %130 = arith.mulf %128, %129 : vector<8x8xf32>
    %131 = arith.addf %130, %124 : vector<8x8xf32>
    %cst_51 = arith.constant dense<0xFF800000> : vector<8xf32>
    %132 = vector.multi_reduction <maximumf>, %131, %cst_51 [1] : vector<8x8xf32> to vector<8xf32>
    %133 = vector.shape_cast %132 : vector<8xf32> to vector<8x1xf32>
    %134 = vector.broadcast %133 : vector<8x1xf32> to vector<8x8xf32>
    %135 = arith.subf %131, %134 : vector<8x8xf32>
    %136 = math.exp %135 : vector<8x8xf32>
    %cst_52 = arith.constant dense<0.000000e+00> : vector<8xf32>
    %137 = vector.multi_reduction <add>, %136, %cst_52 [1] : vector<8x8xf32> to vector<8xf32>
    %138 = vector.shape_cast %137 : vector<8xf32> to vector<8x1xf32>
    %139 = vector.broadcast %138 : vector<8x1xf32> to vector<8x8xf32>
    %140 = arith.divf %136, %139 : vector<8x8xf32>
    %cst_53 = arith.constant dense<0.000000e+00> : vector<8x8xf32>
    %141 = tpu.matmul %140, %127, %cst_53 {dimension_numbers = #tpu.dot_dimension_numbers<[1], [0], [0], [1], [0, 0, 1, 1], [], []>} : vector<8x8xf32>, vector<8x8xf32>, vector<8x8xf32> -> vector<8x8xf32>
    %142 = vector.extract_strided_slice %36 {offsets = [0, 0], sizes = [8, 32], strides = [1, 1]} : vector<32x32xf32> to vector<8x32xf32>
    %cst_54 = arith.constant dense<0.000000e+00> : vector<8x32xf32>
    %143 = tpu.matmul %141, %142, %cst_54 {dimension_numbers = #tpu.dot_dimension_numbers<[1], [0], [0], [1], [0, 0, 1, 1], [], []>} : vector<8x8xf32>, vector<8x32xf32>, vector<8x32xf32> -> vector<8x32xf32>
    %144 = vector.extract_strided_slice %121 {offsets = [0, 8], sizes = [8, 8], strides = [1, 1]} : vector<8x96xf32> to vector<8x8xf32>
    %145 = vector.extract_strided_slice %122 {offsets = [0, 40], sizes = [8, 8], strides = [1, 1]} : vector<8x96xf32> to vector<8x8xf32>
    %146 = vector.extract_strided_slice %122 {offsets = [0, 72], sizes = [8, 8], strides = [1, 1]} : vector<8x96xf32> to vector<8x8xf32>
    %cst_55 = arith.constant dense<0.000000e+00> : vector<8x8xf32>
    %147 = tpu.matmul %144, %145, %cst_55 {dimension_numbers = #tpu.dot_dimension_numbers<[1], [1], [0], [0], [0, 0, 1, 0], [], []>} : vector<8x8xf32>, vector<8x8xf32>, vector<8x8xf32> -> vector<8x8xf32>
    %cst_56 = arith.constant 0.353553385 : f32
    %148 = vector.broadcast %cst_56 : f32 to vector<8x8xf32>
    %149 = arith.mulf %147, %148 : vector<8x8xf32>
    %150 = arith.addf %149, %124 : vector<8x8xf32>
    %cst_57 = arith.constant dense<0xFF800000> : vector<8xf32>
    %151 = vector.multi_reduction <maximumf>, %150, %cst_57 [1] : vector<8x8xf32> to vector<8xf32>
    %152 = vector.shape_cast %151 : vector<8xf32> to vector<8x1xf32>
    %153 = vector.broadcast %152 : vector<8x1xf32> to vector<8x8xf32>
    %154 = arith.subf %150, %153 : vector<8x8xf32>
    %155 = math.exp %154 : vector<8x8xf32>
    %cst_58 = arith.constant dense<0.000000e+00> : vector<8xf32>
    %156 = vector.multi_reduction <add>, %155, %cst_58 [1] : vector<8x8xf32> to vector<8xf32>
    %157 = vector.shape_cast %156 : vector<8xf32> to vector<8x1xf32>
    %158 = vector.broadcast %157 : vector<8x1xf32> to vector<8x8xf32>
    %159 = arith.divf %155, %158 : vector<8x8xf32>
    %cst_59 = arith.constant dense<0.000000e+00> : vector<8x8xf32>
    %160 = tpu.matmul %159, %146, %cst_59 {dimension_numbers = #tpu.dot_dimension_numbers<[1], [0], [0], [1], [0, 0, 1, 1], [], []>} : vector<8x8xf32>, vector<8x8xf32>, vector<8x8xf32> -> vector<8x8xf32>
    %161 = vector.extract_strided_slice %36 {offsets = [8, 0], sizes = [8, 32], strides = [1, 1]} : vector<32x32xf32> to vector<8x32xf32>
    %cst_60 = arith.constant dense<0.000000e+00> : vector<8x32xf32>
    %162 = tpu.matmul %160, %161, %cst_60 {dimension_numbers = #tpu.dot_dimension_numbers<[1], [0], [0], [1], [0, 0, 1, 1], [], []>} : vector<8x8xf32>, vector<8x32xf32>, vector<8x32xf32> -> vector<8x32xf32>
    %163 = arith.addf %143, %162 : vector<8x32xf32>
    %164 = vector.extract_strided_slice %121 {offsets = [0, 16], sizes = [8, 8], strides = [1, 1]} : vector<8x96xf32> to vector<8x8xf32>
    %165 = vector.extract_strided_slice %122 {offsets = [0, 48], sizes = [8, 8], strides = [1, 1]} : vector<8x96xf32> to vector<8x8xf32>
    %166 = vector.extract_strided_slice %122 {offsets = [0, 80], sizes = [8, 8], strides = [1, 1]} : vector<8x96xf32> to vector<8x8xf32>
    %cst_61 = arith.constant dense<0.000000e+00> : vector<8x8xf32>
    %167 = tpu.matmul %164, %165, %cst_61 {dimension_numbers = #tpu.dot_dimension_numbers<[1], [1], [0], [0], [0, 0, 1, 0], [], []>} : vector<8x8xf32>, vector<8x8xf32>, vector<8x8xf32> -> vector<8x8xf32>
    %cst_62 = arith.constant 0.353553385 : f32
    %168 = vector.broadcast %cst_62 : f32 to vector<8x8xf32>
    %169 = arith.mulf %167, %168 : vector<8x8xf32>
    %170 = arith.addf %169, %124 : vector<8x8xf32>
    %cst_63 = arith.constant dense<0xFF800000> : vector<8xf32>
    %171 = vector.multi_reduction <maximumf>, %170, %cst_63 [1] : vector<8x8xf32> to vector<8xf32>
    %172 = vector.shape_cast %171 : vector<8xf32> to vector<8x1xf32>
    %173 = vector.broadcast %172 : vector<8x1xf32> to vector<8x8xf32>
    %174 = arith.subf %170, %173 : vector<8x8xf32>
    %175 = math.exp %174 : vector<8x8xf32>
    %cst_64 = arith.constant dense<0.000000e+00> : vector<8xf32>
    %176 = vector.multi_reduction <add>, %175, %cst_64 [1] : vector<8x8xf32> to vector<8xf32>
    %177 = vector.shape_cast %176 : vector<8xf32> to vector<8x1xf32>
    %178 = vector.broadcast %177 : vector<8x1xf32> to vector<8x8xf32>
    %179 = arith.divf %175, %178 : vector<8x8xf32>
    %cst_65 = arith.constant dense<0.000000e+00> : vector<8x8xf32>
    %180 = tpu.matmul %179, %166, %cst_65 {dimension_numbers = #tpu.dot_dimension_numbers<[1], [0], [0], [1], [0, 0, 1, 1], [], []>} : vector<8x8xf32>, vector<8x8xf32>, vector<8x8xf32> -> vector<8x8xf32>
    %181 = vector.extract_strided_slice %36 {offsets = [16, 0], sizes = [8, 32], strides = [1, 1]} : vector<32x32xf32> to vector<8x32xf32>
    %cst_66 = arith.constant dense<0.000000e+00> : vector<8x32xf32>
    %182 = tpu.matmul %180, %181, %cst_66 {dimension_numbers = #tpu.dot_dimension_numbers<[1], [0], [0], [1], [0, 0, 1, 1], [], []>} : vector<8x8xf32>, vector<8x32xf32>, vector<8x32xf32> -> vector<8x32xf32>
    %183 = arith.addf %163, %182 : vector<8x32xf32>
    %184 = vector.extract_strided_slice %121 {offsets = [0, 24], sizes = [8, 8], strides = [1, 1]} : vector<8x96xf32> to vector<8x8xf32>
    %185 = vector.extract_strided_slice %122 {offsets = [0, 56], sizes = [8, 8], strides = [1, 1]} : vector<8x96xf32> to vector<8x8xf32>
    %186 = vector.extract_strided_slice %122 {offsets = [0, 88], sizes = [8, 8], strides = [1, 1]} : vector<8x96xf32> to vector<8x8xf32>
    %cst_67 = arith.constant dense<0.000000e+00> : vector<8x8xf32>
    %187 = tpu.matmul %184, %185, %cst_67 {dimension_numbers = #tpu.dot_dimension_numbers<[1], [1], [0], [0], [0, 0, 1, 0], [], []>} : vector<8x8xf32>, vector<8x8xf32>, vector<8x8xf32> -> vector<8x8xf32>
    %cst_68 = arith.constant 0.353553385 : f32
    %188 = vector.broadcast %cst_68 : f32 to vector<8x8xf32>
    %189 = arith.mulf %187, %188 : vector<8x8xf32>
    %190 = arith.addf %189, %124 : vector<8x8xf32>
    %cst_69 = arith.constant dense<0xFF800000> : vector<8xf32>
    %191 = vector.multi_reduction <maximumf>, %190, %cst_69 [1] : vector<8x8xf32> to vector<8xf32>
    %192 = vector.shape_cast %191 : vector<8xf32> to vector<8x1xf32>
    %193 = vector.broadcast %192 : vector<8x1xf32> to vector<8x8xf32>
    %194 = arith.subf %190, %193 : vector<8x8xf32>
    %195 = math.exp %194 : vector<8x8xf32>
    %cst_70 = arith.constant dense<0.000000e+00> : vector<8xf32>
    %196 = vector.multi_reduction <add>, %195, %cst_70 [1] : vector<8x8xf32> to vector<8xf32>
    %197 = vector.shape_cast %196 : vector<8xf32> to vector<8x1xf32>
    %198 = vector.broadcast %197 : vector<8x1xf32> to vector<8x8xf32>
    %199 = arith.divf %195, %198 : vector<8x8xf32>
    %cst_71 = arith.constant dense<0.000000e+00> : vector<8x8xf32>
    %200 = tpu.matmul %199, %186, %cst_71 {dimension_numbers = #tpu.dot_dimension_numbers<[1], [0], [0], [1], [0, 0, 1, 1], [], []>} : vector<8x8xf32>, vector<8x8xf32>, vector<8x8xf32> -> vector<8x8xf32>
    %201 = vector.extract_strided_slice %36 {offsets = [24, 0], sizes = [8, 32], strides = [1, 1]} : vector<32x32xf32> to vector<8x32xf32>
    %cst_72 = arith.constant dense<0.000000e+00> : vector<8x32xf32>
    %202 = tpu.matmul %200, %201, %cst_72 {dimension_numbers = #tpu.dot_dimension_numbers<[1], [0], [0], [1], [0, 0, 1, 1], [], []>} : vector<8x8xf32>, vector<8x32xf32>, vector<8x32xf32> -> vector<8x32xf32>
    %203 = arith.addf %183, %202 : vector<8x32xf32>
    %204 = tpu.concatenate %120, %203 in 0 : vector<8x32xf32>, vector<8x32xf32> -> vector<16x32xf32>
    %205 = vector.broadcast %37 : vector<1x32xf32> to vector<16x32xf32>
    %206 = arith.addf %204, %205 : vector<16x32xf32>
    %207 = arith.addf %4, %206 : vector<16x32xf32>
    %208 = vector.extract_strided_slice %6 {offsets = [4, 0], sizes = [1, 32], strides = [1, 1]} : vector<8x96xf32> to vector<1x32xf32>
    %209 = vector.extract_strided_slice %6 {offsets = [5, 0], sizes = [1, 32], strides = [1, 1]} : vector<8x96xf32> to vector<1x32xf32>
    %cst_73 = arith.constant dense<0.000000e+00> : vector<16xf32>
    %210 = vector.multi_reduction <add>, %207, %cst_73 [1] : vector<16x32xf32> to vector<16xf32>
    %211 = vector.shape_cast %210 : vector<16xf32> to vector<16x1xf32>
    %cst_74 = arith.constant 3.200000e+01 : f32
    %212 = vector.broadcast %cst_74 : f32 to vector<16x1xf32>
    %213 = arith.divf %211, %212 : vector<16x1xf32>
    %214 = vector.broadcast %213 : vector<16x1xf32> to vector<16x32xf32>
    %215 = arith.subf %207, %214 : vector<16x32xf32>
    %216 = arith.mulf %215, %215 : vector<16x32xf32>
    %cst_75 = arith.constant dense<0.000000e+00> : vector<16xf32>
    %217 = vector.multi_reduction <add>, %216, %cst_75 [1] : vector<16x32xf32> to vector<16xf32>
    %218 = vector.shape_cast %217 : vector<16xf32> to vector<16x1xf32>
    %cst_76 = arith.constant 3.100000e+01 : f32
    %219 = vector.broadcast %cst_76 : f32 to vector<16x1xf32>
    %220 = arith.divf %218, %219 : vector<16x1xf32>
    %221 = vector.broadcast %208 : vector<1x32xf32> to vector<16x32xf32>
    %222 = arith.mulf %221, %215 : vector<16x32xf32>
    %223 = math.sqrt %220 : vector<16x1xf32>
    %cst_77 = arith.constant 9.99999997E-7 : f32
    %224 = vector.broadcast %cst_77 : f32 to vector<16x1xf32>
    %225 = arith.addf %223, %224 : vector<16x1xf32>
    %226 = vector.broadcast %225 : vector<16x1xf32> to vector<16x32xf32>
    %227 = arith.divf %222, %226 : vector<16x32xf32>
    %228 = vector.broadcast %209 : vector<1x32xf32> to vector<16x32xf32>
    %229 = arith.addf %227, %228 : vector<16x32xf32>
    %c0_78 = arith.constant 0 : index
    %c0_79 = arith.constant 0 : index
    %c0_80 = arith.constant 0 : index
    %230 = vector.load %arg8[%c0_78, %c0_79, %c0_80] : memref<2x32x64xf32, #tpu.memory_space<vmem>>, vector<1x32x64xf32>
    %231 = vector.shape_cast %230 : vector<1x32x64xf32> to vector<32x64xf32>
    %cst_81 = arith.constant dense<0.000000e+00> : vector<16x64xf32>
    %232 = tpu.matmul %229, %231, %cst_81 {dimension_numbers = #tpu.dot_dimension_numbers<[1], [0], [0], [1], [0, 0, 1, 1], [], []>} : vector<16x32xf32>, vector<32x64xf32>, vector<16x64xf32> -> vector<16x64xf32>
    %233 = vector.extract_strided_slice %6 {offsets = [6, 0], sizes = [1, 64], strides = [1, 1]} : vector<8x96xf32> to vector<1x64xf32>
    %234 = vector.broadcast %233 : vector<1x64xf32> to vector<16x64xf32>
    %235 = arith.addf %232, %234 : vector<16x64xf32>
    %cst_82 = arith.constant 0.000000e+00 : f32
    %236 = vector.broadcast %cst_82 : f32 to vector<16x64xf32>
    %237 = arith.maximumf %235, %236 : vector<16x64xf32>
    %c0_83 = arith.constant 0 : index
    %c0_84 = arith.constant 0 : index
    %c0_85 = arith.constant 0 : index
    %238 = vector.load %arg9[%c0_83, %c0_84, %c0_85] : memref<2x64x32xf32, #tpu.memory_space<vmem>>, vector<1x64x32xf32>
    %239 = vector.shape_cast %238 : vector<1x64x32xf32> to vector<64x32xf32>
    %cst_86 = arith.constant dense<0.000000e+00> : vector<16x32xf32>
    %240 = tpu.matmul %237, %239, %cst_86 {dimension_numbers = #tpu.dot_dimension_numbers<[1], [0], [0], [1], [0, 0, 1, 1], [], []>} : vector<16x64xf32>, vector<64x32xf32>, vector<16x32xf32> -> vector<16x32xf32>
    %241 = arith.addf %207, %240 : vector<16x32xf32>
    %242 = vector.extract_strided_slice %6 {offsets = [7, 0], sizes = [1, 32], strides = [1, 1]} : vector<8x96xf32> to vector<1x32xf32>
    %243 = vector.broadcast %242 : vector<1x32xf32> to vector<16x32xf32>
    %244 = arith.addf %241, %243 : vector<16x32xf32>
    %c1 = arith.constant 1 : index
    %c0_87 = arith.constant 0 : index
    %c0_88 = arith.constant 0 : index
    %245 = vector.load %arg10[%c1, %c0_87, %c0_88] : memref<2x8x96xf32, #tpu.memory_space<vmem>>, vector<1x8x96xf32>
    %246 = vector.shape_cast %245 : vector<1x8x96xf32> to vector<8x96xf32>
    %247 = vector.extract_strided_slice %246 {offsets = [1, 0], sizes = [1, 32], strides = [1, 1]} : vector<8x96xf32> to vector<1x32xf32>
    %248 = vector.extract_strided_slice %246 {offsets = [2, 0], sizes = [1, 32], strides = [1, 1]} : vector<8x96xf32> to vector<1x32xf32>
    %cst_89 = arith.constant dense<0.000000e+00> : vector<16xf32>
    %249 = vector.multi_reduction <add>, %244, %cst_89 [1] : vector<16x32xf32> to vector<16xf32>
    %250 = vector.shape_cast %249 : vector<16xf32> to vector<16x1xf32>
    %cst_90 = arith.constant 3.200000e+01 : f32
    %251 = vector.broadcast %cst_90 : f32 to vector<16x1xf32>
    %252 = arith.divf %250, %251 : vector<16x1xf32>
    %253 = vector.broadcast %252 : vector<16x1xf32> to vector<16x32xf32>
    %254 = arith.subf %244, %253 : vector<16x32xf32>
    %255 = arith.mulf %254, %254 : vector<16x32xf32>
    %cst_91 = arith.constant dense<0.000000e+00> : vector<16xf32>
    %256 = vector.multi_reduction <add>, %255, %cst_91 [1] : vector<16x32xf32> to vector<16xf32>
    %257 = vector.shape_cast %256 : vector<16xf32> to vector<16x1xf32>
    %cst_92 = arith.constant 3.100000e+01 : f32
    %258 = vector.broadcast %cst_92 : f32 to vector<16x1xf32>
    %259 = arith.divf %257, %258 : vector<16x1xf32>
    %260 = vector.broadcast %247 : vector<1x32xf32> to vector<16x32xf32>
    %261 = arith.mulf %260, %254 : vector<16x32xf32>
    %262 = math.sqrt %259 : vector<16x1xf32>
    %cst_93 = arith.constant 9.99999997E-7 : f32
    %263 = vector.broadcast %cst_93 : f32 to vector<16x1xf32>
    %264 = arith.addf %262, %263 : vector<16x1xf32>
    %265 = vector.broadcast %264 : vector<16x1xf32> to vector<16x32xf32>
    %266 = arith.divf %261, %265 : vector<16x32xf32>
    %267 = vector.broadcast %248 : vector<1x32xf32> to vector<16x32xf32>
    %268 = arith.addf %266, %267 : vector<16x32xf32>
    %c1_94 = arith.constant 1 : index
    %c0_95 = arith.constant 0 : index
    %c0_96 = arith.constant 0 : index
    %269 = vector.load %arg6[%c1_94, %c0_95, %c0_96] : memref<2x32x96xf32, #tpu.memory_space<vmem>>, vector<1x32x96xf32>
    %270 = vector.shape_cast %269 : vector<1x32x96xf32> to vector<32x96xf32>
    %cst_97 = arith.constant dense<0.000000e+00> : vector<16x96xf32>
    %271 = tpu.matmul %268, %270, %cst_97 {dimension_numbers = #tpu.dot_dimension_numbers<[1], [0], [0], [1], [0, 0, 1, 1], [], []>} : vector<16x32xf32>, vector<32x96xf32>, vector<16x96xf32> -> vector<16x96xf32>
    %272 = vector.extract_strided_slice %246 {offsets = [0, 0], sizes = [1, 96], strides = [1, 1]} : vector<8x96xf32> to vector<1x96xf32>
    %273 = vector.broadcast %272 : vector<1x96xf32> to vector<16x96xf32>
    %274 = arith.addf %271, %273 : vector<16x96xf32>
    %c1_98 = arith.constant 1 : index
    %c0_99 = arith.constant 0 : index
    %c0_100 = arith.constant 0 : index
    %275 = vector.load %arg7[%c1_98, %c0_99, %c0_100] : memref<2x32x32xf32, #tpu.memory_space<vmem>>, vector<1x32x32xf32>
    %276 = vector.shape_cast %275 : vector<1x32x32xf32> to vector<32x32xf32>
    %277 = vector.extract_strided_slice %246 {offsets = [3, 0], sizes = [1, 32], strides = [1, 1]} : vector<8x96xf32> to vector<1x32xf32>
    %278 = vector.extract_strided_slice %274 {offsets = [0, 0], sizes = [8, 96], strides = [1, 1]} : vector<16x96xf32> to vector<8x96xf32>
    %279 = vector.extract_strided_slice %274 {offsets = [0, 0], sizes = [8, 96], strides = [1, 1]} : vector<16x96xf32> to vector<8x96xf32>
    %280 = vector.extract_strided_slice %0 {offsets = [0, 0, 0], sizes = [1, 8, 8], strides = [1, 1, 1]} : vector<2x8x8xf32> to vector<1x8x8xf32>
    %281 = vector.shape_cast %280 : vector<1x8x8xf32> to vector<8x8xf32>
    %282 = vector.extract_strided_slice %278 {offsets = [0, 0], sizes = [8, 8], strides = [1, 1]} : vector<8x96xf32> to vector<8x8xf32>
    %283 = vector.extract_strided_slice %279 {offsets = [0, 32], sizes = [8, 8], strides = [1, 1]} : vector<8x96xf32> to vector<8x8xf32>
    %284 = vector.extract_strided_slice %279 {offsets = [0, 64], sizes = [8, 8], strides = [1, 1]} : vector<8x96xf32> to vector<8x8xf32>
    %cst_101 = arith.constant dense<0.000000e+00> : vector<8x8xf32>
    %285 = tpu.matmul %282, %283, %cst_101 {dimension_numbers = #tpu.dot_dimension_numbers<[1], [1], [0], [0], [0, 0, 1, 0], [], []>} : vector<8x8xf32>, vector<8x8xf32>, vector<8x8xf32> -> vector<8x8xf32>
    %cst_102 = arith.constant 0.353553385 : f32
    %286 = vector.broadcast %cst_102 : f32 to vector<8x8xf32>
    %287 = arith.mulf %285, %286 : vector<8x8xf32>
    %288 = arith.addf %287, %281 : vector<8x8xf32>
    %cst_103 = arith.constant dense<0xFF800000> : vector<8xf32>
    %289 = vector.multi_reduction <maximumf>, %288, %cst_103 [1] : vector<8x8xf32> to vector<8xf32>
    %290 = vector.shape_cast %289 : vector<8xf32> to vector<8x1xf32>
    %291 = vector.broadcast %290 : vector<8x1xf32> to vector<8x8xf32>
    %292 = arith.subf %288, %291 : vector<8x8xf32>
    %293 = math.exp %292 : vector<8x8xf32>
    %cst_104 = arith.constant dense<0.000000e+00> : vector<8xf32>
    %294 = vector.multi_reduction <add>, %293, %cst_104 [1] : vector<8x8xf32> to vector<8xf32>
    %295 = vector.shape_cast %294 : vector<8xf32> to vector<8x1xf32>
    %296 = vector.broadcast %295 : vector<8x1xf32> to vector<8x8xf32>
    %297 = arith.divf %293, %296 : vector<8x8xf32>
    %cst_105 = arith.constant dense<0.000000e+00> : vector<8x8xf32>
    %298 = tpu.matmul %297, %284, %cst_105 {dimension_numbers = #tpu.dot_dimension_numbers<[1], [0], [0], [1], [0, 0, 1, 1], [], []>} : vector<8x8xf32>, vector<8x8xf32>, vector<8x8xf32> -> vector<8x8xf32>
    %299 = vector.extract_strided_slice %276 {offsets = [0, 0], sizes = [8, 32], strides = [1, 1]} : vector<32x32xf32> to vector<8x32xf32>
    %cst_106 = arith.constant dense<0.000000e+00> : vector<8x32xf32>
    %300 = tpu.matmul %298, %299, %cst_106 {dimension_numbers = #tpu.dot_dimension_numbers<[1], [0], [0], [1], [0, 0, 1, 1], [], []>} : vector<8x8xf32>, vector<8x32xf32>, vector<8x32xf32> -> vector<8x32xf32>
    %301 = vector.extract_strided_slice %278 {offsets = [0, 8], sizes = [8, 8], strides = [1, 1]} : vector<8x96xf32> to vector<8x8xf32>
    %302 = vector.extract_strided_slice %279 {offsets = [0, 40], sizes = [8, 8], strides = [1, 1]} : vector<8x96xf32> to vector<8x8xf32>
    %303 = vector.extract_strided_slice %279 {offsets = [0, 72], sizes = [8, 8], strides = [1, 1]} : vector<8x96xf32> to vector<8x8xf32>
    %cst_107 = arith.constant dense<0.000000e+00> : vector<8x8xf32>
    %304 = tpu.matmul %301, %302, %cst_107 {dimension_numbers = #tpu.dot_dimension_numbers<[1], [1], [0], [0], [0, 0, 1, 0], [], []>} : vector<8x8xf32>, vector<8x8xf32>, vector<8x8xf32> -> vector<8x8xf32>
    %cst_108 = arith.constant 0.353553385 : f32
    %305 = vector.broadcast %cst_108 : f32 to vector<8x8xf32>
    %306 = arith.mulf %304, %305 : vector<8x8xf32>
    %307 = arith.addf %306, %281 : vector<8x8xf32>
    %cst_109 = arith.constant dense<0xFF800000> : vector<8xf32>
    %308 = vector.multi_reduction <maximumf>, %307, %cst_109 [1] : vector<8x8xf32> to vector<8xf32>
    %309 = vector.shape_cast %308 : vector<8xf32> to vector<8x1xf32>
    %310 = vector.broadcast %309 : vector<8x1xf32> to vector<8x8xf32>
    %311 = arith.subf %307, %310 : vector<8x8xf32>
    %312 = math.exp %311 : vector<8x8xf32>
    %cst_110 = arith.constant dense<0.000000e+00> : vector<8xf32>
    %313 = vector.multi_reduction <add>, %312, %cst_110 [1] : vector<8x8xf32> to vector<8xf32>
    %314 = vector.shape_cast %313 : vector<8xf32> to vector<8x1xf32>
    %315 = vector.broadcast %314 : vector<8x1xf32> to vector<8x8xf32>
    %316 = arith.divf %312, %315 : vector<8x8xf32>
    %cst_111 = arith.constant dense<0.000000e+00> : vector<8x8xf32>
    %317 = tpu.matmul %316, %303, %cst_111 {dimension_numbers = #tpu.dot_dimension_numbers<[1], [0], [0], [1], [0, 0, 1, 1], [], []>} : vector<8x8xf32>, vector<8x8xf32>, vector<8x8xf32> -> vector<8x8xf32>
    %318 = vector.extract_strided_slice %276 {offsets = [8, 0], sizes = [8, 32], strides = [1, 1]} : vector<32x32xf32> to vector<8x32xf32>
    %cst_112 = arith.constant dense<0.000000e+00> : vector<8x32xf32>
    %319 = tpu.matmul %317, %318, %cst_112 {dimension_numbers = #tpu.dot_dimension_numbers<[1], [0], [0], [1], [0, 0, 1, 1], [], []>} : vector<8x8xf32>, vector<8x32xf32>, vector<8x32xf32> -> vector<8x32xf32>
    %320 = arith.addf %300, %319 : vector<8x32xf32>
    %321 = vector.extract_strided_slice %278 {offsets = [0, 16], sizes = [8, 8], strides = [1, 1]} : vector<8x96xf32> to vector<8x8xf32>
    %322 = vector.extract_strided_slice %279 {offsets = [0, 48], sizes = [8, 8], strides = [1, 1]} : vector<8x96xf32> to vector<8x8xf32>
    %323 = vector.extract_strided_slice %279 {offsets = [0, 80], sizes = [8, 8], strides = [1, 1]} : vector<8x96xf32> to vector<8x8xf32>
    %cst_113 = arith.constant dense<0.000000e+00> : vector<8x8xf32>
    %324 = tpu.matmul %321, %322, %cst_113 {dimension_numbers = #tpu.dot_dimension_numbers<[1], [1], [0], [0], [0, 0, 1, 0], [], []>} : vector<8x8xf32>, vector<8x8xf32>, vector<8x8xf32> -> vector<8x8xf32>
    %cst_114 = arith.constant 0.353553385 : f32
    %325 = vector.broadcast %cst_114 : f32 to vector<8x8xf32>
    %326 = arith.mulf %324, %325 : vector<8x8xf32>
    %327 = arith.addf %326, %281 : vector<8x8xf32>
    %cst_115 = arith.constant dense<0xFF800000> : vector<8xf32>
    %328 = vector.multi_reduction <maximumf>, %327, %cst_115 [1] : vector<8x8xf32> to vector<8xf32>
    %329 = vector.shape_cast %328 : vector<8xf32> to vector<8x1xf32>
    %330 = vector.broadcast %329 : vector<8x1xf32> to vector<8x8xf32>
    %331 = arith.subf %327, %330 : vector<8x8xf32>
    %332 = math.exp %331 : vector<8x8xf32>
    %cst_116 = arith.constant dense<0.000000e+00> : vector<8xf32>
    %333 = vector.multi_reduction <add>, %332, %cst_116 [1] : vector<8x8xf32> to vector<8xf32>
    %334 = vector.shape_cast %333 : vector<8xf32> to vector<8x1xf32>
    %335 = vector.broadcast %334 : vector<8x1xf32> to vector<8x8xf32>
    %336 = arith.divf %332, %335 : vector<8x8xf32>
    %cst_117 = arith.constant dense<0.000000e+00> : vector<8x8xf32>
    %337 = tpu.matmul %336, %323, %cst_117 {dimension_numbers = #tpu.dot_dimension_numbers<[1], [0], [0], [1], [0, 0, 1, 1], [], []>} : vector<8x8xf32>, vector<8x8xf32>, vector<8x8xf32> -> vector<8x8xf32>
    %338 = vector.extract_strided_slice %276 {offsets = [16, 0], sizes = [8, 32], strides = [1, 1]} : vector<32x32xf32> to vector<8x32xf32>
    %cst_118 = arith.constant dense<0.000000e+00> : vector<8x32xf32>
    %339 = tpu.matmul %337, %338, %cst_118 {dimension_numbers = #tpu.dot_dimension_numbers<[1], [0], [0], [1], [0, 0, 1, 1], [], []>} : vector<8x8xf32>, vector<8x32xf32>, vector<8x32xf32> -> vector<8x32xf32>
    %340 = arith.addf %320, %339 : vector<8x32xf32>
    %341 = vector.extract_strided_slice %278 {offsets = [0, 24], sizes = [8, 8], strides = [1, 1]} : vector<8x96xf32> to vector<8x8xf32>
    %342 = vector.extract_strided_slice %279 {offsets = [0, 56], sizes = [8, 8], strides = [1, 1]} : vector<8x96xf32> to vector<8x8xf32>
    %343 = vector.extract_strided_slice %279 {offsets = [0, 88], sizes = [8, 8], strides = [1, 1]} : vector<8x96xf32> to vector<8x8xf32>
    %cst_119 = arith.constant dense<0.000000e+00> : vector<8x8xf32>
    %344 = tpu.matmul %341, %342, %cst_119 {dimension_numbers = #tpu.dot_dimension_numbers<[1], [1], [0], [0], [0, 0, 1, 0], [], []>} : vector<8x8xf32>, vector<8x8xf32>, vector<8x8xf32> -> vector<8x8xf32>
    %cst_120 = arith.constant 0.353553385 : f32
    %345 = vector.broadcast %cst_120 : f32 to vector<8x8xf32>
    %346 = arith.mulf %344, %345 : vector<8x8xf32>
    %347 = arith.addf %346, %281 : vector<8x8xf32>
    %cst_121 = arith.constant dense<0xFF800000> : vector<8xf32>
    %348 = vector.multi_reduction <maximumf>, %347, %cst_121 [1] : vector<8x8xf32> to vector<8xf32>
    %349 = vector.shape_cast %348 : vector<8xf32> to vector<8x1xf32>
    %350 = vector.broadcast %349 : vector<8x1xf32> to vector<8x8xf32>
    %351 = arith.subf %347, %350 : vector<8x8xf32>
    %352 = math.exp %351 : vector<8x8xf32>
    %cst_122 = arith.constant dense<0.000000e+00> : vector<8xf32>
    %353 = vector.multi_reduction <add>, %352, %cst_122 [1] : vector<8x8xf32> to vector<8xf32>
    %354 = vector.shape_cast %353 : vector<8xf32> to vector<8x1xf32>
    %355 = vector.broadcast %354 : vector<8x1xf32> to vector<8x8xf32>
    %356 = arith.divf %352, %355 : vector<8x8xf32>
    %cst_123 = arith.constant dense<0.000000e+00> : vector<8x8xf32>
    %357 = tpu.matmul %356, %343, %cst_123 {dimension_numbers = #tpu.dot_dimension_numbers<[1], [0], [0], [1], [0, 0, 1, 1], [], []>} : vector<8x8xf32>, vector<8x8xf32>, vector<8x8xf32> -> vector<8x8xf32>
    %358 = vector.extract_strided_slice %276 {offsets = [24, 0], sizes = [8, 32], strides = [1, 1]} : vector<32x32xf32> to vector<8x32xf32>
    %cst_124 = arith.constant dense<0.000000e+00> : vector<8x32xf32>
    %359 = tpu.matmul %357, %358, %cst_124 {dimension_numbers = #tpu.dot_dimension_numbers<[1], [0], [0], [1], [0, 0, 1, 1], [], []>} : vector<8x8xf32>, vector<8x32xf32>, vector<8x32xf32> -> vector<8x32xf32>
    %360 = arith.addf %340, %359 : vector<8x32xf32>
    %361 = vector.extract_strided_slice %274 {offsets = [8, 0], sizes = [8, 96], strides = [1, 1]} : vector<16x96xf32> to vector<8x96xf32>
    %362 = vector.extract_strided_slice %274 {offsets = [8, 0], sizes = [8, 96], strides = [1, 1]} : vector<16x96xf32> to vector<8x96xf32>
    %363 = vector.extract_strided_slice %0 {offsets = [1, 0, 0], sizes = [1, 8, 8], strides = [1, 1, 1]} : vector<2x8x8xf32> to vector<1x8x8xf32>
    %364 = vector.shape_cast %363 : vector<1x8x8xf32> to vector<8x8xf32>
    %365 = vector.extract_strided_slice %361 {offsets = [0, 0], sizes = [8, 8], strides = [1, 1]} : vector<8x96xf32> to vector<8x8xf32>
    %366 = vector.extract_strided_slice %362 {offsets = [0, 32], sizes = [8, 8], strides = [1, 1]} : vector<8x96xf32> to vector<8x8xf32>
    %367 = vector.extract_strided_slice %362 {offsets = [0, 64], sizes = [8, 8], strides = [1, 1]} : vector<8x96xf32> to vector<8x8xf32>
    %cst_125 = arith.constant dense<0.000000e+00> : vector<8x8xf32>
    %368 = tpu.matmul %365, %366, %cst_125 {dimension_numbers = #tpu.dot_dimension_numbers<[1], [1], [0], [0], [0, 0, 1, 0], [], []>} : vector<8x8xf32>, vector<8x8xf32>, vector<8x8xf32> -> vector<8x8xf32>
    %cst_126 = arith.constant 0.353553385 : f32
    %369 = vector.broadcast %cst_126 : f32 to vector<8x8xf32>
    %370 = arith.mulf %368, %369 : vector<8x8xf32>
    %371 = arith.addf %370, %364 : vector<8x8xf32>
    %cst_127 = arith.constant dense<0xFF800000> : vector<8xf32>
    %372 = vector.multi_reduction <maximumf>, %371, %cst_127 [1] : vector<8x8xf32> to vector<8xf32>
    %373 = vector.shape_cast %372 : vector<8xf32> to vector<8x1xf32>
    %374 = vector.broadcast %373 : vector<8x1xf32> to vector<8x8xf32>
    %375 = arith.subf %371, %374 : vector<8x8xf32>
    %376 = math.exp %375 : vector<8x8xf32>
    %cst_128 = arith.constant dense<0.000000e+00> : vector<8xf32>
    %377 = vector.multi_reduction <add>, %376, %cst_128 [1] : vector<8x8xf32> to vector<8xf32>
    %378 = vector.shape_cast %377 : vector<8xf32> to vector<8x1xf32>
    %379 = vector.broadcast %378 : vector<8x1xf32> to vector<8x8xf32>
    %380 = arith.divf %376, %379 : vector<8x8xf32>
    %cst_129 = arith.constant dense<0.000000e+00> : vector<8x8xf32>
    %381 = tpu.matmul %380, %367, %cst_129 {dimension_numbers = #tpu.dot_dimension_numbers<[1], [0], [0], [1], [0, 0, 1, 1], [], []>} : vector<8x8xf32>, vector<8x8xf32>, vector<8x8xf32> -> vector<8x8xf32>
    %382 = vector.extract_strided_slice %276 {offsets = [0, 0], sizes = [8, 32], strides = [1, 1]} : vector<32x32xf32> to vector<8x32xf32>
    %cst_130 = arith.constant dense<0.000000e+00> : vector<8x32xf32>
    %383 = tpu.matmul %381, %382, %cst_130 {dimension_numbers = #tpu.dot_dimension_numbers<[1], [0], [0], [1], [0, 0, 1, 1], [], []>} : vector<8x8xf32>, vector<8x32xf32>, vector<8x32xf32> -> vector<8x32xf32>
    %384 = vector.extract_strided_slice %361 {offsets = [0, 8], sizes = [8, 8], strides = [1, 1]} : vector<8x96xf32> to vector<8x8xf32>
    %385 = vector.extract_strided_slice %362 {offsets = [0, 40], sizes = [8, 8], strides = [1, 1]} : vector<8x96xf32> to vector<8x8xf32>
    %386 = vector.extract_strided_slice %362 {offsets = [0, 72], sizes = [8, 8], strides = [1, 1]} : vector<8x96xf32> to vector<8x8xf32>
    %cst_131 = arith.constant dense<0.000000e+00> : vector<8x8xf32>
    %387 = tpu.matmul %384, %385, %cst_131 {dimension_numbers = #tpu.dot_dimension_numbers<[1], [1], [0], [0], [0, 0, 1, 0], [], []>} : vector<8x8xf32>, vector<8x8xf32>, vector<8x8xf32> -> vector<8x8xf32>
    %cst_132 = arith.constant 0.353553385 : f32
    %388 = vector.broadcast %cst_132 : f32 to vector<8x8xf32>
    %389 = arith.mulf %387, %388 : vector<8x8xf32>
    %390 = arith.addf %389, %364 : vector<8x8xf32>
    %cst_133 = arith.constant dense<0xFF800000> : vector<8xf32>
    %391 = vector.multi_reduction <maximumf>, %390, %cst_133 [1] : vector<8x8xf32> to vector<8xf32>
    %392 = vector.shape_cast %391 : vector<8xf32> to vector<8x1xf32>
    %393 = vector.broadcast %392 : vector<8x1xf32> to vector<8x8xf32>
    %394 = arith.subf %390, %393 : vector<8x8xf32>
    %395 = math.exp %394 : vector<8x8xf32>
    %cst_134 = arith.constant dense<0.000000e+00> : vector<8xf32>
    %396 = vector.multi_reduction <add>, %395, %cst_134 [1] : vector<8x8xf32> to vector<8xf32>
    %397 = vector.shape_cast %396 : vector<8xf32> to vector<8x1xf32>
    %398 = vector.broadcast %397 : vector<8x1xf32> to vector<8x8xf32>
    %399 = arith.divf %395, %398 : vector<8x8xf32>
    %cst_135 = arith.constant dense<0.000000e+00> : vector<8x8xf32>
    %400 = tpu.matmul %399, %386, %cst_135 {dimension_numbers = #tpu.dot_dimension_numbers<[1], [0], [0], [1], [0, 0, 1, 1], [], []>} : vector<8x8xf32>, vector<8x8xf32>, vector<8x8xf32> -> vector<8x8xf32>
    %401 = vector.extract_strided_slice %276 {offsets = [8, 0], sizes = [8, 32], strides = [1, 1]} : vector<32x32xf32> to vector<8x32xf32>
    %cst_136 = arith.constant dense<0.000000e+00> : vector<8x32xf32>
    %402 = tpu.matmul %400, %401, %cst_136 {dimension_numbers = #tpu.dot_dimension_numbers<[1], [0], [0], [1], [0, 0, 1, 1], [], []>} : vector<8x8xf32>, vector<8x32xf32>, vector<8x32xf32> -> vector<8x32xf32>
    %403 = arith.addf %383, %402 : vector<8x32xf32>
    %404 = vector.extract_strided_slice %361 {offsets = [0, 16], sizes = [8, 8], strides = [1, 1]} : vector<8x96xf32> to vector<8x8xf32>
    %405 = vector.extract_strided_slice %362 {offsets = [0, 48], sizes = [8, 8], strides = [1, 1]} : vector<8x96xf32> to vector<8x8xf32>
    %406 = vector.extract_strided_slice %362 {offsets = [0, 80], sizes = [8, 8], strides = [1, 1]} : vector<8x96xf32> to vector<8x8xf32>
    %cst_137 = arith.constant dense<0.000000e+00> : vector<8x8xf32>
    %407 = tpu.matmul %404, %405, %cst_137 {dimension_numbers = #tpu.dot_dimension_numbers<[1], [1], [0], [0], [0, 0, 1, 0], [], []>} : vector<8x8xf32>, vector<8x8xf32>, vector<8x8xf32> -> vector<8x8xf32>
    %cst_138 = arith.constant 0.353553385 : f32
    %408 = vector.broadcast %cst_138 : f32 to vector<8x8xf32>
    %409 = arith.mulf %407, %408 : vector<8x8xf32>
    %410 = arith.addf %409, %364 : vector<8x8xf32>
    %cst_139 = arith.constant dense<0xFF800000> : vector<8xf32>
    %411 = vector.multi_reduction <maximumf>, %410, %cst_139 [1] : vector<8x8xf32> to vector<8xf32>
    %412 = vector.shape_cast %411 : vector<8xf32> to vector<8x1xf32>
    %413 = vector.broadcast %412 : vector<8x1xf32> to vector<8x8xf32>
    %414 = arith.subf %410, %413 : vector<8x8xf32>
    %415 = math.exp %414 : vector<8x8xf32>
    %cst_140 = arith.constant dense<0.000000e+00> : vector<8xf32>
    %416 = vector.multi_reduction <add>, %415, %cst_140 [1] : vector<8x8xf32> to vector<8xf32>
    %417 = vector.shape_cast %416 : vector<8xf32> to vector<8x1xf32>
    %418 = vector.broadcast %417 : vector<8x1xf32> to vector<8x8xf32>
    %419 = arith.divf %415, %418 : vector<8x8xf32>
    %cst_141 = arith.constant dense<0.000000e+00> : vector<8x8xf32>
    %420 = tpu.matmul %419, %406, %cst_141 {dimension_numbers = #tpu.dot_dimension_numbers<[1], [0], [0], [1], [0, 0, 1, 1], [], []>} : vector<8x8xf32>, vector<8x8xf32>, vector<8x8xf32> -> vector<8x8xf32>
    %421 = vector.extract_strided_slice %276 {offsets = [16, 0], sizes = [8, 32], strides = [1, 1]} : vector<32x32xf32> to vector<8x32xf32>
    %cst_142 = arith.constant dense<0.000000e+00> : vector<8x32xf32>
    %422 = tpu.matmul %420, %421, %cst_142 {dimension_numbers = #tpu.dot_dimension_numbers<[1], [0], [0], [1], [0, 0, 1, 1], [], []>} : vector<8x8xf32>, vector<8x32xf32>, vector<8x32xf32> -> vector<8x32xf32>
    %423 = arith.addf %403, %422 : vector<8x32xf32>
    %424 = vector.extract_strided_slice %361 {offsets = [0, 24], sizes = [8, 8], strides = [1, 1]} : vector<8x96xf32> to vector<8x8xf32>
    %425 = vector.extract_strided_slice %362 {offsets = [0, 56], sizes = [8, 8], strides = [1, 1]} : vector<8x96xf32> to vector<8x8xf32>
    %426 = vector.extract_strided_slice %362 {offsets = [0, 88], sizes = [8, 8], strides = [1, 1]} : vector<8x96xf32> to vector<8x8xf32>
    %cst_143 = arith.constant dense<0.000000e+00> : vector<8x8xf32>
    %427 = tpu.matmul %424, %425, %cst_143 {dimension_numbers = #tpu.dot_dimension_numbers<[1], [1], [0], [0], [0, 0, 1, 0], [], []>} : vector<8x8xf32>, vector<8x8xf32>, vector<8x8xf32> -> vector<8x8xf32>
    %cst_144 = arith.constant 0.353553385 : f32
    %428 = vector.broadcast %cst_144 : f32 to vector<8x8xf32>
    %429 = arith.mulf %427, %428 : vector<8x8xf32>
    %430 = arith.addf %429, %364 : vector<8x8xf32>
    %cst_145 = arith.constant dense<0xFF800000> : vector<8xf32>
    %431 = vector.multi_reduction <maximumf>, %430, %cst_145 [1] : vector<8x8xf32> to vector<8xf32>
    %432 = vector.shape_cast %431 : vector<8xf32> to vector<8x1xf32>
    %433 = vector.broadcast %432 : vector<8x1xf32> to vector<8x8xf32>
    %434 = arith.subf %430, %433 : vector<8x8xf32>
    %435 = math.exp %434 : vector<8x8xf32>
    %cst_146 = arith.constant dense<0.000000e+00> : vector<8xf32>
    %436 = vector.multi_reduction <add>, %435, %cst_146 [1] : vector<8x8xf32> to vector<8xf32>
    %437 = vector.shape_cast %436 : vector<8xf32> to vector<8x1xf32>
    %438 = vector.broadcast %437 : vector<8x1xf32> to vector<8x8xf32>
    %439 = arith.divf %435, %438 : vector<8x8xf32>
    %cst_147 = arith.constant dense<0.000000e+00> : vector<8x8xf32>
    %440 = tpu.matmul %439, %426, %cst_147 {dimension_numbers = #tpu.dot_dimension_numbers<[1], [0], [0], [1], [0, 0, 1, 1], [], []>} : vector<8x8xf32>, vector<8x8xf32>, vector<8x8xf32> -> vector<8x8xf32>
    %441 = vector.extract_strided_slice %276 {offsets = [24, 0], sizes = [8, 32], strides = [1, 1]} : vector<32x32xf32> to vector<8x32xf32>
    %cst_148 = arith.constant dense<0.000000e+00> : vector<8x32xf32>
    %442 = tpu.matmul %440, %441, %cst_148 {dimension_numbers = #tpu.dot_dimension_numbers<[1], [0], [0], [1], [0, 0, 1, 1], [], []>} : vector<8x8xf32>, vector<8x32xf32>, vector<8x32xf32> -> vector<8x32xf32>
    %443 = arith.addf %423, %442 : vector<8x32xf32>
    %444 = tpu.concatenate %360, %443 in 0 : vector<8x32xf32>, vector<8x32xf32> -> vector<16x32xf32>
    %445 = vector.broadcast %277 : vector<1x32xf32> to vector<16x32xf32>
    %446 = arith.addf %444, %445 : vector<16x32xf32>
    %447 = arith.addf %244, %446 : vector<16x32xf32>
    %448 = vector.extract_strided_slice %246 {offsets = [4, 0], sizes = [1, 32], strides = [1, 1]} : vector<8x96xf32> to vector<1x32xf32>
    %449 = vector.extract_strided_slice %246 {offsets = [5, 0], sizes = [1, 32], strides = [1, 1]} : vector<8x96xf32> to vector<1x32xf32>
    %cst_149 = arith.constant dense<0.000000e+00> : vector<16xf32>
    %450 = vector.multi_reduction <add>, %447, %cst_149 [1] : vector<16x32xf32> to vector<16xf32>
    %451 = vector.shape_cast %450 : vector<16xf32> to vector<16x1xf32>
    %cst_150 = arith.constant 3.200000e+01 : f32
    %452 = vector.broadcast %cst_150 : f32 to vector<16x1xf32>
    %453 = arith.divf %451, %452 : vector<16x1xf32>
    %454 = vector.broadcast %453 : vector<16x1xf32> to vector<16x32xf32>
    %455 = arith.subf %447, %454 : vector<16x32xf32>
    %456 = arith.mulf %455, %455 : vector<16x32xf32>
    %cst_151 = arith.constant dense<0.000000e+00> : vector<16xf32>
    %457 = vector.multi_reduction <add>, %456, %cst_151 [1] : vector<16x32xf32> to vector<16xf32>
    %458 = vector.shape_cast %457 : vector<16xf32> to vector<16x1xf32>
    %cst_152 = arith.constant 3.100000e+01 : f32
    %459 = vector.broadcast %cst_152 : f32 to vector<16x1xf32>
    %460 = arith.divf %458, %459 : vector<16x1xf32>
    %461 = vector.broadcast %448 : vector<1x32xf32> to vector<16x32xf32>
    %462 = arith.mulf %461, %455 : vector<16x32xf32>
    %463 = math.sqrt %460 : vector<16x1xf32>
    %cst_153 = arith.constant 9.99999997E-7 : f32
    %464 = vector.broadcast %cst_153 : f32 to vector<16x1xf32>
    %465 = arith.addf %463, %464 : vector<16x1xf32>
    %466 = vector.broadcast %465 : vector<16x1xf32> to vector<16x32xf32>
    %467 = arith.divf %462, %466 : vector<16x32xf32>
    %468 = vector.broadcast %449 : vector<1x32xf32> to vector<16x32xf32>
    %469 = arith.addf %467, %468 : vector<16x32xf32>
    %c1_154 = arith.constant 1 : index
    %c0_155 = arith.constant 0 : index
    %c0_156 = arith.constant 0 : index
    %470 = vector.load %arg8[%c1_154, %c0_155, %c0_156] : memref<2x32x64xf32, #tpu.memory_space<vmem>>, vector<1x32x64xf32>
    %471 = vector.shape_cast %470 : vector<1x32x64xf32> to vector<32x64xf32>
    %cst_157 = arith.constant dense<0.000000e+00> : vector<16x64xf32>
    %472 = tpu.matmul %469, %471, %cst_157 {dimension_numbers = #tpu.dot_dimension_numbers<[1], [0], [0], [1], [0, 0, 1, 1], [], []>} : vector<16x32xf32>, vector<32x64xf32>, vector<16x64xf32> -> vector<16x64xf32>
    %473 = vector.extract_strided_slice %246 {offsets = [6, 0], sizes = [1, 64], strides = [1, 1]} : vector<8x96xf32> to vector<1x64xf32>
    %474 = vector.broadcast %473 : vector<1x64xf32> to vector<16x64xf32>
    %475 = arith.addf %472, %474 : vector<16x64xf32>
    %cst_158 = arith.constant 0.000000e+00 : f32
    %476 = vector.broadcast %cst_158 : f32 to vector<16x64xf32>
    %477 = arith.maximumf %475, %476 : vector<16x64xf32>
    %c1_159 = arith.constant 1 : index
    %c0_160 = arith.constant 0 : index
    %c0_161 = arith.constant 0 : index
    %478 = vector.load %arg9[%c1_159, %c0_160, %c0_161] : memref<2x64x32xf32, #tpu.memory_space<vmem>>, vector<1x64x32xf32>
    %479 = vector.shape_cast %478 : vector<1x64x32xf32> to vector<64x32xf32>
    %cst_162 = arith.constant dense<0.000000e+00> : vector<16x32xf32>
    %480 = tpu.matmul %477, %479, %cst_162 {dimension_numbers = #tpu.dot_dimension_numbers<[1], [0], [0], [1], [0, 0, 1, 1], [], []>} : vector<16x64xf32>, vector<64x32xf32>, vector<16x32xf32> -> vector<16x32xf32>
    %481 = arith.addf %447, %480 : vector<16x32xf32>
    %482 = vector.extract_strided_slice %246 {offsets = [7, 0], sizes = [1, 32], strides = [1, 1]} : vector<8x96xf32> to vector<1x32xf32>
    %483 = vector.broadcast %482 : vector<1x32xf32> to vector<16x32xf32>
    %484 = arith.addf %481, %483 : vector<16x32xf32>
    %c0_163 = arith.constant 0 : index
    %c0_164 = arith.constant 0 : index
    %485 = vector.load %arg19[%c0_163, %c0_164] : memref<4x32xf32, #tpu.memory_space<vmem>>, vector<1x32xf32>
    %c1_165 = arith.constant 1 : index
    %c0_166 = arith.constant 0 : index
    %486 = vector.load %arg19[%c1_165, %c0_166] : memref<4x32xf32, #tpu.memory_space<vmem>>, vector<1x32xf32>
    %cst_167 = arith.constant dense<0.000000e+00> : vector<16xf32>
    %487 = vector.multi_reduction <add>, %484, %cst_167 [1] : vector<16x32xf32> to vector<16xf32>
    %488 = vector.shape_cast %487 : vector<16xf32> to vector<16x1xf32>
    %cst_168 = arith.constant 3.200000e+01 : f32
    %489 = vector.broadcast %cst_168 : f32 to vector<16x1xf32>
    %490 = arith.divf %488, %489 : vector<16x1xf32>
    %491 = vector.broadcast %490 : vector<16x1xf32> to vector<16x32xf32>
    %492 = arith.subf %484, %491 : vector<16x32xf32>
    %493 = arith.mulf %492, %492 : vector<16x32xf32>
    %cst_169 = arith.constant dense<0.000000e+00> : vector<16xf32>
    %494 = vector.multi_reduction <add>, %493, %cst_169 [1] : vector<16x32xf32> to vector<16xf32>
    %495 = vector.shape_cast %494 : vector<16xf32> to vector<16x1xf32>
    %cst_170 = arith.constant 3.100000e+01 : f32
    %496 = vector.broadcast %cst_170 : f32 to vector<16x1xf32>
    %497 = arith.divf %495, %496 : vector<16x1xf32>
    %498 = vector.broadcast %485 : vector<1x32xf32> to vector<16x32xf32>
    %499 = arith.mulf %498, %492 : vector<16x32xf32>
    %500 = math.sqrt %497 : vector<16x1xf32>
    %cst_171 = arith.constant 9.99999997E-7 : f32
    %501 = vector.broadcast %cst_171 : f32 to vector<16x1xf32>
    %502 = arith.addf %500, %501 : vector<16x1xf32>
    %503 = vector.broadcast %502 : vector<16x1xf32> to vector<16x32xf32>
    %504 = arith.divf %499, %503 : vector<16x32xf32>
    %505 = vector.broadcast %486 : vector<1x32xf32> to vector<16x32xf32>
    %506 = arith.addf %504, %505 : vector<16x32xf32>
    %c0_172 = arith.constant 0 : index
    %c0_173 = arith.constant 0 : index
    %c0_174 = arith.constant 0 : index
    %507 = vector.load %arg2[%c0_172, %c0_173, %c0_174] : memref<2x8x32xf32, #tpu.memory_space<vmem>>, vector<2x8x32xf32>
    %508 = vector.shape_cast %507 : vector<2x8x32xf32> to vector<16x32xf32>
    %c0_175 = arith.constant 0 : index
    %c0_176 = arith.constant 0 : index
    %c0_177 = arith.constant 0 : index
    %509 = vector.load %arg18[%c0_175, %c0_176, %c0_177] : memref<2x16x96xf32, #tpu.memory_space<vmem>>, vector<1x16x96xf32>
    %510 = vector.shape_cast %509 : vector<1x16x96xf32> to vector<16x96xf32>
    %511 = vector.extract_strided_slice %510 {offsets = [1, 0], sizes = [1, 32], strides = [1, 1]} : vector<16x96xf32> to vector<1x32xf32>
    %512 = vector.extract_strided_slice %510 {offsets = [2, 0], sizes = [1, 32], strides = [1, 1]} : vector<16x96xf32> to vector<1x32xf32>
    %cst_178 = arith.constant dense<0.000000e+00> : vector<16xf32>
    %513 = vector.multi_reduction <add>, %508, %cst_178 [1] : vector<16x32xf32> to vector<16xf32>
    %514 = vector.shape_cast %513 : vector<16xf32> to vector<16x1xf32>
    %cst_179 = arith.constant 3.200000e+01 : f32
    %515 = vector.broadcast %cst_179 : f32 to vector<16x1xf32>
    %516 = arith.divf %514, %515 : vector<16x1xf32>
    %517 = vector.broadcast %516 : vector<16x1xf32> to vector<16x32xf32>
    %518 = arith.subf %508, %517 : vector<16x32xf32>
    %519 = arith.mulf %518, %518 : vector<16x32xf32>
    %cst_180 = arith.constant dense<0.000000e+00> : vector<16xf32>
    %520 = vector.multi_reduction <add>, %519, %cst_180 [1] : vector<16x32xf32> to vector<16xf32>
    %521 = vector.shape_cast %520 : vector<16xf32> to vector<16x1xf32>
    %cst_181 = arith.constant 3.100000e+01 : f32
    %522 = vector.broadcast %cst_181 : f32 to vector<16x1xf32>
    %523 = arith.divf %521, %522 : vector<16x1xf32>
    %524 = vector.broadcast %511 : vector<1x32xf32> to vector<16x32xf32>
    %525 = arith.mulf %524, %518 : vector<16x32xf32>
    %526 = math.sqrt %523 : vector<16x1xf32>
    %cst_182 = arith.constant 9.99999997E-7 : f32
    %527 = vector.broadcast %cst_182 : f32 to vector<16x1xf32>
    %528 = arith.addf %526, %527 : vector<16x1xf32>
    %529 = vector.broadcast %528 : vector<16x1xf32> to vector<16x32xf32>
    %530 = arith.divf %525, %529 : vector<16x32xf32>
    %531 = vector.broadcast %512 : vector<1x32xf32> to vector<16x32xf32>
    %532 = arith.addf %530, %531 : vector<16x32xf32>
    %c0_183 = arith.constant 0 : index
    %c0_184 = arith.constant 0 : index
    %c0_185 = arith.constant 0 : index
    %533 = vector.load %arg11[%c0_183, %c0_184, %c0_185] : memref<2x32x96xf32, #tpu.memory_space<vmem>>, vector<1x32x96xf32>
    %534 = vector.shape_cast %533 : vector<1x32x96xf32> to vector<32x96xf32>
    %cst_186 = arith.constant dense<0.000000e+00> : vector<16x96xf32>
    %535 = tpu.matmul %532, %534, %cst_186 {dimension_numbers = #tpu.dot_dimension_numbers<[1], [0], [0], [1], [0, 0, 1, 1], [], []>} : vector<16x32xf32>, vector<32x96xf32>, vector<16x96xf32> -> vector<16x96xf32>
    %536 = vector.extract_strided_slice %510 {offsets = [0, 0], sizes = [1, 96], strides = [1, 1]} : vector<16x96xf32> to vector<1x96xf32>
    %537 = vector.broadcast %536 : vector<1x96xf32> to vector<16x96xf32>
    %538 = arith.addf %535, %537 : vector<16x96xf32>
    %c0_187 = arith.constant 0 : index
    %c0_188 = arith.constant 0 : index
    %c0_189 = arith.constant 0 : index
    %539 = vector.load %arg12[%c0_187, %c0_188, %c0_189] : memref<2x32x32xf32, #tpu.memory_space<vmem>>, vector<1x32x32xf32>
    %540 = vector.shape_cast %539 : vector<1x32x32xf32> to vector<32x32xf32>
    %541 = vector.extract_strided_slice %510 {offsets = [3, 0], sizes = [1, 32], strides = [1, 1]} : vector<16x96xf32> to vector<1x32xf32>
    %542 = vector.extract_strided_slice %538 {offsets = [0, 0], sizes = [8, 96], strides = [1, 1]} : vector<16x96xf32> to vector<8x96xf32>
    %543 = vector.extract_strided_slice %538 {offsets = [0, 0], sizes = [8, 96], strides = [1, 1]} : vector<16x96xf32> to vector<8x96xf32>
    %544 = vector.extract_strided_slice %1 {offsets = [0, 0, 0], sizes = [1, 8, 8], strides = [1, 1, 1]} : vector<2x8x8xf32> to vector<1x8x8xf32>
    %545 = vector.shape_cast %544 : vector<1x8x8xf32> to vector<8x8xf32>
    %546 = vector.extract_strided_slice %542 {offsets = [0, 0], sizes = [8, 8], strides = [1, 1]} : vector<8x96xf32> to vector<8x8xf32>
    %547 = vector.extract_strided_slice %543 {offsets = [0, 32], sizes = [8, 8], strides = [1, 1]} : vector<8x96xf32> to vector<8x8xf32>
    %548 = vector.extract_strided_slice %543 {offsets = [0, 64], sizes = [8, 8], strides = [1, 1]} : vector<8x96xf32> to vector<8x8xf32>
    %cst_190 = arith.constant dense<0.000000e+00> : vector<8x8xf32>
    %549 = tpu.matmul %546, %547, %cst_190 {dimension_numbers = #tpu.dot_dimension_numbers<[1], [1], [0], [0], [0, 0, 1, 0], [], []>} : vector<8x8xf32>, vector<8x8xf32>, vector<8x8xf32> -> vector<8x8xf32>
    %cst_191 = arith.constant 0.353553385 : f32
    %550 = vector.broadcast %cst_191 : f32 to vector<8x8xf32>
    %551 = arith.mulf %549, %550 : vector<8x8xf32>
    %552 = arith.addf %551, %545 : vector<8x8xf32>
    %cst_192 = arith.constant dense<0xFF800000> : vector<8xf32>
    %553 = vector.multi_reduction <maximumf>, %552, %cst_192 [1] : vector<8x8xf32> to vector<8xf32>
    %554 = vector.shape_cast %553 : vector<8xf32> to vector<8x1xf32>
    %555 = vector.broadcast %554 : vector<8x1xf32> to vector<8x8xf32>
    %556 = arith.subf %552, %555 : vector<8x8xf32>
    %557 = math.exp %556 : vector<8x8xf32>
    %cst_193 = arith.constant dense<0.000000e+00> : vector<8xf32>
    %558 = vector.multi_reduction <add>, %557, %cst_193 [1] : vector<8x8xf32> to vector<8xf32>
    %559 = vector.shape_cast %558 : vector<8xf32> to vector<8x1xf32>
    %560 = vector.broadcast %559 : vector<8x1xf32> to vector<8x8xf32>
    %561 = arith.divf %557, %560 : vector<8x8xf32>
    %cst_194 = arith.constant dense<0.000000e+00> : vector<8x8xf32>
    %562 = tpu.matmul %561, %548, %cst_194 {dimension_numbers = #tpu.dot_dimension_numbers<[1], [0], [0], [1], [0, 0, 1, 1], [], []>} : vector<8x8xf32>, vector<8x8xf32>, vector<8x8xf32> -> vector<8x8xf32>
    %563 = vector.extract_strided_slice %540 {offsets = [0, 0], sizes = [8, 32], strides = [1, 1]} : vector<32x32xf32> to vector<8x32xf32>
    %cst_195 = arith.constant dense<0.000000e+00> : vector<8x32xf32>
    %564 = tpu.matmul %562, %563, %cst_195 {dimension_numbers = #tpu.dot_dimension_numbers<[1], [0], [0], [1], [0, 0, 1, 1], [], []>} : vector<8x8xf32>, vector<8x32xf32>, vector<8x32xf32> -> vector<8x32xf32>
    %565 = vector.extract_strided_slice %542 {offsets = [0, 8], sizes = [8, 8], strides = [1, 1]} : vector<8x96xf32> to vector<8x8xf32>
    %566 = vector.extract_strided_slice %543 {offsets = [0, 40], sizes = [8, 8], strides = [1, 1]} : vector<8x96xf32> to vector<8x8xf32>
    %567 = vector.extract_strided_slice %543 {offsets = [0, 72], sizes = [8, 8], strides = [1, 1]} : vector<8x96xf32> to vector<8x8xf32>
    %cst_196 = arith.constant dense<0.000000e+00> : vector<8x8xf32>
    %568 = tpu.matmul %565, %566, %cst_196 {dimension_numbers = #tpu.dot_dimension_numbers<[1], [1], [0], [0], [0, 0, 1, 0], [], []>} : vector<8x8xf32>, vector<8x8xf32>, vector<8x8xf32> -> vector<8x8xf32>
    %cst_197 = arith.constant 0.353553385 : f32
    %569 = vector.broadcast %cst_197 : f32 to vector<8x8xf32>
    %570 = arith.mulf %568, %569 : vector<8x8xf32>
    %571 = arith.addf %570, %545 : vector<8x8xf32>
    %cst_198 = arith.constant dense<0xFF800000> : vector<8xf32>
    %572 = vector.multi_reduction <maximumf>, %571, %cst_198 [1] : vector<8x8xf32> to vector<8xf32>
    %573 = vector.shape_cast %572 : vector<8xf32> to vector<8x1xf32>
    %574 = vector.broadcast %573 : vector<8x1xf32> to vector<8x8xf32>
    %575 = arith.subf %571, %574 : vector<8x8xf32>
    %576 = math.exp %575 : vector<8x8xf32>
    %cst_199 = arith.constant dense<0.000000e+00> : vector<8xf32>
    %577 = vector.multi_reduction <add>, %576, %cst_199 [1] : vector<8x8xf32> to vector<8xf32>
    %578 = vector.shape_cast %577 : vector<8xf32> to vector<8x1xf32>
    %579 = vector.broadcast %578 : vector<8x1xf32> to vector<8x8xf32>
    %580 = arith.divf %576, %579 : vector<8x8xf32>
    %cst_200 = arith.constant dense<0.000000e+00> : vector<8x8xf32>
    %581 = tpu.matmul %580, %567, %cst_200 {dimension_numbers = #tpu.dot_dimension_numbers<[1], [0], [0], [1], [0, 0, 1, 1], [], []>} : vector<8x8xf32>, vector<8x8xf32>, vector<8x8xf32> -> vector<8x8xf32>
    %582 = vector.extract_strided_slice %540 {offsets = [8, 0], sizes = [8, 32], strides = [1, 1]} : vector<32x32xf32> to vector<8x32xf32>
    %cst_201 = arith.constant dense<0.000000e+00> : vector<8x32xf32>
    %583 = tpu.matmul %581, %582, %cst_201 {dimension_numbers = #tpu.dot_dimension_numbers<[1], [0], [0], [1], [0, 0, 1, 1], [], []>} : vector<8x8xf32>, vector<8x32xf32>, vector<8x32xf32> -> vector<8x32xf32>
    %584 = arith.addf %564, %583 : vector<8x32xf32>
    %585 = vector.extract_strided_slice %542 {offsets = [0, 16], sizes = [8, 8], strides = [1, 1]} : vector<8x96xf32> to vector<8x8xf32>
    %586 = vector.extract_strided_slice %543 {offsets = [0, 48], sizes = [8, 8], strides = [1, 1]} : vector<8x96xf32> to vector<8x8xf32>
    %587 = vector.extract_strided_slice %543 {offsets = [0, 80], sizes = [8, 8], strides = [1, 1]} : vector<8x96xf32> to vector<8x8xf32>
    %cst_202 = arith.constant dense<0.000000e+00> : vector<8x8xf32>
    %588 = tpu.matmul %585, %586, %cst_202 {dimension_numbers = #tpu.dot_dimension_numbers<[1], [1], [0], [0], [0, 0, 1, 0], [], []>} : vector<8x8xf32>, vector<8x8xf32>, vector<8x8xf32> -> vector<8x8xf32>
    %cst_203 = arith.constant 0.353553385 : f32
    %589 = vector.broadcast %cst_203 : f32 to vector<8x8xf32>
    %590 = arith.mulf %588, %589 : vector<8x8xf32>
    %591 = arith.addf %590, %545 : vector<8x8xf32>
    %cst_204 = arith.constant dense<0xFF800000> : vector<8xf32>
    %592 = vector.multi_reduction <maximumf>, %591, %cst_204 [1] : vector<8x8xf32> to vector<8xf32>
    %593 = vector.shape_cast %592 : vector<8xf32> to vector<8x1xf32>
    %594 = vector.broadcast %593 : vector<8x1xf32> to vector<8x8xf32>
    %595 = arith.subf %591, %594 : vector<8x8xf32>
    %596 = math.exp %595 : vector<8x8xf32>
    %cst_205 = arith.constant dense<0.000000e+00> : vector<8xf32>
    %597 = vector.multi_reduction <add>, %596, %cst_205 [1] : vector<8x8xf32> to vector<8xf32>
    %598 = vector.shape_cast %597 : vector<8xf32> to vector<8x1xf32>
    %599 = vector.broadcast %598 : vector<8x1xf32> to vector<8x8xf32>
    %600 = arith.divf %596, %599 : vector<8x8xf32>
    %cst_206 = arith.constant dense<0.000000e+00> : vector<8x8xf32>
    %601 = tpu.matmul %600, %587, %cst_206 {dimension_numbers = #tpu.dot_dimension_numbers<[1], [0], [0], [1], [0, 0, 1, 1], [], []>} : vector<8x8xf32>, vector<8x8xf32>, vector<8x8xf32> -> vector<8x8xf32>
    %602 = vector.extract_strided_slice %540 {offsets = [16, 0], sizes = [8, 32], strides = [1, 1]} : vector<32x32xf32> to vector<8x32xf32>
    %cst_207 = arith.constant dense<0.000000e+00> : vector<8x32xf32>
    %603 = tpu.matmul %601, %602, %cst_207 {dimension_numbers = #tpu.dot_dimension_numbers<[1], [0], [0], [1], [0, 0, 1, 1], [], []>} : vector<8x8xf32>, vector<8x32xf32>, vector<8x32xf32> -> vector<8x32xf32>
    %604 = arith.addf %584, %603 : vector<8x32xf32>
    %605 = vector.extract_strided_slice %542 {offsets = [0, 24], sizes = [8, 8], strides = [1, 1]} : vector<8x96xf32> to vector<8x8xf32>
    %606 = vector.extract_strided_slice %543 {offsets = [0, 56], sizes = [8, 8], strides = [1, 1]} : vector<8x96xf32> to vector<8x8xf32>
    %607 = vector.extract_strided_slice %543 {offsets = [0, 88], sizes = [8, 8], strides = [1, 1]} : vector<8x96xf32> to vector<8x8xf32>
    %cst_208 = arith.constant dense<0.000000e+00> : vector<8x8xf32>
    %608 = tpu.matmul %605, %606, %cst_208 {dimension_numbers = #tpu.dot_dimension_numbers<[1], [1], [0], [0], [0, 0, 1, 0], [], []>} : vector<8x8xf32>, vector<8x8xf32>, vector<8x8xf32> -> vector<8x8xf32>
    %cst_209 = arith.constant 0.353553385 : f32
    %609 = vector.broadcast %cst_209 : f32 to vector<8x8xf32>
    %610 = arith.mulf %608, %609 : vector<8x8xf32>
    %611 = arith.addf %610, %545 : vector<8x8xf32>
    %cst_210 = arith.constant dense<0xFF800000> : vector<8xf32>
    %612 = vector.multi_reduction <maximumf>, %611, %cst_210 [1] : vector<8x8xf32> to vector<8xf32>
    %613 = vector.shape_cast %612 : vector<8xf32> to vector<8x1xf32>
    %614 = vector.broadcast %613 : vector<8x1xf32> to vector<8x8xf32>
    %615 = arith.subf %611, %614 : vector<8x8xf32>
    %616 = math.exp %615 : vector<8x8xf32>
    %cst_211 = arith.constant dense<0.000000e+00> : vector<8xf32>
    %617 = vector.multi_reduction <add>, %616, %cst_211 [1] : vector<8x8xf32> to vector<8xf32>
    %618 = vector.shape_cast %617 : vector<8xf32> to vector<8x1xf32>
    %619 = vector.broadcast %618 : vector<8x1xf32> to vector<8x8xf32>
    %620 = arith.divf %616, %619 : vector<8x8xf32>
    %cst_212 = arith.constant dense<0.000000e+00> : vector<8x8xf32>
    %621 = tpu.matmul %620, %607, %cst_212 {dimension_numbers = #tpu.dot_dimension_numbers<[1], [0], [0], [1], [0, 0, 1, 1], [], []>} : vector<8x8xf32>, vector<8x8xf32>, vector<8x8xf32> -> vector<8x8xf32>
    %622 = vector.extract_strided_slice %540 {offsets = [24, 0], sizes = [8, 32], strides = [1, 1]} : vector<32x32xf32> to vector<8x32xf32>
    %cst_213 = arith.constant dense<0.000000e+00> : vector<8x32xf32>
    %623 = tpu.matmul %621, %622, %cst_213 {dimension_numbers = #tpu.dot_dimension_numbers<[1], [0], [0], [1], [0, 0, 1, 1], [], []>} : vector<8x8xf32>, vector<8x32xf32>, vector<8x32xf32> -> vector<8x32xf32>
    %624 = arith.addf %604, %623 : vector<8x32xf32>
    %625 = vector.extract_strided_slice %538 {offsets = [8, 0], sizes = [8, 96], strides = [1, 1]} : vector<16x96xf32> to vector<8x96xf32>
    %626 = vector.extract_strided_slice %538 {offsets = [8, 0], sizes = [8, 96], strides = [1, 1]} : vector<16x96xf32> to vector<8x96xf32>
    %627 = vector.extract_strided_slice %1 {offsets = [1, 0, 0], sizes = [1, 8, 8], strides = [1, 1, 1]} : vector<2x8x8xf32> to vector<1x8x8xf32>
    %628 = vector.shape_cast %627 : vector<1x8x8xf32> to vector<8x8xf32>
    %629 = vector.extract_strided_slice %625 {offsets = [0, 0], sizes = [8, 8], strides = [1, 1]} : vector<8x96xf32> to vector<8x8xf32>
    %630 = vector.extract_strided_slice %626 {offsets = [0, 32], sizes = [8, 8], strides = [1, 1]} : vector<8x96xf32> to vector<8x8xf32>
    %631 = vector.extract_strided_slice %626 {offsets = [0, 64], sizes = [8, 8], strides = [1, 1]} : vector<8x96xf32> to vector<8x8xf32>
    %cst_214 = arith.constant dense<0.000000e+00> : vector<8x8xf32>
    %632 = tpu.matmul %629, %630, %cst_214 {dimension_numbers = #tpu.dot_dimension_numbers<[1], [1], [0], [0], [0, 0, 1, 0], [], []>} : vector<8x8xf32>, vector<8x8xf32>, vector<8x8xf32> -> vector<8x8xf32>
    %cst_215 = arith.constant 0.353553385 : f32
    %633 = vector.broadcast %cst_215 : f32 to vector<8x8xf32>
    %634 = arith.mulf %632, %633 : vector<8x8xf32>
    %635 = arith.addf %634, %628 : vector<8x8xf32>
    %cst_216 = arith.constant dense<0xFF800000> : vector<8xf32>
    %636 = vector.multi_reduction <maximumf>, %635, %cst_216 [1] : vector<8x8xf32> to vector<8xf32>
    %637 = vector.shape_cast %636 : vector<8xf32> to vector<8x1xf32>
    %638 = vector.broadcast %637 : vector<8x1xf32> to vector<8x8xf32>
    %639 = arith.subf %635, %638 : vector<8x8xf32>
    %640 = math.exp %639 : vector<8x8xf32>
    %cst_217 = arith.constant dense<0.000000e+00> : vector<8xf32>
    %641 = vector.multi_reduction <add>, %640, %cst_217 [1] : vector<8x8xf32> to vector<8xf32>
    %642 = vector.shape_cast %641 : vector<8xf32> to vector<8x1xf32>
    %643 = vector.broadcast %642 : vector<8x1xf32> to vector<8x8xf32>
    %644 = arith.divf %640, %643 : vector<8x8xf32>
    %cst_218 = arith.constant dense<0.000000e+00> : vector<8x8xf32>
    %645 = tpu.matmul %644, %631, %cst_218 {dimension_numbers = #tpu.dot_dimension_numbers<[1], [0], [0], [1], [0, 0, 1, 1], [], []>} : vector<8x8xf32>, vector<8x8xf32>, vector<8x8xf32> -> vector<8x8xf32>
    %646 = vector.extract_strided_slice %540 {offsets = [0, 0], sizes = [8, 32], strides = [1, 1]} : vector<32x32xf32> to vector<8x32xf32>
    %cst_219 = arith.constant dense<0.000000e+00> : vector<8x32xf32>
    %647 = tpu.matmul %645, %646, %cst_219 {dimension_numbers = #tpu.dot_dimension_numbers<[1], [0], [0], [1], [0, 0, 1, 1], [], []>} : vector<8x8xf32>, vector<8x32xf32>, vector<8x32xf32> -> vector<8x32xf32>
    %648 = vector.extract_strided_slice %625 {offsets = [0, 8], sizes = [8, 8], strides = [1, 1]} : vector<8x96xf32> to vector<8x8xf32>
    %649 = vector.extract_strided_slice %626 {offsets = [0, 40], sizes = [8, 8], strides = [1, 1]} : vector<8x96xf32> to vector<8x8xf32>
    %650 = vector.extract_strided_slice %626 {offsets = [0, 72], sizes = [8, 8], strides = [1, 1]} : vector<8x96xf32> to vector<8x8xf32>
    %cst_220 = arith.constant dense<0.000000e+00> : vector<8x8xf32>
    %651 = tpu.matmul %648, %649, %cst_220 {dimension_numbers = #tpu.dot_dimension_numbers<[1], [1], [0], [0], [0, 0, 1, 0], [], []>} : vector<8x8xf32>, vector<8x8xf32>, vector<8x8xf32> -> vector<8x8xf32>
    %cst_221 = arith.constant 0.353553385 : f32
    %652 = vector.broadcast %cst_221 : f32 to vector<8x8xf32>
    %653 = arith.mulf %651, %652 : vector<8x8xf32>
    %654 = arith.addf %653, %628 : vector<8x8xf32>
    %cst_222 = arith.constant dense<0xFF800000> : vector<8xf32>
    %655 = vector.multi_reduction <maximumf>, %654, %cst_222 [1] : vector<8x8xf32> to vector<8xf32>
    %656 = vector.shape_cast %655 : vector<8xf32> to vector<8x1xf32>
    %657 = vector.broadcast %656 : vector<8x1xf32> to vector<8x8xf32>
    %658 = arith.subf %654, %657 : vector<8x8xf32>
    %659 = math.exp %658 : vector<8x8xf32>
    %cst_223 = arith.constant dense<0.000000e+00> : vector<8xf32>
    %660 = vector.multi_reduction <add>, %659, %cst_223 [1] : vector<8x8xf32> to vector<8xf32>
    %661 = vector.shape_cast %660 : vector<8xf32> to vector<8x1xf32>
    %662 = vector.broadcast %661 : vector<8x1xf32> to vector<8x8xf32>
    %663 = arith.divf %659, %662 : vector<8x8xf32>
    %cst_224 = arith.constant dense<0.000000e+00> : vector<8x8xf32>
    %664 = tpu.matmul %663, %650, %cst_224 {dimension_numbers = #tpu.dot_dimension_numbers<[1], [0], [0], [1], [0, 0, 1, 1], [], []>} : vector<8x8xf32>, vector<8x8xf32>, vector<8x8xf32> -> vector<8x8xf32>
    %665 = vector.extract_strided_slice %540 {offsets = [8, 0], sizes = [8, 32], strides = [1, 1]} : vector<32x32xf32> to vector<8x32xf32>
    %cst_225 = arith.constant dense<0.000000e+00> : vector<8x32xf32>
    %666 = tpu.matmul %664, %665, %cst_225 {dimension_numbers = #tpu.dot_dimension_numbers<[1], [0], [0], [1], [0, 0, 1, 1], [], []>} : vector<8x8xf32>, vector<8x32xf32>, vector<8x32xf32> -> vector<8x32xf32>
    %667 = arith.addf %647, %666 : vector<8x32xf32>
    %668 = vector.extract_strided_slice %625 {offsets = [0, 16], sizes = [8, 8], strides = [1, 1]} : vector<8x96xf32> to vector<8x8xf32>
    %669 = vector.extract_strided_slice %626 {offsets = [0, 48], sizes = [8, 8], strides = [1, 1]} : vector<8x96xf32> to vector<8x8xf32>
    %670 = vector.extract_strided_slice %626 {offsets = [0, 80], sizes = [8, 8], strides = [1, 1]} : vector<8x96xf32> to vector<8x8xf32>
    %cst_226 = arith.constant dense<0.000000e+00> : vector<8x8xf32>
    %671 = tpu.matmul %668, %669, %cst_226 {dimension_numbers = #tpu.dot_dimension_numbers<[1], [1], [0], [0], [0, 0, 1, 0], [], []>} : vector<8x8xf32>, vector<8x8xf32>, vector<8x8xf32> -> vector<8x8xf32>
    %cst_227 = arith.constant 0.353553385 : f32
    %672 = vector.broadcast %cst_227 : f32 to vector<8x8xf32>
    %673 = arith.mulf %671, %672 : vector<8x8xf32>
    %674 = arith.addf %673, %628 : vector<8x8xf32>
    %cst_228 = arith.constant dense<0xFF800000> : vector<8xf32>
    %675 = vector.multi_reduction <maximumf>, %674, %cst_228 [1] : vector<8x8xf32> to vector<8xf32>
    %676 = vector.shape_cast %675 : vector<8xf32> to vector<8x1xf32>
    %677 = vector.broadcast %676 : vector<8x1xf32> to vector<8x8xf32>
    %678 = arith.subf %674, %677 : vector<8x8xf32>
    %679 = math.exp %678 : vector<8x8xf32>
    %cst_229 = arith.constant dense<0.000000e+00> : vector<8xf32>
    %680 = vector.multi_reduction <add>, %679, %cst_229 [1] : vector<8x8xf32> to vector<8xf32>
    %681 = vector.shape_cast %680 : vector<8xf32> to vector<8x1xf32>
    %682 = vector.broadcast %681 : vector<8x1xf32> to vector<8x8xf32>
    %683 = arith.divf %679, %682 : vector<8x8xf32>
    %cst_230 = arith.constant dense<0.000000e+00> : vector<8x8xf32>
    %684 = tpu.matmul %683, %670, %cst_230 {dimension_numbers = #tpu.dot_dimension_numbers<[1], [0], [0], [1], [0, 0, 1, 1], [], []>} : vector<8x8xf32>, vector<8x8xf32>, vector<8x8xf32> -> vector<8x8xf32>
    %685 = vector.extract_strided_slice %540 {offsets = [16, 0], sizes = [8, 32], strides = [1, 1]} : vector<32x32xf32> to vector<8x32xf32>
    %cst_231 = arith.constant dense<0.000000e+00> : vector<8x32xf32>
    %686 = tpu.matmul %684, %685, %cst_231 {dimension_numbers = #tpu.dot_dimension_numbers<[1], [0], [0], [1], [0, 0, 1, 1], [], []>} : vector<8x8xf32>, vector<8x32xf32>, vector<8x32xf32> -> vector<8x32xf32>
    %687 = arith.addf %667, %686 : vector<8x32xf32>
    %688 = vector.extract_strided_slice %625 {offsets = [0, 24], sizes = [8, 8], strides = [1, 1]} : vector<8x96xf32> to vector<8x8xf32>
    %689 = vector.extract_strided_slice %626 {offsets = [0, 56], sizes = [8, 8], strides = [1, 1]} : vector<8x96xf32> to vector<8x8xf32>
    %690 = vector.extract_strided_slice %626 {offsets = [0, 88], sizes = [8, 8], strides = [1, 1]} : vector<8x96xf32> to vector<8x8xf32>
    %cst_232 = arith.constant dense<0.000000e+00> : vector<8x8xf32>
    %691 = tpu.matmul %688, %689, %cst_232 {dimension_numbers = #tpu.dot_dimension_numbers<[1], [1], [0], [0], [0, 0, 1, 0], [], []>} : vector<8x8xf32>, vector<8x8xf32>, vector<8x8xf32> -> vector<8x8xf32>
    %cst_233 = arith.constant 0.353553385 : f32
    %692 = vector.broadcast %cst_233 : f32 to vector<8x8xf32>
    %693 = arith.mulf %691, %692 : vector<8x8xf32>
    %694 = arith.addf %693, %628 : vector<8x8xf32>
    %cst_234 = arith.constant dense<0xFF800000> : vector<8xf32>
    %695 = vector.multi_reduction <maximumf>, %694, %cst_234 [1] : vector<8x8xf32> to vector<8xf32>
    %696 = vector.shape_cast %695 : vector<8xf32> to vector<8x1xf32>
    %697 = vector.broadcast %696 : vector<8x1xf32> to vector<8x8xf32>
    %698 = arith.subf %694, %697 : vector<8x8xf32>
    %699 = math.exp %698 : vector<8x8xf32>
    %cst_235 = arith.constant dense<0.000000e+00> : vector<8xf32>
    %700 = vector.multi_reduction <add>, %699, %cst_235 [1] : vector<8x8xf32> to vector<8xf32>
    %701 = vector.shape_cast %700 : vector<8xf32> to vector<8x1xf32>
    %702 = vector.broadcast %701 : vector<8x1xf32> to vector<8x8xf32>
    %703 = arith.divf %699, %702 : vector<8x8xf32>
    %cst_236 = arith.constant dense<0.000000e+00> : vector<8x8xf32>
    %704 = tpu.matmul %703, %690, %cst_236 {dimension_numbers = #tpu.dot_dimension_numbers<[1], [0], [0], [1], [0, 0, 1, 1], [], []>} : vector<8x8xf32>, vector<8x8xf32>, vector<8x8xf32> -> vector<8x8xf32>
    %705 = vector.extract_strided_slice %540 {offsets = [24, 0], sizes = [8, 32], strides = [1, 1]} : vector<32x32xf32> to vector<8x32xf32>
    %cst_237 = arith.constant dense<0.000000e+00> : vector<8x32xf32>
    %706 = tpu.matmul %704, %705, %cst_237 {dimension_numbers = #tpu.dot_dimension_numbers<[1], [0], [0], [1], [0, 0, 1, 1], [], []>} : vector<8x8xf32>, vector<8x32xf32>, vector<8x32xf32> -> vector<8x32xf32>
    %707 = arith.addf %687, %706 : vector<8x32xf32>
    %708 = tpu.concatenate %624, %707 in 0 : vector<8x32xf32>, vector<8x32xf32> -> vector<16x32xf32>
    %709 = vector.broadcast %541 : vector<1x32xf32> to vector<16x32xf32>
    %710 = arith.addf %708, %709 : vector<16x32xf32>
    %711 = arith.addf %508, %710 : vector<16x32xf32>
    %712 = vector.extract_strided_slice %510 {offsets = [5, 0], sizes = [1, 32], strides = [1, 1]} : vector<16x96xf32> to vector<1x32xf32>
    %713 = vector.extract_strided_slice %510 {offsets = [6, 0], sizes = [1, 32], strides = [1, 1]} : vector<16x96xf32> to vector<1x32xf32>
    %cst_238 = arith.constant dense<0.000000e+00> : vector<16xf32>
    %714 = vector.multi_reduction <add>, %711, %cst_238 [1] : vector<16x32xf32> to vector<16xf32>
    %715 = vector.shape_cast %714 : vector<16xf32> to vector<16x1xf32>
    %cst_239 = arith.constant 3.200000e+01 : f32
    %716 = vector.broadcast %cst_239 : f32 to vector<16x1xf32>
    %717 = arith.divf %715, %716 : vector<16x1xf32>
    %718 = vector.broadcast %717 : vector<16x1xf32> to vector<16x32xf32>
    %719 = arith.subf %711, %718 : vector<16x32xf32>
    %720 = arith.mulf %719, %719 : vector<16x32xf32>
    %cst_240 = arith.constant dense<0.000000e+00> : vector<16xf32>
    %721 = vector.multi_reduction <add>, %720, %cst_240 [1] : vector<16x32xf32> to vector<16xf32>
    %722 = vector.shape_cast %721 : vector<16xf32> to vector<16x1xf32>
    %cst_241 = arith.constant 3.100000e+01 : f32
    %723 = vector.broadcast %cst_241 : f32 to vector<16x1xf32>
    %724 = arith.divf %722, %723 : vector<16x1xf32>
    %725 = vector.broadcast %712 : vector<1x32xf32> to vector<16x32xf32>
    %726 = arith.mulf %725, %719 : vector<16x32xf32>
    %727 = math.sqrt %724 : vector<16x1xf32>
    %cst_242 = arith.constant 9.99999997E-7 : f32
    %728 = vector.broadcast %cst_242 : f32 to vector<16x1xf32>
    %729 = arith.addf %727, %728 : vector<16x1xf32>
    %730 = vector.broadcast %729 : vector<16x1xf32> to vector<16x32xf32>
    %731 = arith.divf %726, %730 : vector<16x32xf32>
    %732 = vector.broadcast %713 : vector<1x32xf32> to vector<16x32xf32>
    %733 = arith.addf %731, %732 : vector<16x32xf32>
    %c0_243 = arith.constant 0 : index
    %c0_244 = arith.constant 0 : index
    %c0_245 = arith.constant 0 : index
    %734 = vector.load %arg13[%c0_243, %c0_244, %c0_245] : memref<2x32x32xf32, #tpu.memory_space<vmem>>, vector<1x32x32xf32>
    %735 = vector.shape_cast %734 : vector<1x32x32xf32> to vector<32x32xf32>
    %cst_246 = arith.constant dense<0.000000e+00> : vector<16x32xf32>
    %736 = tpu.matmul %733, %735, %cst_246 {dimension_numbers = #tpu.dot_dimension_numbers<[1], [0], [0], [1], [0, 0, 1, 1], [], []>} : vector<16x32xf32>, vector<32x32xf32>, vector<16x32xf32> -> vector<16x32xf32>
    %737 = vector.extract_strided_slice %510 {offsets = [4, 0], sizes = [1, 32], strides = [1, 1]} : vector<16x96xf32> to vector<1x32xf32>
    %738 = vector.broadcast %737 : vector<1x32xf32> to vector<16x32xf32>
    %739 = arith.addf %736, %738 : vector<16x32xf32>
    %c0_247 = arith.constant 0 : index
    %c0_248 = arith.constant 0 : index
    %c0_249 = arith.constant 0 : index
    %740 = vector.load %arg14[%c0_247, %c0_248, %c0_249] : memref<2x32x64xf32, #tpu.memory_space<vmem>>, vector<1x32x64xf32>
    %741 = vector.shape_cast %740 : vector<1x32x64xf32> to vector<32x64xf32>
    %cst_250 = arith.constant dense<0.000000e+00> : vector<16x64xf32>
    %742 = tpu.matmul %506, %741, %cst_250 {dimension_numbers = #tpu.dot_dimension_numbers<[1], [0], [0], [1], [0, 0, 1, 1], [], []>} : vector<16x32xf32>, vector<32x64xf32>, vector<16x64xf32> -> vector<16x64xf32>
    %743 = vector.extract_strided_slice %510 {offsets = [8, 0], sizes = [1, 64], strides = [1, 1]} : vector<16x96xf32> to vector<1x64xf32>
    %744 = vector.broadcast %743 : vector<1x64xf32> to vector<16x64xf32>
    %745 = arith.addf %742, %744 : vector<16x64xf32>
    %c0_251 = arith.constant 0 : index
    %c0_252 = arith.constant 0 : index
    %c0_253 = arith.constant 0 : index
    %746 = vector.load %arg15[%c0_251, %c0_252, %c0_253] : memref<2x32x32xf32, #tpu.memory_space<vmem>>, vector<1x32x32xf32>
    %747 = vector.shape_cast %746 : vector<1x32x32xf32> to vector<32x32xf32>
    %748 = vector.extract_strided_slice %510 {offsets = [7, 0], sizes = [1, 32], strides = [1, 1]} : vector<16x96xf32> to vector<1x32xf32>
    %749 = vector.extract_strided_slice %739 {offsets = [0, 0], sizes = [8, 32], strides = [1, 1]} : vector<16x32xf32> to vector<8x32xf32>
    %750 = vector.extract_strided_slice %745 {offsets = [0, 0], sizes = [8, 64], strides = [1, 1]} : vector<16x64xf32> to vector<8x64xf32>
    %751 = vector.extract_strided_slice %2 {offsets = [0, 0, 0], sizes = [1, 8, 8], strides = [1, 1, 1]} : vector<2x8x8xf32> to vector<1x8x8xf32>
    %752 = vector.shape_cast %751 : vector<1x8x8xf32> to vector<8x8xf32>
    %753 = vector.extract_strided_slice %749 {offsets = [0, 0], sizes = [8, 8], strides = [1, 1]} : vector<8x32xf32> to vector<8x8xf32>
    %754 = vector.extract_strided_slice %750 {offsets = [0, 0], sizes = [8, 8], strides = [1, 1]} : vector<8x64xf32> to vector<8x8xf32>
    %755 = vector.extract_strided_slice %750 {offsets = [0, 32], sizes = [8, 8], strides = [1, 1]} : vector<8x64xf32> to vector<8x8xf32>
    %cst_254 = arith.constant dense<0.000000e+00> : vector<8x8xf32>
    %756 = tpu.matmul %753, %754, %cst_254 {dimension_numbers = #tpu.dot_dimension_numbers<[1], [1], [0], [0], [0, 0, 1, 0], [], []>} : vector<8x8xf32>, vector<8x8xf32>, vector<8x8xf32> -> vector<8x8xf32>
    %cst_255 = arith.constant 0.353553385 : f32
    %757 = vector.broadcast %cst_255 : f32 to vector<8x8xf32>
    %758 = arith.mulf %756, %757 : vector<8x8xf32>
    %759 = arith.addf %758, %752 : vector<8x8xf32>
    %cst_256 = arith.constant dense<0xFF800000> : vector<8xf32>
    %760 = vector.multi_reduction <maximumf>, %759, %cst_256 [1] : vector<8x8xf32> to vector<8xf32>
    %761 = vector.shape_cast %760 : vector<8xf32> to vector<8x1xf32>
    %762 = vector.broadcast %761 : vector<8x1xf32> to vector<8x8xf32>
    %763 = arith.subf %759, %762 : vector<8x8xf32>
    %764 = math.exp %763 : vector<8x8xf32>
    %cst_257 = arith.constant dense<0.000000e+00> : vector<8xf32>
    %765 = vector.multi_reduction <add>, %764, %cst_257 [1] : vector<8x8xf32> to vector<8xf32>
    %766 = vector.shape_cast %765 : vector<8xf32> to vector<8x1xf32>
    %767 = vector.broadcast %766 : vector<8x1xf32> to vector<8x8xf32>
    %768 = arith.divf %764, %767 : vector<8x8xf32>
    %cst_258 = arith.constant dense<0.000000e+00> : vector<8x8xf32>
    %769 = tpu.matmul %768, %755, %cst_258 {dimension_numbers = #tpu.dot_dimension_numbers<[1], [0], [0], [1], [0, 0, 1, 1], [], []>} : vector<8x8xf32>, vector<8x8xf32>, vector<8x8xf32> -> vector<8x8xf32>
    %770 = vector.extract_strided_slice %747 {offsets = [0, 0], sizes = [8, 32], strides = [1, 1]} : vector<32x32xf32> to vector<8x32xf32>
    %cst_259 = arith.constant dense<0.000000e+00> : vector<8x32xf32>
    %771 = tpu.matmul %769, %770, %cst_259 {dimension_numbers = #tpu.dot_dimension_numbers<[1], [0], [0], [1], [0, 0, 1, 1], [], []>} : vector<8x8xf32>, vector<8x32xf32>, vector<8x32xf32> -> vector<8x32xf32>
    %772 = vector.extract_strided_slice %749 {offsets = [0, 8], sizes = [8, 8], strides = [1, 1]} : vector<8x32xf32> to vector<8x8xf32>
    %773 = vector.extract_strided_slice %750 {offsets = [0, 8], sizes = [8, 8], strides = [1, 1]} : vector<8x64xf32> to vector<8x8xf32>
    %774 = vector.extract_strided_slice %750 {offsets = [0, 40], sizes = [8, 8], strides = [1, 1]} : vector<8x64xf32> to vector<8x8xf32>
    %cst_260 = arith.constant dense<0.000000e+00> : vector<8x8xf32>
    %775 = tpu.matmul %772, %773, %cst_260 {dimension_numbers = #tpu.dot_dimension_numbers<[1], [1], [0], [0], [0, 0, 1, 0], [], []>} : vector<8x8xf32>, vector<8x8xf32>, vector<8x8xf32> -> vector<8x8xf32>
    %cst_261 = arith.constant 0.353553385 : f32
    %776 = vector.broadcast %cst_261 : f32 to vector<8x8xf32>
    %777 = arith.mulf %775, %776 : vector<8x8xf32>
    %778 = arith.addf %777, %752 : vector<8x8xf32>
    %cst_262 = arith.constant dense<0xFF800000> : vector<8xf32>
    %779 = vector.multi_reduction <maximumf>, %778, %cst_262 [1] : vector<8x8xf32> to vector<8xf32>
    %780 = vector.shape_cast %779 : vector<8xf32> to vector<8x1xf32>
    %781 = vector.broadcast %780 : vector<8x1xf32> to vector<8x8xf32>
    %782 = arith.subf %778, %781 : vector<8x8xf32>
    %783 = math.exp %782 : vector<8x8xf32>
    %cst_263 = arith.constant dense<0.000000e+00> : vector<8xf32>
    %784 = vector.multi_reduction <add>, %783, %cst_263 [1] : vector<8x8xf32> to vector<8xf32>
    %785 = vector.shape_cast %784 : vector<8xf32> to vector<8x1xf32>
    %786 = vector.broadcast %785 : vector<8x1xf32> to vector<8x8xf32>
    %787 = arith.divf %783, %786 : vector<8x8xf32>
    %cst_264 = arith.constant dense<0.000000e+00> : vector<8x8xf32>
    %788 = tpu.matmul %787, %774, %cst_264 {dimension_numbers = #tpu.dot_dimension_numbers<[1], [0], [0], [1], [0, 0, 1, 1], [], []>} : vector<8x8xf32>, vector<8x8xf32>, vector<8x8xf32> -> vector<8x8xf32>
    %789 = vector.extract_strided_slice %747 {offsets = [8, 0], sizes = [8, 32], strides = [1, 1]} : vector<32x32xf32> to vector<8x32xf32>
    %cst_265 = arith.constant dense<0.000000e+00> : vector<8x32xf32>
    %790 = tpu.matmul %788, %789, %cst_265 {dimension_numbers = #tpu.dot_dimension_numbers<[1], [0], [0], [1], [0, 0, 1, 1], [], []>} : vector<8x8xf32>, vector<8x32xf32>, vector<8x32xf32> -> vector<8x32xf32>
    %791 = arith.addf %771, %790 : vector<8x32xf32>
    %792 = vector.extract_strided_slice %749 {offsets = [0, 16], sizes = [8, 8], strides = [1, 1]} : vector<8x32xf32> to vector<8x8xf32>
    %793 = vector.extract_strided_slice %750 {offsets = [0, 16], sizes = [8, 8], strides = [1, 1]} : vector<8x64xf32> to vector<8x8xf32>
    %794 = vector.extract_strided_slice %750 {offsets = [0, 48], sizes = [8, 8], strides = [1, 1]} : vector<8x64xf32> to vector<8x8xf32>
    %cst_266 = arith.constant dense<0.000000e+00> : vector<8x8xf32>
    %795 = tpu.matmul %792, %793, %cst_266 {dimension_numbers = #tpu.dot_dimension_numbers<[1], [1], [0], [0], [0, 0, 1, 0], [], []>} : vector<8x8xf32>, vector<8x8xf32>, vector<8x8xf32> -> vector<8x8xf32>
    %cst_267 = arith.constant 0.353553385 : f32
    %796 = vector.broadcast %cst_267 : f32 to vector<8x8xf32>
    %797 = arith.mulf %795, %796 : vector<8x8xf32>
    %798 = arith.addf %797, %752 : vector<8x8xf32>
    %cst_268 = arith.constant dense<0xFF800000> : vector<8xf32>
    %799 = vector.multi_reduction <maximumf>, %798, %cst_268 [1] : vector<8x8xf32> to vector<8xf32>
    %800 = vector.shape_cast %799 : vector<8xf32> to vector<8x1xf32>
    %801 = vector.broadcast %800 : vector<8x1xf32> to vector<8x8xf32>
    %802 = arith.subf %798, %801 : vector<8x8xf32>
    %803 = math.exp %802 : vector<8x8xf32>
    %cst_269 = arith.constant dense<0.000000e+00> : vector<8xf32>
    %804 = vector.multi_reduction <add>, %803, %cst_269 [1] : vector<8x8xf32> to vector<8xf32>
    %805 = vector.shape_cast %804 : vector<8xf32> to vector<8x1xf32>
    %806 = vector.broadcast %805 : vector<8x1xf32> to vector<8x8xf32>
    %807 = arith.divf %803, %806 : vector<8x8xf32>
    %cst_270 = arith.constant dense<0.000000e+00> : vector<8x8xf32>
    %808 = tpu.matmul %807, %794, %cst_270 {dimension_numbers = #tpu.dot_dimension_numbers<[1], [0], [0], [1], [0, 0, 1, 1], [], []>} : vector<8x8xf32>, vector<8x8xf32>, vector<8x8xf32> -> vector<8x8xf32>
    %809 = vector.extract_strided_slice %747 {offsets = [16, 0], sizes = [8, 32], strides = [1, 1]} : vector<32x32xf32> to vector<8x32xf32>
    %cst_271 = arith.constant dense<0.000000e+00> : vector<8x32xf32>
    %810 = tpu.matmul %808, %809, %cst_271 {dimension_numbers = #tpu.dot_dimension_numbers<[1], [0], [0], [1], [0, 0, 1, 1], [], []>} : vector<8x8xf32>, vector<8x32xf32>, vector<8x32xf32> -> vector<8x32xf32>
    %811 = arith.addf %791, %810 : vector<8x32xf32>
    %812 = vector.extract_strided_slice %749 {offsets = [0, 24], sizes = [8, 8], strides = [1, 1]} : vector<8x32xf32> to vector<8x8xf32>
    %813 = vector.extract_strided_slice %750 {offsets = [0, 24], sizes = [8, 8], strides = [1, 1]} : vector<8x64xf32> to vector<8x8xf32>
    %814 = vector.extract_strided_slice %750 {offsets = [0, 56], sizes = [8, 8], strides = [1, 1]} : vector<8x64xf32> to vector<8x8xf32>
    %cst_272 = arith.constant dense<0.000000e+00> : vector<8x8xf32>
    %815 = tpu.matmul %812, %813, %cst_272 {dimension_numbers = #tpu.dot_dimension_numbers<[1], [1], [0], [0], [0, 0, 1, 0], [], []>} : vector<8x8xf32>, vector<8x8xf32>, vector<8x8xf32> -> vector<8x8xf32>
    %cst_273 = arith.constant 0.353553385 : f32
    %816 = vector.broadcast %cst_273 : f32 to vector<8x8xf32>
    %817 = arith.mulf %815, %816 : vector<8x8xf32>
    %818 = arith.addf %817, %752 : vector<8x8xf32>
    %cst_274 = arith.constant dense<0xFF800000> : vector<8xf32>
    %819 = vector.multi_reduction <maximumf>, %818, %cst_274 [1] : vector<8x8xf32> to vector<8xf32>
    %820 = vector.shape_cast %819 : vector<8xf32> to vector<8x1xf32>
    %821 = vector.broadcast %820 : vector<8x1xf32> to vector<8x8xf32>
    %822 = arith.subf %818, %821 : vector<8x8xf32>
    %823 = math.exp %822 : vector<8x8xf32>
    %cst_275 = arith.constant dense<0.000000e+00> : vector<8xf32>
    %824 = vector.multi_reduction <add>, %823, %cst_275 [1] : vector<8x8xf32> to vector<8xf32>
    %825 = vector.shape_cast %824 : vector<8xf32> to vector<8x1xf32>
    %826 = vector.broadcast %825 : vector<8x1xf32> to vector<8x8xf32>
    %827 = arith.divf %823, %826 : vector<8x8xf32>
    %cst_276 = arith.constant dense<0.000000e+00> : vector<8x8xf32>
    %828 = tpu.matmul %827, %814, %cst_276 {dimension_numbers = #tpu.dot_dimension_numbers<[1], [0], [0], [1], [0, 0, 1, 1], [], []>} : vector<8x8xf32>, vector<8x8xf32>, vector<8x8xf32> -> vector<8x8xf32>
    %829 = vector.extract_strided_slice %747 {offsets = [24, 0], sizes = [8, 32], strides = [1, 1]} : vector<32x32xf32> to vector<8x32xf32>
    %cst_277 = arith.constant dense<0.000000e+00> : vector<8x32xf32>
    %830 = tpu.matmul %828, %829, %cst_277 {dimension_numbers = #tpu.dot_dimension_numbers<[1], [0], [0], [1], [0, 0, 1, 1], [], []>} : vector<8x8xf32>, vector<8x32xf32>, vector<8x32xf32> -> vector<8x32xf32>
    %831 = arith.addf %811, %830 : vector<8x32xf32>
    %832 = vector.extract_strided_slice %739 {offsets = [8, 0], sizes = [8, 32], strides = [1, 1]} : vector<16x32xf32> to vector<8x32xf32>
    %833 = vector.extract_strided_slice %745 {offsets = [8, 0], sizes = [8, 64], strides = [1, 1]} : vector<16x64xf32> to vector<8x64xf32>
    %834 = vector.extract_strided_slice %2 {offsets = [1, 0, 0], sizes = [1, 8, 8], strides = [1, 1, 1]} : vector<2x8x8xf32> to vector<1x8x8xf32>
    %835 = vector.shape_cast %834 : vector<1x8x8xf32> to vector<8x8xf32>
    %836 = vector.extract_strided_slice %832 {offsets = [0, 0], sizes = [8, 8], strides = [1, 1]} : vector<8x32xf32> to vector<8x8xf32>
    %837 = vector.extract_strided_slice %833 {offsets = [0, 0], sizes = [8, 8], strides = [1, 1]} : vector<8x64xf32> to vector<8x8xf32>
    %838 = vector.extract_strided_slice %833 {offsets = [0, 32], sizes = [8, 8], strides = [1, 1]} : vector<8x64xf32> to vector<8x8xf32>
    %cst_278 = arith.constant dense<0.000000e+00> : vector<8x8xf32>
    %839 = tpu.matmul %836, %837, %cst_278 {dimension_numbers = #tpu.dot_dimension_numbers<[1], [1], [0], [0], [0, 0, 1, 0], [], []>} : vector<8x8xf32>, vector<8x8xf32>, vector<8x8xf32> -> vector<8x8xf32>
    %cst_279 = arith.constant 0.353553385 : f32
    %840 = vector.broadcast %cst_279 : f32 to vector<8x8xf32>
    %841 = arith.mulf %839, %840 : vector<8x8xf32>
    %842 = arith.addf %841, %835 : vector<8x8xf32>
    %cst_280 = arith.constant dense<0xFF800000> : vector<8xf32>
    %843 = vector.multi_reduction <maximumf>, %842, %cst_280 [1] : vector<8x8xf32> to vector<8xf32>
    %844 = vector.shape_cast %843 : vector<8xf32> to vector<8x1xf32>
    %845 = vector.broadcast %844 : vector<8x1xf32> to vector<8x8xf32>
    %846 = arith.subf %842, %845 : vector<8x8xf32>
    %847 = math.exp %846 : vector<8x8xf32>
    %cst_281 = arith.constant dense<0.000000e+00> : vector<8xf32>
    %848 = vector.multi_reduction <add>, %847, %cst_281 [1] : vector<8x8xf32> to vector<8xf32>
    %849 = vector.shape_cast %848 : vector<8xf32> to vector<8x1xf32>
    %850 = vector.broadcast %849 : vector<8x1xf32> to vector<8x8xf32>
    %851 = arith.divf %847, %850 : vector<8x8xf32>
    %cst_282 = arith.constant dense<0.000000e+00> : vector<8x8xf32>
    %852 = tpu.matmul %851, %838, %cst_282 {dimension_numbers = #tpu.dot_dimension_numbers<[1], [0], [0], [1], [0, 0, 1, 1], [], []>} : vector<8x8xf32>, vector<8x8xf32>, vector<8x8xf32> -> vector<8x8xf32>
    %853 = vector.extract_strided_slice %747 {offsets = [0, 0], sizes = [8, 32], strides = [1, 1]} : vector<32x32xf32> to vector<8x32xf32>
    %cst_283 = arith.constant dense<0.000000e+00> : vector<8x32xf32>
    %854 = tpu.matmul %852, %853, %cst_283 {dimension_numbers = #tpu.dot_dimension_numbers<[1], [0], [0], [1], [0, 0, 1, 1], [], []>} : vector<8x8xf32>, vector<8x32xf32>, vector<8x32xf32> -> vector<8x32xf32>
    %855 = vector.extract_strided_slice %832 {offsets = [0, 8], sizes = [8, 8], strides = [1, 1]} : vector<8x32xf32> to vector<8x8xf32>
    %856 = vector.extract_strided_slice %833 {offsets = [0, 8], sizes = [8, 8], strides = [1, 1]} : vector<8x64xf32> to vector<8x8xf32>
    %857 = vector.extract_strided_slice %833 {offsets = [0, 40], sizes = [8, 8], strides = [1, 1]} : vector<8x64xf32> to vector<8x8xf32>
    %cst_284 = arith.constant dense<0.000000e+00> : vector<8x8xf32>
    %858 = tpu.matmul %855, %856, %cst_284 {dimension_numbers = #tpu.dot_dimension_numbers<[1], [1], [0], [0], [0, 0, 1, 0], [], []>} : vector<8x8xf32>, vector<8x8xf32>, vector<8x8xf32> -> vector<8x8xf32>
    %cst_285 = arith.constant 0.353553385 : f32
    %859 = vector.broadcast %cst_285 : f32 to vector<8x8xf32>
    %860 = arith.mulf %858, %859 : vector<8x8xf32>
    %861 = arith.addf %860, %835 : vector<8x8xf32>
    %cst_286 = arith.constant dense<0xFF800000> : vector<8xf32>
    %862 = vector.multi_reduction <maximumf>, %861, %cst_286 [1] : vector<8x8xf32> to vector<8xf32>
    %863 = vector.shape_cast %862 : vector<8xf32> to vector<8x1xf32>
    %864 = vector.broadcast %863 : vector<8x1xf32> to vector<8x8xf32>
    %865 = arith.subf %861, %864 : vector<8x8xf32>
    %866 = math.exp %865 : vector<8x8xf32>
    %cst_287 = arith.constant dense<0.000000e+00> : vector<8xf32>
    %867 = vector.multi_reduction <add>, %866, %cst_287 [1] : vector<8x8xf32> to vector<8xf32>
    %868 = vector.shape_cast %867 : vector<8xf32> to vector<8x1xf32>
    %869 = vector.broadcast %868 : vector<8x1xf32> to vector<8x8xf32>
    %870 = arith.divf %866, %869 : vector<8x8xf32>
    %cst_288 = arith.constant dense<0.000000e+00> : vector<8x8xf32>
    %871 = tpu.matmul %870, %857, %cst_288 {dimension_numbers = #tpu.dot_dimension_numbers<[1], [0], [0], [1], [0, 0, 1, 1], [], []>} : vector<8x8xf32>, vector<8x8xf32>, vector<8x8xf32> -> vector<8x8xf32>
    %872 = vector.extract_strided_slice %747 {offsets = [8, 0], sizes = [8, 32], strides = [1, 1]} : vector<32x32xf32> to vector<8x32xf32>
    %cst_289 = arith.constant dense<0.000000e+00> : vector<8x32xf32>
    %873 = tpu.matmul %871, %872, %cst_289 {dimension_numbers = #tpu.dot_dimension_numbers<[1], [0], [0], [1], [0, 0, 1, 1], [], []>} : vector<8x8xf32>, vector<8x32xf32>, vector<8x32xf32> -> vector<8x32xf32>
    %874 = arith.addf %854, %873 : vector<8x32xf32>
    %875 = vector.extract_strided_slice %832 {offsets = [0, 16], sizes = [8, 8], strides = [1, 1]} : vector<8x32xf32> to vector<8x8xf32>
    %876 = vector.extract_strided_slice %833 {offsets = [0, 16], sizes = [8, 8], strides = [1, 1]} : vector<8x64xf32> to vector<8x8xf32>
    %877 = vector.extract_strided_slice %833 {offsets = [0, 48], sizes = [8, 8], strides = [1, 1]} : vector<8x64xf32> to vector<8x8xf32>
    %cst_290 = arith.constant dense<0.000000e+00> : vector<8x8xf32>
    %878 = tpu.matmul %875, %876, %cst_290 {dimension_numbers = #tpu.dot_dimension_numbers<[1], [1], [0], [0], [0, 0, 1, 0], [], []>} : vector<8x8xf32>, vector<8x8xf32>, vector<8x8xf32> -> vector<8x8xf32>
    %cst_291 = arith.constant 0.353553385 : f32
    %879 = vector.broadcast %cst_291 : f32 to vector<8x8xf32>
    %880 = arith.mulf %878, %879 : vector<8x8xf32>
    %881 = arith.addf %880, %835 : vector<8x8xf32>
    %cst_292 = arith.constant dense<0xFF800000> : vector<8xf32>
    %882 = vector.multi_reduction <maximumf>, %881, %cst_292 [1] : vector<8x8xf32> to vector<8xf32>
    %883 = vector.shape_cast %882 : vector<8xf32> to vector<8x1xf32>
    %884 = vector.broadcast %883 : vector<8x1xf32> to vector<8x8xf32>
    %885 = arith.subf %881, %884 : vector<8x8xf32>
    %886 = math.exp %885 : vector<8x8xf32>
    %cst_293 = arith.constant dense<0.000000e+00> : vector<8xf32>
    %887 = vector.multi_reduction <add>, %886, %cst_293 [1] : vector<8x8xf32> to vector<8xf32>
    %888 = vector.shape_cast %887 : vector<8xf32> to vector<8x1xf32>
    %889 = vector.broadcast %888 : vector<8x1xf32> to vector<8x8xf32>
    %890 = arith.divf %886, %889 : vector<8x8xf32>
    %cst_294 = arith.constant dense<0.000000e+00> : vector<8x8xf32>
    %891 = tpu.matmul %890, %877, %cst_294 {dimension_numbers = #tpu.dot_dimension_numbers<[1], [0], [0], [1], [0, 0, 1, 1], [], []>} : vector<8x8xf32>, vector<8x8xf32>, vector<8x8xf32> -> vector<8x8xf32>
    %892 = vector.extract_strided_slice %747 {offsets = [16, 0], sizes = [8, 32], strides = [1, 1]} : vector<32x32xf32> to vector<8x32xf32>
    %cst_295 = arith.constant dense<0.000000e+00> : vector<8x32xf32>
    %893 = tpu.matmul %891, %892, %cst_295 {dimension_numbers = #tpu.dot_dimension_numbers<[1], [0], [0], [1], [0, 0, 1, 1], [], []>} : vector<8x8xf32>, vector<8x32xf32>, vector<8x32xf32> -> vector<8x32xf32>
    %894 = arith.addf %874, %893 : vector<8x32xf32>
    %895 = vector.extract_strided_slice %832 {offsets = [0, 24], sizes = [8, 8], strides = [1, 1]} : vector<8x32xf32> to vector<8x8xf32>
    %896 = vector.extract_strided_slice %833 {offsets = [0, 24], sizes = [8, 8], strides = [1, 1]} : vector<8x64xf32> to vector<8x8xf32>
    %897 = vector.extract_strided_slice %833 {offsets = [0, 56], sizes = [8, 8], strides = [1, 1]} : vector<8x64xf32> to vector<8x8xf32>
    %cst_296 = arith.constant dense<0.000000e+00> : vector<8x8xf32>
    %898 = tpu.matmul %895, %896, %cst_296 {dimension_numbers = #tpu.dot_dimension_numbers<[1], [1], [0], [0], [0, 0, 1, 0], [], []>} : vector<8x8xf32>, vector<8x8xf32>, vector<8x8xf32> -> vector<8x8xf32>
    %cst_297 = arith.constant 0.353553385 : f32
    %899 = vector.broadcast %cst_297 : f32 to vector<8x8xf32>
    %900 = arith.mulf %898, %899 : vector<8x8xf32>
    %901 = arith.addf %900, %835 : vector<8x8xf32>
    %cst_298 = arith.constant dense<0xFF800000> : vector<8xf32>
    %902 = vector.multi_reduction <maximumf>, %901, %cst_298 [1] : vector<8x8xf32> to vector<8xf32>
    %903 = vector.shape_cast %902 : vector<8xf32> to vector<8x1xf32>
    %904 = vector.broadcast %903 : vector<8x1xf32> to vector<8x8xf32>
    %905 = arith.subf %901, %904 : vector<8x8xf32>
    %906 = math.exp %905 : vector<8x8xf32>
    %cst_299 = arith.constant dense<0.000000e+00> : vector<8xf32>
    %907 = vector.multi_reduction <add>, %906, %cst_299 [1] : vector<8x8xf32> to vector<8xf32>
    %908 = vector.shape_cast %907 : vector<8xf32> to vector<8x1xf32>
    %909 = vector.broadcast %908 : vector<8x1xf32> to vector<8x8xf32>
    %910 = arith.divf %906, %909 : vector<8x8xf32>
    %cst_300 = arith.constant dense<0.000000e+00> : vector<8x8xf32>
    %911 = tpu.matmul %910, %897, %cst_300 {dimension_numbers = #tpu.dot_dimension_numbers<[1], [0], [0], [1], [0, 0, 1, 1], [], []>} : vector<8x8xf32>, vector<8x8xf32>, vector<8x8xf32> -> vector<8x8xf32>
    %912 = vector.extract_strided_slice %747 {offsets = [24, 0], sizes = [8, 32], strides = [1, 1]} : vector<32x32xf32> to vector<8x32xf32>
    %cst_301 = arith.constant dense<0.000000e+00> : vector<8x32xf32>
    %913 = tpu.matmul %911, %912, %cst_301 {dimension_numbers = #tpu.dot_dimension_numbers<[1], [0], [0], [1], [0, 0, 1, 1], [], []>} : vector<8x8xf32>, vector<8x32xf32>, vector<8x32xf32> -> vector<8x32xf32>
    %914 = arith.addf %894, %913 : vector<8x32xf32>
    %915 = tpu.concatenate %831, %914 in 0 : vector<8x32xf32>, vector<8x32xf32> -> vector<16x32xf32>
    %916 = vector.broadcast %748 : vector<1x32xf32> to vector<16x32xf32>
    %917 = arith.addf %915, %916 : vector<16x32xf32>
    %918 = arith.addf %711, %917 : vector<16x32xf32>
    %919 = vector.extract_strided_slice %510 {offsets = [11, 0], sizes = [1, 32], strides = [1, 1]} : vector<16x96xf32> to vector<1x32xf32>
    %920 = vector.extract_strided_slice %510 {offsets = [12, 0], sizes = [1, 32], strides = [1, 1]} : vector<16x96xf32> to vector<1x32xf32>
    %cst_302 = arith.constant dense<0.000000e+00> : vector<16xf32>
    %921 = vector.multi_reduction <add>, %918, %cst_302 [1] : vector<16x32xf32> to vector<16xf32>
    %922 = vector.shape_cast %921 : vector<16xf32> to vector<16x1xf32>
    %cst_303 = arith.constant 3.200000e+01 : f32
    %923 = vector.broadcast %cst_303 : f32 to vector<16x1xf32>
    %924 = arith.divf %922, %923 : vector<16x1xf32>
    %925 = vector.broadcast %924 : vector<16x1xf32> to vector<16x32xf32>
    %926 = arith.subf %918, %925 : vector<16x32xf32>
    %927 = arith.mulf %926, %926 : vector<16x32xf32>
    %cst_304 = arith.constant dense<0.000000e+00> : vector<16xf32>
    %928 = vector.multi_reduction <add>, %927, %cst_304 [1] : vector<16x32xf32> to vector<16xf32>
    %929 = vector.shape_cast %928 : vector<16xf32> to vector<16x1xf32>
    %cst_305 = arith.constant 3.100000e+01 : f32
    %930 = vector.broadcast %cst_305 : f32 to vector<16x1xf32>
    %931 = arith.divf %929, %930 : vector<16x1xf32>
    %932 = vector.broadcast %919 : vector<1x32xf32> to vector<16x32xf32>
    %933 = arith.mulf %932, %926 : vector<16x32xf32>
    %934 = math.sqrt %931 : vector<16x1xf32>
    %cst_306 = arith.constant 9.99999997E-7 : f32
    %935 = vector.broadcast %cst_306 : f32 to vector<16x1xf32>
    %936 = arith.addf %934, %935 : vector<16x1xf32>
    %937 = vector.broadcast %936 : vector<16x1xf32> to vector<16x32xf32>
    %938 = arith.divf %933, %937 : vector<16x32xf32>
    %939 = vector.broadcast %920 : vector<1x32xf32> to vector<16x32xf32>
    %940 = arith.addf %938, %939 : vector<16x32xf32>
    %c0_307 = arith.constant 0 : index
    %c0_308 = arith.constant 0 : index
    %c0_309 = arith.constant 0 : index
    %941 = vector.load %arg16[%c0_307, %c0_308, %c0_309] : memref<2x32x64xf32, #tpu.memory_space<vmem>>, vector<1x32x64xf32>
    %942 = vector.shape_cast %941 : vector<1x32x64xf32> to vector<32x64xf32>
    %cst_310 = arith.constant dense<0.000000e+00> : vector<16x64xf32>
    %943 = tpu.matmul %940, %942, %cst_310 {dimension_numbers = #tpu.dot_dimension_numbers<[1], [0], [0], [1], [0, 0, 1, 1], [], []>} : vector<16x32xf32>, vector<32x64xf32>, vector<16x64xf32> -> vector<16x64xf32>
    %944 = vector.extract_strided_slice %510 {offsets = [9, 0], sizes = [1, 64], strides = [1, 1]} : vector<16x96xf32> to vector<1x64xf32>
    %945 = vector.broadcast %944 : vector<1x64xf32> to vector<16x64xf32>
    %946 = arith.addf %943, %945 : vector<16x64xf32>
    %cst_311 = arith.constant 0.000000e+00 : f32
    %947 = vector.broadcast %cst_311 : f32 to vector<16x64xf32>
    %948 = arith.maximumf %946, %947 : vector<16x64xf32>
    %c0_312 = arith.constant 0 : index
    %c0_313 = arith.constant 0 : index
    %c0_314 = arith.constant 0 : index
    %949 = vector.load %arg17[%c0_312, %c0_313, %c0_314] : memref<2x64x32xf32, #tpu.memory_space<vmem>>, vector<1x64x32xf32>
    %950 = vector.shape_cast %949 : vector<1x64x32xf32> to vector<64x32xf32>
    %cst_315 = arith.constant dense<0.000000e+00> : vector<16x32xf32>
    %951 = tpu.matmul %948, %950, %cst_315 {dimension_numbers = #tpu.dot_dimension_numbers<[1], [0], [0], [1], [0, 0, 1, 1], [], []>} : vector<16x64xf32>, vector<64x32xf32>, vector<16x32xf32> -> vector<16x32xf32>
    %952 = arith.addf %918, %951 : vector<16x32xf32>
    %953 = vector.extract_strided_slice %510 {offsets = [10, 0], sizes = [1, 32], strides = [1, 1]} : vector<16x96xf32> to vector<1x32xf32>
    %954 = vector.broadcast %953 : vector<1x32xf32> to vector<16x32xf32>
    %955 = arith.addf %952, %954 : vector<16x32xf32>
    %c1_316 = arith.constant 1 : index
    %c0_317 = arith.constant 0 : index
    %c0_318 = arith.constant 0 : index
    %956 = vector.load %arg18[%c1_316, %c0_317, %c0_318] : memref<2x16x96xf32, #tpu.memory_space<vmem>>, vector<1x16x96xf32>
    %957 = vector.shape_cast %956 : vector<1x16x96xf32> to vector<16x96xf32>
    %958 = vector.extract_strided_slice %957 {offsets = [1, 0], sizes = [1, 32], strides = [1, 1]} : vector<16x96xf32> to vector<1x32xf32>
    %959 = vector.extract_strided_slice %957 {offsets = [2, 0], sizes = [1, 32], strides = [1, 1]} : vector<16x96xf32> to vector<1x32xf32>
    %cst_319 = arith.constant dense<0.000000e+00> : vector<16xf32>
    %960 = vector.multi_reduction <add>, %955, %cst_319 [1] : vector<16x32xf32> to vector<16xf32>
    %961 = vector.shape_cast %960 : vector<16xf32> to vector<16x1xf32>
    %cst_320 = arith.constant 3.200000e+01 : f32
    %962 = vector.broadcast %cst_320 : f32 to vector<16x1xf32>
    %963 = arith.divf %961, %962 : vector<16x1xf32>
    %964 = vector.broadcast %963 : vector<16x1xf32> to vector<16x32xf32>
    %965 = arith.subf %955, %964 : vector<16x32xf32>
    %966 = arith.mulf %965, %965 : vector<16x32xf32>
    %cst_321 = arith.constant dense<0.000000e+00> : vector<16xf32>
    %967 = vector.multi_reduction <add>, %966, %cst_321 [1] : vector<16x32xf32> to vector<16xf32>
    %968 = vector.shape_cast %967 : vector<16xf32> to vector<16x1xf32>
    %cst_322 = arith.constant 3.100000e+01 : f32
    %969 = vector.broadcast %cst_322 : f32 to vector<16x1xf32>
    %970 = arith.divf %968, %969 : vector<16x1xf32>
    %971 = vector.broadcast %958 : vector<1x32xf32> to vector<16x32xf32>
    %972 = arith.mulf %971, %965 : vector<16x32xf32>
    %973 = math.sqrt %970 : vector<16x1xf32>
    %cst_323 = arith.constant 9.99999997E-7 : f32
    %974 = vector.broadcast %cst_323 : f32 to vector<16x1xf32>
    %975 = arith.addf %973, %974 : vector<16x1xf32>
    %976 = vector.broadcast %975 : vector<16x1xf32> to vector<16x32xf32>
    %977 = arith.divf %972, %976 : vector<16x32xf32>
    %978 = vector.broadcast %959 : vector<1x32xf32> to vector<16x32xf32>
    %979 = arith.addf %977, %978 : vector<16x32xf32>
    %c1_324 = arith.constant 1 : index
    %c0_325 = arith.constant 0 : index
    %c0_326 = arith.constant 0 : index
    %980 = vector.load %arg11[%c1_324, %c0_325, %c0_326] : memref<2x32x96xf32, #tpu.memory_space<vmem>>, vector<1x32x96xf32>
    %981 = vector.shape_cast %980 : vector<1x32x96xf32> to vector<32x96xf32>
    %cst_327 = arith.constant dense<0.000000e+00> : vector<16x96xf32>
    %982 = tpu.matmul %979, %981, %cst_327 {dimension_numbers = #tpu.dot_dimension_numbers<[1], [0], [0], [1], [0, 0, 1, 1], [], []>} : vector<16x32xf32>, vector<32x96xf32>, vector<16x96xf32> -> vector<16x96xf32>
    %983 = vector.extract_strided_slice %957 {offsets = [0, 0], sizes = [1, 96], strides = [1, 1]} : vector<16x96xf32> to vector<1x96xf32>
    %984 = vector.broadcast %983 : vector<1x96xf32> to vector<16x96xf32>
    %985 = arith.addf %982, %984 : vector<16x96xf32>
    %c1_328 = arith.constant 1 : index
    %c0_329 = arith.constant 0 : index
    %c0_330 = arith.constant 0 : index
    %986 = vector.load %arg12[%c1_328, %c0_329, %c0_330] : memref<2x32x32xf32, #tpu.memory_space<vmem>>, vector<1x32x32xf32>
    %987 = vector.shape_cast %986 : vector<1x32x32xf32> to vector<32x32xf32>
    %988 = vector.extract_strided_slice %957 {offsets = [3, 0], sizes = [1, 32], strides = [1, 1]} : vector<16x96xf32> to vector<1x32xf32>
    %989 = vector.extract_strided_slice %985 {offsets = [0, 0], sizes = [8, 96], strides = [1, 1]} : vector<16x96xf32> to vector<8x96xf32>
    %990 = vector.extract_strided_slice %985 {offsets = [0, 0], sizes = [8, 96], strides = [1, 1]} : vector<16x96xf32> to vector<8x96xf32>
    %991 = vector.extract_strided_slice %1 {offsets = [0, 0, 0], sizes = [1, 8, 8], strides = [1, 1, 1]} : vector<2x8x8xf32> to vector<1x8x8xf32>
    %992 = vector.shape_cast %991 : vector<1x8x8xf32> to vector<8x8xf32>
    %993 = vector.extract_strided_slice %989 {offsets = [0, 0], sizes = [8, 8], strides = [1, 1]} : vector<8x96xf32> to vector<8x8xf32>
    %994 = vector.extract_strided_slice %990 {offsets = [0, 32], sizes = [8, 8], strides = [1, 1]} : vector<8x96xf32> to vector<8x8xf32>
    %995 = vector.extract_strided_slice %990 {offsets = [0, 64], sizes = [8, 8], strides = [1, 1]} : vector<8x96xf32> to vector<8x8xf32>
    %cst_331 = arith.constant dense<0.000000e+00> : vector<8x8xf32>
    %996 = tpu.matmul %993, %994, %cst_331 {dimension_numbers = #tpu.dot_dimension_numbers<[1], [1], [0], [0], [0, 0, 1, 0], [], []>} : vector<8x8xf32>, vector<8x8xf32>, vector<8x8xf32> -> vector<8x8xf32>
    %cst_332 = arith.constant 0.353553385 : f32
    %997 = vector.broadcast %cst_332 : f32 to vector<8x8xf32>
    %998 = arith.mulf %996, %997 : vector<8x8xf32>
    %999 = arith.addf %998, %992 : vector<8x8xf32>
    %cst_333 = arith.constant dense<0xFF800000> : vector<8xf32>
    %1000 = vector.multi_reduction <maximumf>, %999, %cst_333 [1] : vector<8x8xf32> to vector<8xf32>
    %1001 = vector.shape_cast %1000 : vector<8xf32> to vector<8x1xf32>
    %1002 = vector.broadcast %1001 : vector<8x1xf32> to vector<8x8xf32>
    %1003 = arith.subf %999, %1002 : vector<8x8xf32>
    %1004 = math.exp %1003 : vector<8x8xf32>
    %cst_334 = arith.constant dense<0.000000e+00> : vector<8xf32>
    %1005 = vector.multi_reduction <add>, %1004, %cst_334 [1] : vector<8x8xf32> to vector<8xf32>
    %1006 = vector.shape_cast %1005 : vector<8xf32> to vector<8x1xf32>
    %1007 = vector.broadcast %1006 : vector<8x1xf32> to vector<8x8xf32>
    %1008 = arith.divf %1004, %1007 : vector<8x8xf32>
    %cst_335 = arith.constant dense<0.000000e+00> : vector<8x8xf32>
    %1009 = tpu.matmul %1008, %995, %cst_335 {dimension_numbers = #tpu.dot_dimension_numbers<[1], [0], [0], [1], [0, 0, 1, 1], [], []>} : vector<8x8xf32>, vector<8x8xf32>, vector<8x8xf32> -> vector<8x8xf32>
    %1010 = vector.extract_strided_slice %987 {offsets = [0, 0], sizes = [8, 32], strides = [1, 1]} : vector<32x32xf32> to vector<8x32xf32>
    %cst_336 = arith.constant dense<0.000000e+00> : vector<8x32xf32>
    %1011 = tpu.matmul %1009, %1010, %cst_336 {dimension_numbers = #tpu.dot_dimension_numbers<[1], [0], [0], [1], [0, 0, 1, 1], [], []>} : vector<8x8xf32>, vector<8x32xf32>, vector<8x32xf32> -> vector<8x32xf32>
    %1012 = vector.extract_strided_slice %989 {offsets = [0, 8], sizes = [8, 8], strides = [1, 1]} : vector<8x96xf32> to vector<8x8xf32>
    %1013 = vector.extract_strided_slice %990 {offsets = [0, 40], sizes = [8, 8], strides = [1, 1]} : vector<8x96xf32> to vector<8x8xf32>
    %1014 = vector.extract_strided_slice %990 {offsets = [0, 72], sizes = [8, 8], strides = [1, 1]} : vector<8x96xf32> to vector<8x8xf32>
    %cst_337 = arith.constant dense<0.000000e+00> : vector<8x8xf32>
    %1015 = tpu.matmul %1012, %1013, %cst_337 {dimension_numbers = #tpu.dot_dimension_numbers<[1], [1], [0], [0], [0, 0, 1, 0], [], []>} : vector<8x8xf32>, vector<8x8xf32>, vector<8x8xf32> -> vector<8x8xf32>
    %cst_338 = arith.constant 0.353553385 : f32
    %1016 = vector.broadcast %cst_338 : f32 to vector<8x8xf32>
    %1017 = arith.mulf %1015, %1016 : vector<8x8xf32>
    %1018 = arith.addf %1017, %992 : vector<8x8xf32>
    %cst_339 = arith.constant dense<0xFF800000> : vector<8xf32>
    %1019 = vector.multi_reduction <maximumf>, %1018, %cst_339 [1] : vector<8x8xf32> to vector<8xf32>
    %1020 = vector.shape_cast %1019 : vector<8xf32> to vector<8x1xf32>
    %1021 = vector.broadcast %1020 : vector<8x1xf32> to vector<8x8xf32>
    %1022 = arith.subf %1018, %1021 : vector<8x8xf32>
    %1023 = math.exp %1022 : vector<8x8xf32>
    %cst_340 = arith.constant dense<0.000000e+00> : vector<8xf32>
    %1024 = vector.multi_reduction <add>, %1023, %cst_340 [1] : vector<8x8xf32> to vector<8xf32>
    %1025 = vector.shape_cast %1024 : vector<8xf32> to vector<8x1xf32>
    %1026 = vector.broadcast %1025 : vector<8x1xf32> to vector<8x8xf32>
    %1027 = arith.divf %1023, %1026 : vector<8x8xf32>
    %cst_341 = arith.constant dense<0.000000e+00> : vector<8x8xf32>
    %1028 = tpu.matmul %1027, %1014, %cst_341 {dimension_numbers = #tpu.dot_dimension_numbers<[1], [0], [0], [1], [0, 0, 1, 1], [], []>} : vector<8x8xf32>, vector<8x8xf32>, vector<8x8xf32> -> vector<8x8xf32>
    %1029 = vector.extract_strided_slice %987 {offsets = [8, 0], sizes = [8, 32], strides = [1, 1]} : vector<32x32xf32> to vector<8x32xf32>
    %cst_342 = arith.constant dense<0.000000e+00> : vector<8x32xf32>
    %1030 = tpu.matmul %1028, %1029, %cst_342 {dimension_numbers = #tpu.dot_dimension_numbers<[1], [0], [0], [1], [0, 0, 1, 1], [], []>} : vector<8x8xf32>, vector<8x32xf32>, vector<8x32xf32> -> vector<8x32xf32>
    %1031 = arith.addf %1011, %1030 : vector<8x32xf32>
    %1032 = vector.extract_strided_slice %989 {offsets = [0, 16], sizes = [8, 8], strides = [1, 1]} : vector<8x96xf32> to vector<8x8xf32>
    %1033 = vector.extract_strided_slice %990 {offsets = [0, 48], sizes = [8, 8], strides = [1, 1]} : vector<8x96xf32> to vector<8x8xf32>
    %1034 = vector.extract_strided_slice %990 {offsets = [0, 80], sizes = [8, 8], strides = [1, 1]} : vector<8x96xf32> to vector<8x8xf32>
    %cst_343 = arith.constant dense<0.000000e+00> : vector<8x8xf32>
    %1035 = tpu.matmul %1032, %1033, %cst_343 {dimension_numbers = #tpu.dot_dimension_numbers<[1], [1], [0], [0], [0, 0, 1, 0], [], []>} : vector<8x8xf32>, vector<8x8xf32>, vector<8x8xf32> -> vector<8x8xf32>
    %cst_344 = arith.constant 0.353553385 : f32
    %1036 = vector.broadcast %cst_344 : f32 to vector<8x8xf32>
    %1037 = arith.mulf %1035, %1036 : vector<8x8xf32>
    %1038 = arith.addf %1037, %992 : vector<8x8xf32>
    %cst_345 = arith.constant dense<0xFF800000> : vector<8xf32>
    %1039 = vector.multi_reduction <maximumf>, %1038, %cst_345 [1] : vector<8x8xf32> to vector<8xf32>
    %1040 = vector.shape_cast %1039 : vector<8xf32> to vector<8x1xf32>
    %1041 = vector.broadcast %1040 : vector<8x1xf32> to vector<8x8xf32>
    %1042 = arith.subf %1038, %1041 : vector<8x8xf32>
    %1043 = math.exp %1042 : vector<8x8xf32>
    %cst_346 = arith.constant dense<0.000000e+00> : vector<8xf32>
    %1044 = vector.multi_reduction <add>, %1043, %cst_346 [1] : vector<8x8xf32> to vector<8xf32>
    %1045 = vector.shape_cast %1044 : vector<8xf32> to vector<8x1xf32>
    %1046 = vector.broadcast %1045 : vector<8x1xf32> to vector<8x8xf32>
    %1047 = arith.divf %1043, %1046 : vector<8x8xf32>
    %cst_347 = arith.constant dense<0.000000e+00> : vector<8x8xf32>
    %1048 = tpu.matmul %1047, %1034, %cst_347 {dimension_numbers = #tpu.dot_dimension_numbers<[1], [0], [0], [1], [0, 0, 1, 1], [], []>} : vector<8x8xf32>, vector<8x8xf32>, vector<8x8xf32> -> vector<8x8xf32>
    %1049 = vector.extract_strided_slice %987 {offsets = [16, 0], sizes = [8, 32], strides = [1, 1]} : vector<32x32xf32> to vector<8x32xf32>
    %cst_348 = arith.constant dense<0.000000e+00> : vector<8x32xf32>
    %1050 = tpu.matmul %1048, %1049, %cst_348 {dimension_numbers = #tpu.dot_dimension_numbers<[1], [0], [0], [1], [0, 0, 1, 1], [], []>} : vector<8x8xf32>, vector<8x32xf32>, vector<8x32xf32> -> vector<8x32xf32>
    %1051 = arith.addf %1031, %1050 : vector<8x32xf32>
    %1052 = vector.extract_strided_slice %989 {offsets = [0, 24], sizes = [8, 8], strides = [1, 1]} : vector<8x96xf32> to vector<8x8xf32>
    %1053 = vector.extract_strided_slice %990 {offsets = [0, 56], sizes = [8, 8], strides = [1, 1]} : vector<8x96xf32> to vector<8x8xf32>
    %1054 = vector.extract_strided_slice %990 {offsets = [0, 88], sizes = [8, 8], strides = [1, 1]} : vector<8x96xf32> to vector<8x8xf32>
    %cst_349 = arith.constant dense<0.000000e+00> : vector<8x8xf32>
    %1055 = tpu.matmul %1052, %1053, %cst_349 {dimension_numbers = #tpu.dot_dimension_numbers<[1], [1], [0], [0], [0, 0, 1, 0], [], []>} : vector<8x8xf32>, vector<8x8xf32>, vector<8x8xf32> -> vector<8x8xf32>
    %cst_350 = arith.constant 0.353553385 : f32
    %1056 = vector.broadcast %cst_350 : f32 to vector<8x8xf32>
    %1057 = arith.mulf %1055, %1056 : vector<8x8xf32>
    %1058 = arith.addf %1057, %992 : vector<8x8xf32>
    %cst_351 = arith.constant dense<0xFF800000> : vector<8xf32>
    %1059 = vector.multi_reduction <maximumf>, %1058, %cst_351 [1] : vector<8x8xf32> to vector<8xf32>
    %1060 = vector.shape_cast %1059 : vector<8xf32> to vector<8x1xf32>
    %1061 = vector.broadcast %1060 : vector<8x1xf32> to vector<8x8xf32>
    %1062 = arith.subf %1058, %1061 : vector<8x8xf32>
    %1063 = math.exp %1062 : vector<8x8xf32>
    %cst_352 = arith.constant dense<0.000000e+00> : vector<8xf32>
    %1064 = vector.multi_reduction <add>, %1063, %cst_352 [1] : vector<8x8xf32> to vector<8xf32>
    %1065 = vector.shape_cast %1064 : vector<8xf32> to vector<8x1xf32>
    %1066 = vector.broadcast %1065 : vector<8x1xf32> to vector<8x8xf32>
    %1067 = arith.divf %1063, %1066 : vector<8x8xf32>
    %cst_353 = arith.constant dense<0.000000e+00> : vector<8x8xf32>
    %1068 = tpu.matmul %1067, %1054, %cst_353 {dimension_numbers = #tpu.dot_dimension_numbers<[1], [0], [0], [1], [0, 0, 1, 1], [], []>} : vector<8x8xf32>, vector<8x8xf32>, vector<8x8xf32> -> vector<8x8xf32>
    %1069 = vector.extract_strided_slice %987 {offsets = [24, 0], sizes = [8, 32], strides = [1, 1]} : vector<32x32xf32> to vector<8x32xf32>
    %cst_354 = arith.constant dense<0.000000e+00> : vector<8x32xf32>
    %1070 = tpu.matmul %1068, %1069, %cst_354 {dimension_numbers = #tpu.dot_dimension_numbers<[1], [0], [0], [1], [0, 0, 1, 1], [], []>} : vector<8x8xf32>, vector<8x32xf32>, vector<8x32xf32> -> vector<8x32xf32>
    %1071 = arith.addf %1051, %1070 : vector<8x32xf32>
    %1072 = vector.extract_strided_slice %985 {offsets = [8, 0], sizes = [8, 96], strides = [1, 1]} : vector<16x96xf32> to vector<8x96xf32>
    %1073 = vector.extract_strided_slice %985 {offsets = [8, 0], sizes = [8, 96], strides = [1, 1]} : vector<16x96xf32> to vector<8x96xf32>
    %1074 = vector.extract_strided_slice %1 {offsets = [1, 0, 0], sizes = [1, 8, 8], strides = [1, 1, 1]} : vector<2x8x8xf32> to vector<1x8x8xf32>
    %1075 = vector.shape_cast %1074 : vector<1x8x8xf32> to vector<8x8xf32>
    %1076 = vector.extract_strided_slice %1072 {offsets = [0, 0], sizes = [8, 8], strides = [1, 1]} : vector<8x96xf32> to vector<8x8xf32>
    %1077 = vector.extract_strided_slice %1073 {offsets = [0, 32], sizes = [8, 8], strides = [1, 1]} : vector<8x96xf32> to vector<8x8xf32>
    %1078 = vector.extract_strided_slice %1073 {offsets = [0, 64], sizes = [8, 8], strides = [1, 1]} : vector<8x96xf32> to vector<8x8xf32>
    %cst_355 = arith.constant dense<0.000000e+00> : vector<8x8xf32>
    %1079 = tpu.matmul %1076, %1077, %cst_355 {dimension_numbers = #tpu.dot_dimension_numbers<[1], [1], [0], [0], [0, 0, 1, 0], [], []>} : vector<8x8xf32>, vector<8x8xf32>, vector<8x8xf32> -> vector<8x8xf32>
    %cst_356 = arith.constant 0.353553385 : f32
    %1080 = vector.broadcast %cst_356 : f32 to vector<8x8xf32>
    %1081 = arith.mulf %1079, %1080 : vector<8x8xf32>
    %1082 = arith.addf %1081, %1075 : vector<8x8xf32>
    %cst_357 = arith.constant dense<0xFF800000> : vector<8xf32>
    %1083 = vector.multi_reduction <maximumf>, %1082, %cst_357 [1] : vector<8x8xf32> to vector<8xf32>
    %1084 = vector.shape_cast %1083 : vector<8xf32> to vector<8x1xf32>
    %1085 = vector.broadcast %1084 : vector<8x1xf32> to vector<8x8xf32>
    %1086 = arith.subf %1082, %1085 : vector<8x8xf32>
    %1087 = math.exp %1086 : vector<8x8xf32>
    %cst_358 = arith.constant dense<0.000000e+00> : vector<8xf32>
    %1088 = vector.multi_reduction <add>, %1087, %cst_358 [1] : vector<8x8xf32> to vector<8xf32>
    %1089 = vector.shape_cast %1088 : vector<8xf32> to vector<8x1xf32>
    %1090 = vector.broadcast %1089 : vector<8x1xf32> to vector<8x8xf32>
    %1091 = arith.divf %1087, %1090 : vector<8x8xf32>
    %cst_359 = arith.constant dense<0.000000e+00> : vector<8x8xf32>
    %1092 = tpu.matmul %1091, %1078, %cst_359 {dimension_numbers = #tpu.dot_dimension_numbers<[1], [0], [0], [1], [0, 0, 1, 1], [], []>} : vector<8x8xf32>, vector<8x8xf32>, vector<8x8xf32> -> vector<8x8xf32>
    %1093 = vector.extract_strided_slice %987 {offsets = [0, 0], sizes = [8, 32], strides = [1, 1]} : vector<32x32xf32> to vector<8x32xf32>
    %cst_360 = arith.constant dense<0.000000e+00> : vector<8x32xf32>
    %1094 = tpu.matmul %1092, %1093, %cst_360 {dimension_numbers = #tpu.dot_dimension_numbers<[1], [0], [0], [1], [0, 0, 1, 1], [], []>} : vector<8x8xf32>, vector<8x32xf32>, vector<8x32xf32> -> vector<8x32xf32>
    %1095 = vector.extract_strided_slice %1072 {offsets = [0, 8], sizes = [8, 8], strides = [1, 1]} : vector<8x96xf32> to vector<8x8xf32>
    %1096 = vector.extract_strided_slice %1073 {offsets = [0, 40], sizes = [8, 8], strides = [1, 1]} : vector<8x96xf32> to vector<8x8xf32>
    %1097 = vector.extract_strided_slice %1073 {offsets = [0, 72], sizes = [8, 8], strides = [1, 1]} : vector<8x96xf32> to vector<8x8xf32>
    %cst_361 = arith.constant dense<0.000000e+00> : vector<8x8xf32>
    %1098 = tpu.matmul %1095, %1096, %cst_361 {dimension_numbers = #tpu.dot_dimension_numbers<[1], [1], [0], [0], [0, 0, 1, 0], [], []>} : vector<8x8xf32>, vector<8x8xf32>, vector<8x8xf32> -> vector<8x8xf32>
    %cst_362 = arith.constant 0.353553385 : f32
    %1099 = vector.broadcast %cst_362 : f32 to vector<8x8xf32>
    %1100 = arith.mulf %1098, %1099 : vector<8x8xf32>
    %1101 = arith.addf %1100, %1075 : vector<8x8xf32>
    %cst_363 = arith.constant dense<0xFF800000> : vector<8xf32>
    %1102 = vector.multi_reduction <maximumf>, %1101, %cst_363 [1] : vector<8x8xf32> to vector<8xf32>
    %1103 = vector.shape_cast %1102 : vector<8xf32> to vector<8x1xf32>
    %1104 = vector.broadcast %1103 : vector<8x1xf32> to vector<8x8xf32>
    %1105 = arith.subf %1101, %1104 : vector<8x8xf32>
    %1106 = math.exp %1105 : vector<8x8xf32>
    %cst_364 = arith.constant dense<0.000000e+00> : vector<8xf32>
    %1107 = vector.multi_reduction <add>, %1106, %cst_364 [1] : vector<8x8xf32> to vector<8xf32>
    %1108 = vector.shape_cast %1107 : vector<8xf32> to vector<8x1xf32>
    %1109 = vector.broadcast %1108 : vector<8x1xf32> to vector<8x8xf32>
    %1110 = arith.divf %1106, %1109 : vector<8x8xf32>
    %cst_365 = arith.constant dense<0.000000e+00> : vector<8x8xf32>
    %1111 = tpu.matmul %1110, %1097, %cst_365 {dimension_numbers = #tpu.dot_dimension_numbers<[1], [0], [0], [1], [0, 0, 1, 1], [], []>} : vector<8x8xf32>, vector<8x8xf32>, vector<8x8xf32> -> vector<8x8xf32>
    %1112 = vector.extract_strided_slice %987 {offsets = [8, 0], sizes = [8, 32], strides = [1, 1]} : vector<32x32xf32> to vector<8x32xf32>
    %cst_366 = arith.constant dense<0.000000e+00> : vector<8x32xf32>
    %1113 = tpu.matmul %1111, %1112, %cst_366 {dimension_numbers = #tpu.dot_dimension_numbers<[1], [0], [0], [1], [0, 0, 1, 1], [], []>} : vector<8x8xf32>, vector<8x32xf32>, vector<8x32xf32> -> vector<8x32xf32>
    %1114 = arith.addf %1094, %1113 : vector<8x32xf32>
    %1115 = vector.extract_strided_slice %1072 {offsets = [0, 16], sizes = [8, 8], strides = [1, 1]} : vector<8x96xf32> to vector<8x8xf32>
    %1116 = vector.extract_strided_slice %1073 {offsets = [0, 48], sizes = [8, 8], strides = [1, 1]} : vector<8x96xf32> to vector<8x8xf32>
    %1117 = vector.extract_strided_slice %1073 {offsets = [0, 80], sizes = [8, 8], strides = [1, 1]} : vector<8x96xf32> to vector<8x8xf32>
    %cst_367 = arith.constant dense<0.000000e+00> : vector<8x8xf32>
    %1118 = tpu.matmul %1115, %1116, %cst_367 {dimension_numbers = #tpu.dot_dimension_numbers<[1], [1], [0], [0], [0, 0, 1, 0], [], []>} : vector<8x8xf32>, vector<8x8xf32>, vector<8x8xf32> -> vector<8x8xf32>
    %cst_368 = arith.constant 0.353553385 : f32
    %1119 = vector.broadcast %cst_368 : f32 to vector<8x8xf32>
    %1120 = arith.mulf %1118, %1119 : vector<8x8xf32>
    %1121 = arith.addf %1120, %1075 : vector<8x8xf32>
    %cst_369 = arith.constant dense<0xFF800000> : vector<8xf32>
    %1122 = vector.multi_reduction <maximumf>, %1121, %cst_369 [1] : vector<8x8xf32> to vector<8xf32>
    %1123 = vector.shape_cast %1122 : vector<8xf32> to vector<8x1xf32>
    %1124 = vector.broadcast %1123 : vector<8x1xf32> to vector<8x8xf32>
    %1125 = arith.subf %1121, %1124 : vector<8x8xf32>
    %1126 = math.exp %1125 : vector<8x8xf32>
    %cst_370 = arith.constant dense<0.000000e+00> : vector<8xf32>
    %1127 = vector.multi_reduction <add>, %1126, %cst_370 [1] : vector<8x8xf32> to vector<8xf32>
    %1128 = vector.shape_cast %1127 : vector<8xf32> to vector<8x1xf32>
    %1129 = vector.broadcast %1128 : vector<8x1xf32> to vector<8x8xf32>
    %1130 = arith.divf %1126, %1129 : vector<8x8xf32>
    %cst_371 = arith.constant dense<0.000000e+00> : vector<8x8xf32>
    %1131 = tpu.matmul %1130, %1117, %cst_371 {dimension_numbers = #tpu.dot_dimension_numbers<[1], [0], [0], [1], [0, 0, 1, 1], [], []>} : vector<8x8xf32>, vector<8x8xf32>, vector<8x8xf32> -> vector<8x8xf32>
    %1132 = vector.extract_strided_slice %987 {offsets = [16, 0], sizes = [8, 32], strides = [1, 1]} : vector<32x32xf32> to vector<8x32xf32>
    %cst_372 = arith.constant dense<0.000000e+00> : vector<8x32xf32>
    %1133 = tpu.matmul %1131, %1132, %cst_372 {dimension_numbers = #tpu.dot_dimension_numbers<[1], [0], [0], [1], [0, 0, 1, 1], [], []>} : vector<8x8xf32>, vector<8x32xf32>, vector<8x32xf32> -> vector<8x32xf32>
    %1134 = arith.addf %1114, %1133 : vector<8x32xf32>
    %1135 = vector.extract_strided_slice %1072 {offsets = [0, 24], sizes = [8, 8], strides = [1, 1]} : vector<8x96xf32> to vector<8x8xf32>
    %1136 = vector.extract_strided_slice %1073 {offsets = [0, 56], sizes = [8, 8], strides = [1, 1]} : vector<8x96xf32> to vector<8x8xf32>
    %1137 = vector.extract_strided_slice %1073 {offsets = [0, 88], sizes = [8, 8], strides = [1, 1]} : vector<8x96xf32> to vector<8x8xf32>
    %cst_373 = arith.constant dense<0.000000e+00> : vector<8x8xf32>
    %1138 = tpu.matmul %1135, %1136, %cst_373 {dimension_numbers = #tpu.dot_dimension_numbers<[1], [1], [0], [0], [0, 0, 1, 0], [], []>} : vector<8x8xf32>, vector<8x8xf32>, vector<8x8xf32> -> vector<8x8xf32>
    %cst_374 = arith.constant 0.353553385 : f32
    %1139 = vector.broadcast %cst_374 : f32 to vector<8x8xf32>
    %1140 = arith.mulf %1138, %1139 : vector<8x8xf32>
    %1141 = arith.addf %1140, %1075 : vector<8x8xf32>
    %cst_375 = arith.constant dense<0xFF800000> : vector<8xf32>
    %1142 = vector.multi_reduction <maximumf>, %1141, %cst_375 [1] : vector<8x8xf32> to vector<8xf32>
    %1143 = vector.shape_cast %1142 : vector<8xf32> to vector<8x1xf32>
    %1144 = vector.broadcast %1143 : vector<8x1xf32> to vector<8x8xf32>
    %1145 = arith.subf %1141, %1144 : vector<8x8xf32>
    %1146 = math.exp %1145 : vector<8x8xf32>
    %cst_376 = arith.constant dense<0.000000e+00> : vector<8xf32>
    %1147 = vector.multi_reduction <add>, %1146, %cst_376 [1] : vector<8x8xf32> to vector<8xf32>
    %1148 = vector.shape_cast %1147 : vector<8xf32> to vector<8x1xf32>
    %1149 = vector.broadcast %1148 : vector<8x1xf32> to vector<8x8xf32>
    %1150 = arith.divf %1146, %1149 : vector<8x8xf32>
    %cst_377 = arith.constant dense<0.000000e+00> : vector<8x8xf32>
    %1151 = tpu.matmul %1150, %1137, %cst_377 {dimension_numbers = #tpu.dot_dimension_numbers<[1], [0], [0], [1], [0, 0, 1, 1], [], []>} : vector<8x8xf32>, vector<8x8xf32>, vector<8x8xf32> -> vector<8x8xf32>
    %1152 = vector.extract_strided_slice %987 {offsets = [24, 0], sizes = [8, 32], strides = [1, 1]} : vector<32x32xf32> to vector<8x32xf32>
    %cst_378 = arith.constant dense<0.000000e+00> : vector<8x32xf32>
    %1153 = tpu.matmul %1151, %1152, %cst_378 {dimension_numbers = #tpu.dot_dimension_numbers<[1], [0], [0], [1], [0, 0, 1, 1], [], []>} : vector<8x8xf32>, vector<8x32xf32>, vector<8x32xf32> -> vector<8x32xf32>
    %1154 = arith.addf %1134, %1153 : vector<8x32xf32>
    %1155 = tpu.concatenate %1071, %1154 in 0 : vector<8x32xf32>, vector<8x32xf32> -> vector<16x32xf32>
    %1156 = vector.broadcast %988 : vector<1x32xf32> to vector<16x32xf32>
    %1157 = arith.addf %1155, %1156 : vector<16x32xf32>
    %1158 = arith.addf %955, %1157 : vector<16x32xf32>
    %1159 = vector.extract_strided_slice %957 {offsets = [5, 0], sizes = [1, 32], strides = [1, 1]} : vector<16x96xf32> to vector<1x32xf32>
    %1160 = vector.extract_strided_slice %957 {offsets = [6, 0], sizes = [1, 32], strides = [1, 1]} : vector<16x96xf32> to vector<1x32xf32>
    %cst_379 = arith.constant dense<0.000000e+00> : vector<16xf32>
    %1161 = vector.multi_reduction <add>, %1158, %cst_379 [1] : vector<16x32xf32> to vector<16xf32>
    %1162 = vector.shape_cast %1161 : vector<16xf32> to vector<16x1xf32>
    %cst_380 = arith.constant 3.200000e+01 : f32
    %1163 = vector.broadcast %cst_380 : f32 to vector<16x1xf32>
    %1164 = arith.divf %1162, %1163 : vector<16x1xf32>
    %1165 = vector.broadcast %1164 : vector<16x1xf32> to vector<16x32xf32>
    %1166 = arith.subf %1158, %1165 : vector<16x32xf32>
    %1167 = arith.mulf %1166, %1166 : vector<16x32xf32>
    %cst_381 = arith.constant dense<0.000000e+00> : vector<16xf32>
    %1168 = vector.multi_reduction <add>, %1167, %cst_381 [1] : vector<16x32xf32> to vector<16xf32>
    %1169 = vector.shape_cast %1168 : vector<16xf32> to vector<16x1xf32>
    %cst_382 = arith.constant 3.100000e+01 : f32
    %1170 = vector.broadcast %cst_382 : f32 to vector<16x1xf32>
    %1171 = arith.divf %1169, %1170 : vector<16x1xf32>
    %1172 = vector.broadcast %1159 : vector<1x32xf32> to vector<16x32xf32>
    %1173 = arith.mulf %1172, %1166 : vector<16x32xf32>
    %1174 = math.sqrt %1171 : vector<16x1xf32>
    %cst_383 = arith.constant 9.99999997E-7 : f32
    %1175 = vector.broadcast %cst_383 : f32 to vector<16x1xf32>
    %1176 = arith.addf %1174, %1175 : vector<16x1xf32>
    %1177 = vector.broadcast %1176 : vector<16x1xf32> to vector<16x32xf32>
    %1178 = arith.divf %1173, %1177 : vector<16x32xf32>
    %1179 = vector.broadcast %1160 : vector<1x32xf32> to vector<16x32xf32>
    %1180 = arith.addf %1178, %1179 : vector<16x32xf32>
    %c1_384 = arith.constant 1 : index
    %c0_385 = arith.constant 0 : index
    %c0_386 = arith.constant 0 : index
    %1181 = vector.load %arg13[%c1_384, %c0_385, %c0_386] : memref<2x32x32xf32, #tpu.memory_space<vmem>>, vector<1x32x32xf32>
    %1182 = vector.shape_cast %1181 : vector<1x32x32xf32> to vector<32x32xf32>
    %cst_387 = arith.constant dense<0.000000e+00> : vector<16x32xf32>
    %1183 = tpu.matmul %1180, %1182, %cst_387 {dimension_numbers = #tpu.dot_dimension_numbers<[1], [0], [0], [1], [0, 0, 1, 1], [], []>} : vector<16x32xf32>, vector<32x32xf32>, vector<16x32xf32> -> vector<16x32xf32>
    %1184 = vector.extract_strided_slice %957 {offsets = [4, 0], sizes = [1, 32], strides = [1, 1]} : vector<16x96xf32> to vector<1x32xf32>
    %1185 = vector.broadcast %1184 : vector<1x32xf32> to vector<16x32xf32>
    %1186 = arith.addf %1183, %1185 : vector<16x32xf32>
    %c1_388 = arith.constant 1 : index
    %c0_389 = arith.constant 0 : index
    %c0_390 = arith.constant 0 : index
    %1187 = vector.load %arg14[%c1_388, %c0_389, %c0_390] : memref<2x32x64xf32, #tpu.memory_space<vmem>>, vector<1x32x64xf32>
    %1188 = vector.shape_cast %1187 : vector<1x32x64xf32> to vector<32x64xf32>
    %cst_391 = arith.constant dense<0.000000e+00> : vector<16x64xf32>
    %1189 = tpu.matmul %506, %1188, %cst_391 {dimension_numbers = #tpu.dot_dimension_numbers<[1], [0], [0], [1], [0, 0, 1, 1], [], []>} : vector<16x32xf32>, vector<32x64xf32>, vector<16x64xf32> -> vector<16x64xf32>
    %1190 = vector.extract_strided_slice %957 {offsets = [8, 0], sizes = [1, 64], strides = [1, 1]} : vector<16x96xf32> to vector<1x64xf32>
    %1191 = vector.broadcast %1190 : vector<1x64xf32> to vector<16x64xf32>
    %1192 = arith.addf %1189, %1191 : vector<16x64xf32>
    %c1_392 = arith.constant 1 : index
    %c0_393 = arith.constant 0 : index
    %c0_394 = arith.constant 0 : index
    %1193 = vector.load %arg15[%c1_392, %c0_393, %c0_394] : memref<2x32x32xf32, #tpu.memory_space<vmem>>, vector<1x32x32xf32>
    %1194 = vector.shape_cast %1193 : vector<1x32x32xf32> to vector<32x32xf32>
    %1195 = vector.extract_strided_slice %957 {offsets = [7, 0], sizes = [1, 32], strides = [1, 1]} : vector<16x96xf32> to vector<1x32xf32>
    %1196 = vector.extract_strided_slice %1186 {offsets = [0, 0], sizes = [8, 32], strides = [1, 1]} : vector<16x32xf32> to vector<8x32xf32>
    %1197 = vector.extract_strided_slice %1192 {offsets = [0, 0], sizes = [8, 64], strides = [1, 1]} : vector<16x64xf32> to vector<8x64xf32>
    %1198 = vector.extract_strided_slice %2 {offsets = [0, 0, 0], sizes = [1, 8, 8], strides = [1, 1, 1]} : vector<2x8x8xf32> to vector<1x8x8xf32>
    %1199 = vector.shape_cast %1198 : vector<1x8x8xf32> to vector<8x8xf32>
    %1200 = vector.extract_strided_slice %1196 {offsets = [0, 0], sizes = [8, 8], strides = [1, 1]} : vector<8x32xf32> to vector<8x8xf32>
    %1201 = vector.extract_strided_slice %1197 {offsets = [0, 0], sizes = [8, 8], strides = [1, 1]} : vector<8x64xf32> to vector<8x8xf32>
    %1202 = vector.extract_strided_slice %1197 {offsets = [0, 32], sizes = [8, 8], strides = [1, 1]} : vector<8x64xf32> to vector<8x8xf32>
    %cst_395 = arith.constant dense<0.000000e+00> : vector<8x8xf32>
    %1203 = tpu.matmul %1200, %1201, %cst_395 {dimension_numbers = #tpu.dot_dimension_numbers<[1], [1], [0], [0], [0, 0, 1, 0], [], []>} : vector<8x8xf32>, vector<8x8xf32>, vector<8x8xf32> -> vector<8x8xf32>
    %cst_396 = arith.constant 0.353553385 : f32
    %1204 = vector.broadcast %cst_396 : f32 to vector<8x8xf32>
    %1205 = arith.mulf %1203, %1204 : vector<8x8xf32>
    %1206 = arith.addf %1205, %1199 : vector<8x8xf32>
    %cst_397 = arith.constant dense<0xFF800000> : vector<8xf32>
    %1207 = vector.multi_reduction <maximumf>, %1206, %cst_397 [1] : vector<8x8xf32> to vector<8xf32>
    %1208 = vector.shape_cast %1207 : vector<8xf32> to vector<8x1xf32>
    %1209 = vector.broadcast %1208 : vector<8x1xf32> to vector<8x8xf32>
    %1210 = arith.subf %1206, %1209 : vector<8x8xf32>
    %1211 = math.exp %1210 : vector<8x8xf32>
    %cst_398 = arith.constant dense<0.000000e+00> : vector<8xf32>
    %1212 = vector.multi_reduction <add>, %1211, %cst_398 [1] : vector<8x8xf32> to vector<8xf32>
    %1213 = vector.shape_cast %1212 : vector<8xf32> to vector<8x1xf32>
    %1214 = vector.broadcast %1213 : vector<8x1xf32> to vector<8x8xf32>
    %1215 = arith.divf %1211, %1214 : vector<8x8xf32>
    %cst_399 = arith.constant dense<0.000000e+00> : vector<8x8xf32>
    %1216 = tpu.matmul %1215, %1202, %cst_399 {dimension_numbers = #tpu.dot_dimension_numbers<[1], [0], [0], [1], [0, 0, 1, 1], [], []>} : vector<8x8xf32>, vector<8x8xf32>, vector<8x8xf32> -> vector<8x8xf32>
    %1217 = vector.extract_strided_slice %1194 {offsets = [0, 0], sizes = [8, 32], strides = [1, 1]} : vector<32x32xf32> to vector<8x32xf32>
    %cst_400 = arith.constant dense<0.000000e+00> : vector<8x32xf32>
    %1218 = tpu.matmul %1216, %1217, %cst_400 {dimension_numbers = #tpu.dot_dimension_numbers<[1], [0], [0], [1], [0, 0, 1, 1], [], []>} : vector<8x8xf32>, vector<8x32xf32>, vector<8x32xf32> -> vector<8x32xf32>
    %1219 = vector.extract_strided_slice %1196 {offsets = [0, 8], sizes = [8, 8], strides = [1, 1]} : vector<8x32xf32> to vector<8x8xf32>
    %1220 = vector.extract_strided_slice %1197 {offsets = [0, 8], sizes = [8, 8], strides = [1, 1]} : vector<8x64xf32> to vector<8x8xf32>
    %1221 = vector.extract_strided_slice %1197 {offsets = [0, 40], sizes = [8, 8], strides = [1, 1]} : vector<8x64xf32> to vector<8x8xf32>
    %cst_401 = arith.constant dense<0.000000e+00> : vector<8x8xf32>
    %1222 = tpu.matmul %1219, %1220, %cst_401 {dimension_numbers = #tpu.dot_dimension_numbers<[1], [1], [0], [0], [0, 0, 1, 0], [], []>} : vector<8x8xf32>, vector<8x8xf32>, vector<8x8xf32> -> vector<8x8xf32>
    %cst_402 = arith.constant 0.353553385 : f32
    %1223 = vector.broadcast %cst_402 : f32 to vector<8x8xf32>
    %1224 = arith.mulf %1222, %1223 : vector<8x8xf32>
    %1225 = arith.addf %1224, %1199 : vector<8x8xf32>
    %cst_403 = arith.constant dense<0xFF800000> : vector<8xf32>
    %1226 = vector.multi_reduction <maximumf>, %1225, %cst_403 [1] : vector<8x8xf32> to vector<8xf32>
    %1227 = vector.shape_cast %1226 : vector<8xf32> to vector<8x1xf32>
    %1228 = vector.broadcast %1227 : vector<8x1xf32> to vector<8x8xf32>
    %1229 = arith.subf %1225, %1228 : vector<8x8xf32>
    %1230 = math.exp %1229 : vector<8x8xf32>
    %cst_404 = arith.constant dense<0.000000e+00> : vector<8xf32>
    %1231 = vector.multi_reduction <add>, %1230, %cst_404 [1] : vector<8x8xf32> to vector<8xf32>
    %1232 = vector.shape_cast %1231 : vector<8xf32> to vector<8x1xf32>
    %1233 = vector.broadcast %1232 : vector<8x1xf32> to vector<8x8xf32>
    %1234 = arith.divf %1230, %1233 : vector<8x8xf32>
    %cst_405 = arith.constant dense<0.000000e+00> : vector<8x8xf32>
    %1235 = tpu.matmul %1234, %1221, %cst_405 {dimension_numbers = #tpu.dot_dimension_numbers<[1], [0], [0], [1], [0, 0, 1, 1], [], []>} : vector<8x8xf32>, vector<8x8xf32>, vector<8x8xf32> -> vector<8x8xf32>
    %1236 = vector.extract_strided_slice %1194 {offsets = [8, 0], sizes = [8, 32], strides = [1, 1]} : vector<32x32xf32> to vector<8x32xf32>
    %cst_406 = arith.constant dense<0.000000e+00> : vector<8x32xf32>
    %1237 = tpu.matmul %1235, %1236, %cst_406 {dimension_numbers = #tpu.dot_dimension_numbers<[1], [0], [0], [1], [0, 0, 1, 1], [], []>} : vector<8x8xf32>, vector<8x32xf32>, vector<8x32xf32> -> vector<8x32xf32>
    %1238 = arith.addf %1218, %1237 : vector<8x32xf32>
    %1239 = vector.extract_strided_slice %1196 {offsets = [0, 16], sizes = [8, 8], strides = [1, 1]} : vector<8x32xf32> to vector<8x8xf32>
    %1240 = vector.extract_strided_slice %1197 {offsets = [0, 16], sizes = [8, 8], strides = [1, 1]} : vector<8x64xf32> to vector<8x8xf32>
    %1241 = vector.extract_strided_slice %1197 {offsets = [0, 48], sizes = [8, 8], strides = [1, 1]} : vector<8x64xf32> to vector<8x8xf32>
    %cst_407 = arith.constant dense<0.000000e+00> : vector<8x8xf32>
    %1242 = tpu.matmul %1239, %1240, %cst_407 {dimension_numbers = #tpu.dot_dimension_numbers<[1], [1], [0], [0], [0, 0, 1, 0], [], []>} : vector<8x8xf32>, vector<8x8xf32>, vector<8x8xf32> -> vector<8x8xf32>
    %cst_408 = arith.constant 0.353553385 : f32
    %1243 = vector.broadcast %cst_408 : f32 to vector<8x8xf32>
    %1244 = arith.mulf %1242, %1243 : vector<8x8xf32>
    %1245 = arith.addf %1244, %1199 : vector<8x8xf32>
    %cst_409 = arith.constant dense<0xFF800000> : vector<8xf32>
    %1246 = vector.multi_reduction <maximumf>, %1245, %cst_409 [1] : vector<8x8xf32> to vector<8xf32>
    %1247 = vector.shape_cast %1246 : vector<8xf32> to vector<8x1xf32>
    %1248 = vector.broadcast %1247 : vector<8x1xf32> to vector<8x8xf32>
    %1249 = arith.subf %1245, %1248 : vector<8x8xf32>
    %1250 = math.exp %1249 : vector<8x8xf32>
    %cst_410 = arith.constant dense<0.000000e+00> : vector<8xf32>
    %1251 = vector.multi_reduction <add>, %1250, %cst_410 [1] : vector<8x8xf32> to vector<8xf32>
    %1252 = vector.shape_cast %1251 : vector<8xf32> to vector<8x1xf32>
    %1253 = vector.broadcast %1252 : vector<8x1xf32> to vector<8x8xf32>
    %1254 = arith.divf %1250, %1253 : vector<8x8xf32>
    %cst_411 = arith.constant dense<0.000000e+00> : vector<8x8xf32>
    %1255 = tpu.matmul %1254, %1241, %cst_411 {dimension_numbers = #tpu.dot_dimension_numbers<[1], [0], [0], [1], [0, 0, 1, 1], [], []>} : vector<8x8xf32>, vector<8x8xf32>, vector<8x8xf32> -> vector<8x8xf32>
    %1256 = vector.extract_strided_slice %1194 {offsets = [16, 0], sizes = [8, 32], strides = [1, 1]} : vector<32x32xf32> to vector<8x32xf32>
    %cst_412 = arith.constant dense<0.000000e+00> : vector<8x32xf32>
    %1257 = tpu.matmul %1255, %1256, %cst_412 {dimension_numbers = #tpu.dot_dimension_numbers<[1], [0], [0], [1], [0, 0, 1, 1], [], []>} : vector<8x8xf32>, vector<8x32xf32>, vector<8x32xf32> -> vector<8x32xf32>
    %1258 = arith.addf %1238, %1257 : vector<8x32xf32>
    %1259 = vector.extract_strided_slice %1196 {offsets = [0, 24], sizes = [8, 8], strides = [1, 1]} : vector<8x32xf32> to vector<8x8xf32>
    %1260 = vector.extract_strided_slice %1197 {offsets = [0, 24], sizes = [8, 8], strides = [1, 1]} : vector<8x64xf32> to vector<8x8xf32>
    %1261 = vector.extract_strided_slice %1197 {offsets = [0, 56], sizes = [8, 8], strides = [1, 1]} : vector<8x64xf32> to vector<8x8xf32>
    %cst_413 = arith.constant dense<0.000000e+00> : vector<8x8xf32>
    %1262 = tpu.matmul %1259, %1260, %cst_413 {dimension_numbers = #tpu.dot_dimension_numbers<[1], [1], [0], [0], [0, 0, 1, 0], [], []>} : vector<8x8xf32>, vector<8x8xf32>, vector<8x8xf32> -> vector<8x8xf32>
    %cst_414 = arith.constant 0.353553385 : f32
    %1263 = vector.broadcast %cst_414 : f32 to vector<8x8xf32>
    %1264 = arith.mulf %1262, %1263 : vector<8x8xf32>
    %1265 = arith.addf %1264, %1199 : vector<8x8xf32>
    %cst_415 = arith.constant dense<0xFF800000> : vector<8xf32>
    %1266 = vector.multi_reduction <maximumf>, %1265, %cst_415 [1] : vector<8x8xf32> to vector<8xf32>
    %1267 = vector.shape_cast %1266 : vector<8xf32> to vector<8x1xf32>
    %1268 = vector.broadcast %1267 : vector<8x1xf32> to vector<8x8xf32>
    %1269 = arith.subf %1265, %1268 : vector<8x8xf32>
    %1270 = math.exp %1269 : vector<8x8xf32>
    %cst_416 = arith.constant dense<0.000000e+00> : vector<8xf32>
    %1271 = vector.multi_reduction <add>, %1270, %cst_416 [1] : vector<8x8xf32> to vector<8xf32>
    %1272 = vector.shape_cast %1271 : vector<8xf32> to vector<8x1xf32>
    %1273 = vector.broadcast %1272 : vector<8x1xf32> to vector<8x8xf32>
    %1274 = arith.divf %1270, %1273 : vector<8x8xf32>
    %cst_417 = arith.constant dense<0.000000e+00> : vector<8x8xf32>
    %1275 = tpu.matmul %1274, %1261, %cst_417 {dimension_numbers = #tpu.dot_dimension_numbers<[1], [0], [0], [1], [0, 0, 1, 1], [], []>} : vector<8x8xf32>, vector<8x8xf32>, vector<8x8xf32> -> vector<8x8xf32>
    %1276 = vector.extract_strided_slice %1194 {offsets = [24, 0], sizes = [8, 32], strides = [1, 1]} : vector<32x32xf32> to vector<8x32xf32>
    %cst_418 = arith.constant dense<0.000000e+00> : vector<8x32xf32>
    %1277 = tpu.matmul %1275, %1276, %cst_418 {dimension_numbers = #tpu.dot_dimension_numbers<[1], [0], [0], [1], [0, 0, 1, 1], [], []>} : vector<8x8xf32>, vector<8x32xf32>, vector<8x32xf32> -> vector<8x32xf32>
    %1278 = arith.addf %1258, %1277 : vector<8x32xf32>
    %1279 = vector.extract_strided_slice %1186 {offsets = [8, 0], sizes = [8, 32], strides = [1, 1]} : vector<16x32xf32> to vector<8x32xf32>
    %1280 = vector.extract_strided_slice %1192 {offsets = [8, 0], sizes = [8, 64], strides = [1, 1]} : vector<16x64xf32> to vector<8x64xf32>
    %1281 = vector.extract_strided_slice %2 {offsets = [1, 0, 0], sizes = [1, 8, 8], strides = [1, 1, 1]} : vector<2x8x8xf32> to vector<1x8x8xf32>
    %1282 = vector.shape_cast %1281 : vector<1x8x8xf32> to vector<8x8xf32>
    %1283 = vector.extract_strided_slice %1279 {offsets = [0, 0], sizes = [8, 8], strides = [1, 1]} : vector<8x32xf32> to vector<8x8xf32>
    %1284 = vector.extract_strided_slice %1280 {offsets = [0, 0], sizes = [8, 8], strides = [1, 1]} : vector<8x64xf32> to vector<8x8xf32>
    %1285 = vector.extract_strided_slice %1280 {offsets = [0, 32], sizes = [8, 8], strides = [1, 1]} : vector<8x64xf32> to vector<8x8xf32>
    %cst_419 = arith.constant dense<0.000000e+00> : vector<8x8xf32>
    %1286 = tpu.matmul %1283, %1284, %cst_419 {dimension_numbers = #tpu.dot_dimension_numbers<[1], [1], [0], [0], [0, 0, 1, 0], [], []>} : vector<8x8xf32>, vector<8x8xf32>, vector<8x8xf32> -> vector<8x8xf32>
    %cst_420 = arith.constant 0.353553385 : f32
    %1287 = vector.broadcast %cst_420 : f32 to vector<8x8xf32>
    %1288 = arith.mulf %1286, %1287 : vector<8x8xf32>
    %1289 = arith.addf %1288, %1282 : vector<8x8xf32>
    %cst_421 = arith.constant dense<0xFF800000> : vector<8xf32>
    %1290 = vector.multi_reduction <maximumf>, %1289, %cst_421 [1] : vector<8x8xf32> to vector<8xf32>
    %1291 = vector.shape_cast %1290 : vector<8xf32> to vector<8x1xf32>
    %1292 = vector.broadcast %1291 : vector<8x1xf32> to vector<8x8xf32>
    %1293 = arith.subf %1289, %1292 : vector<8x8xf32>
    %1294 = math.exp %1293 : vector<8x8xf32>
    %cst_422 = arith.constant dense<0.000000e+00> : vector<8xf32>
    %1295 = vector.multi_reduction <add>, %1294, %cst_422 [1] : vector<8x8xf32> to vector<8xf32>
    %1296 = vector.shape_cast %1295 : vector<8xf32> to vector<8x1xf32>
    %1297 = vector.broadcast %1296 : vector<8x1xf32> to vector<8x8xf32>
    %1298 = arith.divf %1294, %1297 : vector<8x8xf32>
    %cst_423 = arith.constant dense<0.000000e+00> : vector<8x8xf32>
    %1299 = tpu.matmul %1298, %1285, %cst_423 {dimension_numbers = #tpu.dot_dimension_numbers<[1], [0], [0], [1], [0, 0, 1, 1], [], []>} : vector<8x8xf32>, vector<8x8xf32>, vector<8x8xf32> -> vector<8x8xf32>
    %1300 = vector.extract_strided_slice %1194 {offsets = [0, 0], sizes = [8, 32], strides = [1, 1]} : vector<32x32xf32> to vector<8x32xf32>
    %cst_424 = arith.constant dense<0.000000e+00> : vector<8x32xf32>
    %1301 = tpu.matmul %1299, %1300, %cst_424 {dimension_numbers = #tpu.dot_dimension_numbers<[1], [0], [0], [1], [0, 0, 1, 1], [], []>} : vector<8x8xf32>, vector<8x32xf32>, vector<8x32xf32> -> vector<8x32xf32>
    %1302 = vector.extract_strided_slice %1279 {offsets = [0, 8], sizes = [8, 8], strides = [1, 1]} : vector<8x32xf32> to vector<8x8xf32>
    %1303 = vector.extract_strided_slice %1280 {offsets = [0, 8], sizes = [8, 8], strides = [1, 1]} : vector<8x64xf32> to vector<8x8xf32>
    %1304 = vector.extract_strided_slice %1280 {offsets = [0, 40], sizes = [8, 8], strides = [1, 1]} : vector<8x64xf32> to vector<8x8xf32>
    %cst_425 = arith.constant dense<0.000000e+00> : vector<8x8xf32>
    %1305 = tpu.matmul %1302, %1303, %cst_425 {dimension_numbers = #tpu.dot_dimension_numbers<[1], [1], [0], [0], [0, 0, 1, 0], [], []>} : vector<8x8xf32>, vector<8x8xf32>, vector<8x8xf32> -> vector<8x8xf32>
    %cst_426 = arith.constant 0.353553385 : f32
    %1306 = vector.broadcast %cst_426 : f32 to vector<8x8xf32>
    %1307 = arith.mulf %1305, %1306 : vector<8x8xf32>
    %1308 = arith.addf %1307, %1282 : vector<8x8xf32>
    %cst_427 = arith.constant dense<0xFF800000> : vector<8xf32>
    %1309 = vector.multi_reduction <maximumf>, %1308, %cst_427 [1] : vector<8x8xf32> to vector<8xf32>
    %1310 = vector.shape_cast %1309 : vector<8xf32> to vector<8x1xf32>
    %1311 = vector.broadcast %1310 : vector<8x1xf32> to vector<8x8xf32>
    %1312 = arith.subf %1308, %1311 : vector<8x8xf32>
    %1313 = math.exp %1312 : vector<8x8xf32>
    %cst_428 = arith.constant dense<0.000000e+00> : vector<8xf32>
    %1314 = vector.multi_reduction <add>, %1313, %cst_428 [1] : vector<8x8xf32> to vector<8xf32>
    %1315 = vector.shape_cast %1314 : vector<8xf32> to vector<8x1xf32>
    %1316 = vector.broadcast %1315 : vector<8x1xf32> to vector<8x8xf32>
    %1317 = arith.divf %1313, %1316 : vector<8x8xf32>
    %cst_429 = arith.constant dense<0.000000e+00> : vector<8x8xf32>
    %1318 = tpu.matmul %1317, %1304, %cst_429 {dimension_numbers = #tpu.dot_dimension_numbers<[1], [0], [0], [1], [0, 0, 1, 1], [], []>} : vector<8x8xf32>, vector<8x8xf32>, vector<8x8xf32> -> vector<8x8xf32>
    %1319 = vector.extract_strided_slice %1194 {offsets = [8, 0], sizes = [8, 32], strides = [1, 1]} : vector<32x32xf32> to vector<8x32xf32>
    %cst_430 = arith.constant dense<0.000000e+00> : vector<8x32xf32>
    %1320 = tpu.matmul %1318, %1319, %cst_430 {dimension_numbers = #tpu.dot_dimension_numbers<[1], [0], [0], [1], [0, 0, 1, 1], [], []>} : vector<8x8xf32>, vector<8x32xf32>, vector<8x32xf32> -> vector<8x32xf32>
    %1321 = arith.addf %1301, %1320 : vector<8x32xf32>
    %1322 = vector.extract_strided_slice %1279 {offsets = [0, 16], sizes = [8, 8], strides = [1, 1]} : vector<8x32xf32> to vector<8x8xf32>
    %1323 = vector.extract_strided_slice %1280 {offsets = [0, 16], sizes = [8, 8], strides = [1, 1]} : vector<8x64xf32> to vector<8x8xf32>
    %1324 = vector.extract_strided_slice %1280 {offsets = [0, 48], sizes = [8, 8], strides = [1, 1]} : vector<8x64xf32> to vector<8x8xf32>
    %cst_431 = arith.constant dense<0.000000e+00> : vector<8x8xf32>
    %1325 = tpu.matmul %1322, %1323, %cst_431 {dimension_numbers = #tpu.dot_dimension_numbers<[1], [1], [0], [0], [0, 0, 1, 0], [], []>} : vector<8x8xf32>, vector<8x8xf32>, vector<8x8xf32> -> vector<8x8xf32>
    %cst_432 = arith.constant 0.353553385 : f32
    %1326 = vector.broadcast %cst_432 : f32 to vector<8x8xf32>
    %1327 = arith.mulf %1325, %1326 : vector<8x8xf32>
    %1328 = arith.addf %1327, %1282 : vector<8x8xf32>
    %cst_433 = arith.constant dense<0xFF800000> : vector<8xf32>
    %1329 = vector.multi_reduction <maximumf>, %1328, %cst_433 [1] : vector<8x8xf32> to vector<8xf32>
    %1330 = vector.shape_cast %1329 : vector<8xf32> to vector<8x1xf32>
    %1331 = vector.broadcast %1330 : vector<8x1xf32> to vector<8x8xf32>
    %1332 = arith.subf %1328, %1331 : vector<8x8xf32>
    %1333 = math.exp %1332 : vector<8x8xf32>
    %cst_434 = arith.constant dense<0.000000e+00> : vector<8xf32>
    %1334 = vector.multi_reduction <add>, %1333, %cst_434 [1] : vector<8x8xf32> to vector<8xf32>
    %1335 = vector.shape_cast %1334 : vector<8xf32> to vector<8x1xf32>
    %1336 = vector.broadcast %1335 : vector<8x1xf32> to vector<8x8xf32>
    %1337 = arith.divf %1333, %1336 : vector<8x8xf32>
    %cst_435 = arith.constant dense<0.000000e+00> : vector<8x8xf32>
    %1338 = tpu.matmul %1337, %1324, %cst_435 {dimension_numbers = #tpu.dot_dimension_numbers<[1], [0], [0], [1], [0, 0, 1, 1], [], []>} : vector<8x8xf32>, vector<8x8xf32>, vector<8x8xf32> -> vector<8x8xf32>
    %1339 = vector.extract_strided_slice %1194 {offsets = [16, 0], sizes = [8, 32], strides = [1, 1]} : vector<32x32xf32> to vector<8x32xf32>
    %cst_436 = arith.constant dense<0.000000e+00> : vector<8x32xf32>
    %1340 = tpu.matmul %1338, %1339, %cst_436 {dimension_numbers = #tpu.dot_dimension_numbers<[1], [0], [0], [1], [0, 0, 1, 1], [], []>} : vector<8x8xf32>, vector<8x32xf32>, vector<8x32xf32> -> vector<8x32xf32>
    %1341 = arith.addf %1321, %1340 : vector<8x32xf32>
    %1342 = vector.extract_strided_slice %1279 {offsets = [0, 24], sizes = [8, 8], strides = [1, 1]} : vector<8x32xf32> to vector<8x8xf32>
    %1343 = vector.extract_strided_slice %1280 {offsets = [0, 24], sizes = [8, 8], strides = [1, 1]} : vector<8x64xf32> to vector<8x8xf32>
    %1344 = vector.extract_strided_slice %1280 {offsets = [0, 56], sizes = [8, 8], strides = [1, 1]} : vector<8x64xf32> to vector<8x8xf32>
    %cst_437 = arith.constant dense<0.000000e+00> : vector<8x8xf32>
    %1345 = tpu.matmul %1342, %1343, %cst_437 {dimension_numbers = #tpu.dot_dimension_numbers<[1], [1], [0], [0], [0, 0, 1, 0], [], []>} : vector<8x8xf32>, vector<8x8xf32>, vector<8x8xf32> -> vector<8x8xf32>
    %cst_438 = arith.constant 0.353553385 : f32
    %1346 = vector.broadcast %cst_438 : f32 to vector<8x8xf32>
    %1347 = arith.mulf %1345, %1346 : vector<8x8xf32>
    %1348 = arith.addf %1347, %1282 : vector<8x8xf32>
    %cst_439 = arith.constant dense<0xFF800000> : vector<8xf32>
    %1349 = vector.multi_reduction <maximumf>, %1348, %cst_439 [1] : vector<8x8xf32> to vector<8xf32>
    %1350 = vector.shape_cast %1349 : vector<8xf32> to vector<8x1xf32>
    %1351 = vector.broadcast %1350 : vector<8x1xf32> to vector<8x8xf32>
    %1352 = arith.subf %1348, %1351 : vector<8x8xf32>
    %1353 = math.exp %1352 : vector<8x8xf32>
    %cst_440 = arith.constant dense<0.000000e+00> : vector<8xf32>
    %1354 = vector.multi_reduction <add>, %1353, %cst_440 [1] : vector<8x8xf32> to vector<8xf32>
    %1355 = vector.shape_cast %1354 : vector<8xf32> to vector<8x1xf32>
    %1356 = vector.broadcast %1355 : vector<8x1xf32> to vector<8x8xf32>
    %1357 = arith.divf %1353, %1356 : vector<8x8xf32>
    %cst_441 = arith.constant dense<0.000000e+00> : vector<8x8xf32>
    %1358 = tpu.matmul %1357, %1344, %cst_441 {dimension_numbers = #tpu.dot_dimension_numbers<[1], [0], [0], [1], [0, 0, 1, 1], [], []>} : vector<8x8xf32>, vector<8x8xf32>, vector<8x8xf32> -> vector<8x8xf32>
    %1359 = vector.extract_strided_slice %1194 {offsets = [24, 0], sizes = [8, 32], strides = [1, 1]} : vector<32x32xf32> to vector<8x32xf32>
    %cst_442 = arith.constant dense<0.000000e+00> : vector<8x32xf32>
    %1360 = tpu.matmul %1358, %1359, %cst_442 {dimension_numbers = #tpu.dot_dimension_numbers<[1], [0], [0], [1], [0, 0, 1, 1], [], []>} : vector<8x8xf32>, vector<8x32xf32>, vector<8x32xf32> -> vector<8x32xf32>
    %1361 = arith.addf %1341, %1360 : vector<8x32xf32>
    %1362 = tpu.concatenate %1278, %1361 in 0 : vector<8x32xf32>, vector<8x32xf32> -> vector<16x32xf32>
    %1363 = vector.broadcast %1195 : vector<1x32xf32> to vector<16x32xf32>
    %1364 = arith.addf %1362, %1363 : vector<16x32xf32>
    %1365 = arith.addf %1158, %1364 : vector<16x32xf32>
    %1366 = vector.extract_strided_slice %957 {offsets = [11, 0], sizes = [1, 32], strides = [1, 1]} : vector<16x96xf32> to vector<1x32xf32>
    %1367 = vector.extract_strided_slice %957 {offsets = [12, 0], sizes = [1, 32], strides = [1, 1]} : vector<16x96xf32> to vector<1x32xf32>
    %cst_443 = arith.constant dense<0.000000e+00> : vector<16xf32>
    %1368 = vector.multi_reduction <add>, %1365, %cst_443 [1] : vector<16x32xf32> to vector<16xf32>
    %1369 = vector.shape_cast %1368 : vector<16xf32> to vector<16x1xf32>
    %cst_444 = arith.constant 3.200000e+01 : f32
    %1370 = vector.broadcast %cst_444 : f32 to vector<16x1xf32>
    %1371 = arith.divf %1369, %1370 : vector<16x1xf32>
    %1372 = vector.broadcast %1371 : vector<16x1xf32> to vector<16x32xf32>
    %1373 = arith.subf %1365, %1372 : vector<16x32xf32>
    %1374 = arith.mulf %1373, %1373 : vector<16x32xf32>
    %cst_445 = arith.constant dense<0.000000e+00> : vector<16xf32>
    %1375 = vector.multi_reduction <add>, %1374, %cst_445 [1] : vector<16x32xf32> to vector<16xf32>
    %1376 = vector.shape_cast %1375 : vector<16xf32> to vector<16x1xf32>
    %cst_446 = arith.constant 3.100000e+01 : f32
    %1377 = vector.broadcast %cst_446 : f32 to vector<16x1xf32>
    %1378 = arith.divf %1376, %1377 : vector<16x1xf32>
    %1379 = vector.broadcast %1366 : vector<1x32xf32> to vector<16x32xf32>
    %1380 = arith.mulf %1379, %1373 : vector<16x32xf32>
    %1381 = math.sqrt %1378 : vector<16x1xf32>
    %cst_447 = arith.constant 9.99999997E-7 : f32
    %1382 = vector.broadcast %cst_447 : f32 to vector<16x1xf32>
    %1383 = arith.addf %1381, %1382 : vector<16x1xf32>
    %1384 = vector.broadcast %1383 : vector<16x1xf32> to vector<16x32xf32>
    %1385 = arith.divf %1380, %1384 : vector<16x32xf32>
    %1386 = vector.broadcast %1367 : vector<1x32xf32> to vector<16x32xf32>
    %1387 = arith.addf %1385, %1386 : vector<16x32xf32>
    %c1_448 = arith.constant 1 : index
    %c0_449 = arith.constant 0 : index
    %c0_450 = arith.constant 0 : index
    %1388 = vector.load %arg16[%c1_448, %c0_449, %c0_450] : memref<2x32x64xf32, #tpu.memory_space<vmem>>, vector<1x32x64xf32>
    %1389 = vector.shape_cast %1388 : vector<1x32x64xf32> to vector<32x64xf32>
    %cst_451 = arith.constant dense<0.000000e+00> : vector<16x64xf32>
    %1390 = tpu.matmul %1387, %1389, %cst_451 {dimension_numbers = #tpu.dot_dimension_numbers<[1], [0], [0], [1], [0, 0, 1, 1], [], []>} : vector<16x32xf32>, vector<32x64xf32>, vector<16x64xf32> -> vector<16x64xf32>
    %1391 = vector.extract_strided_slice %957 {offsets = [9, 0], sizes = [1, 64], strides = [1, 1]} : vector<16x96xf32> to vector<1x64xf32>
    %1392 = vector.broadcast %1391 : vector<1x64xf32> to vector<16x64xf32>
    %1393 = arith.addf %1390, %1392 : vector<16x64xf32>
    %cst_452 = arith.constant 0.000000e+00 : f32
    %1394 = vector.broadcast %cst_452 : f32 to vector<16x64xf32>
    %1395 = arith.maximumf %1393, %1394 : vector<16x64xf32>
    %c1_453 = arith.constant 1 : index
    %c0_454 = arith.constant 0 : index
    %c0_455 = arith.constant 0 : index
    %1396 = vector.load %arg17[%c1_453, %c0_454, %c0_455] : memref<2x64x32xf32, #tpu.memory_space<vmem>>, vector<1x64x32xf32>
    %1397 = vector.shape_cast %1396 : vector<1x64x32xf32> to vector<64x32xf32>
    %cst_456 = arith.constant dense<0.000000e+00> : vector<16x32xf32>
    %1398 = tpu.matmul %1395, %1397, %cst_456 {dimension_numbers = #tpu.dot_dimension_numbers<[1], [0], [0], [1], [0, 0, 1, 1], [], []>} : vector<16x64xf32>, vector<64x32xf32>, vector<16x32xf32> -> vector<16x32xf32>
    %1399 = arith.addf %1365, %1398 : vector<16x32xf32>
    %1400 = vector.extract_strided_slice %957 {offsets = [10, 0], sizes = [1, 32], strides = [1, 1]} : vector<16x96xf32> to vector<1x32xf32>
    %1401 = vector.broadcast %1400 : vector<1x32xf32> to vector<16x32xf32>
    %1402 = arith.addf %1399, %1401 : vector<16x32xf32>
    %c2 = arith.constant 2 : index
    %c0_457 = arith.constant 0 : index
    %1403 = vector.load %arg19[%c2, %c0_457] : memref<4x32xf32, #tpu.memory_space<vmem>>, vector<1x32xf32>
    %c3 = arith.constant 3 : index
    %c0_458 = arith.constant 0 : index
    %1404 = vector.load %arg19[%c3, %c0_458] : memref<4x32xf32, #tpu.memory_space<vmem>>, vector<1x32xf32>
    %cst_459 = arith.constant dense<0.000000e+00> : vector<16xf32>
    %1405 = vector.multi_reduction <add>, %1402, %cst_459 [1] : vector<16x32xf32> to vector<16xf32>
    %1406 = vector.shape_cast %1405 : vector<16xf32> to vector<16x1xf32>
    %cst_460 = arith.constant 3.200000e+01 : f32
    %1407 = vector.broadcast %cst_460 : f32 to vector<16x1xf32>
    %1408 = arith.divf %1406, %1407 : vector<16x1xf32>
    %1409 = vector.broadcast %1408 : vector<16x1xf32> to vector<16x32xf32>
    %1410 = arith.subf %1402, %1409 : vector<16x32xf32>
    %1411 = arith.mulf %1410, %1410 : vector<16x32xf32>
    %cst_461 = arith.constant dense<0.000000e+00> : vector<16xf32>
    %1412 = vector.multi_reduction <add>, %1411, %cst_461 [1] : vector<16x32xf32> to vector<16xf32>
    %1413 = vector.shape_cast %1412 : vector<16xf32> to vector<16x1xf32>
    %cst_462 = arith.constant 3.100000e+01 : f32
    %1414 = vector.broadcast %cst_462 : f32 to vector<16x1xf32>
    %1415 = arith.divf %1413, %1414 : vector<16x1xf32>
    %1416 = vector.broadcast %1403 : vector<1x32xf32> to vector<16x32xf32>
    %1417 = arith.mulf %1416, %1410 : vector<16x32xf32>
    %1418 = math.sqrt %1415 : vector<16x1xf32>
    %cst_463 = arith.constant 9.99999997E-7 : f32
    %1419 = vector.broadcast %cst_463 : f32 to vector<16x1xf32>
    %1420 = arith.addf %1418, %1419 : vector<16x1xf32>
    %1421 = vector.broadcast %1420 : vector<16x1xf32> to vector<16x32xf32>
    %1422 = arith.divf %1417, %1421 : vector<16x32xf32>
    %1423 = vector.broadcast %1404 : vector<1x32xf32> to vector<16x32xf32>
    %1424 = arith.addf %1422, %1423 : vector<16x32xf32>
    %1425 = vector.extract_strided_slice %1424 {offsets = [0, 0], sizes = [8, 32], strides = [1, 1]} : vector<16x32xf32> to vector<8x32xf32>
    %c0_464 = arith.constant 0 : index
    %c0_465 = arith.constant 0 : index
    %c0_466 = arith.constant 0 : index
    %1426 = vector.load %arg20[%c0_464, %c0_465, %c0_466] : memref<2x8x32xf32, #tpu.memory_space<vmem>>, vector<1x8x32xf32>
    %1427 = vector.shape_cast %1426 : vector<1x8x32xf32> to vector<8x32xf32>
    %1428 = vector.shape_cast %1425 : vector<8x32xf32> to vector<1x8x32xf32>
    tpu.vector_store %arg20[%c0_464, %c0_465, %c0_466], %1428 {strides = array<i32>} : memref<2x8x32xf32, #tpu.memory_space<vmem>>, vector<1x8x32xf32>,
    %1429 = vector.extract_strided_slice %1424 {offsets = [8, 0], sizes = [8, 32], strides = [1, 1]} : vector<16x32xf32> to vector<8x32xf32>
    %c1_467 = arith.constant 1 : index
    %c0_468 = arith.constant 0 : index
    %c0_469 = arith.constant 0 : index
    %1430 = vector.load %arg20[%c1_467, %c0_468, %c0_469] : memref<2x8x32xf32, #tpu.memory_space<vmem>>, vector<1x8x32xf32>
    %1431 = vector.shape_cast %1430 : vector<1x8x32xf32> to vector<8x32xf32>
    %1432 = vector.shape_cast %1429 : vector<8x32xf32> to vector<1x8x32xf32>
    tpu.vector_store %arg20[%c1_467, %c0_468, %c0_469], %1432 {strides = array<i32>} : memref<2x8x32xf32, #tpu.memory_space<vmem>>, vector<1x8x32xf32>,
    return
  }
  func.func @transform_0(%arg0: i32) -> (i32, i32, i32) {
    %c0_i32 = arith.constant 0 : i32
    %c0_i32_0 = arith.constant 0 : i32
    %c0_i32_1 = arith.constant 0 : i32
    %c0_i32_2 = arith.constant 0 : i32
    return %c0_i32, %c0_i32_0, %c0_i32_1 : i32, i32, i32
  }
  func.func @transform_1(%arg0: i32) -> (i32, i32, i32) {
    %c0_i32 = arith.constant 0 : i32
    %c0_i32_0 = arith.constant 0 : i32
    %c0_i32_1 = arith.constant 0 : i32
    %c0_i32_2 = arith.constant 0 : i32
    return %c0_i32, %c0_i32_0, %c0_i32_1 : i32, i32, i32
  }
  func.func @transform_2(%arg0: i32) -> (i32, i32, i32) {
    %c0_i32 = arith.constant 0 : i32
    %c0_i32_0 = arith.constant 0 : i32
    %c0_i32_1 = arith.constant 0 : i32
    %c0_i32_2 = arith.constant 0 : i32
    return %c0_i32, %c0_i32_0, %c0_i32_1 : i32, i32, i32
  }
  func.func @transform_3(%arg0: i32) -> (i32, i32, i32) {
    %c0_i32 = arith.constant 0 : i32
    %c0_i32_0 = arith.constant 0 : i32
    %c0_i32_1 = arith.constant 0 : i32
    %c0_i32_2 = arith.constant 0 : i32
    return %c0_i32, %c0_i32_0, %c0_i32_1 : i32, i32, i32
  }
  func.func @transform_4(%arg0: i32) -> (i32, i32, i32) {
    %c0_i32 = arith.constant 0 : i32
    %c0_i32_0 = arith.constant 0 : i32
    %c0_i32_1 = arith.constant 0 : i32
    %c0_i32_2 = arith.constant 0 : i32
    return %c0_i32, %c0_i32_0, %c0_i32_1 : i32, i32, i32
  }
  func.func @transform_5(%arg0: i32) -> (i32, i32, i32) {
    %c0_i32 = arith.constant 0 : i32
    %c0_i32_0 = arith.constant 0 : i32
    %c0_i32_1 = arith.constant 0 : i32
    %c0_i32_2 = arith.constant 0 : i32
    return %c0_i32, %c0_i32_0, %c0_i32_1 : i32, i32, i32
  }
  func.func @transform_6(%arg0: i32) -> (i32, i32, i32) {
    %c0_i32 = arith.constant 0 : i32
    %c0_i32_0 = arith.constant 0 : i32
    %c0_i32_1 = arith.constant 0 : i32
    %c0_i32_2 = arith.constant 0 : i32
    return %c0_i32, %c0_i32_0, %c0_i32_1 : i32, i32, i32
  }
  func.func @transform_7(%arg0: i32) -> (i32, i32, i32) {
    %c0_i32 = arith.constant 0 : i32
    %c0_i32_0 = arith.constant 0 : i32
    %c0_i32_1 = arith.constant 0 : i32
    %c0_i32_2 = arith.constant 0 : i32
    return %c0_i32, %c0_i32_0, %c0_i32_1 : i32, i32, i32
  }
  func.func @transform_8(%arg0: i32) -> (i32, i32, i32) {
    %c0_i32 = arith.constant 0 : i32
    %c0_i32_0 = arith.constant 0 : i32
    %c0_i32_1 = arith.constant 0 : i32
    %c0_i32_2 = arith.constant 0 : i32
    return %c0_i32, %c0_i32_0, %c0_i32_1 : i32, i32, i32
  }
  func.func @transform_9(%arg0: i32) -> (i32, i32, i32) {
    %c0_i32 = arith.constant 0 : i32
    %c0_i32_0 = arith.constant 0 : i32
    %c0_i32_1 = arith.constant 0 : i32
    %c0_i32_2 = arith.constant 0 : i32
    return %c0_i32, %c0_i32_0, %c0_i32_1 : i32, i32, i32
  }
  func.func @transform_10(%arg0: i32) -> (i32, i32, i32) {
    %c0_i32 = arith.constant 0 : i32
    %c0_i32_0 = arith.constant 0 : i32
    %c0_i32_1 = arith.constant 0 : i32
    %c0_i32_2 = arith.constant 0 : i32
    return %c0_i32, %c0_i32_0, %c0_i32_1 : i32, i32, i32
  }
  func.func @transform_11(%arg0: i32) -> (i32, i32, i32) {
    %c0_i32 = arith.constant 0 : i32
    %c0_i32_0 = arith.constant 0 : i32
    %c0_i32_1 = arith.constant 0 : i32
    %c0_i32_2 = arith.constant 0 : i32
    return %c0_i32, %c0_i32_0, %c0_i32_1 : i32, i32, i32
  }
  func.func @transform_12(%arg0: i32) -> (i32, i32, i32) {
    %c0_i32 = arith.constant 0 : i32
    %c0_i32_0 = arith.constant 0 : i32
    %c0_i32_1 = arith.constant 0 : i32
    %c0_i32_2 = arith.constant 0 : i32
    return %c0_i32, %c0_i32_0, %c0_i32_1 : i32, i32, i32
  }
  func.func @transform_13(%arg0: i32) -> (i32, i32, i32) {
    %c0_i32 = arith.constant 0 : i32
    %c0_i32_0 = arith.constant 0 : i32
    %c0_i32_1 = arith.constant 0 : i32
    %c0_i32_2 = arith.constant 0 : i32
    return %c0_i32, %c0_i32_0, %c0_i32_1 : i32, i32, i32
  }
  func.func @transform_14(%arg0: i32) -> (i32, i32, i32) {
    %c0_i32 = arith.constant 0 : i32
    %c0_i32_0 = arith.constant 0 : i32
    %c0_i32_1 = arith.constant 0 : i32
    %c0_i32_2 = arith.constant 0 : i32
    return %c0_i32, %c0_i32_0, %c0_i32_1 : i32, i32, i32
  }
  func.func @transform_15(%arg0: i32) -> (i32, i32, i32) {
    %c0_i32 = arith.constant 0 : i32
    %c0_i32_0 = arith.constant 0 : i32
    %c0_i32_1 = arith.constant 0 : i32
    %c0_i32_2 = arith.constant 0 : i32
    return %c0_i32, %c0_i32_0, %c0_i32_1 : i32, i32, i32
  }
  func.func @transform_16(%arg0: i32) -> (i32, i32, i32) {
    %c0_i32 = arith.constant 0 : i32
    %c0_i32_0 = arith.constant 0 : i32
    %c0_i32_1 = arith.constant 0 : i32
    %c0_i32_2 = arith.constant 0 : i32
    return %c0_i32, %c0_i32_0, %c0_i32_1 : i32, i32, i32
  }
  func.func @transform_17(%arg0: i32) -> (i32, i32, i32) {
    %c0_i32 = arith.constant 0 : i32
    %c0_i32_0 = arith.constant 0 : i32
    %c0_i32_1 = arith.constant 0 : i32
    %c0_i32_2 = arith.constant 0 : i32
    return %c0_i32, %c0_i32_0, %c0_i32_1 : i32, i32, i32
  }
  func.func @transform_18(%arg0: i32) -> (i32, i32) {
    %c0_i32 = arith.constant 0 : i32
    %c0_i32_0 = arith.constant 0 : i32
    %c0_i32_1 = arith.constant 0 : i32
    return %c0_i32, %c0_i32_0 : i32, i32
  }
  func.func @transform_19(%arg0: i32) -> (i32, i32, i32) {
    %c0_i32 = arith.constant 0 : i32
    %c0_i32_0 = arith.constant 0 : i32
    %c0_i32_1 = arith.constant 0 : i32
    %c0_i32_2 = arith.constant 0 : i32
    return %c0_i32, %c0_i32_0, %c0_i32_1 : i32, i32, i32
  }
}

</mosaic_0001>

<bundles_post_ra>
// kernel: encoder_decoder_forward_impl.1
= control target key start
LH: loop header
LB: loop body
LE: loop exit
PB: predicated region body
PF: predicated region fallthrough
CT: control target
= control target key end

     0   :  { %s18023_s0 = inlined_call_operand.vmem [shape: f32[2,8,32], index: 0, kind: input, shape index: {}]   ;;  %s18024_s1 = inlined_call_operand.vmem [shape: f32[2,8,32], index: 1, kind: input, shape index: {}]   ;;  %s18025_s2 = inlined_call_operand.vmem [shape: f32[2,8,8], index: 2, kind: input, shape index: {}, may-alias: {2,4}]   ;;  %s18026_s3 = inlined_call_operand.vmem [shape: f32[2,8,8], index: 3, kind: input, shape index: {}]   ;;  %s18027_s4 = inlined_call_operand.vmem [shape: f32[2,8,8], index: 4, kind: input, shape index: {}, may-alias: {2,4}]   ;;  %s18028_s5 = inlined_call_operand.vmem [shape: f32[2,32,96], index: 5, kind: input, shape index: {}]   ;;  %s18029_s6 = inlined_call_operand.vmem [shape: f32[2,32,32], index: 6, kind: input, shape index: {}]   ;;  %s18030_s7 = inlined_call_operand.vmem [shape: f32[2,32,64], index: 7, kind: input, shape index: {}]   ;;  %s18031_s8 = inlined_call_operand.vmem [shape: f32[2,64,32], index: 8, kind: input, shape index: {}]   ;;  %s18032_s9 = inlined_call_operand.vmem [shape: f32[2,8,96], index: 9, kind: input, shape index: {}]   ;;  %s18033_s10 = inlined_call_operand.vmem [shape: f32[2,32,96], index: 10, kind: input, shape index: {}]   ;;  %s18034_s11 = inlined_call_operand.vmem [shape: f32[2,32,32], index: 11, kind: input, shape index: {}]   ;;  %s18035_s12 = inlined_call_operand.vmem [shape: f32[2,32,32], index: 12, kind: input, shape index: {}]   ;;  %s18036_s13 = inlined_call_operand.vmem [shape: f32[2,32,64], index: 13, kind: input, shape index: {}]   ;;  %s18037_s14 = inlined_call_operand.vmem [shape: f32[2,32,32], index: 14, kind: input, shape index: {}]   ;;  %s18038_s15 = inlined_call_operand.vmem [shape: f32[2,32,64], index: 15, kind: input, shape index: {}]   ;;  %s18039_s16 = inlined_call_operand.vmem [shape: f32[2,64,32], index: 16, kind: input, shape index: {}]   ;;  %s18040_s17 = inlined_call_operand.vmem [shape: f32[2,16,96], index: 17, kind: input, shape index: {}]   ;;  %s18041_s18 = inlined_call_operand.vmem [shape: f32[4,32], index: 18, kind: input, shape index: {}]   ;;  %s18042_s19 = inlined_call_operand.hbm [shape: f32[2,8,32], index: 19, kind: output, shape index: {}]  }
   0x1   :  { %18070 = sst [smem:[#allocation5_spill]] %s18023_s0 }
   0x2   :  { %18071 = sst [smem:[#allocation6_spill]] %s18024_s1 }
   0x3   :  { %18072 = sst [smem:[#allocation7_spill]] %s18025_s2 }
   0x4   :  { %18073 = sst [smem:[#allocation8_spill]] %s18026_s3 }
   0x5   :  { %18074 = sst [smem:[#allocation9_spill]] %s18042_s19 }
   0x6   :  { %s18075_s20 = sld [smem:[#allocation5_spill]]  ;;  %vm72_vm0 = vcmask 261120  }
   0xc   :  { %v16029_v0 = vld [vmem:[%s18075_s20] sm:$0xff]  ;;  %v16034_v1 = vld [vmem:[%s18075_s20 + $0x8] sm:$0xff] }
   0xd   :  { %24 = vsyncpa [#allocation3], 0  ;;  %v73_v2 = vsel %vm72_vm0, %v16029_v0, 0.0  ;;  %v76_v3 = vsel %vm72_vm0, %v16034_v1, 0.0  ;;  %v127_v14 = vld [vmem:[%s18028_s5] sm:$0xff]  ;;  %v128_v15 = vld [vmem:[%s18028_s5 + $0x8] sm:$0xff]  ;;  %v95_v25 = vlaneseq }
   0xe   :  { %74 = vadd.xlane.f32.xlu0 %v73_v2  ;;  %v129_v16 = vld [vmem:[%s18028_s5 + $0x10] sm:$0xff]  ;;  %v15413_v17 = vpack.c.bf16 %v128_v15, %v127_v14  ;;  %v130_v18 = vld [vmem:[%s18028_s5 + $0x18] sm:$0xff]  ;;  %v16064_v38 = vld [vmem:[%s18032_s9] sm:$0xff]  ;;  %v15910_v51 = vmov 0.0   ;;  %vm15911_vm5 = vmmov 0   ;;  %s18047_s0 = smov 88  }
   0xf   :  { %v15417_v19 = vpack.c.bf16 %v130_v18, %v129_v16  ;;  %v16056_v30 = vshrl.u32 %v95_v25, 7  ;;  %14501 = vmatprep.subr.mxu1 %v15910_v51  ;;  %14503 = vmatprep.mubr.msk.f32.mxu1 %vm15911_vm5, %v15910_v51  ;;  %s18065_s30 = smov 96   ;;  %s18067_s20 = smov 120   ;;  %vm223_vm6 = vcmask 64512   ;;  %vm2302_vm11 = vcmask 523264  }
  0x10   :  { %15414 = vmatprep.subr.bf16.mxu0 %v15413_v17  ;;  %s18076_s22 = sld [smem:[#allocation7_spill]]  ;;  %s18061_s2 = smov 64  }
  0x11   :  { %15416 = vmatpush3.bf16.msra.mxu0 %v15413_v17  ;;  %v16059_v36 = vsub.s32 1, %v16056_v30  ;;  %v16069_v41 = vsub.s32 2, %v16056_v30  ;;  %v16082_v52 = vsub.s32 0, %v16056_v30  ;;  %s18059_s23 = smov 80   ;;  %s18057_s24 = smov 112  }
  0x12   :  { %77 = vadd.xlane.f32.xlu0 %v76_v3  ;;  %15418 = vmatprep.subr.bf16.mxu0 %v15417_v19  ;;  %s18063_s25 = smov 56   ;;  %s18051_s29 = smov 72  }
  0x13   :  { %v98_v40 = vrot.slane %v16064_v38, %v16059_v36  ;;  %v124_v43 = vrot.slane %v16064_v38, %v16069_v41  ;;  %v134_v53 = vrot.slane %v16064_v38, %v16082_v52  ;;  %s18053_s21 = smov 104   ;;  %s18055_s1 = smov 48  }
  0x14   :  { %s18049_s27 = smov 40   ;;  %s18077_s26 = smov 88  }
  0x15   :  { %15420 = vmatpush3.bf16.msra.mxu0 %v15417_v19  ;;  %s18081_s3 = smov 104   ;;  %s18083_s28 = smov 40  }
  0x16   :  { %14496 = vmatprep.subr.mxu0 %v15910_v51  ;;  %v16110_v62 = vld [vmem:[%s18076_s22] sm:$0xff] }
  0x9b   :  { %v75_v4 = vpop.xlane.xlu0 %74 }
  0x9c   :  { %v80_v5 = vmul.f32 0.03125, %v75_v4 }
  0x9e   :  { %v82_v6 = vsub.f32 %v16029_v0, %v80_v5 }
  0x9f   :  { %v78_v7 = vpop.xlane.xlu0 %77 }
  0xa0   :  { %v81_v8 = vmul.f32 0.03125, %v78_v7  ;;  %v84_v9 = vmul.f32 %v82_v6, %v82_v6  ;;  %v99_v42 = vmul.f32 %v98_v40, %v82_v6 }
  0xa2   :  { %v83_v10 = vsub.f32 %v16034_v1, %v81_v8  ;;  %v86_v11 = vsel %vm72_vm0, %v84_v9, 0.0 }
  0xa3   :  { %87 = vadd.xlane.f32.xlu1 %v86_v11 }
  0xa4   :  { %v85_v12 = vmul.f32 %v83_v10, %v83_v10  ;;  %v100_v46 = vmul.f32 %v98_v40, %v83_v10 }
  0xa6   :  { %v89_v13 = vsel %vm72_vm0, %v85_v12, 0.0 }
  0xa7   :  { %90 = vadd.xlane.f32.xlu1 %v89_v13 }
 0x130   :  { %v88_v20 = vpop.xlane.xlu1 %87 }
 0x131   :  { %v93_v21 = vmul.f32 0.032258064, %v88_v20 }
 0x133   :  { %15589 = vrsqrt.f32 %v93_v21  ;;  %vm103_vm1 = vcmp.eq.f32.partialorder %v93_v21, inf  ;;  %v106_v27 = vand.u32 2147483648, %v93_v21  ;;  %vm105_vm2 = vcmp.eq.f32.partialorder %v93_v21, 0.0 }
 0x134   :  { %v91_v22 = vpop.xlane.xlu1 %90 }
 0x135   :  { %v94_v23 = vmul.f32 0.032258064, %v91_v22 }
 0x137   :  { %15591 = vrsqrt.f32 %v94_v23  ;;  %vm110_vm3 = vcmp.eq.f32.partialorder %v94_v23, inf  ;;  %v113_v34 = vand.u32 2147483648, %v94_v23  ;;  %vm112_vm4 = vcmp.eq.f32.partialorder %v94_v23, 0.0 }
 0x13d   :  { %v15590_v24 = vpop.eup %15589 }
 0x13e   :  { %v102_v26 = vmul.f32 %v15590_v24, %v93_v21 }
 0x140   :  { %v104_v28 = vsel %vm103_vm1, %v93_v21, %v102_v26  ;;  %v16130_v21 = vld [vmem:[%s18029_s6 + $0x8] sm:$0xff] }
 0x141   :  { %v15592_v29 = vpop.eup %15591  ;;  %v107_v31 = vsel %vm105_vm2, %v106_v27, %v104_v28 }
 0x142   :  { %v109_v32 = vmul.f32 %v15592_v29, %v94_v23  ;;  %v115_v33 = vadd.f32 1e-06, %v107_v31  ;;  %v16144_v29 = vld [vmem:[%s18029_s6] sm:$0xff] }
 0x144   :  { %v111_v35 = vsel %vm110_vm3, %v94_v23, %v109_v32  ;;  %15593 = vrcp.f32 %v115_v33 }
 0x145   :  { %v114_v37 = vsel %vm112_vm4, %v113_v34, %v111_v35 }
 0x146   :  { %v116_v39 = vadd.f32 1e-06, %v114_v37 }
 0x148   :  { %15595 = vrcp.f32 %v116_v39 }
 0x14e   :  { %v15594_v44 = vpop.eup %15593 }
 0x14f   :  { %v118_v45 = vmul.f32 %v15594_v44, %v99_v42 }
 0x151   :  { %v125_v47 = vadd.f32 %v124_v43, %v118_v45 }
 0x152   :  { %v15596_v48 = vpop.eup %15595 }
 0x153   :  { %v120_v49 = vmul.f32 %v15596_v48, %v100_v46  ;;  %14493 = vmatprep.mubr.msk.f32.mxu0 %vm72_vm0, %v125_v47 }
 0x155   :  { %v126_v50 = vadd.f32 %v124_v43, %v120_v49 }
 0x157   :  { %14494 = vmatmul.mubr.msk.f32.vlgmr.msra.gmra.mrb[0].mxu0 %vm72_vm0, %v126_v50 }
 0x158   :  { %14498 = vmatprep.mubr.msk.f32.mxu0 %vm15911_vm5, %v15910_v51 }
 0x22a   :  { %v14495_v54 = vpop.f32.mrb[0].mxu0 }
 0x22b   :  { %v16086_v55 = vadd.f32 %v14495_v54, %v134_v53  ;;  %v207_v56 = vpop.f32.mrb[1].mxu0 }
 0x22c   :  { %v16088_v57 = vadd.f32 %v207_v56, %v134_v53 }
 0x22e   :  { %389 = vrot.lane.b32.xlu1 %v16088_v57, %s18047_s0  ;;  %221 = vrot.lane.b32.xlu0 %v16088_v57, %s18065_s30 }
 0x232   :  { %387 = vrot.lane.b32.xlu1 %v16088_v57, %s18067_s20 }
 0x2a0   :  { %v222_v58 = vpop.permute.xlu0 %221  ;;  %v390_v59 = vpop.permute.xlu1 %389 }
 0x2a1   :  { %14497 = vmatpush3.xpose.msk.msra.mxu0 %vm223_vm6, %v222_v58 }
 0x2a2   :  { %14506 = vmatprep.subr.mxu0 %v15910_v51 }
 0x2a4   :  { %14499 = vmatmul.mubr.msk.f32.vlgmr.msra.gmra.mrb[2].mxu0 %vm223_vm6, %v16088_v57  ;;  %v388_v60 = vpop.permute.xlu1 %387 }
 0x2a5   :  { %14507 = vmatpush3.xpose.msk.msra.mxu0 %vm223_vm6, %v390_v59  ;;  %14508 = vmatprep.mubr.msk.f32.mxu0 %vm15911_vm5, %v15910_v51 }
 0x2a6   :  { %14516 = vmatprep.subr.mxu0 %v15910_v51 }
 0x2a8   :  { %14509 = vmatmul.mubr.msk.f32.vlgmr.msra.gmra.mrb[4].mxu0 %vm223_vm6, %v388_v60 }
 0x2a9   :  { %14518 = vmatprep.mubr.msk.f32.mxu0 %vm15911_vm5, %v15910_v51  ;;  %14517 = vmatpush3.msra.mxu0 %v16130_v21 }
 0x2aa   :  { %14526 = vmatprep.subr.mxu0 %v15910_v51 }
 0x377   :  { %v294_v61 = vpop.f32.mrb[2].mxu0 }
 0x378   :  { %v298_v63 = vmul.f32 0.35355338, %v294_v61  ;;  %v14500_v2 = vpop.f32.mrb[3].mxu0 }
 0x37a   :  { %v299_v3 = vadd.f32 %v298_v63, %v16110_v62 }
 0x37b   :  { %v461_v4 = vpop.f32.mrb[4].mxu0 }
 0x37c   :  { %v465_v5 = vmul.f32 0.35355338, %v461_v4  ;;  %v14510_v6 = vpop.f32.mrb[5].mxu0  ;;  %v300_v7 = vsel %vm223_vm6, %v299_v3, -inf  ;;  %v16184_v4 = vld [vmem:[%s18029_s6 + $0x10] sm:$0xff] }
 0x37d   :  { %301 = vmax.xlane.f32.xlu1 %v300_v7 }
 0x37e   :  { %v466_v8 = vadd.f32 %v465_v5, %v16110_v62 }
 0x380   :  { %v467_v9 = vsel %vm223_vm6, %v466_v8, -inf }
 0x381   :  { %468 = vmax.xlane.f32.xlu0 %v467_v9 }
 0x38e   :  { %311 = vrot.lane.b32.xlu1 %v16088_v57, %s18061_s2 }
 0x392   :  { %702 = vrot.lane.b32.xlu1 %v16088_v57, %s18059_s23 }
 0x396   :  { %700 = vrot.lane.b32.xlu1 %v16088_v57, %s18057_s24 }
 0x40a   :  { %v302_v10 = vpop.xlane.xlu1 %301 }
 0x40b   :  { %v303_v11 = vsub.f32 %v299_v3, %v302_v10 }
 0x40d   :  { %v304_v12 = vmul.f32 1.442695, %v303_v11 }
 0x40e   :  { %v469_v13 = vpop.xlane.xlu0 %468  ;;  %v312_v14 = vpop.permute.xlu1 %311 }
 0x40f   :  { %15597 = vpow2.f32 %v304_v12  ;;  %v470_v15 = vsub.f32 %v466_v8, %v469_v13  ;;  %14502 = vmatpush3.msra.mxu1 %v312_v14 }
 0x410   :  { %14511 = vmatprep.subr.mxu1 %v15910_v51 }
 0x411   :  { %v471_v16 = vmul.f32 1.442695, %v470_v15 }
 0x412   :  { %v703_v33 = vpop.permute.xlu1 %702 }
 0x413   :  { %15599 = vpow2.f32 %v471_v16 }
 0x416   :  { %v701_v37 = vpop.permute.xlu1 %700 }
 0x419   :  { %v15598_v17 = vpop.eup %15597 }
 0x41a   :  { %v306_v18 = vsel %vm223_vm6, %v15598_v17, 0.0 }
 0x41b   :  { %307 = vadd.xlane.f32.xlu0 %v306_v18 }
 0x41d   :  { %v15600_v19 = vpop.eup %15599 }
 0x41e   :  { %v473_v20 = vsel %vm223_vm6, %v15600_v19, 0.0 }
 0x41f   :  { %474 = vadd.xlane.f32.xlu0 %v473_v20 }
 0x435   :  { %478 = vrot.lane.b32.xlu0 %v16088_v57, %s18063_s25 }
 0x4a8   :  { %v308_v22 = vpop.xlane.xlu0 %307 }
 0x4a9   :  { %15601 = vrcp.f32 %v308_v22 }
 0x4ac   :  { %v475_v23 = vpop.xlane.xlu0 %474 }
 0x4ad   :  { %15603 = vrcp.f32 %v475_v23 }
 0x4b0   :  { %v479_v26 = vpop.permute.xlu0 %478 }
 0x4b3   :  { %v15602_v24 = vpop.eup %15601 }
 0x4b4   :  { %v310_v25 = vmul.f32 %v15602_v24, %v15598_v17 }
 0x4b6   :  { %14504 = vmatmul.mubr.msk.f32.vlgmr.msra.gmra.mrb[0].mxu1 %vm223_vm6, %v310_v25 }
 0x4b7   :  { %v15604_v27 = vpop.eup %15603  ;;  %14512 = vmatpush3.msra.mxu1 %v479_v26  ;;  %14513 = vmatprep.mubr.msk.f32.mxu1 %vm15911_vm5, %v15910_v51 }
 0x4b8   :  { %v477_v28 = vmul.f32 %v15604_v27, %v15600_v19  ;;  %14521 = vmatprep.subr.mxu1 %v15910_v51  ;;  %v16221_v27 = vld [vmem:[%s18029_s6 + $0x18] sm:$0xff] }
 0x4ba   :  { %14514 = vmatmul.mubr.msk.f32.vlgmr.msra.gmra.mrb[2].mxu1 %vm223_vm6, %v477_v28 }
 0x4bb   :  { %14523 = vmatprep.mubr.msk.f32.mxu1 %vm15911_vm5, %v15910_v51  ;;  %14522 = vmatpush3.msra.mxu1 %v16144_v29 }
 0x4bc   :  { %14531 = vmatprep.subr.mxu1 %v15910_v51 }
 0x589   :  { %v383_v31 = vpop.f32.mrb[0].mxu1 }
 0x58a   :  { %v14505_v32 = vpop.f32.mrb[1].mxu1  ;;  %14524 = vmatmul.mubr.msk.f32.vlgmr.msra.gmra.mrb[4].mxu1 %vm223_vm6, %v383_v31 }
 0x58b   :  { %14533 = vmatprep.mubr.msk.f32.mxu1 %vm15911_vm5, %v15910_v51  ;;  %v16231_v32 = vld [vmem:[%s18076_s22 + $0x8] sm:$0xff] }
 0x58d   :  { %v550_v34 = vpop.f32.mrb[2].mxu1 }
 0x58e   :  { %v14515_v35 = vpop.f32.mrb[3].mxu1  ;;  %14519 = vmatmul.mubr.msk.f32.vlgmr.msra.gmra.mrb[6].mxu0 %vm223_vm6, %v550_v34 }
 0x58f   :  { %14527 = vmatpush3.xpose.msk.msra.mxu0 %vm223_vm6, %v703_v33  ;;  %14528 = vmatprep.mubr.msk.f32.mxu0 %vm15911_vm5, %v15910_v51 }
 0x590   :  { %14536 = vmatprep.subr.mxu0 %v15910_v51 }
 0x592   :  { %14529 = vmatmul.mubr.msk.f32.vlgmr.msra.gmra.mrb[8].mxu0 %vm223_vm6, %v701_v37 }
 0x593   :  { %14538 = vmatprep.mubr.msk.f32.mxu0 %vm15911_vm5, %v15910_v51  ;;  %14537 = vmatpush3.msra.mxu0 %v16184_v4 }
 0x594   :  { %14546 = vmatprep.subr.mxu0 %v15910_v51 }
 0x65d   :  { %v696_v39 = vpop.f32.mrb[4].mxu1 }
 0x65e   :  { %v14525_v40 = vpop.f32.mrb[5].mxu1 }
 0x661   :  { %v623_v42 = vpop.f32.mrb[6].mxu0 }
 0x662   :  { %v16159_v43 = vadd.f32 %v696_v39, %v623_v42  ;;  %v14520_v44 = vpop.f32.mrb[7].mxu0 }
 0x665   :  { %v774_v45 = vpop.f32.mrb[8].mxu0 }
 0x666   :  { %v778_v46 = vmul.f32 0.35355338, %v774_v45  ;;  %v14530_v47 = vpop.f32.mrb[9].mxu0 }
 0x668   :  { %v779_v48 = vadd.f32 %v778_v46, %v16110_v62 }
 0x66a   :  { %v780_v49 = vsel %vm223_vm6, %v779_v48, -inf }
 0x66b   :  { %781 = vmax.xlane.f32.xlu1 %v780_v49 }
 0x67c   :  { %943 = vrot.lane.b32.xlu1 %v16088_v57, %s18051_s29 }
 0x680   :  { %941 = vrot.lane.b32.xlu1 %v16088_v57, %s18053_s21 }
 0x684   :  { %1183 = vrot.lane.b32.xlu1 %v16086_v55, %s18065_s30 }
 0x6f8   :  { %v782_v50 = vpop.xlane.xlu1 %781 }
 0x6f9   :  { %v783_v53 = vsub.f32 %v779_v48, %v782_v50 }
 0x6fb   :  { %v784_v54 = vmul.f32 1.442695, %v783_v53 }
 0x6fc   :  { %v944_v63 = vpop.permute.xlu1 %943 }
 0x6fd   :  { %15605 = vpow2.f32 %v784_v54 }
 0x700   :  { %v942_v3 = vpop.permute.xlu1 %941 }
 0x704   :  { %v1184_v20 = vpop.permute.xlu1 %1183 }
 0x707   :  { %v15606_v56 = vpop.eup %15605 }
 0x708   :  { %v786_v58 = vsel %vm223_vm6, %v15606_v56, 0.0 }
 0x709   :  { %787 = vadd.xlane.f32.xlu0 %v786_v58 }
 0x71f   :  { %791 = vrot.lane.b32.xlu0 %v16088_v57, %s18055_s1 }
 0x796   :  { %v788_v59 = vpop.xlane.xlu0 %787 }
 0x797   :  { %15607 = vrcp.f32 %v788_v59 }
 0x79a   :  { %v792_v60 = vpop.permute.xlu0 %791 }
 0x79b   :  { %14532 = vmatpush3.msra.mxu1 %v792_v60 }
 0x79c   :  { %14541 = vmatprep.subr.mxu1 %v15910_v51 }
 0x7a1   :  { %v15608_v61 = vpop.eup %15607 }
 0x7a2   :  { %v790_v2 = vmul.f32 %v15608_v61, %v15606_v56 }
 0x7a4   :  { %14534 = vmatmul.mubr.msk.f32.vlgmr.msra.gmra.mrb[6].mxu1 %vm223_vm6, %v790_v2 }
 0x7a5   :  { %14542 = vmatpush3.xpose.msk.msra.mxu1 %vm223_vm6, %v944_v63  ;;  %14543 = vmatprep.mubr.msk.f32.mxu1 %vm15911_vm5, %v15910_v51 }
 0x7a6   :  { %14551 = vmatprep.subr.mxu1 %v15910_v51 }
 0x7a8   :  { %14544 = vmatmul.mubr.msk.f32.vlgmr.msra.gmra.mrb[8].mxu1 %vm223_vm6, %v942_v3 }
 0x7a9   :  { %14553 = vmatprep.mubr.msk.f32.mxu1 %vm15911_vm5, %v15910_v51  ;;  %14552 = vmatpush3.msra.mxu1 %v16221_v27 }
 0x7aa   :  { %14561 = vmatprep.subr.mxu1 %v15910_v51 }
 0x877   :  { %v863_v5 = vpop.f32.mrb[6].mxu1 }
 0x878   :  { %v14535_v6 = vpop.f32.mrb[7].mxu1  ;;  %14539 = vmatmul.mubr.msk.f32.vlgmr.msra.gmra.mrb[10].mxu0 %vm223_vm6, %v863_v5 }
 0x879   :  { %14548 = vmatprep.mubr.msk.f32.mxu0 %vm15911_vm5, %v15910_v51 }
 0x87b   :  { %v1015_v7 = vpop.f32.mrb[8].mxu1 }
 0x87c   :  { %v1019_v8 = vmul.f32 0.35355338, %v1015_v7  ;;  %v14545_v9 = vpop.f32.mrb[9].mxu1 }
 0x87e   :  { %v1020_v10 = vadd.f32 %v1019_v8, %v16110_v62 }
 0x880   :  { %v1021_v11 = vsel %vm223_vm6, %v1020_v10, -inf }
 0x881   :  { %1022 = vmax.xlane.f32.xlu0 %v1021_v11 }
 0x897   :  { %1032 = vrot.lane.b32.xlu0 %v16088_v57, %s18049_s27 }
 0x89b   :  { %1350 = vrot.lane.b32.xlu0 %v16086_v55, %s18047_s0 }
 0x90e   :  { %v1023_v12 = vpop.xlane.xlu0 %1022 }
 0x90f   :  { %v1024_v13 = vsub.f32 %v1020_v10, %v1023_v12 }
 0x911   :  { %v1025_v14 = vmul.f32 1.442695, %v1024_v13 }
 0x912   :  { %v1033_v15 = vpop.permute.xlu0 %1032 }
 0x913   :  { %15609 = vpow2.f32 %v1025_v14  ;;  %14547 = vmatpush3.msra.mxu0 %v1033_v15 }
 0x914   :  { %14556 = vmatprep.subr.mxu0 %v15910_v51 }
 0x916   :  { %v1351_v25 = vpop.permute.xlu0 %1350 }
 0x91d   :  { %v15610_v16 = vpop.eup %15609 }
 0x91e   :  { %v1027_v17 = vsel %vm223_vm6, %v15610_v16, 0.0 }
 0x91f   :  { %1028 = vadd.xlane.f32.xlu1 %v1027_v17 }
 0x930   :  { %1348 = vrot.lane.b32.xlu1 %v16086_v55, %s18067_s20 }
 0x94b   :  { %v936_v18 = vpop.f32.mrb[10].mxu0 }
 0x94c   :  { %v940_v57 = vadd.f32 %v936_v18, %v16159_v43  ;;  %v14540_v19 = vpop.f32.mrb[11].mxu0 }
 0x9ac   :  { %v1029_v22 = vpop.xlane.xlu1 %1028 }
 0x9ad   :  { %15611 = vrcp.f32 %v1029_v22 }
 0x9b0   :  { %v1349_v26 = vpop.permute.xlu1 %1348 }
 0x9b7   :  { %v15612_v23 = vpop.eup %15611 }
 0x9b8   :  { %v1031_v24 = vmul.f32 %v15612_v23, %v15610_v16 }
 0x9ba   :  { %14549 = vmatmul.mubr.msk.f32.vlgmr.msra.gmra.mrb[12].mxu0 %vm223_vm6, %v1031_v24 }
 0x9bb   :  { %14557 = vmatpush3.xpose.msk.msra.mxu0 %vm223_vm6, %v1184_v20  ;;  %14558 = vmatprep.mubr.msk.f32.mxu0 %vm15911_vm5, %v15910_v51 }
 0x9bc   :  { %14566 = vmatprep.subr.mxu0 %v15910_v51 }
 0x9be   :  { %14559 = vmatmul.mubr.msk.f32.vlgmr.msra.gmra.mrb[14].mxu0 %vm223_vm6, %v16086_v55 }
 0x9bf   :  { %14567 = vmatpush3.xpose.msk.msra.mxu0 %vm223_vm6, %v1351_v25  ;;  %14568 = vmatprep.mubr.msk.f32.mxu0 %vm15911_vm5, %v15910_v51 }
 0x9c0   :  { %14576 = vmatprep.subr.mxu0 %v15910_v51 }
 0x9c2   :  { %14569 = vmatmul.mubr.msk.f32.vlgmr.msra.gmra.mrb[16].mxu0 %vm223_vm6, %v1349_v26 }
 0x9c3   :  { %14577 = vmatpush3.msra.mxu0 %v16130_v21  ;;  %14578 = vmatprep.mubr.msk.f32.mxu0 %vm15911_vm5, %v15910_v51 }
 0x9c4   :  { %14586 = vmatprep.subr.mxu0 %v15910_v51 }
 0xa8d   :  { %v1104_v28 = vpop.f32.mrb[12].mxu0 }
 0xa8e   :  { %v14550_v31 = vpop.f32.mrb[13].mxu0  ;;  %14554 = vmatmul.mubr.msk.f32.vlgmr.msra.gmra.mrb[10].mxu1 %vm223_vm6, %v1104_v28 }
 0xa8f   :  { %14563 = vmatprep.mubr.msk.f32.mxu1 %vm15911_vm5, %v15910_v51 }
 0xa91   :  { %v1255_v21 = vpop.f32.mrb[14].mxu0 }
 0xa92   :  { %v1259_v33 = vmul.f32 0.35355338, %v1255_v21  ;;  %v14560_v34 = vpop.f32.mrb[15].mxu0 }
 0xa94   :  { %v1260_v35 = vadd.f32 %v1259_v33, %v16231_v32 }
 0xa95   :  { %v1422_v37 = vpop.f32.mrb[16].mxu0 }
 0xa96   :  { %v1426_v39 = vmul.f32 0.35355338, %v1422_v37  ;;  %v14570_v40 = vpop.f32.mrb[17].mxu0  ;;  %v1261_v42 = vsel %vm223_vm6, %v1260_v35, -inf }
 0xa97   :  { %1262 = vmax.xlane.f32.xlu0 %v1261_v42  ;;  %v16292_v40 = vsub.s32 3, %v16056_v30 }
 0xa98   :  { %v1427_v43 = vadd.f32 %v1426_v39, %v16231_v32 }
 0xa9a   :  { %v1428_v44 = vsel %vm223_vm6, %v1427_v43, -inf }
 0xa9b   :  { %1429 = vmax.xlane.f32.xlu1 %v1428_v44 }
 0xaac   :  { %1439 = vrot.lane.b32.xlu1 %v16086_v55, %s18063_s25 }
 0xab0   :  { %1663 = vrot.lane.b32.xlu1 %v16086_v55, %s18059_s23  ;;  %s18084_s23 = sld [smem:[#allocation6_spill]] }
 0xab4   :  { %1661 = vrot.lane.b32.xlu1 %v16086_v55, %s18057_s24 }
 0xb24   :  { %v1263_v45 = vpop.xlane.xlu0 %1262 }
 0xb25   :  { %v1264_v46 = vsub.f32 %v1260_v35, %v1263_v45 }
 0xb27   :  { %v1265_v47 = vmul.f32 1.442695, %v1264_v46 }
 0xb28   :  { %v1430_v48 = vpop.xlane.xlu1 %1429 }
 0xb29   :  { %15613 = vpow2.f32 %v1265_v47  ;;  %v1431_v49 = vsub.f32 %v1427_v43, %v1430_v48  ;;  %v2146_v43 = vrot.slane %v16064_v38, %v16292_v40 }
 0xb2b   :  { %v1432_v50 = vmul.f32 1.442695, %v1431_v49 }
 0xb2c   :  { %v1440_v7 = vpop.permute.xlu1 %1439 }
 0xb2d   :  { %15615 = vpow2.f32 %v1432_v50 }
 0xb30   :  { %v1664_v12 = vpop.permute.xlu1 %1663 }
 0xb33   :  { %v15614_v53 = vpop.eup %15613 }
 0xb34   :  { %v1267_v54 = vsel %vm223_vm6, %v15614_v53, 0.0 }
 0xb35   :  { %1268 = vadd.xlane.f32.xlu0 %v1267_v54 }
 0xb37   :  { %v15616_v56 = vpop.eup %15615 }
 0xb38   :  { %v1434_v58 = vsel %vm223_vm6, %v15616_v56, 0.0 }
 0xb39   :  { %1435 = vadd.xlane.f32.xlu0 %v1434_v58 }
 0xb4f   :  { %1272 = vrot.lane.b32.xlu0 %v16086_v55, %s18061_s2 }
 0xb61   :  { %v1177_v59 = vpop.f32.mrb[10].mxu1 }
 0xb62   :  { %v16247_v60 = vadd.f32 %v1177_v59, %v940_v57  ;;  %v14555_v61 = vpop.f32.mrb[11].mxu1 }
 0xb64   :  { %v2147_v46 = vadd.f32 %v2146_v43, %v16247_v60 }
 0xb66   :  { %v16302_v49 = vadd.f32 %v2147_v46, %v16029_v0  ;;  %v2205_v46 = vld [vmem:[%s18030_s7 + $0x10] sm:$0xff] }
 0xbc2   :  { %v1269_v63 = vpop.xlane.xlu0 %1268 }
 0xbc3   :  { %15617 = vrcp.f32 %v1269_v63 }
 0xbc6   :  { %v1436_v2 = vpop.xlane.xlu0 %1435 }
 0xbc7   :  { %15619 = vrcp.f32 %v1436_v2 }
 0xbca   :  { %v1273_v3 = vpop.permute.xlu0 %1272 }
 0xbcb   :  { %14562 = vmatpush3.msra.mxu1 %v1273_v3 }
 0xbcc   :  { %14571 = vmatprep.subr.mxu1 %v15910_v51 }
 0xbcd   :  { %v15618_v5 = vpop.eup %15617 }
 0xbce   :  { %v1271_v6 = vmul.f32 %v15618_v5, %v15614_v53  ;;  %v2151_v53 = vsel %vm72_vm0, %v16302_v49, 0.0 }
 0xbd0   :  { %14564 = vmatmul.mubr.msk.f32.vlgmr.msra.gmra.mrb[12].mxu1 %vm223_vm6, %v1271_v6 }
 0xbd1   :  { %v15620_v8 = vpop.eup %15619  ;;  %14572 = vmatpush3.msra.mxu1 %v1440_v7  ;;  %14573 = vmatprep.mubr.msk.f32.mxu1 %vm15911_vm5, %v15910_v51 }
 0xbd2   :  { %v1438_v9 = vmul.f32 %v15620_v8, %v15616_v56  ;;  %14581 = vmatprep.subr.mxu1 %v15910_v51 }
 0xbd4   :  { %14574 = vmatmul.mubr.msk.f32.vlgmr.msra.gmra.mrb[14].mxu1 %vm223_vm6, %v1438_v9 }
 0xbd5   :  { %14582 = vmatpush3.msra.mxu1 %v16144_v29  ;;  %14583 = vmatprep.mubr.msk.f32.mxu1 %vm15911_vm5, %v15910_v51  ;;  %v1662_v29 = vpop.permute.xlu1 %1661 }
 0xbd6   :  { %14591 = vmatprep.subr.mxu1 %v15910_v51 }
 0xca3   :  { %v1344_v10 = vpop.f32.mrb[12].mxu1 }
 0xca4   :  { %v14565_v11 = vpop.f32.mrb[13].mxu1  ;;  %14584 = vmatmul.mubr.msk.f32.vlgmr.msra.gmra.mrb[16].mxu1 %vm223_vm6, %v1344_v10 }
 0xca5   :  { %14593 = vmatprep.mubr.msk.f32.mxu1 %vm15911_vm5, %v15910_v51 }
 0xca7   :  { %v1511_v13 = vpop.f32.mrb[14].mxu1 }
 0xca8   :  { %v14575_v14 = vpop.f32.mrb[15].mxu1  ;;  %14579 = vmatmul.mubr.msk.f32.vlgmr.msra.gmra.mrb[18].mxu0 %vm223_vm6, %v1511_v13 }
 0xca9   :  { %14587 = vmatpush3.xpose.msk.msra.mxu0 %vm223_vm6, %v1664_v12  ;;  %14588 = vmatprep.mubr.msk.f32.mxu0 %vm15911_vm5, %v15910_v51 }
 0xcaa   :  { %14596 = vmatprep.subr.mxu0 %v15910_v51 }
 0xcac   :  { %14589 = vmatmul.mubr.msk.f32.vlgmr.msra.gmra.mrb[20].mxu0 %vm223_vm6, %v1662_v29 }
 0xcad   :  { %14597 = vmatpush3.msra.mxu0 %v16184_v4  ;;  %14598 = vmatprep.mubr.msk.f32.mxu0 %vm15911_vm5, %v15910_v51 }
 0xcae   :  { %14606 = vmatprep.subr.mxu0 %v15910_v51 }
 0xd77   :  { %v1657_v15 = vpop.f32.mrb[16].mxu1 }
 0xd78   :  { %v14585_v16 = vpop.f32.mrb[17].mxu1 }
 0xd7b   :  { %v1584_v17 = vpop.f32.mrb[18].mxu0 }
 0xd7c   :  { %v1658_v18 = vadd.f32 %v1657_v15, %v1584_v17  ;;  %v14580_v57 = vpop.f32.mrb[19].mxu0 }
 0xd7f   :  { %v1735_v19 = vpop.f32.mrb[20].mxu0 }
 0xd80   :  { %v1739_v20 = vmul.f32 0.35355338, %v1735_v19  ;;  %v14590_v22 = vpop.f32.mrb[21].mxu0 }
 0xd82   :  { %v1740_v23 = vadd.f32 %v1739_v20, %v16231_v32 }
 0xd84   :  { %v1741_v24 = vsel %vm223_vm6, %v1740_v23, -inf }
 0xd85   :  { %1742 = vmax.xlane.f32.xlu0 %v1741_v24 }
 0xd9b   :  { %1752 = vrot.lane.b32.xlu0 %v16086_v55, %s18055_s1  ;;  %s18079_s1 = smov 112  }
 0xd9f   :  { %1902 = vrot.lane.b32.xlu0 %v16086_v55, %s18053_s21  ;;  %s18078_s21 = smov 80  }
 0xe12   :  { %v1743_v4 = vpop.xlane.xlu0 %1742 }
 0xe13   :  { %v1744_v25 = vsub.f32 %v1740_v23, %v1743_v4 }
 0xe15   :  { %v1745_v26 = vmul.f32 1.442695, %v1744_v25 }
 0xe16   :  { %v1753_v28 = vpop.permute.xlu0 %1752 }
 0xe17   :  { %15621 = vpow2.f32 %v1745_v26  ;;  %14592 = vmatpush3.msra.mxu1 %v1753_v28 }
 0xe18   :  { %14601 = vmatprep.subr.mxu1 %v15910_v51 }
 0xe1a   :  { %v1903_v39 = vpop.permute.xlu0 %1902 }
 0xe21   :  { %v15622_v31 = vpop.eup %15621 }
 0xe22   :  { %v1747_v21 = vsel %vm223_vm6, %v15622_v31, 0.0 }
 0xe23   :  { %1748 = vadd.xlane.f32.xlu1 %v1747_v21  ;;  %v16322_v21 = vsub.s32 4, %v16056_v30 }
 0xe34   :  { %1904 = vrot.lane.b32.xlu1 %v16086_v55, %s18051_s29  ;;  %s18082_s29 = smov 72  }
 0xeb0   :  { %v1749_v33 = vpop.xlane.xlu1 %1748 }
 0xeb1   :  { %15623 = vrcp.f32 %v1749_v33  ;;  %v2174_v33 = vrot.slane %v16064_v38, %v16322_v21 }
 0xeb4   :  { %v1905_v37 = vpop.permute.xlu1 %1904 }
 0xebb   :  { %v15624_v34 = vpop.eup %15623 }
 0xebc   :  { %v1751_v35 = vmul.f32 %v15624_v34, %v15622_v31  ;;  %v16327_v34 = vsub.s32 5, %v16056_v30 }
 0xebe   :  { %14594 = vmatmul.mubr.msk.f32.vlgmr.msra.gmra.mrb[18].mxu1 %vm223_vm6, %v1751_v35 }
 0xebf   :  { %14602 = vmatpush3.xpose.msk.msra.mxu1 %vm223_vm6, %v1905_v37  ;;  %14603 = vmatprep.mubr.msk.f32.mxu1 %vm15911_vm5, %v15910_v51  ;;  %v2200_v37 = vrot.slane %v16064_v38, %v16327_v34 }
 0xec0   :  { %14611 = vmatprep.subr.mxu1 %v15910_v51 }
 0xec2   :  { %14604 = vmatmul.mubr.msk.f32.vlgmr.msra.gmra.mrb[20].mxu1 %vm223_vm6, %v1903_v39 }
 0xec3   :  { %14612 = vmatpush3.msra.mxu1 %v16221_v27  ;;  %14613 = vmatprep.mubr.msk.f32.mxu1 %vm15911_vm5, %v15910_v51 }
 0xf91   :  { %v1824_v42 = vpop.f32.mrb[18].mxu1 }
 0xf92   :  { %v14595_v44 = vpop.f32.mrb[19].mxu1  ;;  %14599 = vmatmul.mubr.msk.f32.vlgmr.msra.gmra.mrb[22].mxu0 %vm223_vm6, %v1824_v42 }
 0xf93   :  { %14608 = vmatprep.mubr.msk.f32.mxu0 %vm15911_vm5, %v15910_v51  ;;  %v2203_v44 = vld [vmem:[%s18030_s7] sm:$0xff] }
 0xf95   :  { %v1976_v45 = vpop.f32.mrb[20].mxu1 }
 0xf96   :  { %v1980_v27 = vmul.f32 0.35355338, %v1976_v45  ;;  %v14605_v47 = vpop.f32.mrb[21].mxu1  ;;  %v2204_v45 = vld [vmem:[%s18030_s7 + $0x8] sm:$0xff] }
 0xf97   :  { %v2206_v47 = vld [vmem:[%s18030_s7 + $0x18] sm:$0xff] }
 0xf98   :  { %v1981_v48 = vadd.f32 %v1980_v27, %v16231_v32  ;;  %v15421_v27 = vpack.c.bf16 %v2204_v45, %v2203_v44 }
 0xf9a   :  { %v1982_v50 = vsel %vm223_vm6, %v1981_v48, -inf }
 0xf9b   :  { %1983 = vmax.xlane.f32.xlu1 %v1982_v50  ;;  %v2294_v50 = vld [vmem:[%s18031_s8] sm:$0xff] }
 0xf9f   :  { %2152 = vadd.xlane.f32.xlu1 %v2151_v53  ;;  %v2295_v53 = vld [vmem:[%s18031_s8 + $0x8] sm:$0xff] }
0x1028   :  { %v1984_v54 = vpop.xlane.xlu1 %1983 }
0x1029   :  { %v1985_v56 = vsub.f32 %v1981_v48, %v1984_v54  ;;  %v15425_v48 = vpack.c.bf16 %v2206_v47, %v2205_v46  ;;  %v2296_v54 = vld [vmem:[%s18031_s8 + $0x10] sm:$0xff]  ;;  %v13842_v47 = vld [vmem:[%s18028_s5 + $0x28] sm:$0xff] }
0x102b   :  { %v1986_v58 = vmul.f32 1.442695, %v1985_v56  ;;  %v15429_v56 = vpack.c.bf16 %v2295_v53, %v2294_v50  ;;  %v13844_v53 = vld [vmem:[%s18028_s5 + $0x38] sm:$0xff] }
0x102c   :  { %v2153_v9 = vpop.xlane.xlu1 %2152 }
0x102d   :  { %15625 = vpow2.f32 %v1986_v58  ;;  %v2157_v10 = vmul.f32 0.03125, %v2153_v9  ;;  %v2297_v58 = vld [vmem:[%s18031_s8 + $0x18] sm:$0xff]  ;;  %15430 = vmatprep.subr.bf16.mxu1 %v15429_v56 }
0x102f   :  { %v2159_v13 = vsub.f32 %v16302_v49, %v2157_v10 }
0x1031   :  { %v2161_v16 = vmul.f32 %v2159_v13, %v2159_v13  ;;  %v2175_v35 = vmul.f32 %v2174_v33, %v2159_v13  ;;  %v2300_v13 = vld [vmem:[%s18031_s8 + $0x30] sm:$0xff] }
0x1033   :  { %v2163_v17 = vsel %vm72_vm0, %v2161_v16, 0.0  ;;  %v16371_v16 = vsub.s32 6, %v16056_v30 }
0x1037   :  { %v15626_v59 = vpop.eup %15625 }
0x1038   :  { %v1988_v60 = vsel %vm223_vm6, %v15626_v59, 0.0 }
0x1039   :  { %1989 = vadd.xlane.f32.xlu0 %v1988_v60  ;;  %v2298_v60 = vld [vmem:[%s18031_s8 + $0x20] sm:$0xff] }
0x104f   :  { %1993 = vrot.lane.b32.xlu0 %v16086_v55, %s18049_s27  ;;  %s18088_s27 = smov 64  }
0x1065   :  { %v1897_v0 = vpop.f32.mrb[22].mxu0 }
0x1066   :  { %v1901_v61 = vadd.f32 %v1897_v0, %v1658_v18  ;;  %v14600_v63 = vpop.f32.mrb[23].mxu0  ;;  %v2299_v0 = vld [vmem:[%s18031_s8 + $0x28] sm:$0xff] }
0x10c6   :  { %v1990_v2 = vpop.xlane.xlu0 %1989 }
0x10c7   :  { %15627 = vrcp.f32 %v1990_v2 }
0x10ca   :  { %v1994_v3 = vpop.permute.xlu0 %1993 }
0x10cb   :  { %14607 = vmatpush3.msra.mxu0 %v1994_v3 }
0x10cc   :  { %15422 = vmatprep.subr.bf16.mxu0 %v15421_v27 }
0x10d1   :  { %v15628_v5 = vpop.eup %15627 }
0x10d2   :  { %v1992_v6 = vmul.f32 %v15628_v5, %v15626_v59  ;;  %v15433_v59 = vpack.c.bf16 %v2297_v58, %v2296_v54 }
0x10d4   :  { %14609 = vmatmul.mubr.msk.f32.vlgmr.msra.gmra.mrb[24].mxu0 %vm223_vm6, %v1992_v6 }
0x10d5   :  { %15424 = vmatpush3.bf16.msra.mxu0 %v15421_v27  ;;  %v13841_v27 = vld [vmem:[%s18028_s5 + $0x20] sm:$0xff] }
0x10d6   :  { %15426 = vmatprep.subr.bf16.mxu0 %v15425_v48  ;;  %v15445_v50 = vpack.c.bf16 %v13842_v47, %v13841_v27 }
0x10d9   :  { %15428 = vmatpush3.bf16.msra.mxu0 %v15425_v48  ;;  %v13843_v48 = vld [vmem:[%s18028_s5 + $0x30] sm:$0xff]  ;;  %s18080_s5 = smov 48  }
0x10da   :  { %v15449_v54 = vpack.c.bf16 %v13844_v53, %v13843_v48  ;;  %15446 = vmatprep.subr.bf16.mxu0 %v15445_v50 }
0x11a7   :  { %v2065_v7 = vpop.f32.mrb[24].mxu0 }
0x11a8   :  { %v14610_v8 = vpop.f32.mrb[25].mxu0  ;;  %14614 = vmatmul.mubr.msk.f32.vlgmr.msra.gmra.mrb[22].mxu1 %vm223_vm6, %v2065_v7 }
0x11a9   :  { %15432 = vmatpush3.bf16.msra.mxu1 %v15429_v56 }
0x11aa   :  { %15434 = vmatprep.subr.bf16.mxu1 %v15433_v59 }
0x11ad   :  { %15436 = vmatpush3.bf16.msra.mxu1 %v15433_v59 }
0x127b   :  { %v2138_v11 = vpop.f32.mrb[22].mxu1 }
0x127c   :  { %v2142_v12 = vadd.f32 %v2138_v11, %v1901_v61  ;;  %v14615_v55 = vpop.f32.mrb[23].mxu1  ;;  %v15437_v61 = vpack.c.bf16 %v2299_v0, %v2298_v60 }
0x127e   :  { %v2148_v14 = vadd.f32 %v2146_v43, %v2142_v12  ;;  %15438 = vmatprep.subr.bf16.mxu1 %v15437_v61 }
0x127f   :  { %15440 = vmatpush3.bf16.msra.mxu1 %v15437_v61 }
0x1280   :  { %v16314_v29 = vadd.f32 %v2148_v14, %v16034_v1  ;;  %v2301_v14 = vld [vmem:[%s18031_s8 + $0x38] sm:$0xff] }
0x1282   :  { %v2154_v15 = vsel %vm72_vm0, %v16314_v29, 0.0 }
0x1283   :  { %2155 = vadd.xlane.f32.xlu1 %v2154_v15  ;;  %v15441_v15 = vpack.c.bf16 %v2301_v14, %v2300_v13 }
0x1285   :  { %15442 = vmatprep.subr.bf16.mxu1 %v15441_v15 }
0x1286   :  { %15444 = vmatpush3.bf16.msra.mxu1 %v15441_v15 }
0x1287   :  { %2164 = vadd.xlane.f32.xlu1 %v2163_v17  ;;  %14662 = vmatprep.subr.mxu1 %v15910_v51  ;;  %v2210_v17 = vrot.slane %v16064_v38, %v16371_v16 }
0x1310   :  { %v2156_v18 = vpop.xlane.xlu1 %2155 }
0x1311   :  { %v2158_v57 = vmul.f32 0.03125, %v2156_v18 }
0x1313   :  { %v2160_v19 = vsub.f32 %v16314_v29, %v2158_v57 }
0x1314   :  { %v2165_v20 = vpop.xlane.xlu1 %2164 }
0x1315   :  { %v2169_v22 = vmul.f32 0.032258064, %v2165_v20  ;;  %v2162_v23 = vmul.f32 %v2160_v19, %v2160_v19  ;;  %v2176_v10 = vmul.f32 %v2174_v33, %v2160_v19 }
0x1317   :  { %15629 = vrsqrt.f32 %v2169_v22  ;;  %v2166_v24 = vsel %vm72_vm0, %v2162_v23, 0.0  ;;  %vm2179_vm7 = vcmp.eq.f32.partialorder %v2169_v22, inf  ;;  %v2182_v25 = vand.u32 2147483648, %v2169_v22 }
0x1318   :  { %2167 = vadd.xlane.f32.xlu1 %v2166_v24  ;;  %vm2181_vm8 = vcmp.eq.f32.partialorder %v2169_v22, 0.0  ;;  %v16380_v24 = vsub.s32 7, %v16056_v30 }
0x1321   :  { %v15630_v1 = vpop.eup %15629 }
0x1322   :  { %v2178_v4 = vmul.f32 %v15630_v1, %v2169_v22  ;;  %v2389_v1 = vrot.slane %v16064_v38, %v16380_v24 }
0x1324   :  { %v2180_v26 = vsel %vm2179_vm7, %v2169_v22, %v2178_v4 }
0x1325   :  { %v2183_v28 = vsel %vm2181_vm8, %v2182_v25, %v2180_v26 }
0x1326   :  { %v2191_v31 = vadd.f32 1e-06, %v2183_v28 }
0x1328   :  { %15631 = vrcp.f32 %v2191_v31 }
0x1332   :  { %v15632_v39 = vpop.eup %15631 }
0x1333   :  { %v2194_v42 = vmul.f32 %v15632_v39, %v2175_v35 }
0x1335   :  { %v2201_v43 = vadd.f32 %v2200_v37, %v2194_v42 }
0x1337   :  { %14624 = vmatprep.mubr.msk.f32.mxu0 %vm72_vm0, %v2201_v43 }
0x13a5   :  { %v2168_v63 = vpop.xlane.xlu1 %2167 }
0x13a6   :  { %v2170_v2 = vmul.f32 0.032258064, %v2168_v63 }
0x13a8   :  { %15633 = vrsqrt.f32 %v2170_v2  ;;  %vm2186_vm9 = vcmp.eq.f32.partialorder %v2170_v2, inf  ;;  %v2189_v6 = vand.u32 2147483648, %v2170_v2  ;;  %vm2188_vm10 = vcmp.eq.f32.partialorder %v2170_v2, 0.0 }
0x13b2   :  { %v15634_v3 = vpop.eup %15633 }
0x13b3   :  { %v2185_v5 = vmul.f32 %v15634_v3, %v2170_v2 }
0x13b5   :  { %v2187_v7 = vsel %vm2186_vm9, %v2170_v2, %v2185_v5 }
0x13b6   :  { %v2190_v8 = vsel %vm2188_vm10, %v2189_v6, %v2187_v7 }
0x13b7   :  { %v2192_v9 = vadd.f32 1e-06, %v2190_v8 }
0x13b9   :  { %15635 = vrcp.f32 %v2192_v9 }
0x13c3   :  { %v15636_v11 = vpop.eup %15635 }
0x13c4   :  { %v2196_v12 = vmul.f32 %v15636_v11, %v2176_v10  ;;  %v16414_v11 = vld [vmem:[%s18032_s9 + $0x8] sm:$0xff] }
0x13c5   :  { %v2443_v14 = vrot.slane %v16414_v11, %v16069_v41 }
0x13c6   :  { %v2202_v55 = vadd.f32 %v2200_v37, %v2196_v12 }
0x13c8   :  { %14625 = vmatmul.mubr.msk.f32.vlgmr.msra.gmra.mrb[26].mxu0 %vm72_vm0, %v2202_v55  ;;  %v2417_v55 = vrot.slane %v16414_v11, %v16059_v36 }
0x13c9   :  { %15448 = vmatpush3.bf16.msra.mxu0 %v15445_v50 }
0x13ca   :  { %15450 = vmatprep.subr.bf16.mxu0 %v15449_v54 }
0x13cd   :  { %15452 = vmatpush3.bf16.msra.mxu0 %v15449_v54 }
0x13ce   :  { %14657 = vmatprep.subr.mxu0 %v15910_v51 }
0x149b   :  { %v14626_v18 = vpop.f32.mrb[26].mxu0 }
0x149c   :  { %v2289_v57 = vadd.f32 %v14626_v18, %v2210_v17  ;;  %v2283_v19 = vpop.f32.mrb[27].mxu0 }
0x149d   :  { %v2284_v20 = vadd.f32 %v2283_v19, %v2210_v17 }
0x149e   :  { %v2293_v23 = vmax.f32 %v2289_v57, 0.0 }
0x149f   :  { %v2292_v22 = vmax.f32 %v2284_v20, 0.0 }
0x14a1   :  { %14643 = vmatprep.mubr.msk.f32.mxu1 %vm2302_vm11, %v2292_v22 }
0x14a2   :  { %14644 = vmatmul.mubr.msk.f32.vlgmr.msra.gmra.mrb[24].mxu1 %vm2302_vm11, %v2293_v23  ;;  %v2454_v23 = vrot.slane %v16414_v11, %v16082_v52 }
0x14a3   :  { %14664 = vmatprep.mubr.msk.f32.mxu1 %vm15911_vm5, %v15910_v51 }
0x1575   :  { %v14645_v4 = vpop.f32.mrb[24].mxu1 }
0x1576   :  { %v2385_v25 = vadd.f32 %v14645_v4, %v16314_v29  ;;  %v2375_v26 = vpop.f32.mrb[25].mxu1 }
0x1577   :  { %v2384_v28 = vadd.f32 %v2375_v26, %v16302_v49 }
0x1578   :  { %v16386_v31 = vadd.f32 %v2389_v1, %v2385_v25 }
0x1579   :  { %v16388_v33 = vadd.f32 %v2389_v1, %v2384_v28 }
0x157a   :  { %v2397_v35 = vsel %vm72_vm0, %v16386_v31, 0.0 }
0x157b   :  { %2398 = vadd.xlane.f32.xlu0 %v2397_v35  ;;  %v2394_v30 = vsel %vm72_vm0, %v16388_v33, 0.0 }
0x157c   :  { %2395 = vadd.xlane.f32.xlu1 %v2394_v30 }
0x1608   :  { %v2399_v37 = vpop.xlane.xlu0 %2398 }
0x1609   :  { %v2401_v38 = vmul.f32 0.03125, %v2399_v37  ;;  %v2396_v39 = vpop.xlane.xlu1 %2395 }
0x160a   :  { %v2400_v42 = vmul.f32 0.03125, %v2396_v39 }
0x160b   :  { %v2403_v29 = vsub.f32 %v16386_v31, %v2401_v38 }
0x160c   :  { %v2402_v49 = vsub.f32 %v16388_v33, %v2400_v42 }
0x160d   :  { %v2405_v45 = vmul.f32 %v2403_v29, %v2403_v29  ;;  %v2419_v18 = vmul.f32 %v2417_v55, %v2403_v29 }
0x160e   :  { %v2404_v43 = vmul.f32 %v2402_v49, %v2402_v49  ;;  %v2418_v13 = vmul.f32 %v2417_v55, %v2402_v49 }
0x160f   :  { %v2409_v46 = vsel %vm72_vm0, %v2405_v45, 0.0  ;;  %v16452_v45 = vld [vmem:[%s18076_s22] sm:$0xff] }
0x1610   :  { %v2406_v44 = vsel %vm72_vm0, %v2404_v43, 0.0 }
0x1611   :  { %2407 = vadd.xlane.f32.xlu1 %v2406_v44 }
0x1615   :  { %2410 = vadd.xlane.f32.xlu1 %v2409_v46 }
0x169e   :  { %v2408_v56 = vpop.xlane.xlu1 %2407 }
0x169f   :  { %v2412_v58 = vmul.f32 0.032258064, %v2408_v56 }
0x16a1   :  { %15637 = vrsqrt.f32 %v2412_v58  ;;  %vm2422_vm12 = vcmp.eq.f32.partialorder %v2412_v58, inf  ;;  %v2425_v63 = vand.u32 2147483648, %v2412_v58  ;;  %vm2424_vm13 = vcmp.eq.f32.partialorder %v2412_v58, 0.0 }
0x16a2   :  { %v2411_v59 = vpop.xlane.xlu1 %2410 }
0x16a3   :  { %v2413_v60 = vmul.f32 0.032258064, %v2411_v59 }
0x16a5   :  { %15639 = vrsqrt.f32 %v2413_v60  ;;  %vm2429_vm14 = vcmp.eq.f32.partialorder %v2413_v60, inf  ;;  %v2432_v8 = vand.u32 2147483648, %v2413_v60  ;;  %vm2431_vm15 = vcmp.eq.f32.partialorder %v2413_v60, 0.0 }
0x16ab   :  { %v15638_v0 = vpop.eup %15637 }
0x16ac   :  { %v2421_v61 = vmul.f32 %v15638_v0, %v2412_v58  ;;  %v16469_v0 = vld [vmem:[%s18029_s6 + $0x28] sm:$0xff] }
0x16ae   :  { %v2423_v2 = vsel %vm2422_vm12, %v2412_v58, %v2421_v61 }
0x16af   :  { %v15640_v3 = vpop.eup %15639  ;;  %v2426_v5 = vsel %vm2424_vm13, %v2425_v63, %v2423_v2 }
0x16b0   :  { %v2428_v6 = vmul.f32 %v15640_v3, %v2413_v60  ;;  %v2434_v7 = vadd.f32 1e-06, %v2426_v5 }
0x16b2   :  { %v2430_v9 = vsel %vm2429_vm14, %v2413_v60, %v2428_v6  ;;  %15641 = vrcp.f32 %v2434_v7 }
0x16b3   :  { %v2433_v10 = vsel %vm2431_vm15, %v2432_v8, %v2430_v9  ;;  %v16484_v9 = vld [vmem:[%s18029_s6 + $0x20] sm:$0xff] }
0x16b4   :  { %v2435_v12 = vadd.f32 1e-06, %v2433_v10 }
0x16b6   :  { %15643 = vrcp.f32 %v2435_v12 }
0x16bc   :  { %v15642_v15 = vpop.eup %15641 }
0x16bd   :  { %v2437_v17 = vmul.f32 %v15642_v15, %v2418_v13 }
0x16bf   :  { %v2444_v57 = vadd.f32 %v2443_v14, %v2437_v17 }
0x16c0   :  { %v15644_v19 = vpop.eup %15643 }
0x16c1   :  { %v2439_v20 = vmul.f32 %v15644_v19, %v2419_v18  ;;  %14654 = vmatprep.mubr.msk.f32.mxu0 %vm72_vm0, %v2444_v57 }
0x16c3   :  { %v2445_v22 = vadd.f32 %v2443_v14, %v2439_v20 }
0x16c5   :  { %14655 = vmatmul.mubr.msk.f32.vlgmr.msra.gmra.mrb[28].mxu0 %vm72_vm0, %v2445_v22 }
0x16c6   :  { %14659 = vmatprep.mubr.msk.f32.mxu0 %vm15911_vm5, %v15910_v51 }
0x1798   :  { %v14656_v1 = vpop.f32.mrb[28].mxu0 }
0x1799   :  { %v16426_v4 = vadd.f32 %v14656_v1, %v2454_v23  ;;  %v2527_v25 = vpop.f32.mrb[29].mxu0 }
0x179a   :  { %v16428_v26 = vadd.f32 %v2527_v25, %v2454_v23 }
0x179c   :  { %2707 = vrot.lane.b32.xlu0 %v16428_v26, %s18067_s20  ;;  %2542 = vrot.lane.b32.xlu1 %v16428_v26, %s18065_s30 }
0x17a0   :  { %2709 = vrot.lane.b32.xlu1 %v16428_v26, %s18077_s26 }
0x180e   :  { %v2543_v28 = vpop.permute.xlu1 %2542  ;;  %v2708_v30 = vpop.permute.xlu0 %2707 }
0x180f   :  { %14658 = vmatpush3.xpose.msk.msra.mxu0 %vm223_vm6, %v2543_v28 }
0x1810   :  { %14667 = vmatprep.subr.mxu0 %v15910_v51 }
0x1812   :  { %14660 = vmatmul.mubr.msk.f32.vlgmr.msra.gmra.mrb[30].mxu0 %vm223_vm6, %v16428_v26  ;;  %v2710_v35 = vpop.permute.xlu1 %2709 }
0x1813   :  { %14668 = vmatpush3.xpose.msk.msra.mxu0 %vm223_vm6, %v2710_v35  ;;  %14669 = vmatprep.mubr.msk.f32.mxu0 %vm15911_vm5, %v15910_v51 }
0x1814   :  { %14677 = vmatprep.subr.mxu0 %v15910_v51 }
0x1816   :  { %14670 = vmatmul.mubr.msk.f32.vlgmr.msra.gmra.mrb[32].mxu0 %vm223_vm6, %v2708_v30 }
0x1817   :  { %14679 = vmatprep.mubr.msk.f32.mxu0 %vm15911_vm5, %v15910_v51  ;;  %14678 = vmatpush3.msra.mxu0 %v16469_v0 }
0x1818   :  { %14687 = vmatprep.subr.mxu0 %v15910_v51 }
0x18e5   :  { %v2614_v37 = vpop.f32.mrb[30].mxu0 }
0x18e6   :  { %v2618_v38 = vmul.f32 0.35355338, %v2614_v37  ;;  %v14661_v39 = vpop.f32.mrb[31].mxu0 }
0x18e8   :  { %v2619_v42 = vadd.f32 %v2618_v38, %v16110_v62 }
0x18e9   :  { %v2781_v29 = vpop.f32.mrb[32].mxu0 }
0x18ea   :  { %v2785_v49 = vmul.f32 0.35355338, %v2781_v29  ;;  %v14671_v43 = vpop.f32.mrb[33].mxu0  ;;  %v2620_v44 = vsel %vm223_vm6, %v2619_v42, -inf }
0x18eb   :  { %2621 = vmax.xlane.f32.xlu1 %v2620_v44 }
0x18ec   :  { %v2786_v46 = vadd.f32 %v16452_v45, %v2785_v49 }
0x18ee   :  { %v2787_v27 = vsel %vm223_vm6, %v2786_v46, -inf }
0x18ef   :  { %2788 = vmax.xlane.f32.xlu0 %v2787_v27  ;;  %v16520_v27 = vld [vmem:[%s18029_s6 + $0x30] sm:$0xff] }
0x1905   :  { %2798 = vrot.lane.b32.xlu0 %v16428_v26, %s18063_s25 }
0x1978   :  { %v2622_v62 = vpop.xlane.xlu1 %2621 }
0x1979   :  { %v2623_v47 = vsub.f32 %v2619_v42, %v2622_v62 }
0x197b   :  { %v2624_v48 = vmul.f32 1.442695, %v2623_v47 }
0x197c   :  { %v2789_v50 = vpop.xlane.xlu0 %2788 }
0x197d   :  { %15645 = vpow2.f32 %v2624_v48  ;;  %v2790_v53 = vsub.f32 %v2786_v46, %v2789_v50 }
0x197f   :  { %v2791_v54 = vmul.f32 1.442695, %v2790_v53 }
0x1980   :  { %v2799_v6 = vpop.permute.xlu0 %2798 }
0x1981   :  { %15647 = vpow2.f32 %v2791_v54 }
0x1987   :  { %v15646_v56 = vpop.eup %15645 }
0x1988   :  { %v2626_v58 = vsel %vm223_vm6, %v15646_v56, 0.0 }
0x1989   :  { %2627 = vadd.xlane.f32.xlu1 %v2626_v58 }
0x198b   :  { %v15648_v59 = vpop.eup %15647 }
0x198c   :  { %v2793_v60 = vsel %vm223_vm6, %v15648_v59, 0.0 }
0x198d   :  { %2794 = vadd.xlane.f32.xlu1 %v2793_v60 }
0x199e   :  { %2631 = vrot.lane.b32.xlu1 %v16428_v26, %s18061_s2 }
0x19a2   :  { %3022 = vrot.lane.b32.xlu1 %v16428_v26, %s18078_s21 }
0x19a6   :  { %3020 = vrot.lane.b32.xlu1 %v16428_v26, %s18079_s1 }
0x1a16   :  { %v2628_v61 = vpop.xlane.xlu1 %2627 }
0x1a17   :  { %15649 = vrcp.f32 %v2628_v61 }
0x1a1a   :  { %v2795_v63 = vpop.xlane.xlu1 %2794 }
0x1a1b   :  { %15651 = vrcp.f32 %v2795_v63 }
0x1a1e   :  { %v2632_v2 = vpop.permute.xlu1 %2631 }
0x1a1f   :  { %14663 = vmatpush3.msra.mxu1 %v2632_v2 }
0x1a20   :  { %14672 = vmatprep.subr.mxu1 %v15910_v51 }
0x1a21   :  { %v15650_v3 = vpop.eup %15649 }
0x1a22   :  { %v2630_v5 = vmul.f32 %v15650_v3, %v15646_v56  ;;  %v3023_v55 = vpop.permute.xlu1 %3022 }
0x1a24   :  { %14665 = vmatmul.mubr.msk.f32.vlgmr.msra.gmra.mrb[26].mxu1 %vm223_vm6, %v2630_v5 }
0x1a25   :  { %v15652_v7 = vpop.eup %15651  ;;  %14673 = vmatpush3.msra.mxu1 %v2799_v6  ;;  %14674 = vmatprep.mubr.msk.f32.mxu1 %vm15911_vm5, %v15910_v51 }
0x1a26   :  { %v2797_v8 = vmul.f32 %v15652_v7, %v15648_v59  ;;  %14682 = vmatprep.subr.mxu1 %v15910_v51  ;;  %v3021_v15 = vpop.permute.xlu1 %3020 }
0x1a28   :  { %14675 = vmatmul.mubr.msk.f32.vlgmr.msra.gmra.mrb[28].mxu1 %vm223_vm6, %v2797_v8 }
0x1a29   :  { %14684 = vmatprep.mubr.msk.f32.mxu1 %vm15911_vm5, %v15910_v51  ;;  %14683 = vmatpush3.msra.mxu1 %v16484_v9 }
0x1a2a   :  { %14692 = vmatprep.subr.mxu1 %v15910_v51 }
0x1af7   :  { %v2703_v10 = vpop.f32.mrb[26].mxu1 }
0x1af8   :  { %v14666_v12 = vpop.f32.mrb[27].mxu1  ;;  %14685 = vmatmul.mubr.msk.f32.vlgmr.msra.gmra.mrb[30].mxu1 %vm223_vm6, %v2703_v10 }
0x1af9   :  { %14694 = vmatprep.mubr.msk.f32.mxu1 %vm15911_vm5, %v15910_v51 }
0x1afb   :  { %v2870_v13 = vpop.f32.mrb[28].mxu1 }
0x1afc   :  { %v14676_v14 = vpop.f32.mrb[29].mxu1  ;;  %14680 = vmatmul.mubr.msk.f32.vlgmr.msra.gmra.mrb[34].mxu0 %vm223_vm6, %v2870_v13 }
0x1afd   :  { %14688 = vmatpush3.xpose.msk.msra.mxu0 %vm223_vm6, %v3023_v55  ;;  %14689 = vmatprep.mubr.msk.f32.mxu0 %vm15911_vm5, %v15910_v51  ;;  %v16558_v55 = vld [vmem:[%s18029_s6 + $0x38] sm:$0xff]  ;;  %s18089_s6 = smov 120  }
0x1afe   :  { %14697 = vmatprep.subr.mxu0 %v15910_v51 }
0x1b00   :  { %14690 = vmatmul.mubr.msk.f32.vlgmr.msra.gmra.mrb[36].mxu0 %vm223_vm6, %v3021_v15 }
0x1b01   :  { %14699 = vmatprep.mubr.msk.f32.mxu0 %vm15911_vm5, %v15910_v51  ;;  %14698 = vmatpush3.msra.mxu0 %v16520_v27 }
0x1b02   :  { %14707 = vmatprep.subr.mxu0 %v15910_v51 }
0x1bcb   :  { %v3016_v17 = vpop.f32.mrb[30].mxu1 }
0x1bcc   :  { %v14686_v18 = vpop.f32.mrb[31].mxu1 }
0x1bcf   :  { %v2943_v57 = vpop.f32.mrb[34].mxu0 }
0x1bd0   :  { %v3017_v19 = vadd.f32 %v3016_v17, %v2943_v57  ;;  %v14681_v20 = vpop.f32.mrb[35].mxu0 }
0x1bd3   :  { %v3094_v22 = vpop.f32.mrb[36].mxu0 }
0x1bd4   :  { %v3098_v23 = vmul.f32 0.35355338, %v3094_v22  ;;  %v14691_v1 = vpop.f32.mrb[37].mxu0 }
0x1bd6   :  { %v3099_v25 = vadd.f32 %v16452_v45, %v3098_v23 }
0x1bd8   :  { %v3100_v28 = vsel %vm223_vm6, %v3099_v25, -inf }
0x1bd9   :  { %3101 = vmax.xlane.f32.xlu1 %v3100_v28 }
0x1bea   :  { %3111 = vrot.lane.b32.xlu1 %v16428_v26, %s18080_s5 }
0x1bee   :  { %3261 = vrot.lane.b32.xlu1 %v16428_v26, %s18081_s3 }
0x1c66   :  { %v3102_v35 = vpop.xlane.xlu1 %3101 }
0x1c67   :  { %v3103_v30 = vsub.f32 %v3099_v25, %v3102_v35 }
0x1c69   :  { %v3104_v37 = vmul.f32 1.442695, %v3103_v30 }
0x1c6a   :  { %v3112_v38 = vpop.permute.xlu1 %3111 }
0x1c6b   :  { %15653 = vpow2.f32 %v3104_v37  ;;  %14693 = vmatpush3.msra.mxu1 %v3112_v38 }
0x1c6c   :  { %14702 = vmatprep.subr.mxu1 %v15910_v51 }
0x1c6e   :  { %v3262_v46 = vpop.permute.xlu1 %3261 }
0x1c75   :  { %v15654_v39 = vpop.eup %15653 }
0x1c76   :  { %v3106_v42 = vsel %vm223_vm6, %v15654_v39, 0.0 }
0x1c77   :  { %3107 = vadd.xlane.f32.xlu0 %v3106_v42 }
0x1c8d   :  { %3263 = vrot.lane.b32.xlu0 %v16428_v26, %s18082_s29 }
0x1d04   :  { %v3108_v29 = vpop.xlane.xlu0 %3107 }
0x1d05   :  { %15655 = vrcp.f32 %v3108_v29 }
0x1d08   :  { %v3264_v44 = vpop.permute.xlu0 %3263 }
0x1d0f   :  { %v15656_v49 = vpop.eup %15655 }
0x1d10   :  { %v3110_v43 = vmul.f32 %v15656_v49, %v15654_v39 }
0x1d12   :  { %14695 = vmatmul.mubr.msk.f32.vlgmr.msra.gmra.mrb[32].mxu1 %vm223_vm6, %v3110_v43 }
0x1d13   :  { %14703 = vmatpush3.xpose.msk.msra.mxu1 %vm223_vm6, %v3264_v44  ;;  %14704 = vmatprep.mubr.msk.f32.mxu1 %vm15911_vm5, %v15910_v51 }
0x1d14   :  { %14712 = vmatprep.subr.mxu1 %v15910_v51 }
0x1d16   :  { %14705 = vmatmul.mubr.msk.f32.vlgmr.msra.gmra.mrb[34].mxu1 %vm223_vm6, %v3262_v46 }
0x1d17   :  { %14714 = vmatprep.mubr.msk.f32.mxu1 %vm15911_vm5, %v15910_v51  ;;  %14713 = vmatpush3.msra.mxu1 %v16558_v55 }
0x1d18   :  { %14722 = vmatprep.subr.mxu1 %v15910_v51 }
0x1de5   :  { %v3183_v62 = vpop.f32.mrb[32].mxu1 }
0x1de6   :  { %v14696_v47 = vpop.f32.mrb[33].mxu1  ;;  %14700 = vmatmul.mubr.msk.f32.vlgmr.msra.gmra.mrb[38].mxu0 %vm223_vm6, %v3183_v62 }
0x1de7   :  { %14709 = vmatprep.mubr.msk.f32.mxu0 %vm15911_vm5, %v15910_v51 }
0x1de9   :  { %v3335_v48 = vpop.f32.mrb[34].mxu1 }
0x1dea   :  { %v3339_v50 = vmul.f32 0.35355338, %v3335_v48  ;;  %v14706_v53 = vpop.f32.mrb[35].mxu1 }
0x1dec   :  { %v3340_v54 = vadd.f32 %v16452_v45, %v3339_v50 }
0x1dee   :  { %v3341_v56 = vsel %vm223_vm6, %v3340_v54, -inf }
0x1def   :  { %3342 = vmax.xlane.f32.xlu1 %v3341_v56 }
0x1e00   :  { %3503 = vrot.lane.b32.xlu1 %v16426_v4, %s18065_s30 }
0x1e04   :  { %3670 = vrot.lane.b32.xlu1 %v16426_v4, %s18077_s26 }
0x1e7c   :  { %v3343_v58 = vpop.xlane.xlu1 %3342 }
0x1e7d   :  { %v3344_v59 = vsub.f32 %v3340_v54, %v3343_v58 }
0x1e7f   :  { %v3345_v60 = vmul.f32 1.442695, %v3344_v59 }
0x1e80   :  { %v3504_v8 = vpop.permute.xlu1 %3503 }
0x1e81   :  { %15657 = vpow2.f32 %v3345_v60 }
0x1e8b   :  { %v15658_v61 = vpop.eup %15657 }
0x1e8c   :  { %v3347_v63 = vsel %vm223_vm6, %v15658_v61, 0.0 }
0x1e8d   :  { %3348 = vadd.xlane.f32.xlu0 %v3347_v63 }
0x1ea3   :  { %3352 = vrot.lane.b32.xlu0 %v16428_v26, %s18083_s28  ;;  %v3671_v26 = vpop.permute.xlu1 %3670 }
0x1ea7   :  { %3668 = vrot.lane.b32.xlu0 %v16426_v4, %s18067_s20 }
0x1eb9   :  { %v3256_v45 = vpop.f32.mrb[38].mxu0 }
0x1eba   :  { %v3260_v2 = vadd.f32 %v3256_v45, %v3017_v19  ;;  %v14701_v3 = vpop.f32.mrb[39].mxu0 }
0x1f1a   :  { %v3349_v5 = vpop.xlane.xlu0 %3348 }
0x1f1b   :  { %15659 = vrcp.f32 %v3349_v5 }
0x1f1e   :  { %v3353_v6 = vpop.permute.xlu0 %3352 }
0x1f1f   :  { %14708 = vmatpush3.msra.mxu0 %v3353_v6 }
0x1f20   :  { %14717 = vmatprep.subr.mxu0 %v15910_v51 }
0x1f22   :  { %v3669_v12 = vpop.permute.xlu0 %3668 }
0x1f25   :  { %v15660_v7 = vpop.eup %15659 }
0x1f26   :  { %v3351_v10 = vmul.f32 %v15660_v7, %v15658_v61 }
0x1f28   :  { %14710 = vmatmul.mubr.msk.f32.vlgmr.msra.gmra.mrb[40].mxu0 %vm223_vm6, %v3351_v10 }
0x1f29   :  { %14718 = vmatpush3.xpose.msk.msra.mxu0 %vm223_vm6, %v3504_v8  ;;  %14719 = vmatprep.mubr.msk.f32.mxu0 %vm15911_vm5, %v15910_v51 }
0x1f2a   :  { %14727 = vmatprep.subr.mxu0 %v15910_v51 }
0x1f2c   :  { %14720 = vmatmul.mubr.msk.f32.vlgmr.msra.gmra.mrb[42].mxu0 %vm223_vm6, %v16426_v4 }
0x1f2d   :  { %14728 = vmatpush3.xpose.msk.msra.mxu0 %vm223_vm6, %v3671_v26  ;;  %14729 = vmatprep.mubr.msk.f32.mxu0 %vm15911_vm5, %v15910_v51  ;;  %v15878_v26 = vld [vmem:[%s18076_s22 + $0x8] sm:$0xff] }
0x1f2e   :  { %14737 = vmatprep.subr.mxu0 %v15910_v51 }
0x1f30   :  { %14730 = vmatmul.mubr.msk.f32.vlgmr.msra.gmra.mrb[44].mxu0 %vm223_vm6, %v3669_v12 }
0x1f31   :  { %14738 = vmatpush3.msra.mxu0 %v16469_v0  ;;  %14739 = vmatprep.mubr.msk.f32.mxu0 %vm15911_vm5, %v15910_v51 }
0x1f32   :  { %14747 = vmatprep.subr.mxu0 %v15910_v51 }
0x1ffb   :  { %v3424_v13 = vpop.f32.mrb[40].mxu0 }
0x1ffc   :  { %v14711_v14 = vpop.f32.mrb[41].mxu0  ;;  %14715 = vmatmul.mubr.msk.f32.vlgmr.msra.gmra.mrb[36].mxu1 %vm223_vm6, %v3424_v13 }
0x1ffd   :  { %14724 = vmatprep.mubr.msk.f32.mxu1 %vm15911_vm5, %v15910_v51 }
0x1fff   :  { %v3575_v0 = vpop.f32.mrb[42].mxu0 }
0x2000   :  { %v3579_v15 = vmul.f32 0.35355338, %v3575_v0  ;;  %v14721_v17 = vpop.f32.mrb[43].mxu0 }
0x2002   :  { %v3580_v18 = vadd.f32 %v3579_v15, %v16231_v32 }
0x2003   :  { %v3742_v57 = vpop.f32.mrb[44].mxu0 }
0x2004   :  { %v3746_v19 = vmul.f32 0.35355338, %v3742_v57  ;;  %v14731_v20 = vpop.f32.mrb[45].mxu0  ;;  %v3581_v22 = vsel %vm223_vm6, %v3580_v18, -inf }
0x2005   :  { %3582 = vmax.xlane.f32.xlu1 %v3581_v22 }
0x2006   :  { %v3747_v23 = vadd.f32 %v3746_v19, %v16231_v32 }
0x2008   :  { %v3748_v1 = vsel %vm223_vm6, %v3747_v23, -inf }
0x2009   :  { %3749 = vmax.xlane.f32.xlu0 %v3748_v1 }
0x2092   :  { %v3583_v25 = vpop.xlane.xlu1 %3582 }
0x2093   :  { %v3584_v28 = vsub.f32 %v3580_v18, %v3583_v25 }
0x2095   :  { %v3585_v35 = vmul.f32 1.442695, %v3584_v28 }
0x2096   :  { %v3750_v30 = vpop.xlane.xlu0 %3749 }
0x2097   :  { %15661 = vpow2.f32 %v3585_v35  ;;  %v3751_v37 = vsub.f32 %v3747_v23, %v3750_v30 }
0x2099   :  { %v3752_v38 = vmul.f32 1.442695, %v3751_v37 }
0x209b   :  { %15663 = vpow2.f32 %v3752_v38 }
0x20a1   :  { %v15662_v39 = vpop.eup %15661 }
0x20a2   :  { %v3587_v42 = vsel %vm223_vm6, %v15662_v39, 0.0 }
0x20a3   :  { %3588 = vadd.xlane.f32.xlu0 %v3587_v42 }
0x20a5   :  { %v15664_v29 = vpop.eup %15663 }
0x20a6   :  { %v3754_v49 = vsel %vm223_vm6, %v15664_v29, 0.0 }
0x20a7   :  { %3755 = vadd.xlane.f32.xlu1 %v3754_v49  ;;  %v4466_v49 = vrot.slane %v16414_v11, %v16292_v40 }
0x20b8   :  { %3759 = vrot.lane.b32.xlu1 %v16426_v4, %s18063_s25  ;;  %s18087_s25 = smov 56  }
0x20b9   :  { %3592 = vrot.lane.b32.xlu0 %v16426_v4, %s18061_s2  ;;  %s18086_s2 = sld [smem:[#allocation8_spill]] }
0x20bc   :  { %3983 = vrot.lane.b32.xlu1 %v16426_v4, %s18078_s21 }
0x20bd   :  { %3981 = vrot.lane.b32.xlu0 %v16426_v4, %s18079_s1 }
0x20cf   :  { %v3497_v32 = vpop.f32.mrb[36].mxu1 }
0x20d0   :  { %v16579_v43 = vadd.f32 %v3497_v32, %v3260_v2  ;;  %v14716_v44 = vpop.f32.mrb[37].mxu1 }
0x20d2   :  { %v4467_v32 = vadd.f32 %v4466_v49, %v16579_v43 }
0x2130   :  { %v3589_v46 = vpop.xlane.xlu0 %3588 }
0x2131   :  { %15665 = vrcp.f32 %v3589_v46  ;;  %v16635_v46 = vadd.f32 %v4467_v32, %v16388_v33 }
0x2134   :  { %v3756_v62 = vpop.xlane.xlu1 %3755  ;;  %v3593_v47 = vpop.permute.xlu0 %3592 }
0x2135   :  { %15667 = vrcp.f32 %v3756_v62  ;;  %14723 = vmatpush3.msra.mxu1 %v3593_v47 }
0x2136   :  { %14732 = vmatprep.subr.mxu1 %v15910_v51 }
0x2138   :  { %v3760_v53 = vpop.permute.xlu1 %3759 }
0x213b   :  { %v15666_v48 = vpop.eup %15665 }
0x213c   :  { %v3591_v50 = vmul.f32 %v15666_v48, %v15662_v39  ;;  %v3984_v61 = vpop.permute.xlu1 %3983 }
0x213e   :  { %14725 = vmatmul.mubr.msk.f32.vlgmr.msra.gmra.mrb[38].mxu1 %vm223_vm6, %v3591_v50 }
0x213f   :  { %v15668_v54 = vpop.eup %15667  ;;  %14733 = vmatpush3.msra.mxu1 %v3760_v53  ;;  %14734 = vmatprep.mubr.msk.f32.mxu1 %vm15911_vm5, %v15910_v51 }
0x2140   :  { %v3758_v56 = vmul.f32 %v15668_v54, %v15664_v29  ;;  %14742 = vmatprep.subr.mxu1 %v15910_v51 }
0x2142   :  { %14735 = vmatmul.mubr.msk.f32.vlgmr.msra.gmra.mrb[40].mxu1 %vm223_vm6, %v3758_v56 }
0x2143   :  { %14743 = vmatpush3.msra.mxu1 %v16484_v9  ;;  %14744 = vmatprep.mubr.msk.f32.mxu1 %vm15911_vm5, %v15910_v51  ;;  %v3982_v9 = vpop.permute.xlu0 %3981 }
0x2144   :  { %14752 = vmatprep.subr.mxu1 %v15910_v51 }
0x2211   :  { %v3664_v58 = vpop.f32.mrb[38].mxu1 }
0x2212   :  { %v14726_v59 = vpop.f32.mrb[39].mxu1  ;;  %14745 = vmatmul.mubr.msk.f32.vlgmr.msra.gmra.mrb[42].mxu1 %vm223_vm6, %v3664_v58 }
0x2213   :  { %14754 = vmatprep.mubr.msk.f32.mxu1 %vm15911_vm5, %v15910_v51 }
0x2215   :  { %v3831_v60 = vpop.f32.mrb[40].mxu1 }
0x2216   :  { %v14736_v63 = vpop.f32.mrb[41].mxu1  ;;  %14740 = vmatmul.mubr.msk.f32.vlgmr.msra.gmra.mrb[46].mxu0 %vm223_vm6, %v3831_v60 }
0x2217   :  { %14748 = vmatpush3.xpose.msk.msra.mxu0 %vm223_vm6, %v3984_v61  ;;  %14749 = vmatprep.mubr.msk.f32.mxu0 %vm15911_vm5, %v15910_v51 }
0x2218   :  { %14757 = vmatprep.subr.mxu0 %v15910_v51 }
0x221a   :  { %14750 = vmatmul.mubr.msk.f32.vlgmr.msra.gmra.mrb[48].mxu0 %vm223_vm6, %v3982_v9 }
0x221b   :  { %14758 = vmatpush3.msra.mxu0 %v16520_v27  ;;  %14759 = vmatprep.mubr.msk.f32.mxu0 %vm15911_vm5, %v15910_v51 }
0x221c   :  { %14767 = vmatprep.subr.mxu0 %v15910_v51 }
0x22e5   :  { %v3977_v45 = vpop.f32.mrb[42].mxu1 }
0x22e6   :  { %v14746_v2 = vpop.f32.mrb[43].mxu1 }
0x22e9   :  { %v3904_v3 = vpop.f32.mrb[46].mxu0 }
0x22ea   :  { %v3978_v5 = vadd.f32 %v3977_v45, %v3904_v3  ;;  %v14741_v6 = vpop.f32.mrb[47].mxu0 }
0x22ed   :  { %v4055_v7 = vpop.f32.mrb[48].mxu0 }
0x22ee   :  { %v4059_v8 = vmul.f32 0.35355338, %v4055_v7  ;;  %v14751_v10 = vpop.f32.mrb[49].mxu0  ;;  %v16645_v7 = vrot.slane %v16414_v11, %v16322_v21 }
0x22ef   :  { %v16650_v10 = vrot.slane %v16414_v11, %v16327_v34 }
0x22f0   :  { %v4060_v12 = vadd.f32 %v15878_v26, %v4059_v8 }
0x22f2   :  { %v4061_v27 = vsel %vm223_vm6, %v4060_v12, -inf }
0x22f3   :  { %4062 = vmax.xlane.f32.xlu1 %v4061_v27 }
0x2304   :  { %4224 = vrot.lane.b32.xlu1 %v16426_v4, %s18082_s29 }
0x2308   :  { %4222 = vrot.lane.b32.xlu1 %v16426_v4, %s18081_s3 }
0x2380   :  { %v4063_v13 = vpop.xlane.xlu1 %4062 }
0x2381   :  { %v4064_v14 = vsub.f32 %v4060_v12, %v4063_v13 }
0x2383   :  { %v4065_v0 = vmul.f32 1.442695, %v4064_v14 }
0x2384   :  { %v4225_v20 = vpop.permute.xlu1 %4224 }
0x2385   :  { %15669 = vpow2.f32 %v4065_v0 }
0x2388   :  { %v4223_v23 = vpop.permute.xlu1 %4222 }
0x238f   :  { %v15670_v15 = vpop.eup %15669 }
0x2390   :  { %v4067_v17 = vsel %vm223_vm6, %v15670_v15, 0.0 }
0x2391   :  { %4068 = vadd.xlane.f32.xlu0 %v4067_v17 }
0x23a7   :  { %4072 = vrot.lane.b32.xlu0 %v16426_v4, %s18080_s5 }
0x241e   :  { %v4069_v18 = vpop.xlane.xlu0 %4068 }
0x241f   :  { %15671 = vrcp.f32 %v4069_v18 }
0x2422   :  { %v4073_v57 = vpop.permute.xlu0 %4072 }
0x2423   :  { %14753 = vmatpush3.msra.mxu1 %v4073_v57 }
0x2424   :  { %14762 = vmatprep.subr.mxu1 %v15910_v51 }
0x2429   :  { %v15672_v19 = vpop.eup %15671 }
0x242a   :  { %v4071_v22 = vmul.f32 %v15672_v19, %v15670_v15  ;;  %v16661_v19 = vld [vmem:[%s18084_s23] sm:$0xff] }
0x242c   :  { %14755 = vmatmul.mubr.msk.f32.vlgmr.msra.gmra.mrb[44].mxu1 %vm223_vm6, %v4071_v22  ;;  %v4771_v22 = vsel %vm72_vm0, %v16661_v19, 0.0 }
0x242d   :  { %14763 = vmatpush3.xpose.msk.msra.mxu1 %vm223_vm6, %v4225_v20  ;;  %14764 = vmatprep.mubr.msk.f32.mxu1 %vm15911_vm5, %v15910_v51 }
0x242e   :  { %14772 = vmatprep.subr.mxu1 %v15910_v51 }
0x2430   :  { %14765 = vmatmul.mubr.msk.f32.vlgmr.msra.gmra.mrb[46].mxu1 %vm223_vm6, %v4223_v23  ;;  %v16670_v23 = vld [vmem:[%s18084_s23 + $0x8] sm:$0xff] }
0x2431   :  { %14773 = vmatpush3.msra.mxu1 %v16558_v55  ;;  %14774 = vmatprep.mubr.msk.f32.mxu1 %vm15911_vm5, %v15910_v51 }
0x24ff   :  { %v4144_v1 = vpop.f32.mrb[44].mxu1 }
0x2500   :  { %v14756_v25 = vpop.f32.mrb[45].mxu1  ;;  %14760 = vmatmul.mubr.msk.f32.vlgmr.msra.gmra.mrb[50].mxu0 %vm223_vm6, %v4144_v1 }
0x2501   :  { %14769 = vmatprep.mubr.msk.f32.mxu0 %vm15911_vm5, %v15910_v51 }
0x2503   :  { %v4296_v28 = vpop.f32.mrb[46].mxu1 }
0x2504   :  { %v4300_v35 = vmul.f32 0.35355338, %v4296_v28  ;;  %v14766_v30 = vpop.f32.mrb[47].mxu1 }
0x2506   :  { %v4301_v37 = vadd.f32 %v15878_v26, %v4300_v35 }
0x2508   :  { %v4302_v38 = vsel %vm223_vm6, %v4301_v37, -inf }
0x2509   :  { %4303 = vmax.xlane.f32.xlu0 %v4302_v38 }
0x251f   :  { %4313 = vrot.lane.b32.xlu0 %v16426_v4, %s18083_s28  ;;  %v4471_v4 = vsel %vm72_vm0, %v16635_v46, 0.0 }
0x2596   :  { %v4304_v55 = vpop.xlane.xlu0 %4303 }
0x2597   :  { %v4305_v39 = vsub.f32 %v4301_v37, %v4304_v55 }
0x2599   :  { %v4306_v42 = vmul.f32 1.442695, %v4305_v39 }
0x259a   :  { %v4314_v29 = vpop.permute.xlu0 %4313 }
0x259b   :  { %15673 = vpow2.f32 %v4306_v42  ;;  %14768 = vmatpush3.msra.mxu0 %v4314_v29 }
0x25a5   :  { %v15674_v44 = vpop.eup %15673 }
0x25a6   :  { %v4308_v62 = vsel %vm223_vm6, %v15674_v44, 0.0 }
0x25a7   :  { %4309 = vadd.xlane.f32.xlu1 %v4308_v62 }
0x25ab   :  { %4472 = vadd.xlane.f32.xlu1 %v4471_v4  ;;  %v13883_v4 = vld [vmem:[%s18030_s7 + $0x20] sm:$0xff] }
0x25d3   :  { %v4217_v47 = vpop.f32.mrb[50].mxu0 }
0x25d4   :  { %v4221_v48 = vadd.f32 %v4217_v47, %v3978_v5  ;;  %v14761_v50 = vpop.f32.mrb[51].mxu0  ;;  %v13884_v47 = vld [vmem:[%s18030_s7 + $0x28] sm:$0xff] }
0x25d5   :  { %v13885_v50 = vld [vmem:[%s18030_s7 + $0x30] sm:$0xff] }
0x2634   :  { %v4310_v53 = vpop.xlane.xlu1 %4309 }
0x2635   :  { %15675 = vrcp.f32 %v4310_v53  ;;  %v13886_v53 = vld [vmem:[%s18030_s7 + $0x38] sm:$0xff] }
0x2638   :  { %v4473_v54 = vpop.xlane.xlu1 %4472 }
0x2639   :  { %v4477_v56 = vmul.f32 0.03125, %v4473_v54  ;;  %v15457_v54 = vpack.c.bf16 %v13886_v53, %v13885_v50 }
0x263b   :  { %v4479_v43 = vsub.f32 %v16635_v46, %v4477_v56  ;;  %v4823_v56 = vld [vmem:[%s18033_s10] sm:$0xff] }
0x263d   :  { %v4481_v58 = vmul.f32 %v4479_v43, %v4479_v43  ;;  %v4495_v8 = vmul.f32 %v16645_v7, %v4479_v43  ;;  %v4824_v43 = vld [vmem:[%s18033_s10 + $0x8] sm:$0xff] }
0x263f   :  { %v15676_v59 = vpop.eup %15675  ;;  %v4483_v33 = vsel %vm72_vm0, %v4481_v58, 0.0  ;;  %v16710_v58 = vpack.c.bf16 %v4824_v43, %v4823_v56 }
0x2640   :  { %4484 = vadd.xlane.f32.xlu0 %v4483_v33  ;;  %v4312_v60 = vmul.f32 %v15676_v59, %v15674_v44  ;;  %v13889_v59 = vld [vmem:[%s18031_s8 + $0x40] sm:$0xff]  ;;  %v13890_v33 = vld [vmem:[%s18031_s8 + $0x48] sm:$0xff] }
0x2642   :  { %14770 = vmatmul.mubr.msk.f32.vlgmr.msra.gmra.mrb[52].mxu0 %vm223_vm6, %v4312_v60  ;;  %v13891_v60 = vld [vmem:[%s18031_s8 + $0x50] sm:$0xff] }
0x26cd   :  { %v4485_v61 = vpop.xlane.xlu0 %4484 }
0x26ce   :  { %v4489_v63 = vmul.f32 0.032258064, %v4485_v61  ;;  %v15461_v61 = vpack.c.bf16 %v13890_v33, %v13889_v59 }
0x26d0   :  { %15677 = vrsqrt.f32 %v4489_v63  ;;  %vm4499_vm1 = vcmp.eq.f32.partialorder %v4489_v63, inf  ;;  %v4502_v2 = vand.u32 2147483648, %v4489_v63  ;;  %vm4501_vm2 = vcmp.eq.f32.partialorder %v4489_v63, 0.0  ;;  %15462 = vmatprep.subr.bf16.mxu1 %v15461_v61 }
0x26da   :  { %v15678_v9 = vpop.eup %15677 }
0x26db   :  { %v4498_v45 = vmul.f32 %v15678_v9, %v4489_v63 }
0x26dd   :  { %v4500_v3 = vsel %vm4499_vm1, %v4489_v63, %v4498_v45  ;;  %v13892_v63 = vld [vmem:[%s18031_s8 + $0x58] sm:$0xff]  ;;  %v13893_v45 = vld [vmem:[%s18031_s8 + $0x60] sm:$0xff] }
0x26de   :  { %v4503_v5 = vsel %vm4501_vm2, %v4502_v2, %v4500_v3  ;;  %v15465_v9 = vpack.c.bf16 %v13892_v63, %v13891_v60  ;;  %v13894_v2 = vld [vmem:[%s18031_s8 + $0x68] sm:$0xff]  ;;  %v4531_v63 = vrot.slane %v16414_v11, %v16371_v16 }
0x26df   :  { %v4511_v6 = vadd.f32 1e-06, %v4503_v5  ;;  %v15469_v3 = vpack.c.bf16 %v13894_v2, %v13893_v45 }
0x26e1   :  { %15679 = vrcp.f32 %v4511_v6 }
0x26eb   :  { %v15680_v26 = vpop.eup %15679 }
0x26ec   :  { %v4514_v12 = vmul.f32 %v15680_v26, %v4495_v8 }
0x26ee   :  { %v4521_v27 = vadd.f32 %v16650_v10, %v4514_v12 }
0x26f0   :  { %14785 = vmatprep.mubr.msk.f32.mxu0 %vm72_vm0, %v4521_v27 }
0x2715   :  { %v4385_v13 = vpop.f32.mrb[52].mxu0 }
0x2716   :  { %v14771_v14 = vpop.f32.mrb[53].mxu0  ;;  %14775 = vmatmul.mubr.msk.f32.vlgmr.msra.gmra.mrb[48].mxu1 %vm223_vm6, %v4385_v13 }
0x2717   :  { %15464 = vmatpush3.bf16.msra.mxu1 %v15461_v61 }
0x2718   :  { %15466 = vmatprep.subr.bf16.mxu1 %v15465_v9 }
0x271b   :  { %15468 = vmatpush3.bf16.msra.mxu1 %v15465_v9 }
0x271c   :  { %15470 = vmatprep.subr.bf16.mxu1 %v15469_v3 }
0x271f   :  { %15472 = vmatpush3.bf16.msra.mxu1 %v15469_v3 }
0x27e9   :  { %v4458_v0 = vpop.f32.mrb[48].mxu1 }
0x27ea   :  { %v4462_v15 = vadd.f32 %v4458_v0, %v4221_v48  ;;  %v14776_v17 = vpop.f32.mrb[49].mxu1  ;;  %v15453_v48 = vpack.c.bf16 %v13884_v47, %v13883_v4  ;;  %v4825_v47 = vld [vmem:[%s18033_s10 + $0x10] sm:$0xff] }
0x27ec   :  { %v4468_v18 = vadd.f32 %v4466_v49, %v4462_v15  ;;  %15454 = vmatprep.subr.bf16.mxu0 %v15453_v48 }
0x27ed   :  { %15456 = vmatpush3.bf16.msra.mxu0 %v15453_v48  ;;  %v4826_v48 = vld [vmem:[%s18033_s10 + $0x18] sm:$0xff] }
0x27ee   :  { %v16656_v57 = vadd.f32 %v4468_v18, %v16386_v31  ;;  %v4774_v31 = vsel %vm72_vm0, %v16670_v23, 0.0  ;;  %15458 = vmatprep.subr.bf16.mxu0 %v15457_v54  ;;  %v15481_v56 = vpack.c.bf16 %v4826_v48, %v4825_v47 }
0x27f0   :  { %v4474_v20 = vsel %vm72_vm0, %v16656_v57, 0.0 }
0x27f1   :  { %4475 = vadd.xlane.f32.xlu1 %v4474_v20  ;;  %15460 = vmatpush3.bf16.msra.mxu0 %v15457_v54 }
0x27f2   :  { %15478 = vmatprep.subr.bf16.mxu0 %v16710_v58 }
0x27f5   :  { %4772 = vadd.xlane.f32.xlu1 %v4771_v22 }
0x27f9   :  { %4775 = vadd.xlane.f32.xlu1 %v4774_v31 }
0x287e   :  { %v4476_v1 = vpop.xlane.xlu1 %4475 }
0x287f   :  { %v4478_v25 = vmul.f32 0.03125, %v4476_v1 }
0x2881   :  { %v16675_v28 = vsub.f32 %v16656_v57, %v4478_v25 }
0x2882   :  { %v4773_v35 = vpop.xlane.xlu1 %4772 }
0x2883   :  { %v4777_v30 = vmul.f32 0.03125, %v4773_v35  ;;  %v4482_v37 = vmul.f32 %v16675_v28, %v16675_v28 }
0x2885   :  { %v16680_v38 = vsub.f32 %v16661_v19, %v4777_v30  ;;  %v4486_v55 = vsel %vm72_vm0, %v4482_v37, 0.0 }
0x2886   :  { %4487 = vadd.xlane.f32.xlu1 %v4486_v55  ;;  %v4776_v39 = vpop.xlane.xlu1 %4775 }
0x2887   :  { %v4778_v42 = vmul.f32 0.03125, %v4776_v39  ;;  %v4781_v29 = vmul.f32 %v16680_v38, %v16680_v38 }
0x2889   :  { %v16686_v49 = vsub.f32 %v16670_v23, %v4778_v42  ;;  %v4783_v32 = vsel %vm72_vm0, %v4781_v29, 0.0  ;;  %v16734_v29 = vld [vmem:[%s18040_s17] sm:$0xff] }
0x288a   :  { %4784 = vadd.xlane.f32.xlu1 %v4783_v32 }
0x288b   :  { %v4782_v44 = vmul.f32 %v16686_v49, %v16686_v49 }
0x288d   :  { %v4786_v62 = vsel %vm72_vm0, %v4782_v44, 0.0  ;;  %v4496_v44 = vmul.f32 %v16645_v7, %v16675_v28  ;;  %v4820_v7 = vrot.slane %v16734_v29, %v16069_v41 }
0x288e   :  { %4787 = vadd.xlane.f32.xlu1 %v4786_v62  ;;  %v4794_v62 = vrot.slane %v16734_v29, %v16059_v36 }
0x2890   :  { %v4795_v53 = vmul.f32 %v4794_v62, %v16680_v38  ;;  %v4796_v59 = vmul.f32 %v4794_v62, %v16686_v49  ;;  %v13895_v38 = vld [vmem:[%s18031_s8 + $0x70] sm:$0xff]  ;;  %v13896_v49 = vld [vmem:[%s18031_s8 + $0x78] sm:$0xff]  ;;  %s18085_s8 = smov 96  }
0x2913   :  { %v4488_v5 = vpop.xlane.xlu1 %4487 }
0x2914   :  { %v4490_v6 = vmul.f32 0.032258064, %v4488_v5 }
0x2916   :  { %15681 = vrsqrt.f32 %v4490_v6  ;;  %vm4506_vm3 = vcmp.eq.f32.partialorder %v4490_v6, inf  ;;  %v4509_v0 = vand.u32 2147483648, %v4490_v6  ;;  %vm4508_vm4 = vcmp.eq.f32.partialorder %v4490_v6, 0.0 }
0x2917   :  { %v4785_v8 = vpop.xlane.xlu1 %4784 }
0x2918   :  { %v4789_v26 = vmul.f32 0.032258064, %v4785_v8  ;;  %v4830_v8 = vrot.slane %v16734_v29, %v16082_v52 }
0x291a   :  { %15683 = vrsqrt.f32 %v4789_v26  ;;  %vm4799_vm7 = vcmp.eq.f32.partialorder %v4789_v26, inf  ;;  %v4802_v31 = vand.u32 2147483648, %v4789_v26  ;;  %vm4801_vm8 = vcmp.eq.f32.partialorder %v4789_v26, 0.0 }
0x291b   :  { %v4788_v12 = vpop.xlane.xlu1 %4787 }
0x291c   :  { %v4790_v27 = vmul.f32 0.032258064, %v4788_v12 }
0x291e   :  { %15685 = vrsqrt.f32 %v4790_v27  ;;  %vm4806_vm9 = vcmp.eq.f32.partialorder %v4790_v27, inf  ;;  %v4809_v55 = vand.u32 2147483648, %v4790_v27  ;;  %vm4808_vm10 = vcmp.eq.f32.partialorder %v4790_v27, 0.0 }
0x2920   :  { %v15682_v13 = vpop.eup %15681 }
0x2921   :  { %v4505_v14 = vmul.f32 %v15682_v13, %v4490_v6 }
0x2923   :  { %v4507_v15 = vsel %vm4506_vm3, %v4490_v6, %v4505_v14 }
0x2924   :  { %v15684_v17 = vpop.eup %15683  ;;  %v4510_v18 = vsel %vm4508_vm4, %v4509_v0, %v4507_v15 }
0x2925   :  { %v4512_v20 = vadd.f32 1e-06, %v4510_v18  ;;  %v4798_v22 = vmul.f32 %v15684_v17, %v4789_v26  ;;  %v16801_v18 = vld [vmem:[%s18086_s2] sm:$0xff] }
0x2927   :  { %15687 = vrcp.f32 %v4512_v20  ;;  %v4800_v1 = vsel %vm4799_vm7, %v4789_v26, %v4798_v22 }
0x2928   :  { %v15686_v25 = vpop.eup %15685  ;;  %v4803_v35 = vsel %vm4801_vm8, %v4802_v31, %v4800_v1 }
0x2929   :  { %v4805_v30 = vmul.f32 %v15686_v25, %v4790_v27  ;;  %v4811_v37 = vadd.f32 1e-06, %v4803_v35 }
0x292b   :  { %v4807_v39 = vsel %vm4806_vm9, %v4790_v27, %v4805_v30  ;;  %15689 = vrcp.f32 %v4811_v37 }
0x292c   :  { %v4810_v42 = vsel %vm4808_vm10, %v4809_v55, %v4807_v39 }
0x292d   :  { %v4812_v32 = vadd.f32 1e-06, %v4810_v42 }
0x292f   :  { %15691 = vrcp.f32 %v4812_v32 }
0x2931   :  { %v15688_v4 = vpop.eup %15687 }
0x2932   :  { %v4516_v50 = vmul.f32 %v15688_v4, %v4496_v44 }
0x2934   :  { %v4522_v54 = vadd.f32 %v16650_v10, %v4516_v50 }
0x2935   :  { %v15690_v28 = vpop.eup %15689 }
0x2936   :  { %14786 = vmatmul.mubr.msk.f32.vlgmr.msra.gmra.mrb[54].mxu0 %vm72_vm0, %v4522_v54  ;;  %v4814_v43 = vmul.f32 %v15690_v28, %v4795_v53 }
0x2937   :  { %15480 = vmatpush3.bf16.msra.mxu0 %v16710_v58  ;;  %v15473_v58 = vpack.c.bf16 %v13896_v49, %v13895_v38  ;;  %v16835_v38 = vld [vmem:[%s18034_s11] sm:$0xff] }
0x2938   :  { %15482 = vmatprep.subr.bf16.mxu0 %v15481_v56  ;;  %v4821_v33 = vadd.f32 %v4820_v7, %v4814_v43 }
0x2939   :  { %v15692_v60 = vpop.eup %15691  ;;  %15474 = vmatprep.subr.bf16.mxu1 %v15473_v58 }
0x293a   :  { %v4816_v61 = vmul.f32 %v15692_v60, %v4796_v59  ;;  %14815 = vmatprep.mubr.msk.f32.mxu0 %vm72_vm0, %v4821_v33  ;;  %15476 = vmatpush3.bf16.msra.mxu1 %v15473_v58 }
0x293b   :  { %15484 = vmatpush3.bf16.msra.mxu0 %v15481_v56  ;;  %14823 = vmatprep.subr.mxu1 %v15910_v51  ;;  %v16820_v56 = vld [vmem:[%s18034_s11 + $0x8] sm:$0xff] }
0x293c   :  { %v4822_v10 = vadd.f32 %v4820_v7, %v4816_v61  ;;  %14818 = vmatprep.subr.mxu0 %v15910_v51 }
0x293e   :  { %14816 = vmatmul.mubr.msk.f32.vlgmr.msra.gmra.mrb[56].mxu0 %vm72_vm0, %v4822_v10 }
0x293f   :  { %14820 = vmatprep.mubr.msk.f32.mxu0 %vm15911_vm5, %v15910_v51 }
0x2a09   :  { %v14787_v9 = vpop.f32.mrb[54].mxu0 }
0x2a0a   :  { %v4610_v45 = vadd.f32 %v14787_v9, %v4531_v63  ;;  %v4604_v2 = vpop.f32.mrb[55].mxu0 }
0x2a0b   :  { %v4605_v3 = vadd.f32 %v4604_v2, %v4531_v63 }
0x2a0c   :  { %v4614_v6 = vmax.f32 %v4610_v45, 0.0 }
0x2a0d   :  { %v4613_v5 = vmax.f32 %v4605_v3, 0.0 }
0x2a0f   :  { %14804 = vmatprep.mubr.msk.f32.mxu1 %vm2302_vm11, %v4613_v5 }
0x2a10   :  { %14805 = vmatmul.mubr.msk.f32.vlgmr.msra.gmra.mrb[50].mxu1 %vm2302_vm11, %v4614_v6 }
0x2a11   :  { %v14817_v26 = vpop.f32.mrb[56].mxu0  ;;  %14825 = vmatprep.mubr.msk.f32.mxu1 %vm15911_vm5, %v15910_v51 }
0x2a12   :  { %v16773_v12 = vadd.f32 %v14817_v26, %v4830_v8  ;;  %v4903_v11 = vpop.f32.mrb[57].mxu0 }
0x2a13   :  { %v16775_v27 = vadd.f32 %v4903_v11, %v4830_v8 }
0x2a15   :  { %5082 = vrot.lane.b32.xlu0 %v16775_v27, %s18067_s20  ;;  %4917 = vrot.lane.b32.xlu1 %v16775_v27, %s18085_s8 }
0x2a19   :  { %5084 = vrot.lane.b32.xlu1 %v16775_v27, %s18077_s26 }
0x2a87   :  { %v4918_v13 = vpop.permute.xlu1 %4917  ;;  %v5083_v0 = vpop.permute.xlu0 %5082 }
0x2a88   :  { %14819 = vmatpush3.xpose.msk.msra.mxu0 %vm223_vm6, %v4918_v13 }
0x2a89   :  { %14828 = vmatprep.subr.mxu0 %v15910_v51 }
0x2a8b   :  { %14821 = vmatmul.mubr.msk.f32.vlgmr.msra.gmra.mrb[58].mxu0 %vm223_vm6, %v16775_v27  ;;  %v5085_v14 = vpop.permute.xlu1 %5084 }
0x2a8c   :  { %14829 = vmatpush3.xpose.msk.msra.mxu0 %vm223_vm6, %v5085_v14  ;;  %14830 = vmatprep.mubr.msk.f32.mxu0 %vm15911_vm5, %v15910_v51 }
0x2a8d   :  { %14838 = vmatprep.subr.mxu0 %v15910_v51 }
0x2a8f   :  { %14831 = vmatmul.mubr.msk.f32.vlgmr.msra.gmra.mrb[60].mxu0 %vm223_vm6, %v5083_v0 }
0x2a90   :  { %14840 = vmatprep.mubr.msk.f32.mxu0 %vm15911_vm5, %v15910_v51  ;;  %14839 = vmatpush3.msra.mxu0 %v16820_v56 }
0x2a91   :  { %14848 = vmatprep.subr.mxu0 %v15910_v51 }
0x2ae3   :  { %v16794_v15 = vpop.f32.mrb[50].mxu1 }
0x2ae4   :  { %v16796_v17 = vpop.f32.mrb[51].mxu1 }
0x2b5e   :  { %v4989_v20 = vpop.f32.mrb[58].mxu0 }
0x2b5f   :  { %v4993_v22 = vmul.f32 0.35355338, %v4989_v20  ;;  %v14822_v31 = vpop.f32.mrb[59].mxu0 }
0x2b61   :  { %v4994_v1 = vadd.f32 %v4993_v22, %v16801_v18 }
0x2b62   :  { %v5156_v25 = vpop.f32.mrb[60].mxu0 }
0x2b63   :  { %v5160_v35 = vmul.f32 0.35355338, %v5156_v25  ;;  %v14832_v30 = vpop.f32.mrb[61].mxu0  ;;  %v4995_v37 = vsel %vm223_vm6, %v4994_v1, -inf }
0x2b64   :  { %4996 = vmax.xlane.f32.xlu1 %v4995_v37 }
0x2b65   :  { %v5161_v55 = vadd.f32 %v5160_v35, %v16801_v18 }
0x2b67   :  { %v5162_v39 = vsel %vm223_vm6, %v5161_v55, -inf }
0x2b68   :  { %5163 = vmax.xlane.f32.xlu0 %v5162_v39 }
0x2b7e   :  { %5173 = vrot.lane.b32.xlu0 %v16775_v27, %s18087_s25 }
0x2bf1   :  { %v4997_v42 = vpop.xlane.xlu1 %4996 }
0x2bf2   :  { %v4998_v32 = vsub.f32 %v4994_v1, %v4997_v42 }
0x2bf4   :  { %v4999_v44 = vmul.f32 1.442695, %v4998_v32 }
0x2bf5   :  { %v5164_v62 = vpop.xlane.xlu0 %5163 }
0x2bf6   :  { %15693 = vpow2.f32 %v4999_v44  ;;  %v5165_v4 = vsub.f32 %v5161_v55, %v5164_v62  ;;  %v16873_v44 = vld [vmem:[%s18034_s11 + $0x10] sm:$0xff] }
0x2bf8   :  { %v5166_v47 = vmul.f32 1.442695, %v5165_v4 }
0x2bf9   :  { %v5174_v60 = vpop.permute.xlu0 %5173 }
0x2bfa   :  { %15695 = vpow2.f32 %v5166_v47 }
0x2c00   :  { %v15694_v48 = vpop.eup %15693 }
0x2c01   :  { %v5001_v50 = vsel %vm223_vm6, %v15694_v48, 0.0 }
0x2c02   :  { %5002 = vadd.xlane.f32.xlu1 %v5001_v50 }
0x2c04   :  { %v15696_v53 = vpop.eup %15695 }
0x2c05   :  { %v5168_v54 = vsel %vm223_vm6, %v15696_v53, 0.0 }
0x2c06   :  { %5169 = vadd.xlane.f32.xlu1 %v5168_v54 }
0x2c17   :  { %5006 = vrot.lane.b32.xlu1 %v16775_v27, %s18088_s27 }
0x2c1b   :  { %5397 = vrot.lane.b32.xlu1 %v16775_v27, %s18078_s21 }
0x2c1f   :  { %5395 = vrot.lane.b32.xlu1 %v16775_v27, %s18079_s1 }
0x2c8f   :  { %v5003_v7 = vpop.xlane.xlu1 %5002 }
0x2c90   :  { %15697 = vrcp.f32 %v5003_v7 }
0x2c93   :  { %v5170_v28 = vpop.xlane.xlu1 %5169 }
0x2c94   :  { %15699 = vrcp.f32 %v5170_v28 }
0x2c97   :  { %v5007_v43 = vpop.permute.xlu1 %5006 }
0x2c98   :  { %14824 = vmatpush3.msra.mxu1 %v5007_v43 }
0x2c99   :  { %14833 = vmatprep.subr.mxu1 %v15910_v51 }
0x2c9a   :  { %v15698_v59 = vpop.eup %15697 }
0x2c9b   :  { %v5005_v33 = vmul.f32 %v15698_v59, %v15694_v48  ;;  %v5398_v63 = vpop.permute.xlu1 %5397 }
0x2c9d   :  { %14826 = vmatmul.mubr.msk.f32.vlgmr.msra.gmra.mrb[52].mxu1 %vm223_vm6, %v5005_v33 }
0x2c9e   :  { %v15700_v61 = vpop.eup %15699  ;;  %14834 = vmatpush3.msra.mxu1 %v5174_v60  ;;  %14835 = vmatprep.mubr.msk.f32.mxu1 %vm15911_vm5, %v15910_v51 }
0x2c9f   :  { %v5172_v10 = vmul.f32 %v15700_v61, %v15696_v53  ;;  %14843 = vmatprep.subr.mxu1 %v15910_v51  ;;  %v5396_v2 = vpop.permute.xlu1 %5395 }
0x2ca1   :  { %14836 = vmatmul.mubr.msk.f32.vlgmr.msra.gmra.mrb[54].mxu1 %vm223_vm6, %v5172_v10 }
0x2ca2   :  { %14845 = vmatprep.mubr.msk.f32.mxu1 %vm15911_vm5, %v15910_v51  ;;  %14844 = vmatpush3.msra.mxu1 %v16835_v38 }
0x2ca3   :  { %14853 = vmatprep.subr.mxu1 %v15910_v51 }
0x2d70   :  { %v5078_v49 = vpop.f32.mrb[52].mxu1 }
0x2d71   :  { %v14827_v58 = vpop.f32.mrb[53].mxu1  ;;  %14846 = vmatmul.mubr.msk.f32.vlgmr.msra.gmra.mrb[56].mxu1 %vm223_vm6, %v5078_v49 }
0x2d72   :  { %14855 = vmatprep.mubr.msk.f32.mxu1 %vm15911_vm5, %v15910_v51 }
0x2d74   :  { %v5245_v9 = vpop.f32.mrb[54].mxu1 }
0x2d75   :  { %v14837_v45 = vpop.f32.mrb[55].mxu1  ;;  %14841 = vmatmul.mubr.msk.f32.vlgmr.msra.gmra.mrb[62].mxu0 %vm223_vm6, %v5245_v9 }
0x2d76   :  { %14849 = vmatpush3.xpose.msk.msra.mxu0 %vm223_vm6, %v5398_v63  ;;  %14850 = vmatprep.mubr.msk.f32.mxu0 %vm15911_vm5, %v15910_v51 }
0x2d77   :  { %14858 = vmatprep.subr.mxu0 %v15910_v51 }
0x2d79   :  { %14851 = vmatmul.mubr.msk.f32.vlgmr.msra.gmra.mrb[64].mxu0 %vm223_vm6, %v5396_v2  ;;  %v16911_v2 = vld [vmem:[%s18034_s11 + $0x18] sm:$0xff] }
0x2d7a   :  { %14860 = vmatprep.mubr.msk.f32.mxu0 %vm15911_vm5, %v15910_v51  ;;  %14859 = vmatpush3.msra.mxu0 %v16873_v44 }
0x2d7b   :  { %14868 = vmatprep.subr.mxu0 %v15910_v51 }
0x2e44   :  { %v5391_v3 = vpop.f32.mrb[56].mxu1 }
0x2e45   :  { %v14847_v5 = vpop.f32.mrb[57].mxu1 }
0x2e48   :  { %v5318_v6 = vpop.f32.mrb[62].mxu0 }
0x2e49   :  { %v5392_v8 = vadd.f32 %v5391_v3, %v5318_v6  ;;  %v14842_v26 = vpop.f32.mrb[63].mxu0  ;;  %v16921_v6 = vld [vmem:[%s18086_s2 + $0x8] sm:$0xff] }
0x2e4c   :  { %v5469_v11 = vpop.f32.mrb[64].mxu0 }
0x2e4d   :  { %v5473_v13 = vmul.f32 0.35355338, %v5469_v11  ;;  %v14852_v14 = vpop.f32.mrb[65].mxu0 }
0x2e4f   :  { %v5474_v0 = vadd.f32 %v5473_v13, %v16801_v18 }
0x2e51   :  { %v5475_v20 = vsel %vm223_vm6, %v5474_v0, -inf }
0x2e52   :  { %5476 = vmax.xlane.f32.xlu1 %v5475_v20 }
0x2e63   :  { %5638 = vrot.lane.b32.xlu1 %v16775_v27, %s18082_s29 }
0x2e67   :  { %5636 = vrot.lane.b32.xlu1 %v16775_v27, %s18081_s3 }
0x2e6b   :  { %5878 = vrot.lane.b32.xlu1 %v16773_v12, %s18085_s8 }
0x2edf   :  { %v5477_v22 = vpop.xlane.xlu1 %5476 }
0x2ee0   :  { %v5478_v31 = vsub.f32 %v5474_v0, %v5477_v22 }
0x2ee2   :  { %v5479_v1 = vmul.f32 1.442695, %v5478_v31 }
0x2ee3   :  { %v5639_v39 = vpop.permute.xlu1 %5638 }
0x2ee4   :  { %15701 = vpow2.f32 %v5479_v1 }
0x2ee7   :  { %v5637_v32 = vpop.permute.xlu1 %5636 }
0x2eeb   :  { %v5879_v10 = vpop.permute.xlu1 %5878 }
0x2eee   :  { %v15702_v25 = vpop.eup %15701 }
0x2eef   :  { %v5481_v35 = vsel %vm223_vm6, %v15702_v25, 0.0 }
0x2ef0   :  { %5482 = vadd.xlane.f32.xlu0 %v5481_v35 }
0x2f06   :  { %5486 = vrot.lane.b32.xlu0 %v16775_v27, %s18080_s5 }
0x2f7d   :  { %v5483_v30 = vpop.xlane.xlu0 %5482 }
0x2f7e   :  { %15703 = vrcp.f32 %v5483_v30 }
0x2f81   :  { %v5487_v37 = vpop.permute.xlu0 %5486 }
0x2f82   :  { %14854 = vmatpush3.msra.mxu1 %v5487_v37 }
0x2f83   :  { %14863 = vmatprep.subr.mxu1 %v15910_v51 }
0x2f88   :  { %v15704_v55 = vpop.eup %15703 }
0x2f89   :  { %v5485_v42 = vmul.f32 %v15704_v55, %v15702_v25 }
0x2f8b   :  { %14856 = vmatmul.mubr.msk.f32.vlgmr.msra.gmra.mrb[58].mxu1 %vm223_vm6, %v5485_v42 }
0x2f8c   :  { %14864 = vmatpush3.xpose.msk.msra.mxu1 %vm223_vm6, %v5639_v39  ;;  %14865 = vmatprep.mubr.msk.f32.mxu1 %vm15911_vm5, %v15910_v51 }
0x2f8d   :  { %14873 = vmatprep.subr.mxu1 %v15910_v51 }
0x2f8f   :  { %14866 = vmatmul.mubr.msk.f32.vlgmr.msra.gmra.mrb[60].mxu1 %vm223_vm6, %v5637_v32 }
0x2f90   :  { %14875 = vmatprep.mubr.msk.f32.mxu1 %vm15911_vm5, %v15910_v51  ;;  %14874 = vmatpush3.msra.mxu1 %v16911_v2 }
0x2f91   :  { %14883 = vmatprep.subr.mxu1 %v15910_v51 }
0x305e   :  { %v5558_v62 = vpop.f32.mrb[58].mxu1 }
0x305f   :  { %v14857_v4 = vpop.f32.mrb[59].mxu1  ;;  %14861 = vmatmul.mubr.msk.f32.vlgmr.msra.gmra.mrb[66].mxu0 %vm223_vm6, %v5558_v62 }
0x3060   :  { %14870 = vmatprep.mubr.msk.f32.mxu0 %vm15911_vm5, %v15910_v51 }
0x3062   :  { %v5710_v47 = vpop.f32.mrb[60].mxu1 }
0x3063   :  { %v5714_v48 = vmul.f32 0.35355338, %v5710_v47  ;;  %v14867_v50 = vpop.f32.mrb[61].mxu1 }
0x3065   :  { %v5715_v53 = vadd.f32 %v5714_v48, %v16801_v18 }
0x3067   :  { %v5716_v54 = vsel %vm223_vm6, %v5715_v53, -inf }
0x3068   :  { %5717 = vmax.xlane.f32.xlu0 %v5716_v54 }
0x307e   :  { %5727 = vrot.lane.b32.xlu0 %v16775_v27, %s18083_s28 }
0x3082   :  { %6045 = vrot.lane.b32.xlu0 %v16773_v12, %s18077_s26 }
0x30f5   :  { %v5718_v7 = vpop.xlane.xlu0 %5717 }
0x30f6   :  { %v5719_v28 = vsub.f32 %v5715_v53, %v5718_v7 }
0x30f8   :  { %v5720_v43 = vmul.f32 1.442695, %v5719_v28 }
0x30f9   :  { %v5728_v59 = vpop.permute.xlu0 %5727 }
0x30fa   :  { %15705 = vpow2.f32 %v5720_v43  ;;  %14869 = vmatpush3.msra.mxu0 %v5728_v59 }
0x30fb   :  { %14878 = vmatprep.subr.mxu0 %v15910_v51 }
0x30fd   :  { %v6046_v9 = vpop.permute.xlu0 %6045 }
0x3104   :  { %v15706_v33 = vpop.eup %15705 }
0x3105   :  { %v5722_v18 = vsel %vm223_vm6, %v15706_v33, 0.0 }
0x3106   :  { %5723 = vadd.xlane.f32.xlu1 %v5722_v18 }
0x3117   :  { %6043 = vrot.lane.b32.xlu1 %v16773_v12, %s18067_s20 }
0x3132   :  { %v5631_v60 = vpop.f32.mrb[66].mxu0 }
0x3133   :  { %v16890_v27 = vadd.f32 %v5631_v60, %v5392_v8  ;;  %v14862_v61 = vpop.f32.mrb[67].mxu0 }
0x3193   :  { %v5724_v49 = vpop.xlane.xlu1 %5723 }
0x3194   :  { %15707 = vrcp.f32 %v5724_v49 }
0x3197   :  { %v6044_v45 = vpop.permute.xlu1 %6043 }
0x319e   :  { %v15708_v58 = vpop.eup %15707 }
0x319f   :  { %v5726_v63 = vmul.f32 %v15708_v58, %v15706_v33 }
0x31a1   :  { %14871 = vmatmul.mubr.msk.f32.vlgmr.msra.gmra.mrb[68].mxu0 %vm223_vm6, %v5726_v63 }
0x31a2   :  { %14879 = vmatpush3.xpose.msk.msra.mxu0 %vm223_vm6, %v5879_v10  ;;  %14880 = vmatprep.mubr.msk.f32.mxu0 %vm15911_vm5, %v15910_v51 }
0x31a3   :  { %14888 = vmatprep.subr.mxu0 %v15910_v51 }
0x31a5   :  { %14881 = vmatmul.mubr.msk.f32.vlgmr.msra.gmra.mrb[70].mxu0 %vm223_vm6, %v16773_v12 }
0x31a6   :  { %14889 = vmatpush3.xpose.msk.msra.mxu0 %vm223_vm6, %v6046_v9  ;;  %14890 = vmatprep.mubr.msk.f32.mxu0 %vm15911_vm5, %v15910_v51 }
0x31a7   :  { %14898 = vmatprep.subr.mxu0 %v15910_v51 }
0x31a9   :  { %14891 = vmatmul.mubr.msk.f32.vlgmr.msra.gmra.mrb[72].mxu0 %vm223_vm6, %v6044_v45 }
0x31aa   :  { %14899 = vmatpush3.msra.mxu0 %v16820_v56  ;;  %14900 = vmatprep.mubr.msk.f32.mxu0 %vm15911_vm5, %v15910_v51 }
0x31ab   :  { %14908 = vmatprep.subr.mxu0 %v15910_v51 }
0x3274   :  { %v5799_v3 = vpop.f32.mrb[68].mxu0 }
0x3275   :  { %v14872_v5 = vpop.f32.mrb[69].mxu0  ;;  %14876 = vmatmul.mubr.msk.f32.vlgmr.msra.gmra.mrb[62].mxu1 %vm223_vm6, %v5799_v3 }
0x3276   :  { %14885 = vmatprep.mubr.msk.f32.mxu1 %vm15911_vm5, %v15910_v51 }
0x3278   :  { %v5950_v56 = vpop.f32.mrb[70].mxu0 }
0x3279   :  { %v5954_v8 = vmul.f32 0.35355338, %v5950_v56  ;;  %v14882_v26 = vpop.f32.mrb[71].mxu0 }
0x327b   :  { %v5955_v11 = vadd.f32 %v5954_v8, %v16921_v6 }
0x327c   :  { %v6117_v13 = vpop.f32.mrb[72].mxu0 }
0x327d   :  { %v6121_v14 = vmul.f32 0.35355338, %v6117_v13  ;;  %v14892_v0 = vpop.f32.mrb[73].mxu0  ;;  %v5956_v20 = vsel %vm223_vm6, %v5955_v11, -inf }
0x327e   :  { %5957 = vmax.xlane.f32.xlu0 %v5956_v20 }
0x327f   :  { %v6122_v22 = vadd.f32 %v6121_v14, %v16921_v6 }
0x3281   :  { %v6123_v31 = vsel %vm223_vm6, %v6122_v22, -inf }
0x3282   :  { %6124 = vmax.xlane.f32.xlu1 %v6123_v31 }
0x3293   :  { %5967 = vrot.lane.b32.xlu1 %v16773_v12, %s18088_s27 }
0x3297   :  { %6358 = vrot.lane.b32.xlu1 %v16773_v12, %s18078_s21 }
0x329b   :  { %6356 = vrot.lane.b32.xlu1 %v16773_v12, %s18079_s1 }
0x330b   :  { %v5958_v1 = vpop.xlane.xlu0 %5957 }
0x330c   :  { %v5959_v25 = vsub.f32 %v5955_v11, %v5958_v1 }
0x330e   :  { %v5960_v35 = vmul.f32 1.442695, %v5959_v25 }
0x330f   :  { %v6125_v30 = vpop.xlane.xlu1 %6124 }
0x3310   :  { %15709 = vpow2.f32 %v5960_v35  ;;  %v6126_v37 = vsub.f32 %v6122_v22, %v6125_v30 }
0x3312   :  { %v6127_v55 = vmul.f32 1.442695, %v6126_v37 }
0x3313   :  { %v5968_v39 = vpop.permute.xlu1 %5967 }
0x3314   :  { %15711 = vpow2.f32 %v6127_v55  ;;  %14884 = vmatpush3.msra.mxu1 %v5968_v39  ;;  %v15879_v39 = vld [vmem:[%s18032_s9 + $0x8] sm:$0xff] }
0x3315   :  { %14893 = vmatprep.subr.mxu1 %v15910_v51 }
0x331a   :  { %v15710_v42 = vpop.eup %15709 }
0x331b   :  { %v5962_v32 = vsel %vm223_vm6, %v15710_v42, 0.0 }
0x331c   :  { %5963 = vadd.xlane.f32.xlu0 %v5962_v32 }
0x331e   :  { %v15712_v62 = vpop.eup %15711 }
0x331f   :  { %v6129_v4 = vsel %vm223_vm6, %v15712_v62, 0.0 }
0x3320   :  { %6130 = vadd.xlane.f32.xlu0 %v6129_v4 }
0x3336   :  { %6134 = vrot.lane.b32.xlu0 %v16773_v12, %s18087_s25 }
0x3348   :  { %v5872_v47 = vpop.f32.mrb[62].mxu1 }
0x3349   :  { %v16939_v48 = vadd.f32 %v5872_v47, %v16890_v27  ;;  %v14877_v50 = vpop.f32.mrb[63].mxu1  ;;  %v6359_v27 = vpop.permute.xlu1 %6358  ;;  %v4706_v47 = vadd.f32 %v16794_v15, %v16656_v57 }
0x33a9   :  { %v5964_v53 = vpop.xlane.xlu0 %5963 }
0x33aa   :  { %15713 = vrcp.f32 %v5964_v53  ;;  %v6841_v53 = vrot.slane %v16734_v29, %v16292_v40 }
0x33ad   :  { %v6131_v54 = vpop.xlane.xlu0 %6130 }
0x33ae   :  { %15715 = vrcp.f32 %v6131_v54 }
0x33b1   :  { %v6135_v43 = vpop.permute.xlu0 %6134 }
0x33b4   :  { %v15714_v7 = vpop.eup %15713 }
0x33b5   :  { %v5966_v28 = vmul.f32 %v15714_v7, %v15710_v42  ;;  %v4710_v42 = vrot.slane %v15879_v39, %v16380_v24 }
0x33b7   :  { %14886 = vmatmul.mubr.msk.f32.vlgmr.msra.gmra.mrb[64].mxu1 %vm223_vm6, %v5966_v28  ;;  %v4712_v7 = vadd.f32 %v4710_v42, %v4706_v47  ;;  %v6842_v28 = vadd.f32 %v6841_v53, %v16939_v48 }
0x33b8   :  { %v15716_v59 = vpop.eup %15715  ;;  %14894 = vmatpush3.msra.mxu1 %v6135_v43  ;;  %14895 = vmatprep.mubr.msk.f32.mxu1 %vm15911_vm5, %v15910_v51 }
0x33b9   :  { %v6133_v33 = vmul.f32 %v15716_v59, %v15712_v62  ;;  %14903 = vmatprep.subr.mxu1 %v15910_v51 }
0x33bb   :  { %14896 = vmatmul.mubr.msk.f32.vlgmr.msra.gmra.mrb[66].mxu1 %vm223_vm6, %v6133_v33 }
0x33bc   :  { %14904 = vmatpush3.msra.mxu1 %v16835_v38  ;;  %14905 = vmatprep.mubr.msk.f32.mxu1 %vm15911_vm5, %v15910_v51  ;;  %v6357_v38 = vpop.permute.xlu1 %6356 }
0x33bd   :  { %14913 = vmatprep.subr.mxu1 %v15910_v51 }
0x348a   :  { %v6039_v18 = vpop.f32.mrb[64].mxu1 }
0x348b   :  { %v14887_v60 = vpop.f32.mrb[65].mxu1  ;;  %14906 = vmatmul.mubr.msk.f32.vlgmr.msra.gmra.mrb[68].mxu1 %vm223_vm6, %v6039_v18 }
0x348c   :  { %14915 = vmatprep.mubr.msk.f32.mxu1 %vm15911_vm5, %v15910_v51 }
0x348e   :  { %v6206_v61 = vpop.f32.mrb[66].mxu1 }
0x348f   :  { %v14897_v10 = vpop.f32.mrb[67].mxu1  ;;  %14901 = vmatmul.mubr.msk.f32.vlgmr.msra.gmra.mrb[74].mxu0 %vm223_vm6, %v6206_v61 }
0x3490   :  { %14909 = vmatpush3.xpose.msk.msra.mxu0 %vm223_vm6, %v6359_v27  ;;  %14910 = vmatprep.mubr.msk.f32.mxu0 %vm15911_vm5, %v15910_v51 }
0x3491   :  { %14918 = vmatprep.subr.mxu0 %v15910_v51 }
0x3493   :  { %14911 = vmatmul.mubr.msk.f32.vlgmr.msra.gmra.mrb[76].mxu0 %vm223_vm6, %v6357_v38 }
0x3494   :  { %14919 = vmatpush3.msra.mxu0 %v16873_v44  ;;  %14920 = vmatprep.mubr.msk.f32.mxu0 %vm15911_vm5, %v15910_v51 }
0x3495   :  { %14928 = vmatprep.subr.mxu0 %v15910_v51 }
0x355e   :  { %v6352_v49 = vpop.f32.mrb[68].mxu1 }
0x355f   :  { %v14907_v58 = vpop.f32.mrb[69].mxu1 }
0x3562   :  { %v6279_v63 = vpop.f32.mrb[74].mxu0 }
0x3563   :  { %v16963_v9 = vadd.f32 %v6352_v49, %v6279_v63  ;;  %v14902_v45 = vpop.f32.mrb[75].mxu0 }
0x3566   :  { %v6430_v3 = vpop.f32.mrb[76].mxu0 }
0x3567   :  { %v6434_v5 = vmul.f32 0.35355338, %v6430_v3  ;;  %v14912_v56 = vpop.f32.mrb[77].mxu0 }
0x3569   :  { %v6435_v8 = vadd.f32 %v6434_v5, %v16921_v6 }
0x356b   :  { %v6436_v26 = vsel %vm223_vm6, %v6435_v8, -inf }
0x356c   :  { %6437 = vmax.xlane.f32.xlu0 %v6436_v26 }
0x3582   :  { %6447 = vrot.lane.b32.xlu0 %v16773_v12, %s18080_s5 }
0x3586   :  { %6597 = vrot.lane.b32.xlu0 %v16773_v12, %s18081_s3 }
0x35f9   :  { %v6438_v44 = vpop.xlane.xlu0 %6437 }
0x35fa   :  { %v6439_v11 = vsub.f32 %v6435_v8, %v6438_v44 }
0x35fc   :  { %v6440_v13 = vmul.f32 1.442695, %v6439_v11 }
0x35fd   :  { %v6448_v14 = vpop.permute.xlu0 %6447 }
0x35fe   :  { %15717 = vpow2.f32 %v6440_v13  ;;  %14914 = vmatpush3.msra.mxu1 %v6448_v14 }
0x35ff   :  { %14923 = vmatprep.subr.mxu1 %v15910_v51 }
0x3601   :  { %v6598_v35 = vpop.permute.xlu0 %6597 }
0x3608   :  { %v15718_v0 = vpop.eup %15717 }
0x3609   :  { %v6442_v20 = vsel %vm223_vm6, %v15718_v0, 0.0 }
0x360a   :  { %6443 = vadd.xlane.f32.xlu1 %v6442_v20 }
0x361b   :  { %6599 = vrot.lane.b32.xlu1 %v16773_v12, %s18082_s29 }
0x3697   :  { %v6444_v22 = vpop.xlane.xlu1 %6443 }
0x3698   :  { %15719 = vrcp.f32 %v6444_v22 }
0x369b   :  { %v6600_v25 = vpop.permute.xlu1 %6599 }
0x36a2   :  { %v15720_v31 = vpop.eup %15719 }
0x36a3   :  { %v6446_v1 = vmul.f32 %v15720_v31, %v15718_v0 }
0x36a5   :  { %14916 = vmatmul.mubr.msk.f32.vlgmr.msra.gmra.mrb[70].mxu1 %vm223_vm6, %v6446_v1 }
0x36a6   :  { %14924 = vmatpush3.xpose.msk.msra.mxu1 %vm223_vm6, %v6600_v25  ;;  %14925 = vmatprep.mubr.msk.f32.mxu1 %vm15911_vm5, %v15910_v51 }
0x36a7   :  { %14933 = vmatprep.subr.mxu1 %v15910_v51 }
0x36a9   :  { %14926 = vmatmul.mubr.msk.f32.vlgmr.msra.gmra.mrb[72].mxu1 %vm223_vm6, %v6598_v35 }
0x36aa   :  { %14934 = vmatpush3.msra.mxu1 %v16911_v2  ;;  %14935 = vmatprep.mubr.msk.f32.mxu1 %vm15911_vm5, %v15910_v51  ;;  %v4705_v2 = vadd.f32 %v16796_v17, %v16635_v46  ;;  %v17002_v46 = vadd.f32 %v6842_v28, %v16661_v19  ;;  %v4718_v17 = vsel %vm72_vm0, %v4712_v7, 0.0 }
0x36ac   :  { %v4711_v50 = vadd.f32 %v4710_v42, %v4705_v2  ;;  %v6846_v57 = vsel %vm72_vm0, %v17002_v46, 0.0  ;;  %v6990_v42 = vld [vmem:[%s18036_s13 + $0x18] sm:$0xff] }
0x36ae   :  { %v4715_v43 = vsel %vm72_vm0, %v4711_v50, 0.0 }
0x3778   :  { %v6519_v30 = vpop.f32.mrb[70].mxu1 }
0x3779   :  { %v14917_v37 = vpop.f32.mrb[71].mxu1  ;;  %14921 = vmatmul.mubr.msk.f32.vlgmr.msra.gmra.mrb[78].mxu0 %vm223_vm6, %v6519_v30 }
0x377a   :  { %14930 = vmatprep.mubr.msk.f32.mxu0 %vm15911_vm5, %v15910_v51  ;;  %v6988_v37 = vld [vmem:[%s18036_s13 + $0x8] sm:$0xff] }
0x377c   :  { %v6671_v55 = vpop.f32.mrb[72].mxu1 }
0x377d   :  { %v6675_v32 = vmul.f32 0.35355338, %v6671_v55  ;;  %v14927_v62 = vpop.f32.mrb[73].mxu1  ;;  %v6989_v55 = vld [vmem:[%s18036_s13 + $0x10] sm:$0xff] }
0x377e   :  { %v15497_v2 = vpack.c.bf16 %v6990_v42, %v6989_v55  ;;  %v6901_v55 = vld [vmem:[%s18035_s12 + $0x18] sm:$0xff] }
0x377f   :  { %v6676_v4 = vadd.f32 %v6675_v32, %v16921_v6 }
0x3781   :  { %v6677_v54 = vsel %vm223_vm6, %v6676_v4, -inf }
0x3782   :  { %6678 = vmax.xlane.f32.xlu1 %v6677_v54 }
0x3786   :  { %4716 = vadd.xlane.f32.xlu1 %v4715_v43 }
0x378a   :  { %4719 = vadd.xlane.f32.xlu1 %v4718_v17 }
0x378e   :  { %6847 = vadd.xlane.f32.xlu1 %v6846_v57 }
0x380f   :  { %v6679_v15 = vpop.xlane.xlu1 %6678 }
0x3810   :  { %v6680_v6 = vsub.f32 %v6676_v4, %v6679_v15 }
0x3812   :  { %v6681_v59 = vmul.f32 1.442695, %v6680_v6 }
0x3813   :  { %v4717_v19 = vpop.xlane.xlu1 %4716 }
0x3814   :  { %15721 = vpow2.f32 %v6681_v59 }
0x3817   :  { %v4720_v18 = vpop.xlane.xlu1 %4719 }
0x3818   :  { %v4722_v60 = vmul.f32 0.03125, %v4720_v18 }
0x381a   :  { %v17010_v27 = vsub.f32 %v4712_v7, %v4722_v60 }
0x381b   :  { %v6848_v8 = vpop.xlane.xlu1 %6847 }
0x381c   :  { %v4726_v49 = vmul.f32 %v17010_v27, %v17010_v27  ;;  %v6852_v14 = vmul.f32 0.03125, %v6848_v8 }
0x381e   :  { %v15722_v33 = vpop.eup %15721  ;;  %v4730_v58 = vsel %vm72_vm0, %v4726_v49, 0.0  ;;  %v17024_v22 = vsub.f32 %v17002_v46, %v6852_v14  ;;  %v13900_v14 = vld [vmem:[%s18041_s18 + $0x1] ss:$0 sm:$0xff] }
0x381f   :  { %v6683_v48 = vsel %vm223_vm6, %v15722_v33, 0.0 }
0x3820   :  { %6684 = vadd.xlane.f32.xlu0 %v6683_v48  ;;  %v6856_v35 = vmul.f32 %v17024_v22, %v17024_v22 }
0x3822   :  { %v6858_v30 = vsel %vm72_vm0, %v6856_v35, 0.0 }
0x3836   :  { %6688 = vrot.lane.b32.xlu0 %v16773_v12, %s18083_s28 }
0x384c   :  { %v6592_v61 = vpop.f32.mrb[78].mxu0 }
0x384d   :  { %v6596_v10 = vadd.f32 %v6592_v61, %v16963_v9  ;;  %v14922_v38 = vpop.f32.mrb[79].mxu0  ;;  %v4721_v9 = vmul.f32 0.03125, %v4717_v19 }
0x384f   :  { %v17018_v13 = vsub.f32 %v4711_v50, %v4721_v9 }
0x3851   :  { %v4725_v1 = vmul.f32 %v17018_v13, %v17018_v13 }
0x3853   :  { %v4727_v25 = vsel %vm72_vm0, %v4725_v1, 0.0 }
0x3855   :  { %4731 = vadd.xlane.f32.xlu0 %v4730_v58 }
0x38ad   :  { %v6685_v63 = vpop.xlane.xlu0 %6684 }
0x38ae   :  { %15723 = vrcp.f32 %v6685_v63 }
0x38b1   :  { %v6689_v45 = vpop.permute.xlu0 %6688 }
0x38b2   :  { %14929 = vmatpush3.msra.mxu0 %v6689_v45 }
0x38b8   :  { %v15724_v12 = vpop.eup %15723 }
0x38b9   :  { %v6687_v3 = vmul.f32 %v15724_v12, %v15722_v33 }
0x38bb   :  { %14931 = vmatmul.mubr.msk.f32.vlgmr.msra.gmra.mrb[80].mxu0 %vm223_vm6, %v6687_v3 }
0x38e2   :  { %v4732_v32 = vpop.xlane.xlu0 %4731 }
0x38e3   :  { %v4734_v62 = vmul.f32 0.032258064, %v4732_v32 }
0x38e5   :  { %15725 = vrsqrt.f32 %v4734_v62  ;;  %vm4750_vm12 = vcmp.eq.f32.partialorder %v4734_v62, inf  ;;  %v4753_v59 = vand.u32 2147483648, %v4734_v62  ;;  %vm4752_vm13 = vcmp.eq.f32.partialorder %v4734_v62, 0.0 }
0x398e   :  { %v6760_v5 = vpop.f32.mrb[80].mxu0 }
0x398f   :  { %v14932_v56 = vpop.f32.mrb[81].mxu0  ;;  %14936 = vmatmul.mubr.msk.f32.vlgmr.msra.gmra.mrb[74].mxu1 %vm223_vm6, %v6760_v5  ;;  %v13899_v5 = vld [vmem:[%s18041_s18] ss:$0 sm:$0xff] }
0x3990   :  { %v4740_v9 = vmul.f32 %v13899_v5, %v17010_v27  ;;  %v4739_v8 = vmul.f32 %v13899_v5, %v17018_v13 }
0x3a62   :  { %v6833_v26 = vpop.f32.mrb[74].mxu1 }
0x3a63   :  { %v6837_v44 = vadd.f32 %v6833_v26, %v6596_v10  ;;  %v14937_v11 = vpop.f32.mrb[75].mxu1  ;;  %v6869_v26 = vrot.slane %v16734_v29, %v16327_v34 }
0x3a65   :  { %v6843_v0 = vadd.f32 %v6841_v53, %v6837_v44  ;;  %v15726_v53 = vpop.eup %15725 }
0x3a66   :  { %v4749_v43 = vmul.f32 %v15726_v53, %v4734_v62 }
0x3a67   :  { %v17021_v20 = vadd.f32 %v6843_v0, %v16670_v23  ;;  %v6987_v23 = vld [vmem:[%s18036_s13] sm:$0xff] }
0x3a68   :  { %v15493_v39 = vpack.c.bf16 %v6988_v37, %v6987_v23  ;;  %v4751_v6 = vsel %vm4750_vm12, %v4734_v62, %v4749_v43  ;;  %v6900_v23 = vld [vmem:[%s18035_s12 + $0x10] sm:$0xff] }
0x3a69   :  { %v6849_v31 = vsel %vm72_vm0, %v17021_v20, 0.0  ;;  %v4754_v33 = vsel %vm4752_vm13, %v4753_v59, %v4751_v6 }
0x3a6a   :  { %6850 = vadd.xlane.f32.xlu1 %v6849_v31  ;;  %15494 = vmatprep.subr.bf16.mxu1 %v15493_v39  ;;  %v4756_v19 = vadd.f32 1e-06, %v4754_v33  ;;  %v6870_v31 = vmul.f32 %v6869_v26, %v17024_v22  ;;  %v6898_v22 = vld [vmem:[%s18035_s12] sm:$0xff] }
0x3a6b   :  { %15496 = vmatpush3.bf16.msra.mxu1 %v15493_v39  ;;  %v15489_v39 = vpack.c.bf16 %v6901_v55, %v6900_v23 }
0x3a6c   :  { %15498 = vmatprep.subr.bf16.mxu1 %v15497_v2 }
0x3a6e   :  { %4728 = vadd.xlane.f32.xlu1 %v4727_v25  ;;  %v6895_v25 = vrot.slane %v16734_v29, %v16371_v16  ;;  %v6899_v29 = vld [vmem:[%s18035_s12 + $0x8] sm:$0xff] }
0x3a6f   :  { %15500 = vmatpush3.bf16.msra.mxu1 %v15497_v2  ;;  %v15485_v37 = vpack.c.bf16 %v6899_v29, %v6898_v22 }
0x3a70   :  { %14965 = vmatprep.subr.mxu1 %v15910_v51 }
0x3a71   :  { %15486 = vmatprep.subr.bf16.mxu0 %v15485_v37 }
0x3a72   :  { %6859 = vadd.xlane.f32.xlu1 %v6858_v30  ;;  %15488 = vmatpush3.bf16.msra.mxu0 %v15485_v37 }
0x3a73   :  { %15490 = vmatprep.subr.bf16.mxu0 %v15489_v39 }
0x3a76   :  { %15492 = vmatpush3.bf16.msra.mxu0 %v15489_v39 }
0x3a77   :  { %14960 = vmatprep.subr.mxu0 %v15910_v51 }
0x3af7   :  { %v6851_v4 = vpop.xlane.xlu1 %6850 }
0x3af8   :  { %v6853_v47 = vmul.f32 0.03125, %v6851_v4 }
0x3afa   :  { %v17048_v50 = vsub.f32 %v17021_v20, %v6853_v47 }
0x3afb   :  { %v4729_v54 = vpop.xlane.xlu1 %4728 }
0x3afc   :  { %v4733_v7 = vmul.f32 0.032258064, %v4729_v54  ;;  %v6857_v28 = vmul.f32 %v17048_v50, %v17048_v50 }
0x3afe   :  { %15727 = vrsqrt.f32 %v4733_v7  ;;  %v6861_v17 = vsel %vm72_vm0, %v6857_v28, 0.0  ;;  %vm4743_vm14 = vcmp.eq.f32.partialorder %v4733_v7, inf  ;;  %v4746_v60 = vand.u32 2147483648, %v4733_v7 }
0x3aff   :  { %v6860_v57 = vpop.xlane.xlu1 %6859  ;;  %6862 = vadd.xlane.f32.xlu1 %v6861_v17  ;;  %vm4745_vm15 = vcmp.eq.f32.partialorder %v4733_v7, 0.0 }
0x3b00   :  { %v6864_v15 = vmul.f32 0.032258064, %v6860_v57  ;;  %v17097_v57 = vld [vmem:[%s18040_s17 + $0x8] sm:$0xff] }
0x3b02   :  { %15729 = vrsqrt.f32 %v6864_v15  ;;  %vm6874_vm1 = vcmp.eq.f32.partialorder %v6864_v15, inf  ;;  %v6877_v63 = vand.u32 2147483648, %v6864_v15  ;;  %vm6876_vm2 = vcmp.eq.f32.partialorder %v6864_v15, 0.0 }
0x3b03   :  { %15731 = vrcp.f32 %v4756_v19 }
0x3b08   :  { %v15728_v48 = vpop.eup %15727 }
0x3b09   :  { %v4742_v18 = vmul.f32 %v15728_v48, %v4733_v7  ;;  %v17113_v48 = vld [vmem:[%s18040_s17] sm:$0xff] }
0x3b0a   :  { %v6905_v19 = vrot.slane %v17113_v48, %v16322_v21 }
0x3b0b   :  { %v4744_v61 = vsel %vm4743_vm14, %v4733_v7, %v4742_v18  ;;  %v6871_v7 = vmul.f32 %v6869_v26, %v17048_v50 }
0x3b0c   :  { %v15730_v10 = vpop.eup %15729  ;;  %v4747_v38 = vsel %vm4745_vm15, %v4746_v60, %v4744_v61 }
0x3b0d   :  { %v6873_v49 = vmul.f32 %v15730_v10, %v6864_v15  ;;  %v4755_v58 = vadd.f32 1e-06, %v4747_v38  ;;  %v15732_v56 = vpop.eup %15731 }
0x3b0e   :  { %v4760_v11 = vmul.f32 %v15732_v56, %v4740_v9 }
0x3b0f   :  { %v6875_v45 = vsel %vm6874_vm1, %v6864_v15, %v6873_v49  ;;  %15733 = vrcp.f32 %v4755_v58  ;;  %v6994_v15 = vrot.slane %v17097_v57, %v16082_v52  ;;  %v17135_v58 = vld [vmem:[%s18027_s4] sm:$0xff] }
0x3b10   :  { %v6878_v12 = vsel %vm6876_vm2, %v6877_v63, %v6875_v45  ;;  %v17068_v35 = vadd.f32 %v13900_v14, %v4760_v11 }
0x3b11   :  { %v6886_v3 = vadd.f32 1e-06, %v6878_v12 }
0x3b13   :  { %15735 = vrcp.f32 %v6886_v3 }
0x3b19   :  { %v15734_v44 = vpop.eup %15733 }
0x3b1a   :  { %v4758_v0 = vmul.f32 %v15734_v44, %v4739_v8 }
0x3b1c   :  { %v17064_v1 = vadd.f32 %v13900_v14, %v4758_v0 }
0x3b1d   :  { %v15736_v27 = vpop.eup %15735 }
0x3b1e   :  { %14957 = vmatprep.mubr.msk.f32.mxu1 %vm72_vm0, %v17064_v1  ;;  %v6889_v13 = vmul.f32 %v15736_v27, %v6870_v31 }
0x3b1f   :  { %14958 = vmatmul.mubr.msk.f32.vlgmr.msra.gmra.mrb[76].mxu1 %vm72_vm0, %v17068_v35 }
0x3b20   :  { %v6896_v30 = vadd.f32 %v6895_v25, %v6889_v13  ;;  %14967 = vmatprep.mubr.msk.f32.mxu1 %vm15911_vm5, %v15910_v51 }
0x3b22   :  { %14946 = vmatprep.mubr.msk.f32.mxu0 %vm72_vm0, %v6896_v30 }
0x3b8c   :  { %v6863_v42 = vpop.xlane.xlu1 %6862 }
0x3b8d   :  { %v6865_v2 = vmul.f32 0.032258064, %v6863_v42  ;;  %v17158_v42 = vld [vmem:[%s18037_s14 + $0x8] sm:$0xff] }
0x3b8f   :  { %15737 = vrsqrt.f32 %v6865_v2  ;;  %vm6881_vm3 = vcmp.eq.f32.partialorder %v6865_v2, inf  ;;  %v6884_v4 = vand.u32 2147483648, %v6865_v2  ;;  %vm6883_vm4 = vcmp.eq.f32.partialorder %v6865_v2, 0.0 }
0x3b99   :  { %v15738_v32 = vpop.eup %15737 }
0x3b9a   :  { %v6880_v62 = vmul.f32 %v15738_v32, %v6865_v2 }
0x3b9c   :  { %v6882_v47 = vsel %vm6881_vm3, %v6865_v2, %v6880_v62 }
0x3b9d   :  { %v6885_v53 = vsel %vm6883_vm4, %v6884_v4, %v6882_v47  ;;  %v17166_v47 = vld [vmem:[%s18037_s14] sm:$0xff] }
0x3b9e   :  { %v6887_v54 = vadd.f32 1e-06, %v6885_v53 }
0x3ba0   :  { %15739 = vrcp.f32 %v6887_v54 }
0x3baa   :  { %v15740_v28 = vpop.eup %15739 }
0x3bab   :  { %v6891_v43 = vmul.f32 %v15740_v28, %v6871_v7 }
0x3bad   :  { %v6897_v17 = vadd.f32 %v6895_v25, %v6891_v43 }
0x3baf   :  { %14947 = vmatmul.mubr.msk.f32.vlgmr.msra.gmra.mrb[82].mxu0 %vm72_vm0, %v6897_v17 }
0x3bb0   :  { %14962 = vmatprep.mubr.msk.f32.mxu0 %vm15911_vm5, %v15910_v51 }
0x3bf2   :  { %v14959_v6 = vpop.f32.mrb[76].mxu1 }
0x3bf3   :  { %v17101_v59 = vadd.f32 %v14959_v6, %v6994_v15  ;;  %v7067_v50 = vpop.f32.mrb[77].mxu1 }
0x3bf4   :  { %v17103_v33 = vadd.f32 %v7067_v50, %v6994_v15 }
0x3bf6   :  { %7247 = vrot.lane.b32.xlu1 %v17103_v33, %s18067_s20  ;;  %14961 = vmatpush3.xpose.msk.msra.mxu0 %vm223_vm6, %v17103_v33 }
0x3bf7   :  { %14970 = vmatprep.subr.mxu0 %v15910_v51 }
0x3c68   :  { %v7248_v38 = vpop.permute.xlu1 %7247 }
0x3c82   :  { %v14948_v18 = vpop.f32.mrb[82].mxu0 }
0x3c83   :  { %v17117_v60 = vadd.f32 %v14948_v18, %v6905_v19  ;;  %v6978_v61 = vpop.f32.mrb[83].mxu0 }
0x3c84   :  { %v17119_v10 = vadd.f32 %v6978_v61, %v6905_v19 }
0x3c86   :  { %7245 = vrot.lane.b32.xlu1 %v17119_v10, %s18067_s20  ;;  %14963 = vmatmul.mubr.msk.f32.vlgmr.msra.gmra.mrb[84].mxu0 %vm223_vm6, %v17119_v10 }
0x3c87   :  { %14971 = vmatpush3.xpose.msk.msra.mxu0 %vm223_vm6, %v7248_v38  ;;  %14972 = vmatprep.mubr.msk.f32.mxu0 %vm15911_vm5, %v15910_v51 }
0x3c88   :  { %14980 = vmatprep.subr.mxu0 %v15910_v51 }
0x3cf8   :  { %v7246_v49 = vpop.permute.xlu1 %7245 }
0x3cf9   :  { %14973 = vmatmul.mubr.msk.f32.vlgmr.msra.gmra.mrb[86].mxu0 %vm223_vm6, %v7246_v49 }
0x3cfa   :  { %14982 = vmatprep.mubr.msk.f32.mxu0 %vm15911_vm5, %v15910_v51  ;;  %14981 = vmatpush3.msra.mxu0 %v17158_v42 }
0x3cfb   :  { %14990 = vmatprep.subr.mxu0 %v15910_v51 }
0x3d59   :  { %v7152_v63 = vpop.f32.mrb[84].mxu0 }
0x3d5a   :  { %v7156_v45 = vmul.f32 0.35355338, %v7152_v63  ;;  %v14964_v12 = vpop.f32.mrb[85].mxu0 }
0x3d5c   :  { %v7157_v3 = vadd.f32 %v7156_v45, %v17135_v58 }
0x3d5e   :  { %v7158_v5 = vsel %vm223_vm6, %v7157_v3, -inf }
0x3d5f   :  { %7159 = vmax.xlane.f32.xlu1 %v7158_v5 }
0x3d70   :  { %7560 = vrot.lane.b32.xlu1 %v17103_v33, %s18079_s1 }
0x3dcc   :  { %v7319_v56 = vpop.f32.mrb[86].mxu0 }
0x3dcd   :  { %v7323_v9 = vmul.f32 0.35355338, %v7319_v56  ;;  %v14974_v8 = vpop.f32.mrb[87].mxu0 }
0x3dcf   :  { %v7324_v26 = vadd.f32 %v7323_v9, %v17135_v58 }
0x3dd1   :  { %v7325_v44 = vsel %vm223_vm6, %v7324_v26, -inf }
0x3dd2   :  { %7326 = vmax.xlane.f32.xlu0 %v7325_v44 }
0x3de8   :  { %7169 = vrot.lane.b32.xlu0 %v17103_v33, %s18085_s8 }
0x3dec   :  { %v7160_v11 = vpop.xlane.xlu1 %7159 }
0x3ded   :  { %v7161_v14 = vsub.f32 %v7157_v3, %v7160_v11 }
0x3def   :  { %v7162_v0 = vmul.f32 1.442695, %v7161_v14 }
0x3df0   :  { %v7561_v28 = vpop.permute.xlu1 %7560 }
0x3df1   :  { %15741 = vpow2.f32 %v7162_v0  ;;  %v17205_v0 = vld [vmem:[%s18037_s14 + $0x10] sm:$0xff] }
0x3dfb   :  { %v15742_v31 = vpop.eup %15741 }
0x3dfc   :  { %v7164_v25 = vsel %vm223_vm6, %v15742_v31, 0.0 }
0x3e07   :  { %7165 = vadd.xlane.f32.xlu0 %v7164_v25 }
0x3e5f   :  { %v7327_v27 = vpop.xlane.xlu0 %7326 }
0x3e60   :  { %v7328_v13 = vsub.f32 %v7324_v26, %v7327_v27 }
0x3e62   :  { %v7329_v30 = vmul.f32 1.442695, %v7328_v13 }
0x3e63   :  { %v7170_v22 = vpop.permute.xlu0 %7169 }
0x3e64   :  { %15743 = vpow2.f32 %v7329_v30  ;;  %14966 = vmatpush3.msra.mxu1 %v7170_v22 }
0x3e65   :  { %14975 = vmatprep.subr.mxu1 %v15910_v51 }
0x3e6e   :  { %v15744_v29 = vpop.eup %15743 }
0x3e6f   :  { %v7331_v23 = vsel %vm223_vm6, %v15744_v29, 0.0 }
0x3e70   :  { %7332 = vadd.xlane.f32.xlu0 %v7331_v23 }
0x3e86   :  { %7336 = vrot.lane.b32.xlu0 %v17103_v33, %s18077_s26 }
0x3e8a   :  { %7558 = vrot.lane.b32.xlu0 %v17119_v10, %s18079_s1 }
0x3e94   :  { %v7166_v37 = vpop.xlane.xlu0 %7165 }
0x3e95   :  { %15745 = vrcp.f32 %v7166_v37 }
0x3e9f   :  { %v15746_v55 = vpop.eup %15745 }
0x3ea0   :  { %v7168_v39 = vmul.f32 %v15746_v55, %v15742_v31 }
0x3ea2   :  { %14968 = vmatmul.mubr.msk.f32.vlgmr.msra.gmra.mrb[78].mxu1 %vm223_vm6, %v7168_v39 }
0x3ea3   :  { %14977 = vmatprep.mubr.msk.f32.mxu1 %vm15911_vm5, %v15910_v51 }
0x3efd   :  { %v7333_v2 = vpop.xlane.xlu0 %7332 }
0x3efe   :  { %15747 = vrcp.f32 %v7333_v2 }
0x3f01   :  { %v7337_v32 = vpop.permute.xlu0 %7336 }
0x3f02   :  { %14976 = vmatpush3.msra.mxu1 %v7337_v32 }
0x3f03   :  { %14985 = vmatprep.subr.mxu1 %v15910_v51 }
0x3f05   :  { %v7559_v17 = vpop.permute.xlu0 %7558 }
0x3f08   :  { %v15748_v62 = vpop.eup %15747 }
0x3f09   :  { %v7335_v4 = vmul.f32 %v15748_v62, %v15744_v29 }
0x3f0b   :  { %14978 = vmatmul.mubr.msk.f32.vlgmr.msra.gmra.mrb[80].mxu1 %vm223_vm6, %v7335_v4 }
0x3f0c   :  { %14986 = vmatpush3.msra.mxu1 %v17166_v47  ;;  %14987 = vmatprep.mubr.msk.f32.mxu1 %vm15911_vm5, %v15910_v51 }
0x3f0d   :  { %14995 = vmatprep.subr.mxu1 %v15910_v51 }
0x3f75   :  { %v7241_v53 = vpop.f32.mrb[78].mxu1 }
0x3f76   :  { %v14969_v54 = vpop.f32.mrb[79].mxu1  ;;  %14988 = vmatmul.mubr.msk.f32.vlgmr.msra.gmra.mrb[82].mxu1 %vm223_vm6, %v7241_v53 }
0x3f77   :  { %14997 = vmatprep.mubr.msk.f32.mxu1 %vm15911_vm5, %v15910_v51 }
0x3fde   :  { %v7408_v7 = vpop.f32.mrb[80].mxu1 }
0x3fdf   :  { %v14979_v43 = vpop.f32.mrb[81].mxu1  ;;  %14983 = vmatmul.mubr.msk.f32.vlgmr.msra.gmra.mrb[88].mxu0 %vm223_vm6, %v7408_v7 }
0x3fe0   :  { %14991 = vmatpush3.xpose.msk.msra.mxu0 %vm223_vm6, %v7561_v28  ;;  %14992 = vmatprep.mubr.msk.f32.mxu0 %vm15911_vm5, %v15910_v51  ;;  %v17242_v43 = vld [vmem:[%s18037_s14 + $0x18] sm:$0xff] }
0x3fe1   :  { %15000 = vmatprep.subr.mxu0 %v15910_v51 }
0x3fe3   :  { %14993 = vmatmul.mubr.msk.f32.vlgmr.msra.gmra.mrb[90].mxu0 %vm223_vm6, %v7559_v17 }
0x3fe4   :  { %15002 = vmatprep.mubr.msk.f32.mxu0 %vm15911_vm5, %v15910_v51  ;;  %15001 = vmatpush3.msra.mxu0 %v17205_v0 }
0x3fe5   :  { %15010 = vmatprep.subr.mxu0 %v15910_v51 }
0x4049   :  { %v7554_v15 = vpop.f32.mrb[82].mxu1 }
0x404a   :  { %v14989_v6 = vpop.f32.mrb[83].mxu1 }
0x40b2   :  { %v7481_v50 = vpop.f32.mrb[88].mxu0 }
0x40b3   :  { %v7555_v19 = vadd.f32 %v7554_v15, %v7481_v50  ;;  %v14984_v18 = vpop.f32.mrb[89].mxu0 }
0x40b6   :  { %v7632_v61 = vpop.f32.mrb[90].mxu0 }
0x40b7   :  { %v7636_v38 = vmul.f32 0.35355338, %v7632_v61  ;;  %v14994_v49 = vpop.f32.mrb[91].mxu0 }
0x40b9   :  { %v7637_v63 = vadd.f32 %v7636_v38, %v17135_v58 }
0x40bb   :  { %v7638_v45 = vsel %vm223_vm6, %v7637_v63, -inf }
0x40bc   :  { %7639 = vmax.xlane.f32.xlu0 %v7638_v45 }
0x40d2   :  { %7649 = vrot.lane.b32.xlu0 %v17103_v33, %s18078_s21 }
0x40d6   :  { %7799 = vrot.lane.b32.xlu0 %v17119_v10, %s18081_s3 }
0x4149   :  { %v7640_v12 = vpop.xlane.xlu0 %7639 }
0x414a   :  { %v7641_v3 = vsub.f32 %v7637_v63, %v7640_v12 }
0x414c   :  { %v7642_v5 = vmul.f32 1.442695, %v7641_v3 }
0x414d   :  { %v7650_v56 = vpop.permute.xlu0 %7649 }
0x414e   :  { %15749 = vpow2.f32 %v7642_v5  ;;  %14996 = vmatpush3.msra.mxu1 %v7650_v56 }
0x414f   :  { %15005 = vmatprep.subr.mxu1 %v15910_v51 }
0x4151   :  { %v7800_v14 = vpop.permute.xlu0 %7799 }
0x4158   :  { %v15750_v9 = vpop.eup %15749 }
0x4159   :  { %v7644_v8 = vsel %vm223_vm6, %v15750_v9, 0.0 }
0x415a   :  { %7645 = vadd.xlane.f32.xlu1 %v7644_v8 }
0x416b   :  { %7801 = vrot.lane.b32.xlu1 %v17103_v33, %s18081_s3 }
0x41e7   :  { %v7646_v26 = vpop.xlane.xlu1 %7645 }
0x41e8   :  { %15751 = vrcp.f32 %v7646_v26 }
0x41eb   :  { %v7802_v10 = vpop.permute.xlu1 %7801 }
0x41f2   :  { %v15752_v44 = vpop.eup %15751 }
0x41f3   :  { %v7648_v11 = vmul.f32 %v15752_v44, %v15750_v9 }
0x41f5   :  { %14998 = vmatmul.mubr.msk.f32.vlgmr.msra.gmra.mrb[84].mxu1 %vm223_vm6, %v7648_v11 }
0x41f6   :  { %15006 = vmatpush3.xpose.msk.msra.mxu1 %vm223_vm6, %v7802_v10  ;;  %15007 = vmatprep.mubr.msk.f32.mxu1 %vm15911_vm5, %v15910_v51 }
0x41f7   :  { %15015 = vmatprep.subr.mxu1 %v15910_v51 }
0x41f9   :  { %15008 = vmatmul.mubr.msk.f32.vlgmr.msra.gmra.mrb[86].mxu1 %vm223_vm6, %v7800_v14 }
0x41fa   :  { %15017 = vmatprep.mubr.msk.f32.mxu1 %vm15911_vm5, %v15910_v51  ;;  %15016 = vmatpush3.msra.mxu1 %v17242_v43 }
0x41fb   :  { %15025 = vmatprep.subr.mxu1 %v15910_v51 }
0x42c8   :  { %v7721_v31 = vpop.f32.mrb[84].mxu1 }
0x42c9   :  { %v14999_v25 = vpop.f32.mrb[85].mxu1  ;;  %15003 = vmatmul.mubr.msk.f32.vlgmr.msra.gmra.mrb[92].mxu0 %vm223_vm6, %v7721_v31 }
0x42ca   :  { %15012 = vmatprep.mubr.msk.f32.mxu0 %vm15911_vm5, %v15910_v51 }
0x42cc   :  { %v7873_v27 = vpop.f32.mrb[86].mxu1 }
0x42cd   :  { %v7877_v13 = vmul.f32 0.35355338, %v7873_v27  ;;  %v15009_v30 = vpop.f32.mrb[87].mxu1 }
0x42cf   :  { %v7878_v22 = vadd.f32 %v7877_v13, %v17135_v58 }
0x42d1   :  { %v7879_v29 = vsel %vm223_vm6, %v7878_v22, -inf }
0x42d2   :  { %7880 = vmax.xlane.f32.xlu0 %v7879_v29 }
0x42e8   :  { %7890 = vrot.lane.b32.xlu0 %v17103_v33, %s18082_s29 }
0x42ec   :  { %8205 = vrot.lane.b32.xlu0 %v17117_v60, %s18067_s20 }
0x435f   :  { %v7881_v23 = vpop.xlane.xlu0 %7880 }
0x4360   :  { %v7882_v37 = vsub.f32 %v7878_v22, %v7881_v23 }
0x4362   :  { %v7883_v55 = vmul.f32 1.442695, %v7882_v37 }
0x4363   :  { %v7891_v39 = vpop.permute.xlu0 %7890 }
0x4364   :  { %15753 = vpow2.f32 %v7883_v55  ;;  %15011 = vmatpush3.msra.mxu0 %v7891_v39 }
0x4365   :  { %15020 = vmatprep.subr.mxu0 %v15910_v51 }
0x4367   :  { %v8206_v28 = vpop.permute.xlu0 %8205 }
0x436e   :  { %v15754_v2 = vpop.eup %15753 }
0x436f   :  { %v7885_v58 = vsel %vm223_vm6, %v15754_v2, 0.0 }
0x4370   :  { %7886 = vadd.xlane.f32.xlu1 %v7885_v58 }
0x4381   :  { %8207 = vrot.lane.b32.xlu1 %v17101_v59, %s18067_s20 }
0x439c   :  { %v7794_v32 = vpop.f32.mrb[92].mxu0 }
0x439d   :  { %v7798_v33 = vadd.f32 %v7794_v32, %v7555_v19  ;;  %v15004_v62 = vpop.f32.mrb[93].mxu0 }
0x43fd   :  { %v7887_v4 = vpop.xlane.xlu1 %7886 }
0x43fe   :  { %15755 = vrcp.f32 %v7887_v4 }
0x4401   :  { %v8208_v7 = vpop.permute.xlu1 %8207 }
0x4408   :  { %v15756_v53 = vpop.eup %15755 }
0x4409   :  { %v7889_v54 = vmul.f32 %v15756_v53, %v15754_v2 }
0x440b   :  { %15013 = vmatmul.mubr.msk.f32.vlgmr.msra.gmra.mrb[94].mxu0 %vm223_vm6, %v7889_v54 }
0x440c   :  { %15021 = vmatpush3.xpose.msk.msra.mxu0 %vm223_vm6, %v17101_v59  ;;  %15022 = vmatprep.mubr.msk.f32.mxu0 %vm15911_vm5, %v15910_v51 }
0x440d   :  { %15030 = vmatprep.subr.mxu0 %v15910_v51 }
0x440f   :  { %15023 = vmatmul.mubr.msk.f32.vlgmr.msra.gmra.mrb[96].mxu0 %vm223_vm6, %v17117_v60 }
0x4410   :  { %15031 = vmatpush3.xpose.msk.msra.mxu0 %vm223_vm6, %v8208_v7  ;;  %15032 = vmatprep.mubr.msk.f32.mxu0 %vm15911_vm5, %v15910_v51 }
0x4411   :  { %15040 = vmatprep.subr.mxu0 %v15910_v51 }
0x4413   :  { %15033 = vmatmul.mubr.msk.f32.vlgmr.msra.gmra.mrb[98].mxu0 %vm223_vm6, %v8206_v28 }
0x4414   :  { %15041 = vmatpush3.msra.mxu0 %v17158_v42  ;;  %15042 = vmatprep.mubr.msk.f32.mxu0 %vm15911_vm5, %v15910_v51  ;;  %v17252_v42 = vld [vmem:[%s18027_s4 + $0x8] sm:$0xff] }
0x4415   :  { %15050 = vmatprep.subr.mxu0 %v15910_v51 }
0x44de   :  { %v7962_v17 = vpop.f32.mrb[94].mxu0 }
0x44df   :  { %v15014_v15 = vpop.f32.mrb[95].mxu0  ;;  %15018 = vmatmul.mubr.msk.f32.vlgmr.msra.gmra.mrb[88].mxu1 %vm223_vm6, %v7962_v17 }
0x44e0   :  { %15027 = vmatprep.mubr.msk.f32.mxu1 %vm15911_vm5, %v15910_v51 }
0x44e2   :  { %v8112_v6 = vpop.f32.mrb[96].mxu0 }
0x44e3   :  { %v8116_v50 = vmul.f32 0.35355338, %v8112_v6  ;;  %v15024_v19 = vpop.f32.mrb[97].mxu0 }
0x44e5   :  { %v8117_v18 = vadd.f32 %v8116_v50, %v17252_v42 }
0x44e6   :  { %v8279_v61 = vpop.f32.mrb[98].mxu0 }
0x44e7   :  { %v8283_v38 = vmul.f32 0.35355338, %v8279_v61  ;;  %v15034_v49 = vpop.f32.mrb[99].mxu0  ;;  %v8118_v63 = vsel %vm223_vm6, %v8117_v18, -inf }
0x44e8   :  { %8119 = vmax.xlane.f32.xlu0 %v8118_v63 }
0x44e9   :  { %v8284_v45 = vadd.f32 %v8283_v38, %v17252_v42 }
0x44eb   :  { %v8285_v12 = vsel %vm223_vm6, %v8284_v45, -inf }
0x44ec   :  { %8286 = vmax.xlane.f32.xlu1 %v8285_v12 }
0x44fd   :  { %8129 = vrot.lane.b32.xlu1 %v17101_v59, %s18085_s8 }
0x4501   :  { %8520 = vrot.lane.b32.xlu1 %v17101_v59, %s18079_s1 }
0x4505   :  { %8518 = vrot.lane.b32.xlu1 %v17117_v60, %s18079_s1 }
0x4575   :  { %v8120_v3 = vpop.xlane.xlu0 %8119 }
0x4576   :  { %v8121_v5 = vsub.f32 %v8117_v18, %v8120_v3 }
0x4578   :  { %v8122_v56 = vmul.f32 1.442695, %v8121_v5 }
0x4579   :  { %v8287_v9 = vpop.xlane.xlu1 %8286 }
0x457a   :  { %15757 = vpow2.f32 %v8122_v56  ;;  %v8288_v8 = vsub.f32 %v8284_v45, %v8287_v9  ;;  %v9003_v9 = vrot.slane %v17113_v48, %v16380_v24 }
0x457c   :  { %v8289_v26 = vmul.f32 1.442695, %v8288_v8 }
0x457d   :  { %v8130_v44 = vpop.permute.xlu1 %8129 }
0x457e   :  { %15759 = vpow2.f32 %v8289_v26  ;;  %15026 = vmatpush3.msra.mxu1 %v8130_v44 }
0x457f   :  { %15035 = vmatprep.subr.mxu1 %v15910_v51 }
0x4581   :  { %v8521_v32 = vpop.permute.xlu1 %8520 }
0x4584   :  { %v15758_v11 = vpop.eup %15757 }
0x4585   :  { %v8124_v10 = vsel %vm223_vm6, %v15758_v11, 0.0 }
0x4586   :  { %8125 = vadd.xlane.f32.xlu0 %v8124_v10 }
0x4588   :  { %v15760_v14 = vpop.eup %15759 }
0x4589   :  { %v8291_v31 = vsel %vm223_vm6, %v15760_v14, 0.0 }
0x458a   :  { %8292 = vadd.xlane.f32.xlu0 %v8291_v31 }
0x45a0   :  { %8296 = vrot.lane.b32.xlu0 %v17101_v59, %s18077_s26 }
0x45b2   :  { %v8035_v25 = vpop.f32.mrb[88].mxu1 }
0x45b3   :  { %v17269_v27 = vadd.f32 %v8035_v25, %v7798_v33  ;;  %v15019_v13 = vpop.f32.mrb[89].mxu1 }
0x45b5   :  { %v9004_v44 = vadd.f32 %v9003_v9, %v17269_v27 }
0x4613   :  { %v8126_v30 = vpop.xlane.xlu0 %8125 }
0x4614   :  { %15761 = vrcp.f32 %v8126_v30 }
0x4617   :  { %v8293_v22 = vpop.xlane.xlu0 %8292 }
0x4618   :  { %15763 = vrcp.f32 %v8293_v22 }
0x461b   :  { %v8297_v37 = vpop.permute.xlu0 %8296 }
0x461e   :  { %v15762_v29 = vpop.eup %15761 }
0x461f   :  { %v8128_v23 = vmul.f32 %v15762_v29, %v15758_v11 }
0x4621   :  { %15028 = vmatmul.mubr.msk.f32.vlgmr.msra.gmra.mrb[90].mxu1 %vm223_vm6, %v8128_v23 }
0x4622   :  { %v15764_v55 = vpop.eup %15763  ;;  %15036 = vmatpush3.msra.mxu1 %v8297_v37  ;;  %15037 = vmatprep.mubr.msk.f32.mxu1 %vm15911_vm5, %v15910_v51 }
0x4623   :  { %v8295_v39 = vmul.f32 %v15764_v55, %v15760_v14  ;;  %15045 = vmatprep.subr.mxu1 %v15910_v51  ;;  %v17320_v14 = vadd.f32 %v9004_v44, %v17002_v46  ;;  %v9061_v44 = vld [vmem:[%s18038_s15 + $0x8] sm:$0xff] }
0x4625   :  { %15038 = vmatmul.mubr.msk.f32.vlgmr.msra.gmra.mrb[92].mxu1 %vm223_vm6, %v8295_v39  ;;  %v9008_v48 = vsel %vm72_vm0, %v17320_v14, 0.0 }
0x4626   :  { %15046 = vmatpush3.msra.mxu1 %v17166_v47  ;;  %15047 = vmatprep.mubr.msk.f32.mxu1 %vm15911_vm5, %v15910_v51  ;;  %v8519_v47 = vpop.permute.xlu1 %8518 }
0x4627   :  { %15055 = vmatprep.subr.mxu1 %v15910_v51 }
0x46f4   :  { %v8201_v2 = vpop.f32.mrb[90].mxu1 }
0x46f5   :  { %v15029_v58 = vpop.f32.mrb[91].mxu1  ;;  %15048 = vmatmul.mubr.msk.f32.vlgmr.msra.gmra.mrb[94].mxu1 %vm223_vm6, %v8201_v2 }
0x46f6   :  { %15057 = vmatprep.mubr.msk.f32.mxu1 %vm15911_vm5, %v15910_v51 }
0x46f8   :  { %v8368_v33 = vpop.f32.mrb[92].mxu1 }
0x46f9   :  { %v15039_v62 = vpop.f32.mrb[93].mxu1  ;;  %15043 = vmatmul.mubr.msk.f32.vlgmr.msra.gmra.mrb[100].mxu0 %vm223_vm6, %v8368_v33 }
0x46fa   :  { %15051 = vmatpush3.xpose.msk.msra.mxu0 %vm223_vm6, %v8521_v32  ;;  %15052 = vmatprep.mubr.msk.f32.mxu0 %vm15911_vm5, %v15910_v51 }
0x46fb   :  { %15060 = vmatprep.subr.mxu0 %v15910_v51 }
0x46fd   :  { %15053 = vmatmul.mubr.msk.f32.vlgmr.msra.gmra.mrb[102].mxu0 %vm223_vm6, %v8519_v47 }
0x46fe   :  { %15061 = vmatpush3.msra.mxu0 %v17205_v0  ;;  %15062 = vmatprep.mubr.msk.f32.mxu0 %vm15911_vm5, %v15910_v51 }
0x46ff   :  { %15070 = vmatprep.subr.mxu0 %v15910_v51 }
0x47c8   :  { %v8514_v4 = vpop.f32.mrb[94].mxu1 }
0x47c9   :  { %v15049_v53 = vpop.f32.mrb[95].mxu1 }
0x47cc   :  { %v8441_v54 = vpop.f32.mrb[100].mxu0 }
0x47cd   :  { %v8515_v7 = vadd.f32 %v8514_v4, %v8441_v54  ;;  %v15044_v28 = vpop.f32.mrb[101].mxu0 }
0x47d0   :  { %v8592_v17 = vpop.f32.mrb[102].mxu0 }
0x47d1   :  { %v8596_v15 = vmul.f32 0.35355338, %v8592_v17  ;;  %v15054_v6 = vpop.f32.mrb[103].mxu0 }
0x47d3   :  { %v8597_v50 = vadd.f32 %v8596_v15, %v17252_v42 }
0x47d5   :  { %v8598_v19 = vsel %vm223_vm6, %v8597_v50, -inf }
0x47d6   :  { %8599 = vmax.xlane.f32.xlu0 %v8598_v19 }
0x47ec   :  { %8609 = vrot.lane.b32.xlu0 %v17101_v59, %s18078_s21 }
0x47f0   :  { %8759 = vrot.lane.b32.xlu0 %v17117_v60, %s18081_s3 }
0x4863   :  { %v8600_v0 = vpop.xlane.xlu0 %8599 }
0x4864   :  { %v8601_v18 = vsub.f32 %v8597_v50, %v8600_v0 }
0x4866   :  { %v8602_v61 = vmul.f32 1.442695, %v8601_v18 }
0x4867   :  { %v8610_v38 = vpop.permute.xlu0 %8609 }
0x4868   :  { %15765 = vpow2.f32 %v8602_v61  ;;  %15056 = vmatpush3.msra.mxu1 %v8610_v38 }
0x4869   :  { %15065 = vmatprep.subr.mxu1 %v15910_v51 }
0x486b   :  { %v8760_v5 = vpop.permute.xlu0 %8759 }
0x4872   :  { %v15766_v49 = vpop.eup %15765 }
0x4873   :  { %v8604_v63 = vsel %vm223_vm6, %v15766_v49, 0.0 }
0x4874   :  { %8605 = vadd.xlane.f32.xlu1 %v8604_v63 }
0x4885   :  { %8761 = vrot.lane.b32.xlu1 %v17101_v59, %s18081_s3 }
0x4901   :  { %v8606_v45 = vpop.xlane.xlu1 %8605 }
0x4902   :  { %15767 = vrcp.f32 %v8606_v45 }
0x4905   :  { %v8762_v60 = vpop.permute.xlu1 %8761 }
0x490c   :  { %v15768_v12 = vpop.eup %15767 }
0x490d   :  { %v8608_v3 = vmul.f32 %v15768_v12, %v15766_v49 }
0x490f   :  { %15058 = vmatmul.mubr.msk.f32.vlgmr.msra.gmra.mrb[96].mxu1 %vm223_vm6, %v8608_v3  ;;  %v9031_v3 = vrot.slane %v17097_v57, %v16292_v40 }
0x4910   :  { %15066 = vmatpush3.xpose.msk.msra.mxu1 %vm223_vm6, %v8762_v60  ;;  %15067 = vmatprep.mubr.msk.f32.mxu1 %vm15911_vm5, %v15910_v51 }
0x4911   :  { %15075 = vmatprep.subr.mxu1 %v15910_v51 }
0x4913   :  { %15068 = vmatmul.mubr.msk.f32.vlgmr.msra.gmra.mrb[98].mxu1 %vm223_vm6, %v8760_v5  ;;  %v9057_v5 = vrot.slane %v17097_v57, %v16322_v21 }
0x4914   :  { %15076 = vmatpush3.msra.mxu1 %v17242_v43  ;;  %15077 = vmatprep.mubr.msk.f32.mxu1 %vm15911_vm5, %v15910_v51 }
0x49e2   :  { %v8681_v56 = vpop.f32.mrb[96].mxu1 }
0x49e3   :  { %v15059_v8 = vpop.f32.mrb[97].mxu1  ;;  %15063 = vmatmul.mubr.msk.f32.vlgmr.msra.gmra.mrb[104].mxu0 %vm223_vm6, %v8681_v56 }
0x49e4   :  { %15072 = vmatprep.mubr.msk.f32.mxu0 %vm15911_vm5, %v15910_v51 }
0x49e6   :  { %v8833_v26 = vpop.f32.mrb[98].mxu1 }
0x49e7   :  { %v8837_v11 = vmul.f32 0.35355338, %v8833_v26  ;;  %v15069_v10 = vpop.f32.mrb[99].mxu1  ;;  %v9060_v26 = vld [vmem:[%s18038_s15] sm:$0xff] }
0x49e8   :  { %v15501_v10 = vpack.c.bf16 %v9061_v44, %v9060_v26 }
0x49e9   :  { %v8838_v43 = vadd.f32 %v8837_v11, %v17252_v42  ;;  %v9062_v11 = vld [vmem:[%s18038_s15 + $0x10] sm:$0xff] }
0x49eb   :  { %v8839_v31 = vsel %vm223_vm6, %v8838_v43, -inf }
0x49ec   :  { %8840 = vmax.xlane.f32.xlu1 %v8839_v31 }
0x49f0   :  { %9009 = vadd.xlane.f32.xlu1 %v9008_v48  ;;  %v9151_v48 = vld [vmem:[%s18039_s16] sm:$0xff] }
0x4a79   :  { %v8841_v25 = vpop.xlane.xlu1 %8840 }
0x4a7a   :  { %v8842_v13 = vsub.f32 %v8838_v43, %v8841_v25  ;;  %v9063_v43 = vld [vmem:[%s18038_s15 + $0x18] sm:$0xff]  ;;  %v9152_v25 = vld [vmem:[%s18039_s16 + $0x8] sm:$0xff] }
0x4a7b   :  { %v15505_v31 = vpack.c.bf16 %v9063_v43, %v9062_v11  ;;  %v13978_v43 = vld [vmem:[%s18033_s10 + $0x28] sm:$0xff] }
0x4a7c   :  { %v8843_v30 = vmul.f32 1.442695, %v8842_v13  ;;  %v9153_v13 = vld [vmem:[%s18039_s16 + $0x10] sm:$0xff] }
0x4a7d   :  { %v9010_v32 = vpop.xlane.xlu1 %9009 }
0x4a7e   :  { %15769 = vpow2.f32 %v8843_v30  ;;  %v9014_v33 = vmul.f32 0.03125, %v9010_v32  ;;  %v15509_v30 = vpack.c.bf16 %v9152_v25, %v9151_v48  ;;  %v13980_v25 = vld [vmem:[%s18033_s10 + $0x38] sm:$0xff] }
0x4a80   :  { %v9016_v4 = vsub.f32 %v17320_v14, %v9014_v33  ;;  %15510 = vmatprep.subr.bf16.mxu1 %v15509_v30 }
0x4a82   :  { %v9018_v28 = vmul.f32 %v9016_v4, %v9016_v4  ;;  %v9032_v60 = vmul.f32 %v9031_v3, %v9016_v4 }
0x4a84   :  { %v9020_v17 = vsel %vm72_vm0, %v9018_v28, 0.0 }
0x4a88   :  { %v15770_v22 = vpop.eup %15769 }
0x4a89   :  { %v8845_v27 = vsel %vm223_vm6, %v15770_v22, 0.0 }
0x4a8a   :  { %8846 = vadd.xlane.f32.xlu0 %v8845_v27 }
0x4aa0   :  { %8850 = vrot.lane.b32.xlu0 %v17101_v59, %s18082_s29 }
0x4ab6   :  { %v8754_v46 = vpop.f32.mrb[104].mxu0 }
0x4ab7   :  { %v8758_v42 = vadd.f32 %v8754_v46, %v8515_v7  ;;  %v15064_v29 = vpop.f32.mrb[105].mxu0  ;;  %v9155_v46 = vld [vmem:[%s18039_s16 + $0x20] sm:$0xff] }
0x4b17   :  { %v8847_v23 = vpop.xlane.xlu0 %8846 }
0x4b18   :  { %15771 = vrcp.f32 %v8847_v23 }
0x4b1b   :  { %v8851_v37 = vpop.permute.xlu0 %8850 }
0x4b1c   :  { %15071 = vmatpush3.msra.mxu0 %v8851_v37 }
0x4b1d   :  { %15502 = vmatprep.subr.bf16.mxu0 %v15501_v10 }
0x4b22   :  { %v15772_v55 = vpop.eup %15771 }
0x4b23   :  { %v8849_v39 = vmul.f32 %v15772_v55, %v15770_v22  ;;  %v9154_v22 = vld [vmem:[%s18039_s16 + $0x18] sm:$0xff] }
0x4b24   :  { %v15513_v27 = vpack.c.bf16 %v9154_v22, %v9153_v13 }
0x4b25   :  { %15073 = vmatmul.mubr.msk.f32.vlgmr.msra.gmra.mrb[106].mxu0 %vm223_vm6, %v8849_v39 }
0x4b26   :  { %15504 = vmatpush3.bf16.msra.mxu0 %v15501_v10  ;;  %v13977_v10 = vld [vmem:[%s18033_s10 + $0x20] sm:$0xff] }
0x4b27   :  { %15506 = vmatprep.subr.bf16.mxu0 %v15505_v31  ;;  %v15525_v48 = vpack.c.bf16 %v13978_v43, %v13977_v10 }
0x4b2a   :  { %15508 = vmatpush3.bf16.msra.mxu0 %v15505_v31  ;;  %v13979_v31 = vld [vmem:[%s18033_s10 + $0x30] sm:$0xff] }
0x4b2b   :  { %v15529_v13 = vpack.c.bf16 %v13980_v25, %v13979_v31  ;;  %15526 = vmatprep.subr.bf16.mxu0 %v15525_v48 }
0x4bf8   :  { %v8922_v2 = vpop.f32.mrb[106].mxu0 }
0x4bf9   :  { %v15074_v58 = vpop.f32.mrb[107].mxu0  ;;  %15078 = vmatmul.mubr.msk.f32.vlgmr.msra.gmra.mrb[100].mxu1 %vm223_vm6, %v8922_v2 }
0x4bfa   :  { %15512 = vmatpush3.bf16.msra.mxu1 %v15509_v30 }
0x4bfb   :  { %15514 = vmatprep.subr.bf16.mxu1 %v15513_v27 }
0x4bfe   :  { %15516 = vmatpush3.bf16.msra.mxu1 %v15513_v27 }
0x4ccc   :  { %v8995_v62 = vpop.f32.mrb[100].mxu1 }
0x4ccd   :  { %v8999_v47 = vadd.f32 %v8995_v62, %v8758_v42  ;;  %v15079_v59 = vpop.f32.mrb[101].mxu1  ;;  %v9156_v42 = vld [vmem:[%s18039_s16 + $0x28] sm:$0xff] }
0x4cce   :  { %v15517_v29 = vpack.c.bf16 %v9156_v42, %v9155_v46 }
0x4ccf   :  { %v9005_v53 = vadd.f32 %v9003_v9, %v8999_v47 }
0x4cd0   :  { %15518 = vmatprep.subr.bf16.mxu1 %v15517_v29 }
0x4cd1   :  { %v17332_v54 = vadd.f32 %v9005_v53, %v17021_v20  ;;  %15520 = vmatpush3.bf16.msra.mxu1 %v15517_v29  ;;  %v9157_v53 = vld [vmem:[%s18039_s16 + $0x30] sm:$0xff] }
0x4cd3   :  { %v9011_v7 = vsel %vm72_vm0, %v17332_v54, 0.0 }
0x4cd4   :  { %9012 = vadd.xlane.f32.xlu1 %v9011_v7  ;;  %v9158_v7 = vld [vmem:[%s18039_s16 + $0x38] sm:$0xff] }
0x4cd5   :  { %v15521_v28 = vpack.c.bf16 %v9158_v7, %v9157_v53 }
0x4cd7   :  { %15522 = vmatprep.subr.bf16.mxu1 %v15521_v28 }
0x4cd8   :  { %9021 = vadd.xlane.f32.xlu1 %v9020_v17  ;;  %15524 = vmatpush3.bf16.msra.mxu1 %v15521_v28  ;;  %v9067_v17 = vrot.slane %v17097_v57, %v16059_v36 }
0x4cd9   :  { %15126 = vmatprep.subr.mxu1 %v15910_v51 }
0x4d61   :  { %v9013_v15 = vpop.xlane.xlu1 %9012 }
0x4d62   :  { %v9015_v6 = vmul.f32 0.03125, %v9013_v15 }
0x4d64   :  { %v9017_v50 = vsub.f32 %v17332_v54, %v9015_v6 }
0x4d65   :  { %v9022_v19 = vpop.xlane.xlu1 %9021 }
0x4d66   :  { %v9026_v0 = vmul.f32 0.032258064, %v9022_v19  ;;  %v9019_v18 = vmul.f32 %v9017_v50, %v9017_v50  ;;  %v9033_v62 = vmul.f32 %v9031_v3, %v9017_v50 }
0x4d68   :  { %15773 = vrsqrt.f32 %v9026_v0  ;;  %v9023_v61 = vsel %vm72_vm0, %v9019_v18, 0.0  ;;  %vm9036_vm7 = vcmp.eq.f32.partialorder %v9026_v0, inf  ;;  %v9039_v49 = vand.u32 2147483648, %v9026_v0 }
0x4d69   :  { %9024 = vadd.xlane.f32.xlu1 %v9023_v61  ;;  %vm9038_vm8 = vcmp.eq.f32.partialorder %v9026_v0, 0.0  ;;  %v9245_v61 = vrot.slane %v17097_v57, %v16069_v41 }
0x4d72   :  { %v15774_v20 = vpop.eup %15773 }
0x4d73   :  { %v9035_v38 = vmul.f32 %v15774_v20, %v9026_v0 }
0x4d75   :  { %v9037_v63 = vsel %vm9036_vm7, %v9026_v0, %v9035_v38 }
0x4d76   :  { %v9040_v45 = vsel %vm9038_vm8, %v9039_v49, %v9037_v63 }
0x4d77   :  { %v9048_v12 = vadd.f32 1e-06, %v9040_v45 }
0x4d79   :  { %15775 = vrcp.f32 %v9048_v12 }
0x4d83   :  { %v15776_v56 = vpop.eup %15775 }
0x4d84   :  { %v9051_v9 = vmul.f32 %v15776_v56, %v9032_v60 }
0x4d86   :  { %v9058_v8 = vadd.f32 %v9057_v5, %v9051_v9 }
0x4d88   :  { %15088 = vmatprep.mubr.msk.f32.mxu0 %vm72_vm0, %v9058_v8 }
0x4df6   :  { %v9025_v23 = vpop.xlane.xlu1 %9024 }
0x4df7   :  { %v9027_v37 = vmul.f32 0.032258064, %v9025_v23 }
0x4df9   :  { %15777 = vrsqrt.f32 %v9027_v37  ;;  %vm9043_vm9 = vcmp.eq.f32.partialorder %v9027_v37, inf  ;;  %v9046_v2 = vand.u32 2147483648, %v9027_v37  ;;  %vm9045_vm10 = vcmp.eq.f32.partialorder %v9027_v37, 0.0 }
0x4e03   :  { %v15778_v55 = vpop.eup %15777 }
0x4e04   :  { %v9042_v39 = vmul.f32 %v15778_v55, %v9027_v37 }
0x4e06   :  { %v9044_v58 = vsel %vm9043_vm9, %v9027_v37, %v9042_v39 }
0x4e07   :  { %v9047_v32 = vsel %vm9045_vm10, %v9046_v2, %v9044_v58 }
0x4e08   :  { %v9049_v33 = vadd.f32 1e-06, %v9047_v32 }
0x4e0a   :  { %15779 = vrcp.f32 %v9049_v33 }
0x4e14   :  { %v15780_v47 = vpop.eup %15779 }
0x4e15   :  { %v9053_v59 = vmul.f32 %v15780_v47, %v9033_v62  ;;  %v17420_v47 = vld [vmem:[%s18040_s17 + $0x10] sm:$0xff] }
0x4e16   :  { %v9300_v7 = vrot.slane %v17420_v47, %v16069_v41 }
0x4e17   :  { %v9059_v4 = vadd.f32 %v9057_v5, %v9053_v59 }
0x4e19   :  { %15089 = vmatmul.mubr.msk.f32.vlgmr.msra.gmra.mrb[108].mxu0 %vm72_vm0, %v9059_v4  ;;  %v9274_v4 = vrot.slane %v17420_v47, %v16059_v36 }
0x4e1a   :  { %15528 = vmatpush3.bf16.msra.mxu0 %v15525_v48 }
0x4e1b   :  { %15530 = vmatprep.subr.bf16.mxu0 %v15529_v13 }
0x4e1e   :  { %15532 = vmatpush3.bf16.msra.mxu0 %v15529_v13 }
0x4e1f   :  { %15121 = vmatprep.subr.mxu0 %v15910_v51 }
0x4eec   :  { %v15090_v15 = vpop.f32.mrb[108].mxu0 }
0x4eed   :  { %v9146_v6 = vadd.f32 %v15090_v15, %v9067_v17  ;;  %v9140_v50 = vpop.f32.mrb[109].mxu0 }
0x4eee   :  { %v9141_v19 = vadd.f32 %v9140_v50, %v9067_v17 }
0x4eef   :  { %v9150_v18 = vmax.f32 %v9146_v6, 0.0 }
0x4ef0   :  { %v9149_v0 = vmax.f32 %v9141_v19, 0.0 }
0x4ef2   :  { %15107 = vmatprep.mubr.msk.f32.mxu1 %vm2302_vm11, %v9149_v0 }
0x4ef3   :  { %15108 = vmatmul.mubr.msk.f32.vlgmr.msra.gmra.mrb[102].mxu1 %vm2302_vm11, %v9150_v18  ;;  %v9311_v18 = vrot.slane %v17420_v47, %v16082_v52 }
0x4ef4   :  { %15128 = vmatprep.mubr.msk.f32.mxu1 %vm15911_vm5, %v15910_v51 }
0x4fc6   :  { %v15109_v20 = vpop.f32.mrb[102].mxu1 }
0x4fc7   :  { %v9241_v38 = vadd.f32 %v15109_v20, %v17332_v54  ;;  %v9231_v49 = vpop.f32.mrb[103].mxu1 }
0x4fc8   :  { %v9240_v63 = vadd.f32 %v9231_v49, %v17320_v14 }
0x4fc9   :  { %v17392_v45 = vadd.f32 %v9245_v61, %v9241_v38 }
0x4fca   :  { %v17394_v12 = vadd.f32 %v9245_v61, %v9240_v63 }
0x4fcb   :  { %v9254_v3 = vsel %vm72_vm0, %v17392_v45, 0.0 }
0x4fcc   :  { %9255 = vadd.xlane.f32.xlu0 %v9254_v3  ;;  %v9251_v60 = vsel %vm72_vm0, %v17394_v12, 0.0 }
0x4fcd   :  { %9252 = vadd.xlane.f32.xlu1 %v9251_v60 }
0x5059   :  { %v9256_v5 = vpop.xlane.xlu0 %9255 }
0x505a   :  { %v9258_v57 = vmul.f32 0.03125, %v9256_v5  ;;  %v9253_v56 = vpop.xlane.xlu1 %9252 }
0x505b   :  { %v9257_v9 = vmul.f32 0.03125, %v9253_v56 }
0x505c   :  { %v9260_v54 = vsub.f32 %v17392_v45, %v9258_v57 }
0x505d   :  { %v9259_v14 = vsub.f32 %v17394_v12, %v9257_v9  ;;  %v17456_v9 = vld [vmem:[%s18086_s2] sm:$0xff] }
0x505e   :  { %v9262_v44 = vmul.f32 %v9260_v54, %v9260_v54  ;;  %v9276_v15 = vmul.f32 %v9274_v4, %v9260_v54 }
0x505f   :  { %v9261_v8 = vmul.f32 %v9259_v14, %v9259_v14  ;;  %v9275_v53 = vmul.f32 %v9274_v4, %v9259_v14 }
0x5060   :  { %v9266_v11 = vsel %vm72_vm0, %v9262_v44, 0.0 }
0x5061   :  { %v9263_v26 = vsel %vm72_vm0, %v9261_v8, 0.0 }
0x5062   :  { %9264 = vadd.xlane.f32.xlu1 %v9263_v26 }
0x5066   :  { %9267 = vadd.xlane.f32.xlu1 %v9266_v11 }
0x50ef   :  { %v9265_v30 = vpop.xlane.xlu1 %9264 }
0x50f0   :  { %v9269_v22 = vmul.f32 0.032258064, %v9265_v30 }
0x50f2   :  { %15781 = vrsqrt.f32 %v9269_v22  ;;  %vm9279_vm12 = vcmp.eq.f32.partialorder %v9269_v22, inf  ;;  %v9282_v23 = vand.u32 2147483648, %v9269_v22  ;;  %vm9281_vm13 = vcmp.eq.f32.partialorder %v9269_v22, 0.0 }
0x50f3   :  { %v9268_v27 = vpop.xlane.xlu1 %9267 }
0x50f4   :  { %v9270_v46 = vmul.f32 0.032258064, %v9268_v27 }
0x50f6   :  { %15783 = vrsqrt.f32 %v9270_v46  ;;  %vm9286_vm14 = vcmp.eq.f32.partialorder %v9270_v46, inf  ;;  %v9289_v32 = vand.u32 2147483648, %v9270_v46  ;;  %vm9288_vm15 = vcmp.eq.f32.partialorder %v9270_v46, 0.0 }
0x50fc   :  { %v15782_v42 = vpop.eup %15781 }
0x50fd   :  { %v9278_v29 = vmul.f32 %v15782_v42, %v9269_v22 }
0x50ff   :  { %v9280_v37 = vsel %vm9279_vm12, %v9269_v22, %v9278_v29 }
0x5100   :  { %v15784_v55 = vpop.eup %15783  ;;  %v9283_v39 = vsel %vm9281_vm13, %v9282_v23, %v9280_v37  ;;  %v17476_v23 = vld [vmem:[%s18034_s11 + $0x28] sm:$0xff] }
0x5101   :  { %v9285_v2 = vmul.f32 %v15784_v55, %v9270_v46  ;;  %v9291_v58 = vadd.f32 1e-06, %v9283_v39 }
0x5103   :  { %v9287_v33 = vsel %vm9286_vm14, %v9270_v46, %v9285_v2  ;;  %15785 = vrcp.f32 %v9291_v58 }
0x5104   :  { %v9290_v62 = vsel %vm9288_vm15, %v9289_v32, %v9287_v33 }
0x5105   :  { %v9292_v59 = vadd.f32 1e-06, %v9290_v62  ;;  %v17490_v62 = vld [vmem:[%s18034_s11 + $0x20] sm:$0xff] }
0x5107   :  { %15787 = vrcp.f32 %v9292_v59 }
0x510d   :  { %v15786_v28 = vpop.eup %15785 }
0x510e   :  { %v9294_v17 = vmul.f32 %v15786_v28, %v9275_v53 }
0x5110   :  { %v9301_v6 = vadd.f32 %v9300_v7, %v9294_v17 }
0x5111   :  { %v15788_v50 = vpop.eup %15787 }
0x5112   :  { %v9296_v19 = vmul.f32 %v15788_v50, %v9276_v15  ;;  %15118 = vmatprep.mubr.msk.f32.mxu0 %vm72_vm0, %v9301_v6 }
0x5114   :  { %v9302_v0 = vadd.f32 %v9300_v7, %v9296_v19 }
0x5116   :  { %15119 = vmatmul.mubr.msk.f32.vlgmr.msra.gmra.mrb[110].mxu0 %vm72_vm0, %v9302_v0 }
0x5117   :  { %15123 = vmatprep.mubr.msk.f32.mxu0 %vm15911_vm5, %v15910_v51 }
0x51e9   :  { %v15120_v61 = vpop.f32.mrb[110].mxu0 }
0x51ea   :  { %v17432_v20 = vadd.f32 %v15120_v61, %v9311_v18  ;;  %v9384_v38 = vpop.f32.mrb[111].mxu0 }
0x51eb   :  { %v17434_v49 = vadd.f32 %v9384_v38, %v9311_v18 }
0x51ed   :  { %9399 = vrot.lane.b32.xlu1 %v17434_v49, %s18085_s8 }
0x51f1   :  { %9566 = vrot.lane.b32.xlu1 %v17434_v49, %s18077_s26 }
0x51f5   :  { %9564 = vrot.lane.b32.xlu1 %v17434_v49, %s18089_s6 }
0x525f   :  { %v9400_v63 = vpop.permute.xlu1 %9399 }
0x5260   :  { %15122 = vmatpush3.xpose.msk.msra.mxu0 %vm223_vm6, %v9400_v63 }
0x5261   :  { %15131 = vmatprep.subr.mxu0 %v15910_v51 }
0x5263   :  { %15124 = vmatmul.mubr.msk.f32.vlgmr.msra.gmra.mrb[112].mxu0 %vm223_vm6, %v17434_v49  ;;  %v9567_v3 = vpop.permute.xlu1 %9566 }
0x5264   :  { %15132 = vmatpush3.xpose.msk.msra.mxu0 %vm223_vm6, %v9567_v3  ;;  %15133 = vmatprep.mubr.msk.f32.mxu0 %vm15911_vm5, %v15910_v51 }
0x5265   :  { %15141 = vmatprep.subr.mxu0 %v15910_v51 }
0x5267   :  { %v9565_v60 = vpop.permute.xlu1 %9564 }
0x5268   :  { %15134 = vmatmul.mubr.msk.f32.vlgmr.msra.gmra.mrb[114].mxu0 %vm223_vm6, %v9565_v60 }
0x5269   :  { %15143 = vmatprep.mubr.msk.f32.mxu0 %vm15911_vm5, %v15910_v51  ;;  %15142 = vmatpush3.msra.mxu0 %v17476_v23 }
0x526a   :  { %15151 = vmatprep.subr.mxu0 %v15910_v51 }
0x5336   :  { %v9471_v5 = vpop.f32.mrb[112].mxu0 }
0x5337   :  { %v9475_v57 = vmul.f32 0.35355338, %v9471_v5  ;;  %v15125_v56 = vpop.f32.mrb[113].mxu0 }
0x5339   :  { %v9476_v54 = vadd.f32 %v17456_v9, %v9475_v57 }
0x533b   :  { %v9638_v14 = vpop.f32.mrb[114].mxu0  ;;  %v9477_v8 = vsel %vm223_vm6, %v9476_v54, -inf }
0x533c   :  { %v9642_v26 = vmul.f32 0.35355338, %v9638_v14  ;;  %9478 = vmax.xlane.f32.xlu0 %v9477_v8  ;;  %v15135_v44 = vpop.f32.mrb[115].mxu0 }
0x533e   :  { %v9643_v11 = vadd.f32 %v17456_v9, %v9642_v26 }
0x5340   :  { %v9644_v10 = vsel %vm223_vm6, %v9643_v11, -inf }
0x5341   :  { %9645 = vmax.xlane.f32.xlu1 %v9644_v10 }
0x5352   :  { %9488 = vrot.lane.b32.xlu0 %v17434_v49, %s18088_s27  ;;  %9877 = vrot.lane.b32.xlu1 %v17434_v49, %s18079_s1 }
0x53c9   :  { %v9479_v43 = vpop.xlane.xlu0 %9478 }
0x53ca   :  { %v9480_v31 = vsub.f32 %v9476_v54, %v9479_v43  ;;  %v17526_v43 = vld [vmem:[%s18034_s11 + $0x30] sm:$0xff] }
0x53cc   :  { %v9481_v48 = vmul.f32 1.442695, %v9480_v31 }
0x53cd   :  { %v9489_v25 = vpop.permute.xlu0 %9488 }
0x53ce   :  { %15789 = vpow2.f32 %v9481_v48  ;;  %15127 = vmatpush3.msra.mxu1 %v9489_v25  ;;  %v9646_v13 = vpop.xlane.xlu1 %9645 }
0x53cf   :  { %v9647_v30 = vsub.f32 %v9643_v11, %v9646_v13  ;;  %15136 = vmatprep.subr.mxu1 %v15910_v51 }
0x53d1   :  { %v9648_v22 = vmul.f32 1.442695, %v9647_v30 }
0x53d2   :  { %v9878_v17 = vpop.permute.xlu1 %9877 }
0x53d3   :  { %15791 = vpow2.f32 %v9648_v22 }
0x53d8   :  { %v15790_v27 = vpop.eup %15789 }
0x53d9   :  { %v9483_v46 = vsel %vm223_vm6, %v15790_v27, 0.0 }
0x53da   :  { %9484 = vadd.xlane.f32.xlu0 %v9483_v46 }
0x53dd   :  { %v15792_v42 = vpop.eup %15791 }
0x53de   :  { %v9650_v29 = vsel %vm223_vm6, %v15792_v42, 0.0 }
0x53df   :  { %9651 = vadd.xlane.f32.xlu0 %v9650_v29 }
0x53f5   :  { %9655 = vrot.lane.b32.xlu0 %v17434_v49, %s18087_s25 }
0x53f9   :  { %9879 = vrot.lane.b32.xlu0 %v17434_v49, %s18078_s21 }
0x5467   :  { %v9485_v37 = vpop.xlane.xlu0 %9484 }
0x5468   :  { %15793 = vrcp.f32 %v9485_v37 }
0x546c   :  { %v9652_v55 = vpop.xlane.xlu0 %9651 }
0x546d   :  { %15795 = vrcp.f32 %v9652_v55 }
0x5470   :  { %v9656_v58 = vpop.permute.xlu0 %9655 }
0x5472   :  { %v15794_v39 = vpop.eup %15793 }
0x5473   :  { %v9487_v2 = vmul.f32 %v15794_v39, %v15790_v27 }
0x5474   :  { %v9880_v7 = vpop.permute.xlu0 %9879 }
0x5475   :  { %15129 = vmatmul.mubr.msk.f32.vlgmr.msra.gmra.mrb[104].mxu1 %vm223_vm6, %v9487_v2 }
0x5476   :  { %15137 = vmatpush3.msra.mxu1 %v9656_v58  ;;  %15138 = vmatprep.mubr.msk.f32.mxu1 %vm15911_vm5, %v15910_v51 }
0x5477   :  { %v15796_v32 = vpop.eup %15795  ;;  %15146 = vmatprep.subr.mxu1 %v15910_v51 }
0x5478   :  { %v9654_v33 = vmul.f32 %v15796_v32, %v15792_v42 }
0x547a   :  { %15139 = vmatmul.mubr.msk.f32.vlgmr.msra.gmra.mrb[106].mxu1 %vm223_vm6, %v9654_v33 }
0x547b   :  { %15148 = vmatprep.mubr.msk.f32.mxu1 %vm15911_vm5, %v15910_v51  ;;  %15147 = vmatpush3.msra.mxu1 %v17490_v62 }
0x547c   :  { %15156 = vmatprep.subr.mxu1 %v15910_v51 }
0x5548   :  { %v9560_v59 = vpop.f32.mrb[104].mxu1 }
0x5549   :  { %v15130_v4 = vpop.f32.mrb[105].mxu1  ;;  %15149 = vmatmul.mubr.msk.f32.vlgmr.msra.gmra.mrb[108].mxu1 %vm223_vm6, %v9560_v59 }
0x554a   :  { %15158 = vmatprep.mubr.msk.f32.mxu1 %vm15911_vm5, %v15910_v51 }
0x554d   :  { %v9727_v53 = vpop.f32.mrb[106].mxu1 }
0x554e   :  { %v15140_v28 = vpop.f32.mrb[107].mxu1  ;;  %15144 = vmatmul.mubr.msk.f32.vlgmr.msra.gmra.mrb[116].mxu0 %vm223_vm6, %v9727_v53 }
0x554f   :  { %15152 = vmatpush3.xpose.msk.msra.mxu0 %vm223_vm6, %v9880_v7  ;;  %15153 = vmatprep.mubr.msk.f32.mxu0 %vm15911_vm5, %v15910_v51  ;;  %v17566_v7 = vld [vmem:[%s18034_s11 + $0x38] sm:$0xff] }
0x5550   :  { %15161 = vmatprep.subr.mxu0 %v15910_v51 }
0x5552   :  { %15154 = vmatmul.mubr.msk.f32.vlgmr.msra.gmra.mrb[118].mxu0 %vm223_vm6, %v9878_v17 }
0x5553   :  { %15163 = vmatprep.mubr.msk.f32.mxu0 %vm15911_vm5, %v15910_v51  ;;  %15162 = vmatpush3.msra.mxu0 %v17526_v43 }
0x5554   :  { %15171 = vmatprep.subr.mxu0 %v15910_v51 }
0x561c   :  { %v9873_v15 = vpop.f32.mrb[108].mxu1 }
0x561d   :  { %v15150_v6 = vpop.f32.mrb[109].mxu1 }
0x5621   :  { %v9800_v50 = vpop.f32.mrb[116].mxu0 }
0x5622   :  { %v9874_v19 = vadd.f32 %v9873_v15, %v9800_v50  ;;  %v15145_v0 = vpop.f32.mrb[117].mxu0  ;;  %v17576_v50 = vld [vmem:[%s18086_s2 + $0x8] sm:$0xff] }
0x5625   :  { %v9951_v18 = vpop.f32.mrb[118].mxu0 }
0x5626   :  { %v9955_v61 = vmul.f32 0.35355338, %v9951_v18  ;;  %v15155_v38 = vpop.f32.mrb[119].mxu0 }
0x5628   :  { %v9956_v63 = vadd.f32 %v17456_v9, %v9955_v61 }
0x562a   :  { %v9957_v3 = vsel %vm223_vm6, %v9956_v63, -inf }
0x562b   :  { %9958 = vmax.xlane.f32.xlu0 %v9957_v3 }
0x5641   :  { %9968 = vrot.lane.b32.xlu0 %v17434_v49, %s18080_s5 }
0x5645   :  { %10118 = vrot.lane.b32.xlu0 %v17434_v49, %s18081_s3 }
0x56b8   :  { %v9959_v60 = vpop.xlane.xlu0 %9958 }
0x56b9   :  { %v9960_v5 = vsub.f32 %v9956_v63, %v9959_v60 }
0x56bb   :  { %v9961_v57 = vmul.f32 1.442695, %v9960_v5 }
0x56bc   :  { %v9969_v56 = vpop.permute.xlu0 %9968 }
0x56bd   :  { %15797 = vpow2.f32 %v9961_v57  ;;  %15157 = vmatpush3.msra.mxu1 %v9969_v56 }
0x56be   :  { %15166 = vmatprep.subr.mxu1 %v15910_v51 }
0x56c0   :  { %v10119_v10 = vpop.permute.xlu0 %10118 }
0x56c7   :  { %v15798_v54 = vpop.eup %15797 }
0x56c8   :  { %v9963_v14 = vsel %vm223_vm6, %v15798_v54, 0.0 }
0x56c9   :  { %9964 = vadd.xlane.f32.xlu1 %v9963_v14 }
0x56da   :  { %10120 = vrot.lane.b32.xlu1 %v17434_v49, %s18082_s29 }
0x5756   :  { %v9965_v8 = vpop.xlane.xlu1 %9964 }
0x5757   :  { %15799 = vrcp.f32 %v9965_v8 }
0x575a   :  { %v10121_v11 = vpop.permute.xlu1 %10120 }
0x5761   :  { %v15800_v26 = vpop.eup %15799 }
0x5762   :  { %v9967_v44 = vmul.f32 %v15800_v26, %v15798_v54 }
0x5764   :  { %15159 = vmatmul.mubr.msk.f32.vlgmr.msra.gmra.mrb[110].mxu1 %vm223_vm6, %v9967_v44 }
0x5765   :  { %15167 = vmatpush3.xpose.msk.msra.mxu1 %vm223_vm6, %v10121_v11  ;;  %15168 = vmatprep.mubr.msk.f32.mxu1 %vm15911_vm5, %v15910_v51 }
0x5766   :  { %15176 = vmatprep.subr.mxu1 %v15910_v51 }
0x5768   :  { %15169 = vmatmul.mubr.msk.f32.vlgmr.msra.gmra.mrb[112].mxu1 %vm223_vm6, %v10119_v10 }
0x5769   :  { %15178 = vmatprep.mubr.msk.f32.mxu1 %vm15911_vm5, %v15910_v51  ;;  %15177 = vmatpush3.msra.mxu1 %v17566_v7 }
0x576a   :  { %15186 = vmatprep.subr.mxu1 %v15910_v51 }
0x5837   :  { %v10040_v31 = vpop.f32.mrb[110].mxu1 }
0x5838   :  { %v15160_v48 = vpop.f32.mrb[111].mxu1  ;;  %15164 = vmatmul.mubr.msk.f32.vlgmr.msra.gmra.mrb[120].mxu0 %vm223_vm6, %v10040_v31 }
0x5839   :  { %15173 = vmatprep.mubr.msk.f32.mxu0 %vm15911_vm5, %v15910_v51 }
0x583b   :  { %v10192_v25 = vpop.f32.mrb[112].mxu1 }
0x583c   :  { %v10196_v13 = vmul.f32 0.35355338, %v10192_v25  ;;  %v15170_v30 = vpop.f32.mrb[113].mxu1 }
0x583e   :  { %v10197_v22 = vadd.f32 %v17456_v9, %v10196_v13 }
0x5840   :  { %v10198_v27 = vsel %vm223_vm6, %v10197_v22, -inf }
0x5841   :  { %10199 = vmax.xlane.f32.xlu0 %v10198_v27 }
0x5857   :  { %10209 = vrot.lane.b32.xlu0 %v17434_v49, %s18083_s28 }
0x585b   :  { %10527 = vrot.lane.b32.xlu0 %v17432_v20, %s18077_s26 }
0x585f   :  { %10525 = vrot.lane.b32.xlu0 %v17432_v20, %s18089_s6 }
0x58ce   :  { %v10200_v46 = vpop.xlane.xlu0 %10199 }
0x58cf   :  { %v10201_v42 = vsub.f32 %v10197_v22, %v10200_v46 }
0x58d1   :  { %v10202_v29 = vmul.f32 1.442695, %v10201_v42 }
0x58d2   :  { %v10210_v37 = vpop.permute.xlu0 %10209 }
0x58d3   :  { %15801 = vpow2.f32 %v10202_v29  ;;  %15172 = vmatpush3.msra.mxu0 %v10210_v37 }
0x58d4   :  { %15181 = vmatprep.subr.mxu0 %v15910_v51 }
0x58d6   :  { %v10528_v4 = vpop.permute.xlu0 %10527 }
0x58da   :  { %v10526_v53 = vpop.permute.xlu0 %10525 }
0x58dd   :  { %v15802_v9 = vpop.eup %15801 }
0x58de   :  { %v10204_v55 = vsel %vm223_vm6, %v15802_v9, 0.0 }
0x58df   :  { %10205 = vadd.xlane.f32.xlu1 %v10204_v55 }
0x58f0   :  { %10360 = vrot.lane.b32.xlu1 %v17432_v20, %s18085_s8 }
0x590b   :  { %v10113_v49 = vpop.f32.mrb[120].mxu0 }
0x590c   :  { %v17545_v39 = vadd.f32 %v10113_v49, %v9874_v19  ;;  %v15165_v2 = vpop.f32.mrb[121].mxu0 }
0x596c   :  { %v10206_v58 = vpop.xlane.xlu1 %10205 }
0x596d   :  { %15803 = vrcp.f32 %v10206_v58 }
0x5970   :  { %v10361_v59 = vpop.permute.xlu1 %10360 }
0x5977   :  { %v15804_v32 = vpop.eup %15803 }
0x5978   :  { %v10208_v33 = vmul.f32 %v15804_v32, %v15802_v9 }
0x597a   :  { %15174 = vmatmul.mubr.msk.f32.vlgmr.msra.gmra.mrb[122].mxu0 %vm223_vm6, %v10208_v33 }
0x597b   :  { %15182 = vmatpush3.xpose.msk.msra.mxu0 %vm223_vm6, %v10361_v59  ;;  %15183 = vmatprep.mubr.msk.f32.mxu0 %vm15911_vm5, %v15910_v51 }
0x597c   :  { %15191 = vmatprep.subr.mxu0 %v15910_v51 }
0x597e   :  { %15184 = vmatmul.mubr.msk.f32.vlgmr.msra.gmra.mrb[124].mxu0 %vm223_vm6, %v17432_v20 }
0x597f   :  { %15192 = vmatpush3.xpose.msk.msra.mxu0 %vm223_vm6, %v10528_v4  ;;  %15193 = vmatprep.mubr.msk.f32.mxu0 %vm15911_vm5, %v15910_v51 }
0x5980   :  { %15201 = vmatprep.subr.mxu0 %v15910_v51 }
0x5982   :  { %15194 = vmatmul.mubr.msk.f32.vlgmr.msra.gmra.mrb[126].mxu0 %vm223_vm6, %v10526_v53 }
0x5983   :  { %15202 = vmatpush3.msra.mxu0 %v17476_v23  ;;  %15203 = vmatprep.mubr.msk.f32.mxu0 %vm15911_vm5, %v15910_v51 }
0x5984   :  { %15211 = vmatprep.subr.mxu0 %v15910_v51 }
0x5a4d   :  { %v10281_v28 = vpop.f32.mrb[122].mxu0 }
0x5a4e   :  { %v15175_v17 = vpop.f32.mrb[123].mxu0  ;;  %15179 = vmatmul.mubr.msk.f32.vlgmr.msra.gmra.mrb[114].mxu1 %vm223_vm6, %v10281_v28 }
0x5a4f   :  { %15188 = vmatprep.mubr.msk.f32.mxu1 %vm15911_vm5, %v15910_v51 }
0x5a51   :  { %v10432_v23 = vpop.f32.mrb[124].mxu0 }
0x5a52   :  { %v10436_v15 = vmul.f32 0.35355338, %v10432_v23  ;;  %v15185_v6 = vpop.f32.mrb[125].mxu0 }
0x5a54   :  { %v10437_v19 = vadd.f32 %v17576_v50, %v10436_v15 }
0x5a55   :  { %v10599_v0 = vpop.f32.mrb[126].mxu0 }
0x5a56   :  { %v10603_v18 = vmul.f32 0.35355338, %v10599_v0  ;;  %v15195_v61 = vpop.f32.mrb[127].mxu0  ;;  %v10438_v38 = vsel %vm223_vm6, %v10437_v19, -inf }
0x5a57   :  { %10439 = vmax.xlane.f32.xlu0 %v10438_v38 }
0x5a58   :  { %v10604_v63 = vadd.f32 %v17576_v50, %v10603_v18 }
0x5a5a   :  { %v10605_v3 = vsel %vm223_vm6, %v10604_v63, -inf }
0x5a5b   :  { %10606 = vmax.xlane.f32.xlu1 %v10605_v3 }
0x5a6c   :  { %10449 = vrot.lane.b32.xlu1 %v17432_v20, %s18088_s27 }
0x5a70   :  { %10840 = vrot.lane.b32.xlu1 %v17432_v20, %s18078_s21 }
0x5a74   :  { %10838 = vrot.lane.b32.xlu1 %v17432_v20, %s18079_s1 }
0x5ae4   :  { %v10440_v60 = vpop.xlane.xlu0 %10439 }
0x5ae5   :  { %v10441_v5 = vsub.f32 %v10437_v19, %v10440_v60 }
0x5ae7   :  { %v10442_v57 = vmul.f32 1.442695, %v10441_v5 }
0x5ae8   :  { %v10607_v56 = vpop.xlane.xlu1 %10606 }
0x5ae9   :  { %15805 = vpow2.f32 %v10442_v57  ;;  %v10608_v54 = vsub.f32 %v10604_v63, %v10607_v56  ;;  %v11323_v57 = vrot.slane %v17420_v47, %v16292_v40 }
0x5aeb   :  { %v10609_v14 = vmul.f32 1.442695, %v10608_v54 }
0x5aec   :  { %v10450_v8 = vpop.permute.xlu1 %10449 }
0x5aed   :  { %15807 = vpow2.f32 %v10609_v14  ;;  %15187 = vmatpush3.msra.mxu1 %v10450_v8 }
0x5aee   :  { %15196 = vmatprep.subr.mxu1 %v15910_v51 }
0x5af0   :  { %v10841_v55 = vpop.permute.xlu1 %10840 }
0x5af3   :  { %v15806_v26 = vpop.eup %15805 }
0x5af4   :  { %v10444_v44 = vsel %vm223_vm6, %v15806_v26, 0.0 }
0x5af5   :  { %10445 = vadd.xlane.f32.xlu0 %v10444_v44 }
0x5af7   :  { %v15808_v11 = vpop.eup %15807 }
0x5af8   :  { %v10611_v10 = vsel %vm223_vm6, %v15808_v11, 0.0 }
0x5af9   :  { %10612 = vadd.xlane.f32.xlu0 %v10611_v10 }
0x5b0f   :  { %10616 = vrot.lane.b32.xlu0 %v17432_v20, %s18087_s25 }
0x5b21   :  { %v10354_v31 = vpop.f32.mrb[114].mxu1 }
0x5b22   :  { %v17594_v48 = vadd.f32 %v10354_v31, %v17545_v39  ;;  %v15180_v25 = vpop.f32.mrb[115].mxu1 }
0x5b24   :  { %v11324_v14 = vadd.f32 %v11323_v57, %v17594_v48 }
0x5b26   :  { %v17645_v44 = vadd.f32 %v11324_v14, %v17394_v12 }
0x5b28   :  { %v11328_v10 = vsel %vm72_vm0, %v17645_v44, 0.0 }
0x5b82   :  { %v10446_v13 = vpop.xlane.xlu0 %10445 }
0x5b83   :  { %15809 = vrcp.f32 %v10446_v13 }
0x5b86   :  { %v10613_v30 = vpop.xlane.xlu0 %10612 }
0x5b87   :  { %15811 = vrcp.f32 %v10613_v30 }
0x5b8a   :  { %v10617_v46 = vpop.permute.xlu0 %10616 }
0x5b8d   :  { %v15810_v22 = vpop.eup %15809 }
0x5b8e   :  { %v10448_v27 = vmul.f32 %v15810_v22, %v15806_v26 }
0x5b90   :  { %15189 = vmatmul.mubr.msk.f32.vlgmr.msra.gmra.mrb[116].mxu1 %vm223_vm6, %v10448_v27 }
0x5b91   :  { %v15812_v42 = vpop.eup %15811  ;;  %15197 = vmatpush3.msra.mxu1 %v10617_v46  ;;  %15198 = vmatprep.mubr.msk.f32.mxu1 %vm15911_vm5, %v15910_v51 }
0x5b92   :  { %v10615_v29 = vmul.f32 %v15812_v42, %v15808_v11  ;;  %15206 = vmatprep.subr.mxu1 %v15910_v51 }
0x5b94   :  { %15199 = vmatmul.mubr.msk.f32.vlgmr.msra.gmra.mrb[118].mxu1 %vm223_vm6, %v10615_v29 }
0x5b95   :  { %15207 = vmatpush3.msra.mxu1 %v17490_v62  ;;  %15208 = vmatprep.mubr.msk.f32.mxu1 %vm15911_vm5, %v15910_v51  ;;  %v10839_v62 = vpop.permute.xlu1 %10838 }
0x5b96   :  { %15216 = vmatprep.subr.mxu1 %v15910_v51 }
0x5c63   :  { %v10521_v37 = vpop.f32.mrb[116].mxu1 }
0x5c64   :  { %v15190_v9 = vpop.f32.mrb[117].mxu1  ;;  %15209 = vmatmul.mubr.msk.f32.vlgmr.msra.gmra.mrb[120].mxu1 %vm223_vm6, %v10521_v37  ;;  %v14025_v37 = vld [vmem:[%s18036_s13 + $0x20] sm:$0xff] }
0x5c65   :  { %15218 = vmatprep.mubr.msk.f32.mxu1 %vm15911_vm5, %v15910_v51  ;;  %v14026_v9 = vld [vmem:[%s18036_s13 + $0x28] sm:$0xff] }
0x5c67   :  { %v10688_v49 = vpop.f32.mrb[118].mxu1 }
0x5c68   :  { %v15200_v39 = vpop.f32.mrb[119].mxu1  ;;  %15204 = vmatmul.mubr.msk.f32.vlgmr.msra.gmra.mrb[128].mxu0 %vm223_vm6, %v10688_v49  ;;  %v14028_v49 = vld [vmem:[%s18036_s13 + $0x38] sm:$0xff] }
0x5c69   :  { %15212 = vmatpush3.xpose.msk.msra.mxu0 %vm223_vm6, %v10841_v55  ;;  %15213 = vmatprep.mubr.msk.f32.mxu0 %vm15911_vm5, %v15910_v51  ;;  %v14027_v55 = vld [vmem:[%s18036_s13 + $0x30] sm:$0xff] }
0x5c6a   :  { %15221 = vmatprep.subr.mxu0 %v15910_v51  ;;  %v15545_v39 = vpack.c.bf16 %v14028_v49, %v14027_v55 }
0x5c6c   :  { %15214 = vmatmul.mubr.msk.f32.vlgmr.msra.gmra.mrb[130].mxu0 %vm223_vm6, %v10839_v62 }
0x5c6d   :  { %15222 = vmatpush3.msra.mxu0 %v17526_v43  ;;  %15223 = vmatprep.mubr.msk.f32.mxu0 %vm15911_vm5, %v15910_v51 }
0x5c6e   :  { %15231 = vmatprep.subr.mxu0 %v15910_v51 }
0x5d37   :  { %v10834_v2 = vpop.f32.mrb[120].mxu1 }
0x5d38   :  { %v15210_v58 = vpop.f32.mrb[121].mxu1 }
0x5d3b   :  { %v10761_v32 = vpop.f32.mrb[128].mxu0 }
0x5d3c   :  { %v10835_v33 = vadd.f32 %v10834_v2, %v10761_v32  ;;  %v15205_v59 = vpop.f32.mrb[129].mxu0 }
0x5d3f   :  { %v10912_v4 = vpop.f32.mrb[130].mxu0 }
0x5d40   :  { %v10916_v53 = vmul.f32 0.35355338, %v10912_v4  ;;  %v15215_v28 = vpop.f32.mrb[131].mxu0 }
0x5d42   :  { %v10917_v17 = vadd.f32 %v17576_v50, %v10916_v53  ;;  %v17677_v53 = vld [vmem:[%s18040_s17 + $0x18] sm:$0xff] }
0x5d44   :  { %v10918_v23 = vsel %vm223_vm6, %v10917_v17, -inf }
0x5d45   :  { %10919 = vmax.xlane.f32.xlu0 %v10918_v23 }
0x5d5b   :  { %10929 = vrot.lane.b32.xlu0 %v17432_v20, %s18080_s5 }
0x5d5f   :  { %11079 = vrot.lane.b32.xlu0 %v17432_v20, %s18081_s3 }
0x5dd2   :  { %v10920_v43 = vpop.xlane.xlu0 %10919 }
0x5dd3   :  { %v10921_v15 = vsub.f32 %v10917_v17, %v10920_v43 }
0x5dd5   :  { %v10922_v6 = vmul.f32 1.442695, %v10921_v15 }
0x5dd6   :  { %v10930_v19 = vpop.permute.xlu0 %10929 }
0x5dd7   :  { %15813 = vpow2.f32 %v10922_v6  ;;  %15217 = vmatpush3.msra.mxu1 %v10930_v19 }
0x5dd8   :  { %15226 = vmatprep.subr.mxu1 %v15910_v51 }
0x5dda   :  { %v11080_v60 = vpop.permute.xlu0 %11079 }
0x5de1   :  { %v15814_v0 = vpop.eup %15813 }
0x5de2   :  { %v10924_v18 = vsel %vm223_vm6, %v15814_v0, 0.0 }
0x5de3   :  { %10925 = vadd.xlane.f32.xlu1 %v10924_v18 }
0x5df4   :  { %11081 = vrot.lane.b32.xlu1 %v17432_v20, %s18082_s29 }
0x5e70   :  { %v10926_v61 = vpop.xlane.xlu1 %10925 }
0x5e71   :  { %15815 = vrcp.f32 %v10926_v61 }
0x5e74   :  { %v11082_v3 = vpop.permute.xlu1 %11081 }
0x5e7b   :  { %v15816_v38 = vpop.eup %15815 }
0x5e7c   :  { %v10928_v63 = vmul.f32 %v15816_v38, %v15814_v0 }
0x5e7e   :  { %15219 = vmatmul.mubr.msk.f32.vlgmr.msra.gmra.mrb[122].mxu1 %vm223_vm6, %v10928_v63 }
0x5e7f   :  { %15227 = vmatpush3.xpose.msk.msra.mxu1 %vm223_vm6, %v11082_v3  ;;  %15228 = vmatprep.mubr.msk.f32.mxu1 %vm15911_vm5, %v15910_v51 }
0x5e80   :  { %15236 = vmatprep.subr.mxu1 %v15910_v51 }
0x5e82   :  { %15229 = vmatmul.mubr.msk.f32.vlgmr.msra.gmra.mrb[124].mxu1 %vm223_vm6, %v11080_v60 }
0x5e83   :  { %15237 = vmatpush3.msra.mxu1 %v17566_v7  ;;  %15238 = vmatprep.mubr.msk.f32.mxu1 %vm15911_vm5, %v15910_v51 }
0x5f51   :  { %v11001_v5 = vpop.f32.mrb[122].mxu1 }
0x5f52   :  { %v15220_v56 = vpop.f32.mrb[123].mxu1  ;;  %15224 = vmatmul.mubr.msk.f32.vlgmr.msra.gmra.mrb[132].mxu0 %vm223_vm6, %v11001_v5 }
0x5f53   :  { %15233 = vmatprep.mubr.msk.f32.mxu0 %vm15911_vm5, %v15910_v51 }
0x5f55   :  { %v11153_v54 = vpop.f32.mrb[124].mxu1 }
0x5f56   :  { %v11157_v8 = vmul.f32 0.35355338, %v11153_v54  ;;  %v15230_v26 = vpop.f32.mrb[125].mxu1 }
0x5f57   :  { %v11351_v26 = vrot.slane %v17420_v47, %v16327_v34  ;;  %v14021_v34 = vld [vmem:[%s18035_s12 + $0x30] sm:$0xff] }
0x5f58   :  { %v11158_v7 = vadd.f32 %v17576_v50, %v11157_v8 }
0x5f5a   :  { %v11159_v11 = vsel %vm223_vm6, %v11158_v7, -inf }
0x5f5b   :  { %11160 = vmax.xlane.f32.xlu1 %v11159_v11  ;;  %v11377_v11 = vrot.slane %v17420_v47, %v16371_v16  ;;  %v14022_v16 = vld [vmem:[%s18035_s12 + $0x38] sm:$0xff] }
0x5f5f   :  { %11329 = vadd.xlane.f32.xlu1 %v11328_v10 }
0x5fe8   :  { %v11161_v31 = vpop.xlane.xlu1 %11160 }
0x5fe9   :  { %v11162_v25 = vsub.f32 %v11158_v7, %v11161_v31 }
0x5feb   :  { %v11163_v13 = vmul.f32 1.442695, %v11162_v25 }
0x5fec   :  { %v11330_v58 = vpop.xlane.xlu1 %11329 }
0x5fed   :  { %15817 = vpow2.f32 %v11163_v13  ;;  %v11334_v32 = vmul.f32 0.03125, %v11330_v58  ;;  %v14019_v13 = vld [vmem:[%s18035_s12 + $0x20] sm:$0xff] }
0x5ff7   :  { %v15818_v30 = vpop.eup %15817 }
0x5ff8   :  { %v11165_v48 = vsel %vm223_vm6, %v15818_v30, 0.0 }
0x5ff9   :  { %11166 = vadd.xlane.f32.xlu0 %v11165_v48 }
0x600f   :  { %11170 = vrot.lane.b32.xlu0 %v17432_v20, %s18083_s28  ;;  %v15541_v20 = vpack.c.bf16 %v14026_v9, %v14025_v37 }
0x6011   :  { %15542 = vmatprep.subr.bf16.mxu1 %v15541_v20 }
0x6025   :  { %v11074_v12 = vpop.f32.mrb[132].mxu0 }
0x6026   :  { %v11078_v50 = vadd.f32 %v11074_v12, %v10835_v33  ;;  %v15225_v22 = vpop.f32.mrb[133].mxu0  ;;  %v15537_v12 = vpack.c.bf16 %v14022_v16, %v14021_v34 }
0x6086   :  { %v11167_v27 = vpop.xlane.xlu0 %11166 }
0x6087   :  { %15819 = vrcp.f32 %v11167_v27 }
0x608a   :  { %v11171_v46 = vpop.permute.xlu0 %11170 }
0x608b   :  { %15232 = vmatpush3.msra.mxu0 %v11171_v46 }
0x6091   :  { %v15820_v42 = vpop.eup %15819 }
0x6092   :  { %v11169_v29 = vmul.f32 %v15820_v42, %v15818_v30  ;;  %v14020_v30 = vld [vmem:[%s18035_s12 + $0x28] sm:$0xff] }
0x6093   :  { %v15533_v48 = vpack.c.bf16 %v14020_v30, %v14019_v13  ;;  %v17767_v30 = vld [vmem:[%s18037_s14 + $0x20] sm:$0xff] }
0x6094   :  { %15234 = vmatmul.mubr.msk.f32.vlgmr.msra.gmra.mrb[134].mxu0 %vm223_vm6, %v11169_v29 }
0x6095   :  { %15534 = vmatprep.subr.bf16.mxu0 %v15533_v48 }
0x6096   :  { %15536 = vmatpush3.bf16.msra.mxu0 %v15533_v48  ;;  %v17773_v48 = vld [vmem:[%s18037_s14 + $0x28] sm:$0xff] }
0x6097   :  { %15538 = vmatprep.subr.bf16.mxu0 %v15537_v12 }
0x609a   :  { %15540 = vmatpush3.bf16.msra.mxu0 %v15537_v12 }
0x609b   :  { %15263 = vmatprep.subr.mxu0 %v15910_v51 }
0x6167   :  { %v11242_v62 = vpop.f32.mrb[134].mxu0 }
0x6168   :  { %v15235_v2 = vpop.f32.mrb[135].mxu0  ;;  %15239 = vmatmul.mubr.msk.f32.vlgmr.msra.gmra.mrb[126].mxu1 %vm223_vm6, %v11242_v62  ;;  %v11388_v62 = vrot.slane %v17420_v47, %v16322_v21 }
0x6169   :  { %15544 = vmatpush3.bf16.msra.mxu1 %v15541_v20  ;;  %15260 = vmatprep.mubr.msk.f32.mxu1 %vm72_vm0, %v17064_v1  ;;  %v11336_v1 = vsub.f32 %v17645_v44, %v11334_v32 }
0x616a   :  { %15546 = vmatprep.subr.bf16.mxu1 %v15545_v39 }
0x616b   :  { %v11338_v43 = vmul.f32 %v11336_v1, %v11336_v1  ;;  %v11352_v7 = vmul.f32 %v11351_v26, %v11336_v1 }
0x616d   :  { %15548 = vmatpush3.bf16.msra.mxu1 %v15545_v39  ;;  %v11340_v0 = vsel %vm72_vm0, %v11338_v43, 0.0 }
0x616e   :  { %15268 = vmatprep.subr.mxu1 %v15910_v51 }
0x6170   :  { %15261 = vmatmul.mubr.msk.f32.vlgmr.msra.gmra.mrb[128].mxu1 %vm72_vm0, %v17068_v35  ;;  %v11478_v35 = vrot.slane %v17677_v53, %v16082_v52 }
0x6171   :  { %15270 = vmatprep.mubr.msk.f32.mxu1 %vm15911_vm5, %v15910_v51 }
0x623b   :  { %v11315_v33 = vpop.f32.mrb[126].mxu1 }
0x623c   :  { %v11319_v59 = vadd.f32 %v11315_v33, %v11078_v50  ;;  %v15240_v4 = vpop.f32.mrb[127].mxu1 }
0x623e   :  { %v11325_v28 = vadd.f32 %v11323_v57, %v11319_v59 }
0x6240   :  { %v17681_v17 = vadd.f32 %v11325_v28, %v17392_v45 }
0x6242   :  { %v11331_v23 = vsel %vm72_vm0, %v17681_v17, 0.0 }
0x6243   :  { %v15262_v15 = vpop.f32.mrb[128].mxu1  ;;  %11332 = vadd.xlane.f32.xlu1 %v11331_v23 }
0x6244   :  { %v17687_v6 = vadd.f32 %v15262_v15, %v11478_v35  ;;  %v11545_v19 = vpop.f32.mrb[129].mxu1 }
0x6245   :  { %v17692_v8 = vadd.f32 %v11545_v19, %v11478_v35  ;;  %v17740_v35 = vld [vmem:[%s18027_s4] sm:$0xff] }
0x6247   :  { %11341 = vadd.xlane.f32.xlu1 %v11340_v0 }
0x62d0   :  { %v11333_v18 = vpop.xlane.xlu1 %11332 }
0x62d1   :  { %v11335_v61 = vmul.f32 0.03125, %v11333_v18 }
0x62d3   :  { %v11337_v45 = vsub.f32 %v17681_v17, %v11335_v61 }
0x62d4   :  { %v11342_v38 = vpop.xlane.xlu1 %11341 }
0x62d5   :  { %v11346_v63 = vmul.f32 0.032258064, %v11342_v38  ;;  %v11339_v3 = vmul.f32 %v11337_v45, %v11337_v45  ;;  %v11353_v20 = vmul.f32 %v11351_v26, %v11337_v45 }
0x62d7   :  { %15821 = vrsqrt.f32 %v11346_v63  ;;  %v11343_v52 = vsel %vm72_vm0, %v11339_v3, 0.0  ;;  %vm11356_vm1 = vcmp.eq.f32.partialorder %v11346_v63, inf  ;;  %v11359_v57 = vand.u32 2147483648, %v11346_v63 }
0x62d8   :  { %11344 = vadd.xlane.f32.xlu1 %v11343_v52  ;;  %vm11358_vm2 = vcmp.eq.f32.partialorder %v11346_v63, 0.0 }
0x62e1   :  { %v15822_v60 = vpop.eup %15821 }
0x62e2   :  { %v11355_v5 = vmul.f32 %v15822_v60, %v11346_v63 }
0x62e4   :  { %v11357_v56 = vsel %vm11356_vm1, %v11346_v63, %v11355_v5 }
0x62e5   :  { %v11360_v54 = vsel %vm11358_vm2, %v11359_v57, %v11357_v56 }
0x62e6   :  { %v11368_v14 = vadd.f32 1e-06, %v11360_v54 }
0x62e8   :  { %15823 = vrcp.f32 %v11368_v14 }
0x62e9   :  { %11726 = vrot.lane.b32.xlu1 %v17692_v8, %s18089_s6 }
0x62f2   :  { %v15824_v10 = vpop.eup %15823 }
0x62f3   :  { %v11371_v31 = vmul.f32 %v15824_v10, %v11352_v7 }
0x62f5   :  { %v11378_v25 = vadd.f32 %v11377_v11, %v11371_v31 }
0x62f7   :  { %15249 = vmatprep.mubr.msk.f32.mxu0 %vm72_vm0, %v11378_v25 }
0x6365   :  { %v11345_v50 = vpop.xlane.xlu1 %11344 }
0x6366   :  { %v11347_v22 = vmul.f32 0.032258064, %v11345_v50 }
0x6368   :  { %15825 = vrsqrt.f32 %v11347_v22  ;;  %vm11363_vm3 = vcmp.eq.f32.partialorder %v11347_v22, inf  ;;  %v11366_v42 = vand.u32 2147483648, %v11347_v22  ;;  %vm11365_vm4 = vcmp.eq.f32.partialorder %v11347_v22, 0.0 }
0x6369   :  { %v11727_v59 = vpop.permute.xlu1 %11726 }
0x6372   :  { %v15826_v27 = vpop.eup %15825 }
0x6373   :  { %v11362_v46 = vmul.f32 %v15826_v27, %v11347_v22 }
0x6375   :  { %v11364_v29 = vsel %vm11363_vm3, %v11347_v22, %v11362_v46 }
0x6376   :  { %v11367_v37 = vsel %vm11365_vm4, %v11366_v42, %v11364_v29 }
0x6377   :  { %v11369_v9 = vadd.f32 1e-06, %v11367_v37 }
0x6379   :  { %15827 = vrcp.f32 %v11369_v9 }
0x6383   :  { %v15828_v55 = vpop.eup %15827 }
0x6384   :  { %v11373_v49 = vmul.f32 %v15828_v55, %v11353_v20 }
0x6386   :  { %v11379_v39 = vadd.f32 %v11377_v11, %v11373_v49 }
0x6388   :  { %15250 = vmatmul.mubr.msk.f32.vlgmr.msra.gmra.mrb[136].mxu0 %vm72_vm0, %v11379_v39 }
0x6389   :  { %15264 = vmatpush3.xpose.msk.msra.mxu0 %vm223_vm6, %v17692_v8  ;;  %15265 = vmatprep.mubr.msk.f32.mxu0 %vm15911_vm5, %v15910_v51 }
0x638a   :  { %15273 = vmatprep.subr.mxu0 %v15910_v51 }
0x645b   :  { %v15251_v2 = vpop.f32.mrb[136].mxu0 }
0x645c   :  { %v17722_v58 = vadd.f32 %v15251_v2, %v11388_v62  ;;  %v11461_v32 = vpop.f32.mrb[137].mxu0 }
0x645d   :  { %v17724_v33 = vadd.f32 %v11461_v32, %v11388_v62 }
0x645f   :  { %11724 = vrot.lane.b32.xlu0 %v17724_v33, %s18089_s6  ;;  %15266 = vmatmul.mubr.msk.f32.vlgmr.msra.gmra.mrb[138].mxu0 %vm223_vm6, %v17724_v33 }
0x6460   :  { %15274 = vmatpush3.xpose.msk.msra.mxu0 %vm223_vm6, %v11727_v59  ;;  %15275 = vmatprep.mubr.msk.f32.mxu0 %vm15911_vm5, %v15910_v51 }
0x6461   :  { %15283 = vmatprep.subr.mxu0 %v15910_v51 }
0x64d1   :  { %v11725_v47 = vpop.permute.xlu0 %11724 }
0x64d2   :  { %15276 = vmatmul.mubr.msk.f32.vlgmr.msra.gmra.mrb[140].mxu0 %vm223_vm6, %v11725_v47 }
0x64d3   :  { %15285 = vmatprep.mubr.msk.f32.mxu0 %vm15911_vm5, %v15910_v51  ;;  %15284 = vmatpush3.msra.mxu0 %v17773_v48 }
0x64d4   :  { %15293 = vmatprep.subr.mxu0 %v15910_v51 }
0x6532   :  { %v11631_v4 = vpop.f32.mrb[138].mxu0 }
0x6533   :  { %v11635_v1 = vmul.f32 0.35355338, %v11631_v4  ;;  %v15267_v28 = vpop.f32.mrb[139].mxu0 }
0x6535   :  { %v11636_v23 = vadd.f32 %v17740_v35, %v11635_v1 }
0x6537   :  { %v11637_v43 = vsel %vm223_vm6, %v11636_v23, -inf }
0x6538   :  { %11638 = vmax.xlane.f32.xlu0 %v11637_v43 }
0x65a5   :  { %v11798_v15 = vpop.f32.mrb[140].mxu0 }
0x65a6   :  { %v11802_v19 = vmul.f32 0.35355338, %v11798_v15  ;;  %v15277_v0 = vpop.f32.mrb[141].mxu0 }
0x65a8   :  { %v11803_v18 = vadd.f32 %v17740_v35, %v11802_v19  ;;  %v17810_v19 = vld [vmem:[%s18037_s14 + $0x30] sm:$0xff] }
0x65aa   :  { %v11804_v61 = vsel %vm223_vm6, %v11803_v18, -inf }
0x65ab   :  { %11805 = vmax.xlane.f32.xlu1 %v11804_v61 }
0x65bc   :  { %11815 = vrot.lane.b32.xlu1 %v17692_v8, %s18077_s26 }
0x65c0   :  { %12037 = vrot.lane.b32.xlu1 %v17724_v33, %s18079_s1 }
0x65c5   :  { %v11639_v45 = vpop.xlane.xlu0 %11638 }
0x65c6   :  { %v11640_v38 = vsub.f32 %v11636_v23, %v11639_v45 }
0x65c8   :  { %v11641_v63 = vmul.f32 1.442695, %v11640_v38 }
0x65ca   :  { %15829 = vpow2.f32 %v11641_v63 }
0x65d4   :  { %v15830_v3 = vpop.eup %15829 }
0x65d5   :  { %v11643_v52 = vsel %vm223_vm6, %v15830_v3, 0.0 }
0x65d6   :  { %11644 = vadd.xlane.f32.xlu0 %v11643_v52 }
0x6638   :  { %v11806_v60 = vpop.xlane.xlu1 %11805 }
0x6639   :  { %v11807_v5 = vsub.f32 %v11803_v18, %v11806_v60 }
0x663b   :  { %v11808_v57 = vmul.f32 1.442695, %v11807_v5 }
0x663c   :  { %v11816_v31 = vpop.permute.xlu1 %11815 }
0x663d   :  { %15831 = vpow2.f32 %v11808_v57 }
0x6640   :  { %v12038_v27 = vpop.permute.xlu1 %12037 }
0x6647   :  { %v15832_v56 = vpop.eup %15831 }
0x6648   :  { %v11810_v54 = vsel %vm223_vm6, %v15832_v56, 0.0 }
0x6649   :  { %11811 = vadd.xlane.f32.xlu0 %v11810_v54 }
0x665f   :  { %11648 = vrot.lane.b32.xlu0 %v17692_v8, %s18085_s8 }
0x6663   :  { %12039 = vrot.lane.b32.xlu0 %v17692_v8, %s18079_s1  ;;  %v11645_v14 = vpop.xlane.xlu0 %11644 }
0x6664   :  { %15833 = vrcp.f32 %v11645_v14 }
0x666e   :  { %v15834_v7 = vpop.eup %15833 }
0x666f   :  { %v11647_v11 = vmul.f32 %v15834_v7, %v15830_v3 }
0x66d6   :  { %v11812_v26 = vpop.xlane.xlu0 %11811 }
0x66d7   :  { %15835 = vrcp.f32 %v11812_v26 }
0x66da   :  { %v11649_v10 = vpop.permute.xlu0 %11648 }
0x66db   :  { %15269 = vmatpush3.msra.mxu1 %v11649_v10 }
0x66dc   :  { %15271 = vmatmul.mubr.msk.f32.vlgmr.msra.gmra.mrb[130].mxu1 %vm223_vm6, %v11647_v11  ;;  %15278 = vmatprep.subr.mxu1 %v15910_v51 }
0x66dd   :  { %15279 = vmatpush3.msra.mxu1 %v11816_v31  ;;  %15280 = vmatprep.mubr.msk.f32.mxu1 %vm15911_vm5, %v15910_v51 }
0x66de   :  { %15288 = vmatprep.subr.mxu1 %v15910_v51  ;;  %v12040_v50 = vpop.permute.xlu0 %12039 }
0x66e1   :  { %v15836_v25 = vpop.eup %15835 }
0x66e2   :  { %v11814_v13 = vmul.f32 %v15836_v25, %v15832_v56  ;;  %v17849_v25 = vld [vmem:[%s18037_s14 + $0x38] sm:$0xff] }
0x66e4   :  { %15281 = vmatmul.mubr.msk.f32.vlgmr.msra.gmra.mrb[132].mxu1 %vm223_vm6, %v11814_v13 }
0x66e5   :  { %15290 = vmatprep.mubr.msk.f32.mxu1 %vm15911_vm5, %v15910_v51  ;;  %15289 = vmatpush3.msra.mxu1 %v17767_v30 }
0x66e6   :  { %15298 = vmatprep.subr.mxu1 %v15910_v51 }
0x67af   :  { %v11720_v34 = vpop.f32.mrb[130].mxu1 }
0x67b0   :  { %v15272_v16 = vpop.f32.mrb[131].mxu1  ;;  %15291 = vmatmul.mubr.msk.f32.vlgmr.msra.gmra.mrb[134].mxu1 %vm223_vm6, %v11720_v34 }
0x67b1   :  { %15300 = vmatprep.mubr.msk.f32.mxu1 %vm15911_vm5, %v15910_v51 }
0x67b7   :  { %v11887_v12 = vpop.f32.mrb[132].mxu1 }
0x67b8   :  { %v15282_v22 = vpop.f32.mrb[133].mxu1  ;;  %15286 = vmatmul.mubr.msk.f32.vlgmr.msra.gmra.mrb[142].mxu0 %vm223_vm6, %v11887_v12 }
0x67b9   :  { %15294 = vmatpush3.xpose.msk.msra.mxu0 %vm223_vm6, %v12040_v50  ;;  %15295 = vmatprep.mubr.msk.f32.mxu0 %vm15911_vm5, %v15910_v51  ;;  %v17859_v50 = vld [vmem:[%s18027_s4 + $0x8] sm:$0xff]  ;;  %s15923_s4 = smov [#allocation2]  }
0x67ba   :  { %15303 = vmatprep.subr.mxu0 %v15910_v51  ;;  %s13791_s14 = sshll.u32 %s15923_s4, 4  ;;  %s13792_s14 = int_to_ptr.vmem [resolvable:$true] %s13791_s14 }
0x67bb   :  { %p15891_p1 = scmp.lt.s32.totalorder %s13792_s14, %s13792_s14 }
0x67bc   :  { %15296 = vmatmul.mubr.msk.f32.vlgmr.msra.gmra.mrb[144].mxu0 %vm223_vm6, %v12038_v27 }
0x67bd   :  { %15305 = vmatprep.mubr.msk.f32.mxu0 %vm15911_vm5, %v15910_v51  ;;  %15304 = vmatpush3.msra.mxu0 %v17810_v19 }
0x67be   :  { %15313 = vmatprep.subr.mxu0 %v15910_v51 }
0x6883   :  { %v12033_v46 = vpop.f32.mrb[134].mxu1 }
0x6884   :  { %v15292_v42 = vpop.f32.mrb[135].mxu1 }
0x688b   :  { %v11960_v29 = vpop.f32.mrb[142].mxu0 }
0x688c   :  { %v12034_v37 = vadd.f32 %v12033_v46, %v11960_v29  ;;  %v15287_v9 = vpop.f32.mrb[143].mxu0 }
0x688f   :  { %v12111_v20 = vpop.f32.mrb[144].mxu0 }
0x6890   :  { %v12115_v55 = vmul.f32 0.35355338, %v12111_v20  ;;  %v15297_v49 = vpop.f32.mrb[145].mxu0 }
0x6892   :  { %v12116_v39 = vadd.f32 %v17740_v35, %v12115_v55 }
0x6894   :  { %v12117_v62 = vsel %vm223_vm6, %v12116_v39, -inf }
0x6895   :  { %12118 = vmax.xlane.f32.xlu0 %v12117_v62 }
0x68ab   :  { %12128 = vrot.lane.b32.xlu0 %v17692_v8, %s18078_s21 }
0x68af   :  { %12278 = vrot.lane.b32.xlu0 %v17724_v33, %s18081_s3 }
0x6922   :  { %v12119_v2 = vpop.xlane.xlu0 %12118 }
0x6923   :  { %v12120_v32 = vsub.f32 %v12116_v39, %v12119_v2 }
0x6925   :  { %v12121_v59 = vmul.f32 1.442695, %v12120_v32 }
0x6926   :  { %v12129_v47 = vpop.permute.xlu0 %12128 }
0x6927   :  { %15837 = vpow2.f32 %v12121_v59  ;;  %15299 = vmatpush3.msra.mxu1 %v12129_v47 }
0x6928   :  { %15308 = vmatprep.subr.mxu1 %v15910_v51 }
0x692a   :  { %v12279_v15 = vpop.permute.xlu0 %12278 }
0x6931   :  { %v15838_v4 = vpop.eup %15837 }
0x6932   :  { %v12123_v1 = vsel %vm223_vm6, %v15838_v4, 0.0 }
0x6933   :  { %12124 = vadd.xlane.f32.xlu1 %v12123_v1 }
0x6944   :  { %12280 = vrot.lane.b32.xlu1 %v17692_v8, %s18081_s3 }
0x69c0   :  { %v12125_v28 = vpop.xlane.xlu1 %12124 }
0x69c1   :  { %15839 = vrcp.f32 %v12125_v28 }
0x69c4   :  { %v12281_v33 = vpop.permute.xlu1 %12280 }
0x69cb   :  { %v15840_v23 = vpop.eup %15839 }
0x69cc   :  { %v12127_v43 = vmul.f32 %v15840_v23, %v15838_v4 }
0x69ce   :  { %15301 = vmatmul.mubr.msk.f32.vlgmr.msra.gmra.mrb[136].mxu1 %vm223_vm6, %v12127_v43 }
0x69cf   :  { %15309 = vmatpush3.xpose.msk.msra.mxu1 %vm223_vm6, %v12281_v33  ;;  %15310 = vmatprep.mubr.msk.f32.mxu1 %vm15911_vm5, %v15910_v51 }
0x69d0   :  { %15318 = vmatprep.subr.mxu1 %v15910_v51 }
0x69d2   :  { %15311 = vmatmul.mubr.msk.f32.vlgmr.msra.gmra.mrb[138].mxu1 %vm223_vm6, %v12279_v15 }
0x69d3   :  { %15320 = vmatprep.mubr.msk.f32.mxu1 %vm15911_vm5, %v15910_v51  ;;  %15319 = vmatpush3.msra.mxu1 %v17849_v25 }
0x69d4   :  { %15328 = vmatprep.subr.mxu1 %v15910_v51 }
0x6aa1   :  { %v12200_v0 = vpop.f32.mrb[136].mxu1 }
0x6aa2   :  { %v15302_v18 = vpop.f32.mrb[137].mxu1  ;;  %15306 = vmatmul.mubr.msk.f32.vlgmr.msra.gmra.mrb[146].mxu0 %vm223_vm6, %v12200_v0 }
0x6aa3   :  { %15315 = vmatprep.mubr.msk.f32.mxu0 %vm15911_vm5, %v15910_v51 }
0x6aa5   :  { %v12352_v61 = vpop.f32.mrb[138].mxu1 }
0x6aa6   :  { %v12356_v45 = vmul.f32 0.35355338, %v12352_v61  ;;  %v15312_v38 = vpop.f32.mrb[139].mxu1 }
0x6aa8   :  { %v12357_v63 = vadd.f32 %v17740_v35, %v12356_v45 }
0x6aaa   :  { %v12358_v3 = vsel %vm223_vm6, %v12357_v63, -inf }
0x6aab   :  { %12359 = vmax.xlane.f32.xlu1 %v12358_v3 }
0x6abc   :  { %12686 = vrot.lane.b32.xlu1 %v17687_v6, %s18089_s6 }
0x6ac0   :  { %12684 = vrot.lane.b32.xlu1 %v17722_v58, %s18089_s6 }
0x6b38   :  { %v12360_v52 = vpop.xlane.xlu1 %12359 }
0x6b39   :  { %v12361_v60 = vsub.f32 %v12357_v63, %v12360_v52 }
0x6b3b   :  { %v12362_v5 = vmul.f32 1.442695, %v12361_v60 }
0x6b3c   :  { %v12687_v31 = vpop.permute.xlu1 %12686 }
0x6b3d   :  { %15841 = vpow2.f32 %v12362_v5 }
0x6b47   :  { %v15842_v57 = vpop.eup %15841 }
0x6b48   :  { %v12364_v56 = vsel %vm223_vm6, %v15842_v57, 0.0 }
0x6b49   :  { %12365 = vadd.xlane.f32.xlu0 %v12364_v56 }
0x6b5f   :  { %12369 = vrot.lane.b32.xlu0 %v17692_v8, %s18082_s29  ;;  %v12685_v8 = vpop.permute.xlu1 %12684 }
0x6b75   :  { %v12273_v35 = vpop.f32.mrb[146].mxu0 }
0x6b76   :  { %v17826_v54 = vadd.f32 %v12273_v35, %v12034_v37  ;;  %v15307_v14 = vpop.f32.mrb[147].mxu0 }
0x6bd6   :  { %v12366_v26 = vpop.xlane.xlu0 %12365 }
0x6bd7   :  { %15843 = vrcp.f32 %v12366_v26 }
0x6bda   :  { %v12370_v7 = vpop.permute.xlu0 %12369 }
0x6bdb   :  { %15314 = vmatpush3.msra.mxu0 %v12370_v7 }
0x6bdc   :  { %15323 = vmatprep.subr.mxu0 %v15910_v51 }
0x6be1   :  { %v15844_v11 = vpop.eup %15843 }
0x6be2   :  { %v12368_v10 = vmul.f32 %v15844_v11, %v15842_v57 }
0x6be4   :  { %15316 = vmatmul.mubr.msk.f32.vlgmr.msra.gmra.mrb[148].mxu0 %vm223_vm6, %v12368_v10 }
0x6be5   :  { %15324 = vmatpush3.xpose.msk.msra.mxu0 %vm223_vm6, %v17687_v6  ;;  %15325 = vmatprep.mubr.msk.f32.mxu0 %vm15911_vm5, %v15910_v51 }
0x6be6   :  { %15333 = vmatprep.subr.mxu0 %v15910_v51 }
0x6be8   :  { %15326 = vmatmul.mubr.msk.f32.vlgmr.msra.gmra.mrb[150].mxu0 %vm223_vm6, %v17722_v58 }
0x6be9   :  { %15334 = vmatpush3.xpose.msk.msra.mxu0 %vm223_vm6, %v12687_v31  ;;  %15335 = vmatprep.mubr.msk.f32.mxu0 %vm15911_vm5, %v15910_v51 }
0x6bea   :  { %15343 = vmatprep.subr.mxu0 %v15910_v51 }
0x6bec   :  { %15336 = vmatmul.mubr.msk.f32.vlgmr.msra.gmra.mrb[152].mxu0 %vm223_vm6, %v12685_v8 }
0x6bed   :  { %15344 = vmatpush3.msra.mxu0 %v17773_v48  ;;  %15345 = vmatprep.mubr.msk.f32.mxu0 %vm15911_vm5, %v15910_v51 }
0x6bee   :  { %15353 = vmatprep.subr.mxu0 %v15910_v51 }
0x6cb7   :  { %v12441_v13 = vpop.f32.mrb[148].mxu0 }
0x6cb8   :  { %v15317_v34 = vpop.f32.mrb[149].mxu0  ;;  %15321 = vmatmul.mubr.msk.f32.vlgmr.msra.gmra.mrb[140].mxu1 %vm223_vm6, %v12441_v13 }
0x6cb9   :  { %15330 = vmatprep.mubr.msk.f32.mxu1 %vm15911_vm5, %v15910_v51 }
0x6cbb   :  { %v12591_v48 = vpop.f32.mrb[150].mxu0 }
0x6cbc   :  { %v12595_v16 = vmul.f32 0.35355338, %v12591_v48  ;;  %v15327_v12 = vpop.f32.mrb[151].mxu0 }
0x6cbe   :  { %v12596_v22 = vadd.f32 %v17859_v50, %v12595_v16 }
0x6cbf   :  { %v12758_v27 = vpop.f32.mrb[152].mxu0 }
0x6cc0   :  { %v12762_v46 = vmul.f32 0.35355338, %v12758_v27  ;;  %v15337_v42 = vpop.f32.mrb[153].mxu0  ;;  %v12597_v29 = vsel %vm223_vm6, %v12596_v22, -inf }
0x6cc1   :  { %12598 = vmax.xlane.f32.xlu0 %v12597_v29  ;;  %v15885_v29 = vld [vmem:[%s18040_s17 + $0x10] sm:$0xff]  ;;  %s15886_s17 = scalar_lea.vmem %s13792_s14, 256 }
0x6cc2   :  { %v12763_v37 = vadd.f32 %v17859_v50, %v12762_v46  ;;  %p15887_p0 = scmp.ne.s32.totalorder %s13792_s14, %s15886_s17  ;;  %p15892_p2 = scmp.lt.s32.totalorder %s15886_s17, %s15886_s17 }
0x6cc4   :  { %v12764_v9 = vsel %vm223_vm6, %v12763_v37, -inf  ;;  %p15893_p3 = por %p15892_p2, %p15891_p1 }
0x6cc5   :  { %12765 = vmax.xlane.f32.xlu1 %v12764_v9 }
0x6cc6   :  { %p15894_p4 = pnand %p15893_p3, %p15887_p0 }
0x6cd6   :  { %12608 = vrot.lane.b32.xlu1 %v17687_v6, %s18085_s8 }
0x6cda   :  { %12999 = vrot.lane.b32.xlu1 %v17687_v6, %s18079_s1 }
0x6cde   :  { %12997 = vrot.lane.b32.xlu1 %v17722_v58, %s18079_s1 }
0x6d4e   :  { %v12599_v20 = vpop.xlane.xlu0 %12598 }
0x6d4f   :  { %v12600_v55 = vsub.f32 %v12596_v22, %v12599_v20 }
0x6d51   :  { %v12601_v49 = vmul.f32 1.442695, %v12600_v55 }
0x6d52   :  { %v12766_v39 = vpop.xlane.xlu1 %12765 }
0x6d53   :  { %15845 = vpow2.f32 %v12601_v49  ;;  %v12767_v62 = vsub.f32 %v12763_v37, %v12766_v39  ;;  %v13482_v37 = vrot.slane %v15885_v29, %v16380_v24  ;;  %v14073_v29 = vld [vmem:[%s18039_s16 + $0x40] sm:$0xff] }
0x6d55   :  { %v12768_v2 = vmul.f32 1.442695, %v12767_v62 }
0x6d56   :  { %v12609_v32 = vpop.permute.xlu1 %12608 }
0x6d57   :  { %15847 = vpow2.f32 %v12768_v2  ;;  %15329 = vmatpush3.msra.mxu1 %v12609_v32 }
0x6d58   :  { %15338 = vmatprep.subr.mxu1 %v15910_v51 }
0x6d5a   :  { %v13000_v52 = vpop.permute.xlu1 %12999 }
0x6d5d   :  { %v15846_v59 = vpop.eup %15845 }
0x6d5e   :  { %v12603_v47 = vsel %vm223_vm6, %v15846_v59, 0.0 }
0x6d5f   :  { %12604 = vadd.xlane.f32.xlu0 %v12603_v47 }
0x6d61   :  { %v15848_v4 = vpop.eup %15847 }
0x6d62   :  { %v12770_v1 = vsel %vm223_vm6, %v15848_v4, 0.0 }
0x6d63   :  { %12771 = vadd.xlane.f32.xlu0 %v12770_v1 }
0x6d79   :  { %12775 = vrot.lane.b32.xlu0 %v17687_v6, %s18077_s26 }
0x6d8b   :  { %v12514_v28 = vpop.f32.mrb[140].mxu1 }
0x6d8c   :  { %v17877_v23 = vadd.f32 %v12514_v28, %v17826_v54  ;;  %v15322_v43 = vpop.f32.mrb[141].mxu1 }
0x6d8e   :  { %v13483_v55 = vadd.f32 %v13482_v37, %v17877_v23 }
0x6d90   :  { %v17930_v62 = vadd.f32 %v13483_v55, %v17645_v44  ;;  %v14076_v55 = vld [vmem:[%s18039_s16 + $0x58] sm:$0xff] }
0x6d92   :  { %v13487_v24 = vsel %vm72_vm0, %v17930_v62, 0.0 }
0x6dec   :  { %v12605_v33 = vpop.xlane.xlu0 %12604 }
0x6ded   :  { %15849 = vrcp.f32 %v12605_v33 }
0x6df0   :  { %v12772_v15 = vpop.xlane.xlu0 %12771 }
0x6df1   :  { %15851 = vrcp.f32 %v12772_v15 }
0x6df4   :  { %v12776_v61 = vpop.permute.xlu0 %12775 }
0x6df7   :  { %v15850_v0 = vpop.eup %15849 }
0x6df8   :  { %v12607_v18 = vmul.f32 %v15850_v0, %v15846_v59 }
0x6dfa   :  { %15331 = vmatmul.mubr.msk.f32.vlgmr.msra.gmra.mrb[142].mxu1 %vm223_vm6, %v12607_v18 }
0x6dfb   :  { %v15852_v45 = vpop.eup %15851  ;;  %15339 = vmatpush3.msra.mxu1 %v12776_v61  ;;  %15340 = vmatprep.mubr.msk.f32.mxu1 %vm15911_vm5, %v15910_v51 }
0x6dfc   :  { %v12774_v38 = vmul.f32 %v15852_v45, %v15848_v4  ;;  %15348 = vmatprep.subr.mxu1 %v15910_v51 }
0x6dfe   :  { %15341 = vmatmul.mubr.msk.f32.vlgmr.msra.gmra.mrb[144].mxu1 %vm223_vm6, %v12774_v38 }
0x6dff   :  { %15349 = vmatpush3.msra.mxu1 %v17767_v30  ;;  %15350 = vmatprep.mubr.msk.f32.mxu1 %vm15911_vm5, %v15910_v51  ;;  %v12998_v30 = vpop.permute.xlu1 %12997 }
0x6e00   :  { %15358 = vmatprep.subr.mxu1 %v15910_v51 }
0x6ecd   :  { %v12680_v63 = vpop.f32.mrb[142].mxu1 }
0x6ece   :  { %v15332_v3 = vpop.f32.mrb[143].mxu1  ;;  %15351 = vmatmul.mubr.msk.f32.vlgmr.msra.gmra.mrb[146].mxu1 %vm223_vm6, %v12680_v63 }
0x6ecf   :  { %15360 = vmatprep.mubr.msk.f32.mxu1 %vm15911_vm5, %v15910_v51 }
0x6ed1   :  { %v12847_v60 = vpop.f32.mrb[144].mxu1 }
0x6ed2   :  { %v15342_v5 = vpop.f32.mrb[145].mxu1  ;;  %15346 = vmatmul.mubr.msk.f32.vlgmr.msra.gmra.mrb[154].mxu0 %vm223_vm6, %v12847_v60 }
0x6ed3   :  { %15354 = vmatpush3.xpose.msk.msra.mxu0 %vm223_vm6, %v13000_v52  ;;  %15355 = vmatprep.mubr.msk.f32.mxu0 %vm15911_vm5, %v15910_v51 }
0x6ed4   :  { %15363 = vmatprep.subr.mxu0 %v15910_v51 }
0x6ed6   :  { %15356 = vmatmul.mubr.msk.f32.vlgmr.msra.gmra.mrb[156].mxu0 %vm223_vm6, %v12998_v30 }
0x6ed7   :  { %15364 = vmatpush3.msra.mxu0 %v17810_v19  ;;  %15365 = vmatprep.mubr.msk.f32.mxu0 %vm15911_vm5, %v15910_v51 }
0x6ed8   :  { %15373 = vmatprep.subr.mxu0 %v15910_v51 }
0x6fa1   :  { %v12993_v57 = vpop.f32.mrb[146].mxu1 }
0x6fa2   :  { %v15352_v56 = vpop.f32.mrb[147].mxu1 }
0x6fa5   :  { %v12920_v35 = vpop.f32.mrb[154].mxu0 }
0x6fa6   :  { %v12994_v54 = vadd.f32 %v12993_v57, %v12920_v35  ;;  %v15347_v14 = vpop.f32.mrb[155].mxu0 }
0x6fa9   :  { %v13071_v26 = vpop.f32.mrb[156].mxu0 }
0x6faa   :  { %v13075_v7 = vmul.f32 0.35355338, %v13071_v26  ;;  %v15357_v11 = vpop.f32.mrb[157].mxu0 }
0x6fac   :  { %v13076_v10 = vadd.f32 %v17859_v50, %v13075_v7 }
0x6fae   :  { %v13077_v31 = vsel %vm223_vm6, %v13076_v10, -inf }
0x6faf   :  { %13078 = vmax.xlane.f32.xlu0 %v13077_v31 }
0x6fc5   :  { %13088 = vrot.lane.b32.xlu0 %v17687_v6, %s18078_s21 }
0x6fc9   :  { %13238 = vrot.lane.b32.xlu0 %v17722_v58, %s18081_s3 }
0x703c   :  { %v13079_v19 = vpop.xlane.xlu0 %13078 }
0x703d   :  { %v13080_v8 = vsub.f32 %v13076_v10, %v13079_v19 }
0x703f   :  { %v13081_v13 = vmul.f32 1.442695, %v13080_v8 }
0x7040   :  { %v13089_v34 = vpop.permute.xlu0 %13088 }
0x7041   :  { %15853 = vpow2.f32 %v13081_v13  ;;  %15359 = vmatpush3.msra.mxu1 %v13089_v34  ;;  %v13510_v13 = vrot.slane %v17677_v53, %v16292_v40  ;;  %v14069_v40 = vld [vmem:[%s18038_s15 + $0x30] sm:$0xff] }
0x7042   :  { %15368 = vmatprep.subr.mxu1 %v15910_v51 }
0x7044   :  { %v13239_v46 = vpop.permute.xlu0 %13238 }
0x704b   :  { %v15854_v48 = vpop.eup %15853 }
0x704c   :  { %v13083_v16 = vsel %vm223_vm6, %v15854_v48, 0.0 }
0x704d   :  { %13084 = vadd.xlane.f32.xlu1 %v13083_v16 }
0x705e   :  { %13240 = vrot.lane.b32.xlu1 %v17687_v6, %s18081_s3 }
0x70da   :  { %v13085_v12 = vpop.xlane.xlu1 %13084 }
0x70db   :  { %15855 = vrcp.f32 %v13085_v12 }
0x70de   :  { %v13241_v58 = vpop.permute.xlu1 %13240 }
0x70e5   :  { %v15856_v22 = vpop.eup %15855 }
0x70e6   :  { %v13087_v27 = vmul.f32 %v15856_v22, %v15854_v48  ;;  %v13536_v48 = vrot.slane %v17677_v53, %v16322_v21  ;;  %v14070_v21 = vld [vmem:[%s18038_s15 + $0x38] sm:$0xff] }
0x70e8   :  { %15361 = vmatmul.mubr.msk.f32.vlgmr.msra.gmra.mrb[148].mxu1 %vm223_vm6, %v13087_v27  ;;  %v14067_v27 = vld [vmem:[%s18038_s15 + $0x20] sm:$0xff] }
0x70e9   :  { %15369 = vmatpush3.xpose.msk.msra.mxu1 %vm223_vm6, %v13241_v58  ;;  %15370 = vmatprep.mubr.msk.f32.mxu1 %vm15911_vm5, %v15910_v51  ;;  %v14068_v58 = vld [vmem:[%s18038_s15 + $0x28] sm:$0xff] }
0x70ea   :  { %15378 = vmatprep.subr.mxu1 %v15910_v51 }
0x70ec   :  { %15371 = vmatmul.mubr.msk.f32.vlgmr.msra.gmra.mrb[150].mxu1 %vm223_vm6, %v13239_v46  ;;  %v15549_v46 = vpack.c.bf16 %v14068_v58, %v14067_v27 }
0x70ed   :  { %15379 = vmatpush3.msra.mxu1 %v17849_v25  ;;  %15380 = vmatprep.mubr.msk.f32.mxu1 %vm15911_vm5, %v15910_v51 }
0x71bb   :  { %v13160_v42 = vpop.f32.mrb[148].mxu1 }
0x71bc   :  { %v15362_v9 = vpop.f32.mrb[149].mxu1  ;;  %15366 = vmatmul.mubr.msk.f32.vlgmr.msra.gmra.mrb[158].mxu0 %vm223_vm6, %v13160_v42  ;;  %v15553_v42 = vpack.c.bf16 %v14070_v21, %v14069_v40 }
0x71bd   :  { %15375 = vmatprep.mubr.msk.f32.mxu0 %vm15911_vm5, %v15910_v51  ;;  %v14075_v9 = vld [vmem:[%s18039_s16 + $0x50] sm:$0xff] }
0x71bf   :  { %v13312_v20 = vpop.f32.mrb[150].mxu1 }
0x71c0   :  { %v13316_v25 = vmul.f32 0.35355338, %v13312_v20  ;;  %v15372_v49 = vpop.f32.mrb[151].mxu1 }
0x71c1   :  { %v14077_v49 = vld [vmem:[%s18039_s16 + $0x60] sm:$0xff] }
0x71c2   :  { %v13317_v39 = vadd.f32 %v17859_v50, %v13316_v25  ;;  %v15561_v25 = vpack.c.bf16 %v14076_v55, %v14075_v9  ;;  %v14083_v9 = vld [vmem:[%s18041_s18 + $0x2] ss:$0 sm:$0xff] }
0x71c4   :  { %v13318_v2 = vsel %vm223_vm6, %v13317_v39, -inf }
0x71c5   :  { %13319 = vmax.xlane.f32.xlu1 %v13318_v2 }
0x71c9   :  { %13488 = vadd.xlane.f32.xlu1 %v13487_v24 }
0x7252   :  { %v13320_v32 = vpop.xlane.xlu1 %13319 }
0x7253   :  { %v13321_v59 = vsub.f32 %v13317_v39, %v13320_v32  ;;  %v14078_v39 = vld [vmem:[%s18039_s16 + $0x68] sm:$0xff] }
0x7254   :  { %v15565_v2 = vpack.c.bf16 %v14078_v39, %v14077_v49 }
0x7255   :  { %v13322_v51 = vmul.f32 1.442695, %v13321_v59 }
0x7256   :  { %v13489_v18 = vpop.xlane.xlu1 %13488 }
0x7257   :  { %15857 = vpow2.f32 %v13322_v51  ;;  %v13493_v61 = vmul.f32 0.03125, %v13489_v18  ;;  %v13547_v18 = vrot.slane %v17677_v53, %v16059_v36 }
0x7259   :  { %v13495_v63 = vsub.f32 %v17930_v62, %v13493_v61 }
0x725b   :  { %v13497_v5 = vmul.f32 %v13495_v63, %v13495_v63  ;;  %v13511_v34 = vmul.f32 %v13510_v13, %v13495_v63 }
0x725d   :  { %v13499_v30 = vsel %vm72_vm0, %v13497_v5, 0.0 }
0x7261   :  { %v15858_v47 = vpop.eup %15857 }
0x7262   :  { %v13324_v4 = vsel %vm223_vm6, %v15858_v47, 0.0 }
0x7263   :  { %13325 = vadd.xlane.f32.xlu0 %v13324_v4 }
0x7279   :  { %13329 = vrot.lane.b32.xlu0 %v17687_v6, %s18082_s29 }
0x728f   :  { %v13233_v44 = vpop.f32.mrb[158].mxu0 }
0x7290   :  { %v13237_v50 = vadd.f32 %v13233_v44, %v12994_v54  ;;  %v15367_v1 = vpop.f32.mrb[159].mxu0 }
0x72f0   :  { %v13326_v28 = vpop.xlane.xlu0 %13325 }
0x72f1   :  { %15859 = vrcp.f32 %v13326_v28 }
0x72f4   :  { %v13330_v23 = vpop.permute.xlu0 %13329 }
0x72f5   :  { %15374 = vmatpush3.msra.mxu0 %v13330_v23 }
0x72f6   :  { %15550 = vmatprep.subr.bf16.mxu0 %v15549_v46 }
0x72fb   :  { %v15860_v43 = vpop.eup %15859 }
0x72fc   :  { %v13328_v33 = vmul.f32 %v15860_v43, %v15858_v47 }
0x72fe   :  { %15376 = vmatmul.mubr.msk.f32.vlgmr.msra.gmra.mrb[160].mxu0 %vm223_vm6, %v13328_v33  ;;  %v14079_v33 = vld [vmem:[%s18039_s16 + $0x70] sm:$0xff] }
0x72ff   :  { %15552 = vmatpush3.bf16.msra.mxu0 %v15549_v46 }
0x7300   :  { %15554 = vmatprep.subr.bf16.mxu0 %v15553_v42 }
0x7303   :  { %15556 = vmatpush3.bf16.msra.mxu0 %v15553_v42 }
0x73d1   :  { %v13401_v15 = vpop.f32.mrb[160].mxu0 }
0x73d2   :  { %v15377_v0 = vpop.f32.mrb[161].mxu0  ;;  %15381 = vmatmul.mubr.msk.f32.vlgmr.msra.gmra.mrb[152].mxu1 %vm223_vm6, %v13401_v15  ;;  %v14080_v15 = vld [vmem:[%s18039_s16 + $0x78] sm:$0xff] }
0x73d3   :  { %v15569_v0 = vpack.c.bf16 %v14080_v15, %v14079_v33 }
0x74a5   :  { %v13474_v45 = vpop.f32.mrb[152].mxu1 }
0x74a6   :  { %v13478_v38 = vadd.f32 %v13474_v45, %v13237_v50  ;;  %v15382_v6 = vpop.f32.mrb[153].mxu1 }
0x74a8   :  { %v13484_v3 = vadd.f32 %v13482_v37, %v13478_v38  ;;  %v14074_v37 = vld [vmem:[%s18039_s16 + $0x48] sm:$0xff] }
0x74a9   :  { %v15557_v20 = vpack.c.bf16 %v14074_v37, %v14073_v29 }
0x74aa   :  { %v17942_v52 = vadd.f32 %v13484_v3, %v17681_v17 }
0x74ab   :  { %15558 = vmatprep.subr.bf16.mxu1 %v15557_v20 }
0x74ac   :  { %v13490_v60 = vsel %vm72_vm0, %v17942_v52, 0.0  ;;  %15560 = vmatpush3.bf16.msra.mxu1 %v15557_v20 }
0x74ad   :  { %13491 = vadd.xlane.f32.xlu1 %v13490_v60  ;;  %15562 = vmatprep.subr.bf16.mxu1 %v15561_v25  ;;  %v13726_v60 = vrot.slane %v17677_v53, %v16069_v41 }
0x74b0   :  { %15564 = vmatpush3.bf16.msra.mxu1 %v15561_v25  ;;  %v14084_v25 = vld [vmem:[%s18041_s18 + $0x3] ss:$0 sm:$0xff] }
0x74b1   :  { %13500 = vadd.xlane.f32.xlu1 %v13499_v30  ;;  %15566 = vmatprep.subr.bf16.mxu1 %v15565_v2 }
0x74b4   :  { %15568 = vmatpush3.bf16.msra.mxu1 %v15565_v2 }
0x74b5   :  { %15570 = vmatprep.subr.bf16.mxu1 %v15569_v0 }
0x74b8   :  { %15572 = vmatpush3.bf16.msra.mxu1 %v15569_v0 }
0x753a   :  { %v13492_v57 = vpop.xlane.xlu1 %13491 }
0x753b   :  { %v13494_v56 = vmul.f32 0.03125, %v13492_v57 }
0x753d   :  { %v13496_v35 = vsub.f32 %v17942_v52, %v13494_v56 }
0x753e   :  { %v13501_v54 = vpop.xlane.xlu1 %13500 }
0x753f   :  { %v13505_v14 = vmul.f32 0.032258064, %v13501_v54  ;;  %v13498_v26 = vmul.f32 %v13496_v35, %v13496_v35  ;;  %v13512_v1 = vmul.f32 %v13510_v13, %v13496_v35 }
0x7541   :  { %15861 = vrsqrt.f32 %v13505_v14  ;;  %v13502_v7 = vsel %vm72_vm0, %v13498_v26, 0.0  ;;  %vm13515_vm5 = vcmp.eq.f32.partialorder %v13505_v14, inf  ;;  %v13518_v10 = vand.u32 2147483648, %v13505_v14 }
0x7542   :  { %13503 = vadd.xlane.f32.xlu1 %v13502_v7  ;;  %vm13517_vm6 = vcmp.eq.f32.partialorder %v13505_v14, 0.0 }
0x754b   :  { %v15862_v17 = vpop.eup %15861 }
0x754c   :  { %v13514_v11 = vmul.f32 %v15862_v17, %v13505_v14 }
0x754e   :  { %v13516_v31 = vsel %vm13515_vm5, %v13505_v14, %v13514_v11 }
0x754f   :  { %v13519_v19 = vsel %vm13517_vm6, %v13518_v10, %v13516_v31 }
0x7550   :  { %v13527_v8 = vadd.f32 1e-06, %v13519_v19 }
0x7552   :  { %15863 = vrcp.f32 %v13527_v8 }
0x755c   :  { %v15864_v16 = vpop.eup %15863 }
0x755d   :  { %v13530_v12 = vmul.f32 %v15864_v16, %v13511_v34 }
0x755f   :  { %v13537_v22 = vadd.f32 %v13536_v48, %v13530_v12 }
0x7561   :  { %15391 = vmatprep.mubr.msk.f32.mxu0 %vm72_vm0, %v13537_v22 }
0x75cf   :  { %v13504_v24 = vpop.xlane.xlu1 %13503 }
0x75d0   :  { %v13506_v32 = vmul.f32 0.032258064, %v13504_v24 }
0x75d2   :  { %15865 = vrsqrt.f32 %v13506_v32  ;;  %vm13522_vm7 = vcmp.eq.f32.partialorder %v13506_v32, inf  ;;  %v13525_v47 = vand.u32 2147483648, %v13506_v32  ;;  %vm13524_vm8 = vcmp.eq.f32.partialorder %v13506_v32, 0.0 }
0x75dc   :  { %v15866_v59 = vpop.eup %15865 }
0x75dd   :  { %v13521_v51 = vmul.f32 %v15866_v59, %v13506_v32 }
0x75df   :  { %v13523_v4 = vsel %vm13522_vm7, %v13506_v32, %v13521_v51 }
0x75e0   :  { %v13526_v44 = vsel %vm13524_vm8, %v13525_v47, %v13523_v4 }
0x75e1   :  { %v13528_v50 = vadd.f32 1e-06, %v13526_v44 }
0x75e3   :  { %15867 = vrcp.f32 %v13528_v50 }
0x75ed   :  { %v15868_v28 = vpop.eup %15867 }
0x75ee   :  { %v13532_v23 = vmul.f32 %v15868_v28, %v13512_v1 }
0x75f0   :  { %v13538_v43 = vadd.f32 %v13536_v48, %v13532_v23 }
0x75f2   :  { %15392 = vmatmul.mubr.msk.f32.vlgmr.msra.gmra.mrb[162].mxu0 %vm72_vm0, %v13538_v43 }
0x76c5   :  { %v15393_v61 = vpop.f32.mrb[162].mxu0 }
0x76c6   :  { %v13626_v45 = vadd.f32 %v15393_v61, %v13547_v18  ;;  %v13620_v38 = vpop.f32.mrb[163].mxu0 }
0x76c7   :  { %v13621_v6 = vadd.f32 %v13620_v38, %v13547_v18 }
0x76c8   :  { %v13630_v3 = vmax.f32 %v13626_v45, 0.0 }
0x76c9   :  { %v13629_v63 = vmax.f32 %v13621_v6, 0.0 }
0x76cb   :  { %15410 = vmatprep.mubr.msk.f32.mxu1 %vm2302_vm11, %v13629_v63 }
0x76cc   :  { %15411 = vmatmul.mubr.msk.f32.vlgmr.msra.gmra.mrb[154].mxu1 %vm2302_vm11, %v13630_v3 }
0x779f   :  { %v15412_v5 = vpop.f32.mrb[154].mxu1 }
0x77a0   :  { %v13722_v30 = vadd.f32 %v15412_v5, %v17942_v52  ;;  %v13712_v57 = vpop.f32.mrb[155].mxu1 }
0x77a1   :  { %v13721_v56 = vadd.f32 %v13712_v57, %v17930_v62 }
0x77a2   :  { %v13728_v36 = vadd.f32 %v13726_v60, %v13722_v30 }
0x77a3   :  { %v13727_v35 = vadd.f32 %v13726_v60, %v13721_v56 }
0x77a4   :  { %v13734_v54 = vsel %vm72_vm0, %v13728_v36, 0.0 }
0x77a5   :  { %13735 = vadd.xlane.f32.xlu0 %v13734_v54  ;;  %v13731_v14 = vsel %vm72_vm0, %v13727_v35, 0.0 }
0x77a6   :  { %13732 = vadd.xlane.f32.xlu1 %v13731_v14 }
0x7832   :  { %v13736_v26 = vpop.xlane.xlu0 %13735 }
0x7833   :  { %v13738_v7 = vmul.f32 0.03125, %v13736_v26  ;;  %v13733_v17 = vpop.xlane.xlu1 %13732 }
0x7834   :  { %v13737_v11 = vmul.f32 0.03125, %v13733_v17 }
0x7835   :  { %v13740_v10 = vsub.f32 %v13728_v36, %v13738_v7 }
0x7836   :  { %v13739_v41 = vsub.f32 %v13727_v35, %v13737_v11 }
0x7837   :  { %v13742_v31 = vmul.f32 %v13740_v10, %v13740_v10  ;;  %v13756_v39 = vmul.f32 %v14083_v9, %v13740_v10 }
0x7838   :  { %v13741_v53 = vmul.f32 %v13739_v41, %v13739_v41  ;;  %v13755_v20 = vmul.f32 %v14083_v9, %v13739_v41 }
0x7839   :  { %v13746_v62 = vsel %vm72_vm0, %v13742_v31, 0.0 }
0x783a   :  { %v13743_v52 = vsel %vm72_vm0, %v13741_v53, 0.0 }
0x783b   :  { %13744 = vadd.xlane.f32.xlu1 %v13743_v52 }
0x783f   :  { %13747 = vadd.xlane.f32.xlu1 %v13746_v62 }
0x78c8   :  { %v13745_v19 = vpop.xlane.xlu1 %13744 }
0x78c9   :  { %v13749_v8 = vmul.f32 0.032258064, %v13745_v19 }
0x78cb   :  { %15869 = vrsqrt.f32 %v13749_v8  ;;  %vm13759_vm11 = vcmp.eq.f32.partialorder %v13749_v8, inf  ;;  %v13762_v12 = vand.u32 2147483648, %v13749_v8  ;;  %vm13761_vm9 = vcmp.eq.f32.partialorder %v13749_v8, 0.0 }
0x78cc   :  { %v13748_v13 = vpop.xlane.xlu1 %13747 }
0x78cd   :  { %v13750_v34 = vmul.f32 0.032258064, %v13748_v13 }
0x78cf   :  { %15871 = vrsqrt.f32 %v13750_v34  ;;  %vm13766_vm10 = vcmp.eq.f32.partialorder %v13750_v34, inf  ;;  %v13769_v21 = vand.u32 2147483648, %v13750_v34  ;;  %vm13768_vm12 = vcmp.eq.f32.partialorder %v13750_v34, 0.0 }
0x78d5   :  { %v15870_v48 = vpop.eup %15869 }
0x78d6   :  { %v13758_v16 = vmul.f32 %v15870_v48, %v13749_v8 }
0x78d8   :  { %v13760_v22 = vsel %vm13759_vm11, %v13749_v8, %v13758_v16 }
0x78d9   :  { %v15872_v27 = vpop.eup %15871  ;;  %v13763_v58 = vsel %vm13761_vm9, %v13762_v12, %v13760_v22 }
0x78da   :  { %v13771_v40 = vadd.f32 1e-06, %v13763_v58  ;;  %v13765_v46 = vmul.f32 %v15872_v27, %v13750_v34 }
0x78dc   :  { %15873 = vrcp.f32 %v13771_v40  ;;  %v13767_v42 = vsel %vm13766_vm10, %v13750_v34, %v13765_v46 }
0x78dd   :  { %v13770_v29 = vsel %vm13768_vm12, %v13769_v21, %v13767_v42 }
0x78de   :  { %v13772_v37 = vadd.f32 1e-06, %v13770_v29 }
0x78e0   :  { %15875 = vrcp.f32 %v13772_v37 }
0x78e6   :  { %v15874_v55 = vpop.eup %15873 }
0x78e7   :  { %v13774_v49 = vmul.f32 %v15874_v55, %v13755_v20 }
0x78e9   :  { %v13781_v2 = vadd.f32 %v14084_v25, %v13774_v49 }
0x78ea   :  { %v15876_v24 = vpop.eup %15875 }
0x78eb   :  { %v13776_v32 = vmul.f32 %v15876_v24, %v13756_v39  ;;  %13783 = vst.msk [vmem:[#allocation2] sm:$0xff] %vm72_vm0, %v13781_v2 }
0x78ed   :  { %v13782_v59 = vadd.f32 %v14084_v25, %v13776_v32 }
0x78ef   :  { %13785 = vst.msk [vmem:[#allocation2 + $0x8] sm:$0xff] %vm72_vm0, %v13782_v59 }
0x78f0   :  { %15897 = shalt.err (!%p15894_p4)
}
0x78f1   :  { %s18090_s21 = sld [smem:[#allocation9_spill]] }
0x78f7   :  { %s15898_s1 = scalar_lea.hbm %s18090_s21, 256 }
0x78f8   :  { %p15899_p5 = scmp.ne.s32.totalorder %s18090_s21, %s15898_s1  ;;  %p15902_p6 = scmp.lt.u32.totalorder %s15898_s1, %s18090_s21 }
0x78fa   :  { %p15904_p7 = pnand %p15902_p6, %p15899_p5 }
0x78fc   :  { %15907 = shalt.err (!%p15904_p7)
}
0x78fd   :  { %s15924_s20 = smov 128   ;;  %s15925_s10 = smov 8  }
0x78fe   :  { %13797 = dma.vmem_to_hbm [thread:$0]  %s13792_s14, 256, %s18090_s21, [#allocation3], %s15924_s20, %s15924_s20, %s15925_s10  }
0x78ff   :  { %15908 = dma.done.wait [#allocation3], 256  }
0x7900   :  { %15909 = vsyncadd [#allocation3], 4294967040 }
0x7901   :  { %13801 = vsyncpa [#allocation3], 1 }

</bundles_post_ra>
